<compile_context>
chip_gen: v7x
topology: tpu7x:2x2x1
jax: 0.10.0
libtpu: 0.0.40
codegen_flags: <defaults>
</compile_context>

<pallas_src>
import functools

import jax
import jax.numpy as jnp
import numpy as np
from jax.experimental import pallas as pl
from jax.experimental.pallas import tpu as pltpu


_STRIDE = 304          # per-image flat region (19 rows of 16)
_B1 = 102              # layer-1 image base inside its region
# Per-image accumulator row counts (multiples of 8).  Sized so the masked
# store of A_L covers every index read by layer L+1's valid outputs:
#   layer-2/3 valid reads go up to index 255, layer-4 up to 221.
_M1, _M2, _M3, _M4 = 256, 256, 224, 160
# Per-image scratch heights (>= M_L + max tap offset, and >= M_{L-1}).
_R2, _R3, _R4 = 296, 264, 232


def _make_kernel(bb):
    """Build the fused decoder kernel for `bb` images stacked along M."""
    off = (bb - 1) * _STRIDE
    m1, m2, m3, m4 = _M1 + off, _M2 + off, _M3 + off, _M4 + off

    def im2col(s_ref, p_ref, k, m, cin):
        # Fold the k*k taps into the contraction axis: one sublane-shifted
        # (m, cin) copy of the flat buffer per tap at lane offset t*cin.
        # These shifted loads / narrow lane stores land in otherwise idle
        # XLU / vst slots; the MXU matmul stays the critical path.
        for p in range(k):
            for q in range(k):
                t = p * k + q
                s = p * 16 + q
                s_ref[:, t * cin:(t + 1) * cin] = p_ref[s:s + m, :]

    def mask_valid(a, o_base, h_out, w_out):
        # Keep only valid output positions m = b*STRIDE + o_base + 16*oh + ow
        # (oh < h_out, ow < w_out); zero padded/wrapped garbage rows so the
        # single bulk store also provides the next layer's zero halo.
        m_idx = jax.lax.broadcasted_iota(jnp.int32, a.shape, 0)
        col_ok = jnp.bitwise_and(m_idx - o_base, 15) < w_out
        extent = 16 * (h_out - 1) + w_out
        row_ok = None
        for b in range(bb):
            lo = b * _STRIDE + o_base
            ok = (m_idx >= lo) & (m_idx < lo + extent)
            row_ok = ok if row_ok is None else (row_ok | ok)
        return jnp.where(col_ok & row_ok, a, 0.0)

    def kernel(x_ref, w1, b1, w2, b2, w3, b3, w4, b4, out_ref,
               p2, p3, p4, s1, s2, s3, s4):
        # Layer 1: ConvTranspose2d(64 -> 32, k=3) + ReLU.
        im2col(s1, x_ref, 3, m1, 64)
        a1 = jnp.dot(s1[...], w1[...],
                     preferred_element_type=jnp.float32) + b1[...]
        p2[0:m1, :] = mask_valid(jnp.maximum(a1, 0.0), _B1 - 34, 10, 10)

        # Layer 2: ConvTranspose2d(32 -> 16, k=3) + ReLU.
        im2col(s2, p2, 3, m2, 32)
        a2 = jnp.dot(s2[...], w2[...],
                     preferred_element_type=jnp.float32) + b2[...]
        p3[0:m2, :] = mask_valid(jnp.maximum(a2, 0.0), _B1 - 68, 12, 12)

        # Layer 3: ConvTranspose2d(16 -> 8, k=3) + ReLU.
        im2col(s3, p3, 3, m3, 16)
        a3 = jnp.dot(s3[...], w3[...],
                     preferred_element_type=jnp.float32) + b3[...]
        # No mask needed: layer 4's valid outputs only read valid image
        # positions of a3; its garbage rows only feed output columns >= 10,
        # which the wrapper slices off.
        p4[0:m3, :] = jnp.maximum(a3, 0.0)

        # Layer 4: Conv2d(8 -> 1, k=5), no activation.
        im2col(s4, p4, 5, m4, 8)
        a4 = jnp.dot(s4[...], w4[...],
                     preferred_element_type=jnp.float32) + b4[...]
        # Emit raw accumulator rows (10 flat rows of 16 per image); the
        # wrapper keeps columns 0..9.  No sublane->lane transpose.
        for b in range(bb):
            out_ref[b * 160:(b + 1) * 160, :] = \
                a4[b * _STRIDE:b * _STRIDE + 160, :]

    return kernel


def decoder_transpose_forward(x_nchw, flat_params, images_per_step=1):
    """Forward pass of DecoderTranspose. x_nchw: (N, 64, 8, 8) float32."""
    (w1, b1), (w2, b2), (w3, b3), (w4, b4) = flat_params
    n = x_nchw.shape[0]
    bb = images_per_step
    assert n % bb == 0, (n, bb)

    # NCHW -> NHWC, then place the 8x8x64 image at rows 6..13, cols 6..13 of a
    # zero (19, 16) flat grid per image (flat base 102) -> (N*304, 64).
    x_nhwc = jnp.transpose(x_nchw, (0, 2, 3, 1)).astype(jnp.float32)
    xp = jnp.zeros((n, _STRIDE // 16, 16, 64), jnp.float32)
    xp = xp.at[:, 6:14, 6:14, :].set(x_nhwc)
    xp = xp.reshape(n * _STRIDE, 64)

    off = (bb - 1) * _STRIDE
    m1, m2, m3, m4 = _M1 + off, _M2 + off, _M3 + off, _M4 + off
    r2, r3, r4 = _R2 + off, _R3 + off, _R4 + off

    out_flat = pl.pallas_call(
        _make_kernel(bb),
        out_shape=jax.ShapeDtypeStruct((n * 160, 1), jnp.float32),
        grid=(n // bb,),
        in_specs=[
            pl.BlockSpec((bb * _STRIDE, 64), lambda i: (i, 0)),   # x (bb imgs)
            pl.BlockSpec((576, 32), lambda i: (0, 0)),            # w1 flat
            pl.BlockSpec((1, 32), lambda i: (0, 0)),              # b1
            pl.BlockSpec((288, 16), lambda i: (0, 0)),            # w2 flat
            pl.BlockSpec((1, 16), lambda i: (0, 0)),              # b2
            pl.BlockSpec((144, 8), lambda i: (0, 0)),             # w3 flat
            pl.BlockSpec((1, 8), lambda i: (0, 0)),               # b3
            pl.BlockSpec((200, 1), lambda i: (0, 0)),             # w4 flat
            pl.BlockSpec((1, 1), lambda i: (0, 0)),               # b4
        ],
        out_specs=pl.BlockSpec((bb * 160, 1), lambda i: (i, 0)),
        scratch_shapes=[
            pltpu.VMEM((r2, 32), jnp.float32),    # flat layer-2 input
            pltpu.VMEM((r3, 16), jnp.float32),    # flat layer-3 input
            pltpu.VMEM((r4, 8), jnp.float32),     # flat layer-4 input
            pltpu.VMEM((m1, 576), jnp.float32),   # im2col slab, layer 1
            pltpu.VMEM((m2, 288), jnp.float32),   # im2col slab, layer 2
            pltpu.VMEM((m3, 144), jnp.float32),   # im2col slab, layer 3
            pltpu.VMEM((m4, 200), jnp.float32),   # im2col slab, layer 4
        ],
        compiler_params=pltpu.CompilerParams(
            dimension_semantics=("parallel",)),
    )(xp, w1, b1, w2, b2, w3, b3, w4, b4)

    # (N*160, 1) -> 10 flat rows of 16 per image -> valid 10x10 -> NCHW.
    out = out_flat.reshape(n, 10, 16)[:, :, :10]
    return out[:, None, :, :]


def init_params(key):
    """Deterministic synthetic parameters (PyTorch-layout, uniform init)."""
    params = []
    for cin, cout in [(64, 32), (32, 16), (16, 8)]:      # TransposeBlock x3
        key, k1, k2 = jax.random.split(key, 3)
        bound = 1.0 / np.sqrt(cin * 3 * 3)
        w = jax.random.uniform(k1, (cin, cout, 3, 3), jnp.float32, -bound, bound)
        b = jax.random.uniform(k2, (cout,), jnp.float32, -bound, bound)
        params.append(("convT", w, b))
    key, k1, k2 = jax.random.split(key, 3)                # final Conv2d(8, 1, 5)
    bound = 1.0 / np.sqrt(8 * 5 * 5)
    w = jax.random.uniform(k1, (1, 8, 5, 5), jnp.float32, -bound, bound)
    b = jax.random.uniform(k2, (1,), jnp.float32, -bound, bound)
    params.append(("conv", w, b))
    return params


def prep_flat_params(params):
    """PyTorch-layout params -> ((k*k*Cin, Cout), (1, Cout)) matmul operands.

    Stride-1 ConvTranspose2d == "full" conv with the spatially flipped kernel,
    so its (Cin, Cout, K, K) weight becomes HWIO after a flip; the plain
    Conv2d weight (Cout, Cin, K, K) is transposed to HWIO.  Reshaping HWIO to
    (K*K*Cin, Cout) matches the im2col lane order (tap-major, then Cin).
    """
    prepped = []
    for kind, w, b in params:
        k = w.shape[2]
        if kind == "convT":
            w_hwio = jnp.flip(w, axis=(2, 3)).transpose(2, 3, 0, 1)
        else:
            w_hwio = w.transpose(2, 3, 1, 0)
        cin, cout = w_hwio.shape[2], w_hwio.shape[3]
        prepped.append((w_hwio.reshape(k * k * cin, cout), b.reshape(1, cout)))
    return prepped


def _reference_forward(x_nchw, params):
    """Pure-JAX reference (lax conv) with identical math, for validation."""
    x = jnp.transpose(x_nchw, (0, 2, 3, 1))
    for kind, w, b in params:
        k = w.shape[2]
        if kind == "convT":
            w_hwio = jnp.flip(w, axis=(2, 3)).transpose(2, 3, 0, 1)
            x = jnp.pad(x, ((0, 0), (k - 1, k - 1), (k - 1, k - 1), (0, 0)))
        else:
            w_hwio = w.transpose(2, 3, 1, 0)
        y = jax.lax.conv_general_dilated(
            x, w_hwio, window_strides=(1, 1), padding="VALID",
            dimension_numbers=("NHWC", "HWIO", "NHWC"))
        y = y + b[None, None, None, :]
        x = jnp.maximum(y, 0.0) if kind == "convT" else y
    return jnp.transpose(x, (0, 3, 1, 2))


if __name__ == "__main__":
    key = jax.random.PRNGKey(0)
    # Input implied by the module: 64 channels.  (2, 64, 8, 8) -> (2, 1, 10, 10).
    x = jax.random.normal(key, (2, 64, 8, 8), jnp.float32)
    params = init_params(jax.random.PRNGKey(42))
    flat_params = prep_flat_params(params)

    ref = jax.block_until_ready(_reference_forward(x, params))

    # bb=1: one image per grid step ("parallel" -> one per TensorCore on v7x).
    # bb=2: whole batch stacked along M in a single step (best on v5e/v6e).
    for bb in (1, 2):
        fwd = jax.jit(functools.partial(decoder_transpose_forward,
                                        images_per_step=bb))
        out = jax.block_until_ready(fwd(x, flat_params))
        assert out.shape == (2, 1, 10, 10), out.shape
        assert np.allclose(np.asarray(out), np.asarray(ref),
                           rtol=1e-4, atol=1e-4), f"mismatch (bb={bb})"

    print("KERNEL_OK")
</pallas_src>

<mosaic_0001>
module attributes {stable_mosaic.version = 11 : i64} {
  func.func @kernel(%arg0: i32, %arg1: memref<304x64xf32, #tpu.memory_space<vmem>>, %arg2: memref<576x32xf32, #tpu.memory_space<vmem>>, %arg3: memref<1x32xf32, #tpu.memory_space<vmem>>, %arg4: memref<288x16xf32, #tpu.memory_space<vmem>>, %arg5: memref<1x16xf32, #tpu.memory_space<vmem>>, %arg6: memref<144x8xf32, #tpu.memory_space<vmem>>, %arg7: memref<1x8xf32, #tpu.memory_space<vmem>>, %arg8: memref<200x1xf32, #tpu.memory_space<vmem>>, %arg9: memref<1x1xf32, #tpu.memory_space<vmem>>, %arg10: memref<160x1xf32, #tpu.memory_space<vmem>>, %arg11: memref<296x32xf32, #tpu.memory_space<vmem>>, %arg12: memref<264x16xf32, #tpu.memory_space<vmem>>, %arg13: memref<232x8xf32, #tpu.memory_space<vmem>>, %arg14: memref<256x576xf32, #tpu.memory_space<vmem>>, %arg15: memref<256x288xf32, #tpu.memory_space<vmem>>, %arg16: memref<224x144xf32, #tpu.memory_space<vmem>>, %arg17: memref<160x200xf32, #tpu.memory_space<vmem>>) attributes {dimension_semantics = [#tpu.dimension_semantics<parallel>], iteration_bounds = array<i64: 2>, scalar_prefetch = 0 : i64, scratch_operands = 7 : i64, tpu.core_type = #tpu.core_type<tc>, window_params = [{transform_indices = @transform_0, window_bounds = array<i64: 304, 64>}, {pipeline_mode = #tpu.pipeline_mode<synchronous>, transform_indices = @transform_1, window_bounds = array<i64: 576, 32>}, {pipeline_mode = #tpu.pipeline_mode<synchronous>, transform_indices = @transform_2, window_bounds = array<i64: 1, 32>}, {pipeline_mode = #tpu.pipeline_mode<synchronous>, transform_indices = @transform_3, window_bounds = array<i64: 288, 16>}, {pipeline_mode = #tpu.pipeline_mode<synchronous>, transform_indices = @transform_4, window_bounds = array<i64: 1, 16>}, {pipeline_mode = #tpu.pipeline_mode<synchronous>, transform_indices = @transform_5, window_bounds = array<i64: 144, 8>}, {pipeline_mode = #tpu.pipeline_mode<synchronous>, transform_indices = @transform_6, window_bounds = array<i64: 1, 8>}, {pipeline_mode = #tpu.pipeline_mode<synchronous>, transform_indices = @transform_7, window_bounds = array<i64: 200, 1>}, {pipeline_mode = #tpu.pipeline_mode<synchronous>, transform_indices = @transform_8, window_bounds = array<i64: 1, 1>}, {transform_indices = @transform_9, window_bounds = array<i64: 160, 1>}]} {
    %c0 = arith.constant 0 : index
    %c0_0 = arith.constant 0 : index
    %0 = vector.load %arg1[%c0, %c0_0] : memref<304x64xf32, #tpu.memory_space<vmem>>, vector<256x64xf32>
    %c0_1 = arith.constant 0 : index
    %c0_2 = arith.constant 0 : index
    %1 = vector.load %arg14[%c0_1, %c0_2] : memref<256x576xf32, #tpu.memory_space<vmem>>, vector<256x64xf32>
    tpu.vector_store %arg14[%c0_1, %c0_2], %0 {strides = array<i32>} : memref<256x576xf32, #tpu.memory_space<vmem>>, vector<256x64xf32>,
    %c1 = arith.constant 1 : index
    %c0_3 = arith.constant 0 : index
    %2 = vector.load %arg1[%c1, %c0_3] : memref<304x64xf32, #tpu.memory_space<vmem>>, vector<256x64xf32>
    %c0_4 = arith.constant 0 : index
    %c64 = arith.constant 64 : index
    %3 = vector.load %arg14[%c0_4, %c64] : memref<256x576xf32, #tpu.memory_space<vmem>>, vector<256x64xf32>
    tpu.vector_store %arg14[%c0_4, %c64], %2 {strides = array<i32>} : memref<256x576xf32, #tpu.memory_space<vmem>>, vector<256x64xf32>,
    %c2 = arith.constant 2 : index
    %c0_5 = arith.constant 0 : index
    %4 = vector.load %arg1[%c2, %c0_5] : memref<304x64xf32, #tpu.memory_space<vmem>>, vector<256x64xf32>
    %c0_6 = arith.constant 0 : index
    %c128 = arith.constant 128 : index
    %5 = vector.load %arg14[%c0_6, %c128] : memref<256x576xf32, #tpu.memory_space<vmem>>, vector<256x64xf32>
    tpu.vector_store %arg14[%c0_6, %c128], %4 {strides = array<i32>} : memref<256x576xf32, #tpu.memory_space<vmem>>, vector<256x64xf32>,
    %c16 = arith.constant 16 : index
    %c0_7 = arith.constant 0 : index
    %6 = vector.load %arg1[%c16, %c0_7] : memref<304x64xf32, #tpu.memory_space<vmem>>, vector<256x64xf32>
    %c0_8 = arith.constant 0 : index
    %c192 = arith.constant 192 : index
    %7 = vector.load %arg14[%c0_8, %c192] : memref<256x576xf32, #tpu.memory_space<vmem>>, vector<256x64xf32>
    tpu.vector_store %arg14[%c0_8, %c192], %6 {strides = array<i32>} : memref<256x576xf32, #tpu.memory_space<vmem>>, vector<256x64xf32>,
    %c17 = arith.constant 17 : index
    %c0_9 = arith.constant 0 : index
    %8 = vector.load %arg1[%c17, %c0_9] : memref<304x64xf32, #tpu.memory_space<vmem>>, vector<256x64xf32>
    %c0_10 = arith.constant 0 : index
    %c256 = arith.constant 256 : index
    %9 = vector.load %arg14[%c0_10, %c256] : memref<256x576xf32, #tpu.memory_space<vmem>>, vector<256x64xf32>
    tpu.vector_store %arg14[%c0_10, %c256], %8 {strides = array<i32>} : memref<256x576xf32, #tpu.memory_space<vmem>>, vector<256x64xf32>,
    %c18 = arith.constant 18 : index
    %c0_11 = arith.constant 0 : index
    %10 = vector.load %arg1[%c18, %c0_11] : memref<304x64xf32, #tpu.memory_space<vmem>>, vector<256x64xf32>
    %c0_12 = arith.constant 0 : index
    %c320 = arith.constant 320 : index
    %11 = vector.load %arg14[%c0_12, %c320] : memref<256x576xf32, #tpu.memory_space<vmem>>, vector<256x64xf32>
    tpu.vector_store %arg14[%c0_12, %c320], %10 {strides = array<i32>} : memref<256x576xf32, #tpu.memory_space<vmem>>, vector<256x64xf32>,
    %c32 = arith.constant 32 : index
    %c0_13 = arith.constant 0 : index
    %12 = vector.load %arg1[%c32, %c0_13] : memref<304x64xf32, #tpu.memory_space<vmem>>, vector<256x64xf32>
    %c0_14 = arith.constant 0 : index
    %c384 = arith.constant 384 : index
    %13 = vector.load %arg14[%c0_14, %c384] : memref<256x576xf32, #tpu.memory_space<vmem>>, vector<256x64xf32>
    tpu.vector_store %arg14[%c0_14, %c384], %12 {strides = array<i32>} : memref<256x576xf32, #tpu.memory_space<vmem>>, vector<256x64xf32>,
    %c33 = arith.constant 33 : index
    %c0_15 = arith.constant 0 : index
    %14 = vector.load %arg1[%c33, %c0_15] : memref<304x64xf32, #tpu.memory_space<vmem>>, vector<256x64xf32>
    %c0_16 = arith.constant 0 : index
    %c448 = arith.constant 448 : index
    %15 = vector.load %arg14[%c0_16, %c448] : memref<256x576xf32, #tpu.memory_space<vmem>>, vector<256x64xf32>
    tpu.vector_store %arg14[%c0_16, %c448], %14 {strides = array<i32>} : memref<256x576xf32, #tpu.memory_space<vmem>>, vector<256x64xf32>,
    %c34 = arith.constant 34 : index
    %c0_17 = arith.constant 0 : index
    %16 = vector.load %arg1[%c34, %c0_17] : memref<304x64xf32, #tpu.memory_space<vmem>>, vector<256x64xf32>
    %c0_18 = arith.constant 0 : index
    %c512 = arith.constant 512 : index
    %17 = vector.load %arg14[%c0_18, %c512] : memref<256x576xf32, #tpu.memory_space<vmem>>, vector<256x64xf32>
    tpu.vector_store %arg14[%c0_18, %c512], %16 {strides = array<i32>} : memref<256x576xf32, #tpu.memory_space<vmem>>, vector<256x64xf32>,
    %c0_19 = arith.constant 0 : index
    %c0_20 = arith.constant 0 : index
    %18 = vector.load %arg14[%c0_19, %c0_20] : memref<256x576xf32, #tpu.memory_space<vmem>>, vector<256x576xf32>
    %c0_21 = arith.constant 0 : index
    %c0_22 = arith.constant 0 : index
    %19 = vector.load %arg2[%c0_21, %c0_22] : memref<576x32xf32, #tpu.memory_space<vmem>>, vector<576x32xf32>
    %cst = arith.constant dense<0.000000e+00> : vector<256x32xf32>
    %20 = tpu.matmul %18, %19, %cst {dimension_numbers = #tpu.dot_dimension_numbers<[1], [0], [0], [1], [0, 0, 1, 1], [], []>} : vector<256x576xf32>, vector<576x32xf32>, vector<256x32xf32> -> vector<256x32xf32>
    %c0_23 = arith.constant 0 : index
    %c0_24 = arith.constant 0 : index
    %21 = vector.load %arg3[%c0_23, %c0_24] : memref<1x32xf32, #tpu.memory_space<vmem>>, vector<1x32xf32>
    %22 = vector.broadcast %21 : vector<1x32xf32> to vector<256x32xf32>
    %23 = arith.addf %20, %22 : vector<256x32xf32>
    %cst_25 = arith.constant 0.000000e+00 : f32
    %24 = vector.broadcast %cst_25 : f32 to vector<256x32xf32>
    %25 = arith.maximumf %23, %24 : vector<256x32xf32>
    %26 = tpu.iota {dimensions = array<i32: 0>} : vector<256x32xi32>
    %c68_i32 = arith.constant 68 : i32
    %27 = vector.broadcast %c68_i32 : i32 to vector<256x32xi32>
    %28 = arith.subi %26, %27 : vector<256x32xi32>
    %c15_i32 = arith.constant 15 : i32
    %29 = vector.broadcast %c15_i32 : i32 to vector<256x32xi32>
    %30 = arith.andi %28, %29 : vector<256x32xi32>
    %c10_i32 = arith.constant 10 : i32
    %31 = vector.broadcast %c10_i32 : i32 to vector<256x32xi32>
    %32 = arith.cmpi slt, %30, %31 : vector<256x32xi32>
    %c68_i32_26 = arith.constant 68 : i32
    %33 = vector.broadcast %c68_i32_26 : i32 to vector<256x32xi32>
    %34 = arith.cmpi sge, %26, %33 : vector<256x32xi32>
    %c222_i32 = arith.constant 222 : i32
    %35 = vector.broadcast %c222_i32 : i32 to vector<256x32xi32>
    %36 = arith.cmpi slt, %26, %35 : vector<256x32xi32>
    %37 = arith.andi %34, %36 : vector<256x32xi1>
    %38 = arith.andi %32, %37 : vector<256x32xi1>
    %cst_27 = arith.constant 0.000000e+00 : f32
    %39 = vector.broadcast %cst_27 : f32 to vector<256x32xf32>
    %40 = arith.select %38, %25, %39 : vector<256x32xi1>, vector<256x32xf32>
    %c0_28 = arith.constant 0 : index
    %c0_29 = arith.constant 0 : index
    %41 = vector.load %arg11[%c0_28, %c0_29] : memref<296x32xf32, #tpu.memory_space<vmem>>, vector<256x32xf32>
    tpu.vector_store %arg11[%c0_28, %c0_29], %40 {strides = array<i32>} : memref<296x32xf32, #tpu.memory_space<vmem>>, vector<256x32xf32>,
    %c0_30 = arith.constant 0 : index
    %c0_31 = arith.constant 0 : index
    %42 = vector.load %arg11[%c0_30, %c0_31] : memref<296x32xf32, #tpu.memory_space<vmem>>, vector<256x32xf32>
    %c0_32 = arith.constant 0 : index
    %c0_33 = arith.constant 0 : index
    %43 = vector.load %arg15[%c0_32, %c0_33] : memref<256x288xf32, #tpu.memory_space<vmem>>, vector<256x32xf32>
    tpu.vector_store %arg15[%c0_32, %c0_33], %42 {strides = array<i32>} : memref<256x288xf32, #tpu.memory_space<vmem>>, vector<256x32xf32>,
    %c1_34 = arith.constant 1 : index
    %c0_35 = arith.constant 0 : index
    %44 = vector.load %arg11[%c1_34, %c0_35] : memref<296x32xf32, #tpu.memory_space<vmem>>, vector<256x32xf32>
    %c0_36 = arith.constant 0 : index
    %c32_37 = arith.constant 32 : index
    %45 = vector.load %arg15[%c0_36, %c32_37] : memref<256x288xf32, #tpu.memory_space<vmem>>, vector<256x32xf32>
    tpu.vector_store %arg15[%c0_36, %c32_37], %44 {strides = array<i32>} : memref<256x288xf32, #tpu.memory_space<vmem>>, vector<256x32xf32>,
    %c2_38 = arith.constant 2 : index
    %c0_39 = arith.constant 0 : index
    %46 = vector.load %arg11[%c2_38, %c0_39] : memref<296x32xf32, #tpu.memory_space<vmem>>, vector<256x32xf32>
    %c0_40 = arith.constant 0 : index
    %c64_41 = arith.constant 64 : index
    %47 = vector.load %arg15[%c0_40, %c64_41] : memref<256x288xf32, #tpu.memory_space<vmem>>, vector<256x32xf32>
    tpu.vector_store %arg15[%c0_40, %c64_41], %46 {strides = array<i32>} : memref<256x288xf32, #tpu.memory_space<vmem>>, vector<256x32xf32>,
    %c16_42 = arith.constant 16 : index
    %c0_43 = arith.constant 0 : index
    %48 = vector.load %arg11[%c16_42, %c0_43] : memref<296x32xf32, #tpu.memory_space<vmem>>, vector<256x32xf32>
    %c0_44 = arith.constant 0 : index
    %c96 = arith.constant 96 : index
    %49 = vector.load %arg15[%c0_44, %c96] : memref<256x288xf32, #tpu.memory_space<vmem>>, vector<256x32xf32>
    tpu.vector_store %arg15[%c0_44, %c96], %48 {strides = array<i32>} : memref<256x288xf32, #tpu.memory_space<vmem>>, vector<256x32xf32>,
    %c17_45 = arith.constant 17 : index
    %c0_46 = arith.constant 0 : index
    %50 = vector.load %arg11[%c17_45, %c0_46] : memref<296x32xf32, #tpu.memory_space<vmem>>, vector<256x32xf32>
    %c0_47 = arith.constant 0 : index
    %c128_48 = arith.constant 128 : index
    %51 = vector.load %arg15[%c0_47, %c128_48] : memref<256x288xf32, #tpu.memory_space<vmem>>, vector<256x32xf32>
    tpu.vector_store %arg15[%c0_47, %c128_48], %50 {strides = array<i32>} : memref<256x288xf32, #tpu.memory_space<vmem>>, vector<256x32xf32>,
    %c18_49 = arith.constant 18 : index
    %c0_50 = arith.constant 0 : index
    %52 = vector.load %arg11[%c18_49, %c0_50] : memref<296x32xf32, #tpu.memory_space<vmem>>, vector<256x32xf32>
    %c0_51 = arith.constant 0 : index
    %c160 = arith.constant 160 : index
    %53 = vector.load %arg15[%c0_51, %c160] : memref<256x288xf32, #tpu.memory_space<vmem>>, vector<256x32xf32>
    tpu.vector_store %arg15[%c0_51, %c160], %52 {strides = array<i32>} : memref<256x288xf32, #tpu.memory_space<vmem>>, vector<256x32xf32>,
    %c32_52 = arith.constant 32 : index
    %c0_53 = arith.constant 0 : index
    %54 = vector.load %arg11[%c32_52, %c0_53] : memref<296x32xf32, #tpu.memory_space<vmem>>, vector<256x32xf32>
    %c0_54 = arith.constant 0 : index
    %c192_55 = arith.constant 192 : index
    %55 = vector.load %arg15[%c0_54, %c192_55] : memref<256x288xf32, #tpu.memory_space<vmem>>, vector<256x32xf32>
    tpu.vector_store %arg15[%c0_54, %c192_55], %54 {strides = array<i32>} : memref<256x288xf32, #tpu.memory_space<vmem>>, vector<256x32xf32>,
    %c33_56 = arith.constant 33 : index
    %c0_57 = arith.constant 0 : index
    %56 = vector.load %arg11[%c33_56, %c0_57] : memref<296x32xf32, #tpu.memory_space<vmem>>, vector<256x32xf32>
    %c0_58 = arith.constant 0 : index
    %c224 = arith.constant 224 : index
    %57 = vector.load %arg15[%c0_58, %c224] : memref<256x288xf32, #tpu.memory_space<vmem>>, vector<256x32xf32>
    tpu.vector_store %arg15[%c0_58, %c224], %56 {strides = array<i32>} : memref<256x288xf32, #tpu.memory_space<vmem>>, vector<256x32xf32>,
    %c34_59 = arith.constant 34 : index
    %c0_60 = arith.constant 0 : index
    %58 = vector.load %arg11[%c34_59, %c0_60] : memref<296x32xf32, #tpu.memory_space<vmem>>, vector<256x32xf32>
    %c0_61 = arith.constant 0 : index
    %c256_62 = arith.constant 256 : index
    %59 = vector.load %arg15[%c0_61, %c256_62] : memref<256x288xf32, #tpu.memory_space<vmem>>, vector<256x32xf32>
    tpu.vector_store %arg15[%c0_61, %c256_62], %58 {strides = array<i32>} : memref<256x288xf32, #tpu.memory_space<vmem>>, vector<256x32xf32>,
    %c0_63 = arith.constant 0 : index
    %c0_64 = arith.constant 0 : index
    %60 = vector.load %arg15[%c0_63, %c0_64] : memref<256x288xf32, #tpu.memory_space<vmem>>, vector<256x288xf32>
    %c0_65 = arith.constant 0 : index
    %c0_66 = arith.constant 0 : index
    %61 = vector.load %arg4[%c0_65, %c0_66] : memref<288x16xf32, #tpu.memory_space<vmem>>, vector<288x16xf32>
    %cst_67 = arith.constant dense<0.000000e+00> : vector<256x16xf32>
    %62 = tpu.matmul %60, %61, %cst_67 {dimension_numbers = #tpu.dot_dimension_numbers<[1], [0], [0], [1], [0, 0, 1, 1], [], []>} : vector<256x288xf32>, vector<288x16xf32>, vector<256x16xf32> -> vector<256x16xf32>
    %c0_68 = arith.constant 0 : index
    %c0_69 = arith.constant 0 : index
    %63 = vector.load %arg5[%c0_68, %c0_69] : memref<1x16xf32, #tpu.memory_space<vmem>>, vector<1x16xf32>
    %64 = vector.broadcast %63 : vector<1x16xf32> to vector<256x16xf32>
    %65 = arith.addf %62, %64 : vector<256x16xf32>
    %cst_70 = arith.constant 0.000000e+00 : f32
    %66 = vector.broadcast %cst_70 : f32 to vector<256x16xf32>
    %67 = arith.maximumf %65, %66 : vector<256x16xf32>
    %68 = tpu.iota {dimensions = array<i32: 0>} : vector<256x16xi32>
    %c34_i32 = arith.constant 34 : i32
    %69 = vector.broadcast %c34_i32 : i32 to vector<256x16xi32>
    %70 = arith.subi %68, %69 : vector<256x16xi32>
    %c15_i32_71 = arith.constant 15 : i32
    %71 = vector.broadcast %c15_i32_71 : i32 to vector<256x16xi32>
    %72 = arith.andi %70, %71 : vector<256x16xi32>
    %c12_i32 = arith.constant 12 : i32
    %73 = vector.broadcast %c12_i32 : i32 to vector<256x16xi32>
    %74 = arith.cmpi slt, %72, %73 : vector<256x16xi32>
    %c34_i32_72 = arith.constant 34 : i32
    %75 = vector.broadcast %c34_i32_72 : i32 to vector<256x16xi32>
    %76 = arith.cmpi sge, %68, %75 : vector<256x16xi32>
    %c222_i32_73 = arith.constant 222 : i32
    %77 = vector.broadcast %c222_i32_73 : i32 to vector<256x16xi32>
    %78 = arith.cmpi slt, %68, %77 : vector<256x16xi32>
    %79 = arith.andi %76, %78 : vector<256x16xi1>
    %80 = arith.andi %74, %79 : vector<256x16xi1>
    %cst_74 = arith.constant 0.000000e+00 : f32
    %81 = vector.broadcast %cst_74 : f32 to vector<256x16xf32>
    %82 = arith.select %80, %67, %81 : vector<256x16xi1>, vector<256x16xf32>
    %c0_75 = arith.constant 0 : index
    %c0_76 = arith.constant 0 : index
    %83 = vector.load %arg12[%c0_75, %c0_76] : memref<264x16xf32, #tpu.memory_space<vmem>>, vector<256x16xf32>
    tpu.vector_store %arg12[%c0_75, %c0_76], %82 {strides = array<i32>} : memref<264x16xf32, #tpu.memory_space<vmem>>, vector<256x16xf32>,
    %c0_77 = arith.constant 0 : index
    %c0_78 = arith.constant 0 : index
    %84 = vector.load %arg12[%c0_77, %c0_78] : memref<264x16xf32, #tpu.memory_space<vmem>>, vector<224x16xf32>
    %c0_79 = arith.constant 0 : index
    %c0_80 = arith.constant 0 : index
    %85 = vector.load %arg16[%c0_79, %c0_80] : memref<224x144xf32, #tpu.memory_space<vmem>>, vector<224x16xf32>
    tpu.vector_store %arg16[%c0_79, %c0_80], %84 {strides = array<i32>} : memref<224x144xf32, #tpu.memory_space<vmem>>, vector<224x16xf32>,
    %c1_81 = arith.constant 1 : index
    %c0_82 = arith.constant 0 : index
    %86 = vector.load %arg12[%c1_81, %c0_82] : memref<264x16xf32, #tpu.memory_space<vmem>>, vector<224x16xf32>
    %c0_83 = arith.constant 0 : index
    %c16_84 = arith.constant 16 : index
    %87 = vector.load %arg16[%c0_83, %c16_84] : memref<224x144xf32, #tpu.memory_space<vmem>>, vector<224x16xf32>
    tpu.vector_store %arg16[%c0_83, %c16_84], %86 {strides = array<i32>} : memref<224x144xf32, #tpu.memory_space<vmem>>, vector<224x16xf32>,
    %c2_85 = arith.constant 2 : index
    %c0_86 = arith.constant 0 : index
    %88 = vector.load %arg12[%c2_85, %c0_86] : memref<264x16xf32, #tpu.memory_space<vmem>>, vector<224x16xf32>
    %c0_87 = arith.constant 0 : index
    %c32_88 = arith.constant 32 : index
    %89 = vector.load %arg16[%c0_87, %c32_88] : memref<224x144xf32, #tpu.memory_space<vmem>>, vector<224x16xf32>
    tpu.vector_store %arg16[%c0_87, %c32_88], %88 {strides = array<i32>} : memref<224x144xf32, #tpu.memory_space<vmem>>, vector<224x16xf32>,
    %c16_89 = arith.constant 16 : index
    %c0_90 = arith.constant 0 : index
    %90 = vector.load %arg12[%c16_89, %c0_90] : memref<264x16xf32, #tpu.memory_space<vmem>>, vector<224x16xf32>
    %c0_91 = arith.constant 0 : index
    %c48 = arith.constant 48 : index
    %91 = vector.load %arg16[%c0_91, %c48] : memref<224x144xf32, #tpu.memory_space<vmem>>, vector<224x16xf32>
    tpu.vector_store %arg16[%c0_91, %c48], %90 {strides = array<i32>} : memref<224x144xf32, #tpu.memory_space<vmem>>, vector<224x16xf32>,
    %c17_92 = arith.constant 17 : index
    %c0_93 = arith.constant 0 : index
    %92 = vector.load %arg12[%c17_92, %c0_93] : memref<264x16xf32, #tpu.memory_space<vmem>>, vector<224x16xf32>
    %c0_94 = arith.constant 0 : index
    %c64_95 = arith.constant 64 : index
    %93 = vector.load %arg16[%c0_94, %c64_95] : memref<224x144xf32, #tpu.memory_space<vmem>>, vector<224x16xf32>
    tpu.vector_store %arg16[%c0_94, %c64_95], %92 {strides = array<i32>} : memref<224x144xf32, #tpu.memory_space<vmem>>, vector<224x16xf32>,
    %c18_96 = arith.constant 18 : index
    %c0_97 = arith.constant 0 : index
    %94 = vector.load %arg12[%c18_96, %c0_97] : memref<264x16xf32, #tpu.memory_space<vmem>>, vector<224x16xf32>
    %c0_98 = arith.constant 0 : index
    %c80 = arith.constant 80 : index
    %95 = vector.load %arg16[%c0_98, %c80] : memref<224x144xf32, #tpu.memory_space<vmem>>, vector<224x16xf32>
    tpu.vector_store %arg16[%c0_98, %c80], %94 {strides = array<i32>} : memref<224x144xf32, #tpu.memory_space<vmem>>, vector<224x16xf32>,
    %c32_99 = arith.constant 32 : index
    %c0_100 = arith.constant 0 : index
    %96 = vector.load %arg12[%c32_99, %c0_100] : memref<264x16xf32, #tpu.memory_space<vmem>>, vector<224x16xf32>
    %c0_101 = arith.constant 0 : index
    %c96_102 = arith.constant 96 : index
    %97 = vector.load %arg16[%c0_101, %c96_102] : memref<224x144xf32, #tpu.memory_space<vmem>>, vector<224x16xf32>
    tpu.vector_store %arg16[%c0_101, %c96_102], %96 {strides = array<i32>} : memref<224x144xf32, #tpu.memory_space<vmem>>, vector<224x16xf32>,
    %c33_103 = arith.constant 33 : index
    %c0_104 = arith.constant 0 : index
    %98 = vector.load %arg12[%c33_103, %c0_104] : memref<264x16xf32, #tpu.memory_space<vmem>>, vector<224x16xf32>
    %c0_105 = arith.constant 0 : index
    %c112 = arith.constant 112 : index
    %99 = vector.load %arg16[%c0_105, %c112] : memref<224x144xf32, #tpu.memory_space<vmem>>, vector<224x16xf32>
    tpu.vector_store %arg16[%c0_105, %c112], %98 {strides = array<i32>} : memref<224x144xf32, #tpu.memory_space<vmem>>, vector<224x16xf32>,
    %c34_106 = arith.constant 34 : index
    %c0_107 = arith.constant 0 : index
    %100 = vector.load %arg12[%c34_106, %c0_107] : memref<264x16xf32, #tpu.memory_space<vmem>>, vector<224x16xf32>
    %c0_108 = arith.constant 0 : index
    %c128_109 = arith.constant 128 : index
    %101 = vector.load %arg16[%c0_108, %c128_109] : memref<224x144xf32, #tpu.memory_space<vmem>>, vector<224x16xf32>
    tpu.vector_store %arg16[%c0_108, %c128_109], %100 {strides = array<i32>} : memref<224x144xf32, #tpu.memory_space<vmem>>, vector<224x16xf32>,
    %c0_110 = arith.constant 0 : index
    %c0_111 = arith.constant 0 : index
    %102 = vector.load %arg16[%c0_110, %c0_111] : memref<224x144xf32, #tpu.memory_space<vmem>>, vector<224x144xf32>
    %c0_112 = arith.constant 0 : index
    %c0_113 = arith.constant 0 : index
    %103 = vector.load %arg6[%c0_112, %c0_113] : memref<144x8xf32, #tpu.memory_space<vmem>>, vector<144x8xf32>
    %cst_114 = arith.constant dense<0.000000e+00> : vector<224x8xf32>
    %104 = tpu.matmul %102, %103, %cst_114 {dimension_numbers = #tpu.dot_dimension_numbers<[1], [0], [0], [1], [0, 0, 1, 1], [], []>} : vector<224x144xf32>, vector<144x8xf32>, vector<224x8xf32> -> vector<224x8xf32>
    %c0_115 = arith.constant 0 : index
    %c0_116 = arith.constant 0 : index
    %105 = vector.load %arg7[%c0_115, %c0_116] : memref<1x8xf32, #tpu.memory_space<vmem>>, vector<1x8xf32>
    %106 = vector.broadcast %105 : vector<1x8xf32> to vector<224x8xf32>
    %107 = arith.addf %104, %106 : vector<224x8xf32>
    %cst_117 = arith.constant 0.000000e+00 : f32
    %108 = vector.broadcast %cst_117 : f32 to vector<224x8xf32>
    %109 = arith.maximumf %107, %108 : vector<224x8xf32>
    %c0_118 = arith.constant 0 : index
    %c0_119 = arith.constant 0 : index
    %110 = vector.load %arg13[%c0_118, %c0_119] : memref<232x8xf32, #tpu.memory_space<vmem>>, vector<224x8xf32>
    tpu.vector_store %arg13[%c0_118, %c0_119], %109 {strides = array<i32>} : memref<232x8xf32, #tpu.memory_space<vmem>>, vector<224x8xf32>,
    %c0_120 = arith.constant 0 : index
    %c0_121 = arith.constant 0 : index
    %111 = vector.load %arg13[%c0_120, %c0_121] : memref<232x8xf32, #tpu.memory_space<vmem>>, vector<160x8xf32>
    %c0_122 = arith.constant 0 : index
    %c0_123 = arith.constant 0 : index
    %112 = vector.load %arg17[%c0_122, %c0_123] : memref<160x200xf32, #tpu.memory_space<vmem>>, vector<160x8xf32>
    tpu.vector_store %arg17[%c0_122, %c0_123], %111 {strides = array<i32>} : memref<160x200xf32, #tpu.memory_space<vmem>>, vector<160x8xf32>,
    %c1_124 = arith.constant 1 : index
    %c0_125 = arith.constant 0 : index
    %113 = vector.load %arg13[%c1_124, %c0_125] : memref<232x8xf32, #tpu.memory_space<vmem>>, vector<160x8xf32>
    %c0_126 = arith.constant 0 : index
    %c8 = arith.constant 8 : index
    %114 = vector.load %arg17[%c0_126, %c8] : memref<160x200xf32, #tpu.memory_space<vmem>>, vector<160x8xf32>
    tpu.vector_store %arg17[%c0_126, %c8], %113 {strides = array<i32>} : memref<160x200xf32, #tpu.memory_space<vmem>>, vector<160x8xf32>,
    %c2_127 = arith.constant 2 : index
    %c0_128 = arith.constant 0 : index
    %115 = vector.load %arg13[%c2_127, %c0_128] : memref<232x8xf32, #tpu.memory_space<vmem>>, vector<160x8xf32>
    %c0_129 = arith.constant 0 : index
    %c16_130 = arith.constant 16 : index
    %116 = vector.load %arg17[%c0_129, %c16_130] : memref<160x200xf32, #tpu.memory_space<vmem>>, vector<160x8xf32>
    tpu.vector_store %arg17[%c0_129, %c16_130], %115 {strides = array<i32>} : memref<160x200xf32, #tpu.memory_space<vmem>>, vector<160x8xf32>,
    %c3 = arith.constant 3 : index
    %c0_131 = arith.constant 0 : index
    %117 = vector.load %arg13[%c3, %c0_131] : memref<232x8xf32, #tpu.memory_space<vmem>>, vector<160x8xf32>
    %c0_132 = arith.constant 0 : index
    %c24 = arith.constant 24 : index
    %118 = vector.load %arg17[%c0_132, %c24] : memref<160x200xf32, #tpu.memory_space<vmem>>, vector<160x8xf32>
    tpu.vector_store %arg17[%c0_132, %c24], %117 {strides = array<i32>} : memref<160x200xf32, #tpu.memory_space<vmem>>, vector<160x8xf32>,
    %c4 = arith.constant 4 : index
    %c0_133 = arith.constant 0 : index
    %119 = vector.load %arg13[%c4, %c0_133] : memref<232x8xf32, #tpu.memory_space<vmem>>, vector<160x8xf32>
    %c0_134 = arith.constant 0 : index
    %c32_135 = arith.constant 32 : index
    %120 = vector.load %arg17[%c0_134, %c32_135] : memref<160x200xf32, #tpu.memory_space<vmem>>, vector<160x8xf32>
    tpu.vector_store %arg17[%c0_134, %c32_135], %119 {strides = array<i32>} : memref<160x200xf32, #tpu.memory_space<vmem>>, vector<160x8xf32>,
    %c16_136 = arith.constant 16 : index
    %c0_137 = arith.constant 0 : index
    %121 = vector.load %arg13[%c16_136, %c0_137] : memref<232x8xf32, #tpu.memory_space<vmem>>, vector<160x8xf32>
    %c0_138 = arith.constant 0 : index
    %c40 = arith.constant 40 : index
    %122 = vector.load %arg17[%c0_138, %c40] : memref<160x200xf32, #tpu.memory_space<vmem>>, vector<160x8xf32>
    tpu.vector_store %arg17[%c0_138, %c40], %121 {strides = array<i32>} : memref<160x200xf32, #tpu.memory_space<vmem>>, vector<160x8xf32>,
    %c17_139 = arith.constant 17 : index
    %c0_140 = arith.constant 0 : index
    %123 = vector.load %arg13[%c17_139, %c0_140] : memref<232x8xf32, #tpu.memory_space<vmem>>, vector<160x8xf32>
    %c0_141 = arith.constant 0 : index
    %c48_142 = arith.constant 48 : index
    %124 = vector.load %arg17[%c0_141, %c48_142] : memref<160x200xf32, #tpu.memory_space<vmem>>, vector<160x8xf32>
    tpu.vector_store %arg17[%c0_141, %c48_142], %123 {strides = array<i32>} : memref<160x200xf32, #tpu.memory_space<vmem>>, vector<160x8xf32>,
    %c18_143 = arith.constant 18 : index
    %c0_144 = arith.constant 0 : index
    %125 = vector.load %arg13[%c18_143, %c0_144] : memref<232x8xf32, #tpu.memory_space<vmem>>, vector<160x8xf32>
    %c0_145 = arith.constant 0 : index
    %c56 = arith.constant 56 : index
    %126 = vector.load %arg17[%c0_145, %c56] : memref<160x200xf32, #tpu.memory_space<vmem>>, vector<160x8xf32>
    tpu.vector_store %arg17[%c0_145, %c56], %125 {strides = array<i32>} : memref<160x200xf32, #tpu.memory_space<vmem>>, vector<160x8xf32>,
    %c19 = arith.constant 19 : index
    %c0_146 = arith.constant 0 : index
    %127 = vector.load %arg13[%c19, %c0_146] : memref<232x8xf32, #tpu.memory_space<vmem>>, vector<160x8xf32>
    %c0_147 = arith.constant 0 : index
    %c64_148 = arith.constant 64 : index
    %128 = vector.load %arg17[%c0_147, %c64_148] : memref<160x200xf32, #tpu.memory_space<vmem>>, vector<160x8xf32>
    tpu.vector_store %arg17[%c0_147, %c64_148], %127 {strides = array<i32>} : memref<160x200xf32, #tpu.memory_space<vmem>>, vector<160x8xf32>,
    %c20 = arith.constant 20 : index
    %c0_149 = arith.constant 0 : index
    %129 = vector.load %arg13[%c20, %c0_149] : memref<232x8xf32, #tpu.memory_space<vmem>>, vector<160x8xf32>
    %c0_150 = arith.constant 0 : index
    %c72 = arith.constant 72 : index
    %130 = vector.load %arg17[%c0_150, %c72] : memref<160x200xf32, #tpu.memory_space<vmem>>, vector<160x8xf32>
    tpu.vector_store %arg17[%c0_150, %c72], %129 {strides = array<i32>} : memref<160x200xf32, #tpu.memory_space<vmem>>, vector<160x8xf32>,
    %c32_151 = arith.constant 32 : index
    %c0_152 = arith.constant 0 : index
    %131 = vector.load %arg13[%c32_151, %c0_152] : memref<232x8xf32, #tpu.memory_space<vmem>>, vector<160x8xf32>
    %c0_153 = arith.constant 0 : index
    %c80_154 = arith.constant 80 : index
    %132 = vector.load %arg17[%c0_153, %c80_154] : memref<160x200xf32, #tpu.memory_space<vmem>>, vector<160x8xf32>
    tpu.vector_store %arg17[%c0_153, %c80_154], %131 {strides = array<i32>} : memref<160x200xf32, #tpu.memory_space<vmem>>, vector<160x8xf32>,
    %c33_155 = arith.constant 33 : index
    %c0_156 = arith.constant 0 : index
    %133 = vector.load %arg13[%c33_155, %c0_156] : memref<232x8xf32, #tpu.memory_space<vmem>>, vector<160x8xf32>
    %c0_157 = arith.constant 0 : index
    %c88 = arith.constant 88 : index
    %134 = vector.load %arg17[%c0_157, %c88] : memref<160x200xf32, #tpu.memory_space<vmem>>, vector<160x8xf32>
    tpu.vector_store %arg17[%c0_157, %c88], %133 {strides = array<i32>} : memref<160x200xf32, #tpu.memory_space<vmem>>, vector<160x8xf32>,
    %c34_158 = arith.constant 34 : index
    %c0_159 = arith.constant 0 : index
    %135 = vector.load %arg13[%c34_158, %c0_159] : memref<232x8xf32, #tpu.memory_space<vmem>>, vector<160x8xf32>
    %c0_160 = arith.constant 0 : index
    %c96_161 = arith.constant 96 : index
    %136 = vector.load %arg17[%c0_160, %c96_161] : memref<160x200xf32, #tpu.memory_space<vmem>>, vector<160x8xf32>
    tpu.vector_store %arg17[%c0_160, %c96_161], %135 {strides = array<i32>} : memref<160x200xf32, #tpu.memory_space<vmem>>, vector<160x8xf32>,
    %c35 = arith.constant 35 : index
    %c0_162 = arith.constant 0 : index
    %137 = vector.load %arg13[%c35, %c0_162] : memref<232x8xf32, #tpu.memory_space<vmem>>, vector<160x8xf32>
    %c0_163 = arith.constant 0 : index
    %c104 = arith.constant 104 : index
    %138 = vector.load %arg17[%c0_163, %c104] : memref<160x200xf32, #tpu.memory_space<vmem>>, vector<160x8xf32>
    tpu.vector_store %arg17[%c0_163, %c104], %137 {strides = array<i32>} : memref<160x200xf32, #tpu.memory_space<vmem>>, vector<160x8xf32>,
    %c36 = arith.constant 36 : index
    %c0_164 = arith.constant 0 : index
    %139 = vector.load %arg13[%c36, %c0_164] : memref<232x8xf32, #tpu.memory_space<vmem>>, vector<160x8xf32>
    %c0_165 = arith.constant 0 : index
    %c112_166 = arith.constant 112 : index
    %140 = vector.load %arg17[%c0_165, %c112_166] : memref<160x200xf32, #tpu.memory_space<vmem>>, vector<160x8xf32>
    tpu.vector_store %arg17[%c0_165, %c112_166], %139 {strides = array<i32>} : memref<160x200xf32, #tpu.memory_space<vmem>>, vector<160x8xf32>,
    %c48_167 = arith.constant 48 : index
    %c0_168 = arith.constant 0 : index
    %141 = vector.load %arg13[%c48_167, %c0_168] : memref<232x8xf32, #tpu.memory_space<vmem>>, vector<160x8xf32>
    %c0_169 = arith.constant 0 : index
    %c120 = arith.constant 120 : index
    %142 = vector.load %arg17[%c0_169, %c120] : memref<160x200xf32, #tpu.memory_space<vmem>>, vector<160x8xf32>
    tpu.vector_store %arg17[%c0_169, %c120], %141 {strides = array<i32>} : memref<160x200xf32, #tpu.memory_space<vmem>>, vector<160x8xf32>,
    %c49 = arith.constant 49 : index
    %c0_170 = arith.constant 0 : index
    %143 = vector.load %arg13[%c49, %c0_170] : memref<232x8xf32, #tpu.memory_space<vmem>>, vector<160x8xf32>
    %c0_171 = arith.constant 0 : index
    %c128_172 = arith.constant 128 : index
    %144 = vector.load %arg17[%c0_171, %c128_172] : memref<160x200xf32, #tpu.memory_space<vmem>>, vector<160x8xf32>
    tpu.vector_store %arg17[%c0_171, %c128_172], %143 {strides = array<i32>} : memref<160x200xf32, #tpu.memory_space<vmem>>, vector<160x8xf32>,
    %c50 = arith.constant 50 : index
    %c0_173 = arith.constant 0 : index
    %145 = vector.load %arg13[%c50, %c0_173] : memref<232x8xf32, #tpu.memory_space<vmem>>, vector<160x8xf32>
    %c0_174 = arith.constant 0 : index
    %c136 = arith.constant 136 : index
    %146 = vector.load %arg17[%c0_174, %c136] : memref<160x200xf32, #tpu.memory_space<vmem>>, vector<160x8xf32>
    tpu.vector_store %arg17[%c0_174, %c136], %145 {strides = array<i32>} : memref<160x200xf32, #tpu.memory_space<vmem>>, vector<160x8xf32>,
    %c51 = arith.constant 51 : index
    %c0_175 = arith.constant 0 : index
    %147 = vector.load %arg13[%c51, %c0_175] : memref<232x8xf32, #tpu.memory_space<vmem>>, vector<160x8xf32>
    %c0_176 = arith.constant 0 : index
    %c144 = arith.constant 144 : index
    %148 = vector.load %arg17[%c0_176, %c144] : memref<160x200xf32, #tpu.memory_space<vmem>>, vector<160x8xf32>
    tpu.vector_store %arg17[%c0_176, %c144], %147 {strides = array<i32>} : memref<160x200xf32, #tpu.memory_space<vmem>>, vector<160x8xf32>,
    %c52 = arith.constant 52 : index
    %c0_177 = arith.constant 0 : index
    %149 = vector.load %arg13[%c52, %c0_177] : memref<232x8xf32, #tpu.memory_space<vmem>>, vector<160x8xf32>
    %c0_178 = arith.constant 0 : index
    %c152 = arith.constant 152 : index
    %150 = vector.load %arg17[%c0_178, %c152] : memref<160x200xf32, #tpu.memory_space<vmem>>, vector<160x8xf32>
    tpu.vector_store %arg17[%c0_178, %c152], %149 {strides = array<i32>} : memref<160x200xf32, #tpu.memory_space<vmem>>, vector<160x8xf32>,
    %c64_179 = arith.constant 64 : index
    %c0_180 = arith.constant 0 : index
    %151 = vector.load %arg13[%c64_179, %c0_180] : memref<232x8xf32, #tpu.memory_space<vmem>>, vector<160x8xf32>
    %c0_181 = arith.constant 0 : index
    %c160_182 = arith.constant 160 : index
    %152 = vector.load %arg17[%c0_181, %c160_182] : memref<160x200xf32, #tpu.memory_space<vmem>>, vector<160x8xf32>
    tpu.vector_store %arg17[%c0_181, %c160_182], %151 {strides = array<i32>} : memref<160x200xf32, #tpu.memory_space<vmem>>, vector<160x8xf32>,
    %c65 = arith.constant 65 : index
    %c0_183 = arith.constant 0 : index
    %153 = vector.load %arg13[%c65, %c0_183] : memref<232x8xf32, #tpu.memory_space<vmem>>, vector<160x8xf32>
    %c0_184 = arith.constant 0 : index
    %c168 = arith.constant 168 : index
    %154 = vector.load %arg17[%c0_184, %c168] : memref<160x200xf32, #tpu.memory_space<vmem>>, vector<160x8xf32>
    tpu.vector_store %arg17[%c0_184, %c168], %153 {strides = array<i32>} : memref<160x200xf32, #tpu.memory_space<vmem>>, vector<160x8xf32>,
    %c66 = arith.constant 66 : index
    %c0_185 = arith.constant 0 : index
    %155 = vector.load %arg13[%c66, %c0_185] : memref<232x8xf32, #tpu.memory_space<vmem>>, vector<160x8xf32>
    %c0_186 = arith.constant 0 : index
    %c176 = arith.constant 176 : index
    %156 = vector.load %arg17[%c0_186, %c176] : memref<160x200xf32, #tpu.memory_space<vmem>>, vector<160x8xf32>
    tpu.vector_store %arg17[%c0_186, %c176], %155 {strides = array<i32>} : memref<160x200xf32, #tpu.memory_space<vmem>>, vector<160x8xf32>,
    %c67 = arith.constant 67 : index
    %c0_187 = arith.constant 0 : index
    %157 = vector.load %arg13[%c67, %c0_187] : memref<232x8xf32, #tpu.memory_space<vmem>>, vector<160x8xf32>
    %c0_188 = arith.constant 0 : index
    %c184 = arith.constant 184 : index
    %158 = vector.load %arg17[%c0_188, %c184] : memref<160x200xf32, #tpu.memory_space<vmem>>, vector<160x8xf32>
    tpu.vector_store %arg17[%c0_188, %c184], %157 {strides = array<i32>} : memref<160x200xf32, #tpu.memory_space<vmem>>, vector<160x8xf32>,
    %c68 = arith.constant 68 : index
    %c0_189 = arith.constant 0 : index
    %159 = vector.load %arg13[%c68, %c0_189] : memref<232x8xf32, #tpu.memory_space<vmem>>, vector<160x8xf32>
    %c0_190 = arith.constant 0 : index
    %c192_191 = arith.constant 192 : index
    %160 = vector.load %arg17[%c0_190, %c192_191] : memref<160x200xf32, #tpu.memory_space<vmem>>, vector<160x8xf32>
    tpu.vector_store %arg17[%c0_190, %c192_191], %159 {strides = array<i32>} : memref<160x200xf32, #tpu.memory_space<vmem>>, vector<160x8xf32>,
    %c0_192 = arith.constant 0 : index
    %c0_193 = arith.constant 0 : index
    %161 = vector.load %arg17[%c0_192, %c0_193] : memref<160x200xf32, #tpu.memory_space<vmem>>, vector<160x200xf32>
    %c0_194 = arith.constant 0 : index
    %c0_195 = arith.constant 0 : index
    %162 = vector.load %arg8[%c0_194, %c0_195] : memref<200x1xf32, #tpu.memory_space<vmem>>, vector<200x1xf32>
    %cst_196 = arith.constant dense<0.000000e+00> : vector<160x1xf32>
    %163 = tpu.matmul %161, %162, %cst_196 {dimension_numbers = #tpu.dot_dimension_numbers<[1], [0], [0], [1], [0, 0, 1, 1], [], []>} : vector<160x200xf32>, vector<200x1xf32>, vector<160x1xf32> -> vector<160x1xf32>
    %c0_197 = arith.constant 0 : index
    %c0_198 = arith.constant 0 : index
    %164 = vector.load %arg9[%c0_197, %c0_198] : memref<1x1xf32, #tpu.memory_space<vmem>>, vector<1x1xf32>
    %165 = vector.broadcast %164 : vector<1x1xf32> to vector<160x1xf32>
    %166 = arith.addf %163, %165 : vector<160x1xf32>
    %c0_199 = arith.constant 0 : index
    %c0_200 = arith.constant 0 : index
    %167 = vector.load %arg10[%c0_199, %c0_200] : memref<160x1xf32, #tpu.memory_space<vmem>>, vector<160x1xf32>
    tpu.vector_store %arg10[%c0_199, %c0_200], %166 {strides = array<i32>} : memref<160x1xf32, #tpu.memory_space<vmem>>, vector<160x1xf32>,
    return
  }
  func.func @transform_0(%arg0: i32) -> (i32, i32) {
    %c0_i32 = arith.constant 0 : i32
    %c0_i32_0 = arith.constant 0 : i32
    return %arg0, %c0_i32 : i32, i32
  }
  func.func @transform_1(%arg0: i32) -> (i32, i32) {
    %c0_i32 = arith.constant 0 : i32
    %c0_i32_0 = arith.constant 0 : i32
    %c0_i32_1 = arith.constant 0 : i32
    return %c0_i32, %c0_i32_0 : i32, i32
  }
  func.func @transform_2(%arg0: i32) -> (i32, i32) {
    %c0_i32 = arith.constant 0 : i32
    %c0_i32_0 = arith.constant 0 : i32
    %c0_i32_1 = arith.constant 0 : i32
    return %c0_i32, %c0_i32_0 : i32, i32
  }
  func.func @transform_3(%arg0: i32) -> (i32, i32) {
    %c0_i32 = arith.constant 0 : i32
    %c0_i32_0 = arith.constant 0 : i32
    %c0_i32_1 = arith.constant 0 : i32
    return %c0_i32, %c0_i32_0 : i32, i32
  }
  func.func @transform_4(%arg0: i32) -> (i32, i32) {
    %c0_i32 = arith.constant 0 : i32
    %c0_i32_0 = arith.constant 0 : i32
    %c0_i32_1 = arith.constant 0 : i32
    return %c0_i32, %c0_i32_0 : i32, i32
  }
  func.func @transform_5(%arg0: i32) -> (i32, i32) {
    %c0_i32 = arith.constant 0 : i32
    %c0_i32_0 = arith.constant 0 : i32
    %c0_i32_1 = arith.constant 0 : i32
    return %c0_i32, %c0_i32_0 : i32, i32
  }
  func.func @transform_6(%arg0: i32) -> (i32, i32) {
    %c0_i32 = arith.constant 0 : i32
    %c0_i32_0 = arith.constant 0 : i32
    %c0_i32_1 = arith.constant 0 : i32
    return %c0_i32, %c0_i32_0 : i32, i32
  }
  func.func @transform_7(%arg0: i32) -> (i32, i32) {
    %c0_i32 = arith.constant 0 : i32
    %c0_i32_0 = arith.constant 0 : i32
    %c0_i32_1 = arith.constant 0 : i32
    return %c0_i32, %c0_i32_0 : i32, i32
  }
  func.func @transform_8(%arg0: i32) -> (i32, i32) {
    %c0_i32 = arith.constant 0 : i32
    %c0_i32_0 = arith.constant 0 : i32
    %c0_i32_1 = arith.constant 0 : i32
    return %c0_i32, %c0_i32_0 : i32, i32
  }
  func.func @transform_9(%arg0: i32) -> (i32, i32) {
    %c0_i32 = arith.constant 0 : i32
    %c0_i32_0 = arith.constant 0 : i32
    return %arg0, %c0_i32 : i32, i32
  }
}

</mosaic_0001>

<bundles_post_ra>
// kernel: decoder_transpose_forward.1
= control target key start
LH: loop header
LB: loop body
LE: loop exit
PB: predicated region body
PF: predicated region fallthrough
CT: control target
= control target key end

     0   :  { %s10875_s11 = smov 0   ;;  %s16177_s0 = inlined_call_operand.vmem [shape: f32[608,64], index: 0, kind: input, shape index: {}]   ;;  %s16178_s1 = inlined_call_operand.vmem [shape: f32[576,32], index: 1, kind: input, shape index: {}]   ;;  %s16179_s2 = inlined_call_operand.vmem [shape: f32[1,32], index: 2, kind: input, shape index: {}]   ;;  %s16180_s3 = inlined_call_operand.vmem [shape: f32[288,16], index: 3, kind: input, shape index: {}]   ;;  %s16181_s4 = inlined_call_operand.vmem [shape: f32[1,16], index: 4, kind: input, shape index: {}]   ;;  %s16182_s5 = inlined_call_operand.vmem [shape: f32[144,8], index: 5, kind: input, shape index: {}]   ;;  %s16183_s6 = inlined_call_operand.vmem [shape: f32[1,8], index: 6, kind: input, shape index: {}]   ;;  %s16184_s7 = inlined_call_operand.vmem [shape: f32[200,1], index: 7, kind: input, shape index: {}]   ;;  %s16185_s8 = inlined_call_operand.<no memory space> [shape: f32[1,1], index: 8, kind: input, shape index: {}]   ;;  %s16186_s9 = inlined_call_operand.vmem [shape: f32[320,1], index: 9, kind: output, shape index: {}]  }
   0x1   :  { %v14_v0 = vstv %s16185_s8 }
   0x2   :  { %15 = vst [vmem:[#allocation9] sm:$0x1] %v14_v0 }
   0x3 LB: > { %s10065_s12 = sadd.s32 4294967295, %s10803_s11   ;;  %p10069_p0 = scmp.ge.s32.totalorder %s10803_s11, 1  ;;  %s10803_s11 = sphi %s10875_s11, %s21_s11  }
   0x4   : > { %p290_p1 = scmp.lt.s32.totalorder %s10803_s11, 3 }
   0x6   : > { %p291_p2 = pnand %p10069_p0, %p290_p1 }
   0x8   : > { %294 = sbr.rel (%p291_p2) target bundleno = 2928 (0xb70), region = 56 }
   0xf   : > { %s326_s13 = smul.u32 38, %s10065_s12  ;;  %v1588_v1 = vld [vmem:[%s16178_s1] sm:$0xff]  ;;  %v1589_v2 = vld [vmem:[%s16178_s1 + $0x8] sm:$0xff]  ;;  %v16187_v4 = vmov 0.0|0.0   ;;  %v1590_v5 = vld [vmem:[%s16178_s1 + $0x10] sm:$0xff]  ;;  %s10806_s25 = smov 64  }
  0x10   : > { %v10451_v3 = vpack.c.bf16 %v1589_v2, %v1588_v1  ;;  %10450 = vmatprep.subr.bf16.mxu0 %v16187_v4  ;;  %v1591_v6 = vld [vmem:[%s16178_s1 + $0x18] sm:$0xff]  ;;  %vm370_vm0 = vcmask 523264   ;;  %v1592_v57 = vld [vmem:[%s16178_s1 + $0x20] sm:$0xff]  ;;  %v1593_v58 = vld [vmem:[%s16178_s1 + $0x28] sm:$0xff]  ;;  %vm563_vm1 = vcmask 1048064   ;;  %vm2759_vm2 = vcmask 261120  }
  0x11   : > { %p327_p3 = scmp.lt.s32.totalorder %s326_s13, 75  ;;  %v10454_v9 = vpack.c.bf16 %v1591_v6, %v1590_v5  ;;  %v10457_v59 = vpack.c.bf16 %v1593_v58, %v1592_v57  ;;  %v1594_v62 = vld [vmem:[%s16178_s1 + $0x30] sm:$0xff]  ;;  %v1595_v63 = vld [vmem:[%s16178_s1 + $0x38] sm:$0xff]  ;;  %v1597_v5 = vld [vmem:[%s16178_s1 + $0x48] sm:$0xff]  ;;  %s10808_s16 = smov 32   ;;  %vm3016_vm3 = vcmask 523520  }
  0x12   : > { %10452 = vmatpush1.bf16.msra.mxu0 %v10451_v3  ;;  %v10460_v1 = vpack.c.bf16 %v1595_v63, %v1594_v62  ;;  %v1596_v3 = vld [vmem:[%s16178_s1 + $0x40] sm:$0xff]  ;;  %v1601_v62 = vld [vmem:[%s16178_s1 + $0x68] sm:$0xff]  ;;  %vm3209_vm4 = vcmask 785920   ;;  %vm3402_vm5 = vcmask 1048320   ;;  %s10810_s29 = smov 16   ;;  %s10811_s30 = smov 48  }
  0x13   : > { %s16275_s13 = smov (!%p327_p3, %s326_s13), 75  ;;  %10453 = vmatprep.subr.bf16.mxu0 %v16187_v4  ;;  %s10812_s10 = smov 80  }
  0x14   : > { %s10070_s17 = sshll.u32 %s16275_s13, 3  ;;  %s10814_s8 = smov 8  }
  0x15   : > { %s10895_s20 = scalar_lea.vmem %s16177_s0, %s10070_s17  ;;  %s10809_s17 = smov 96  }
  0x16   : > { %v403_v7 = vld [vmem:[%s10895_s20 + $0x1] sm:$0xff]  ;;  %v405_v8 = vld [vmem:[%s10895_s20 + $0x11] sm:$0xff]  ;;  %v404_v10 = vld [vmem:[%s10895_s20 + $0x9] sm:$0xff]  ;;  %10455 = vmatpush1.bf16.msra.mxu0 %v10454_v9  ;;  %s10815_s14 = smov 24   ;;  %s10816_s15 = smov 40  }
  0x17   : > { %467 = vrot.lane.b32.xlu0 %v403_v7, %s10806_s25  ;;  %471 = vrot.lane.b32.xlu1 %v405_v8, %s10806_s25  ;;  %v406_v11 = vld [vmem:[%s10895_s20 + $0x19] sm:$0xff]  ;;  %v10914_v12 = vld [vmem:[%s10895_s20 + $0x21] sm:$0xff]  ;;  %s10817_s18 = smov 56   ;;  %s10818_s19 = smov 72  }
  0x18   : > { %10456 = vmatprep.subr.bf16.mxu0 %v16187_v4  ;;  %16204 = vst [vmem:[#allocation10_spill] sm:$0xff] %v10914_v12  ;;  %v10917_v13 = vld [vmem:[%s10895_s20 + $0x29] sm:$0xff]  ;;  %v409_v14 = vld [vmem:[%s10895_s20 + $0x31] sm:$0xff]  ;;  %v410_v15 = vld [vmem:[%s10895_s20 + $0x39] sm:$0xff]  ;;  %s10819_s23 = smov 88   ;;  %s10821_s26 = smov 120  }
  0x19   : > { %16205 = vst [vmem:[#allocation11_spill] sm:$0xff] %v10917_v13  ;;  %v10926_v16 = vld [vmem:[%s10895_s20 + $0x10] sm:$0xff]  ;;  %v411_v17 = vld [vmem:[%s10895_s20 + $0x41] sm:$0xff]  ;;  %v10931_v19 = vld [vmem:[%s10895_s20 + $0x18] sm:$0xff] }
  0x1a   : > { %v412_v18 = vld [vmem:[%s10895_s20 + $0x49] sm:$0xff]  ;;  %v10934_v20 = vld [vmem:[%s10895_s20 + $0x20] sm:$0xff]  ;;  %373 = vst.msk [vmem:[#allocation5 + $0x50] sm:$0xff] %vm370_vm0, %v10926_v16  ;;  %v10947_v23 = vld [vmem:[%s10895_s20 + $0x38] sm:$0xff]  ;;  %10458 = vmatpush1.bf16.msra.mxu0 %v10457_v59 }
  0x1b   : > { %469 = vrot.lane.b32.xlu0 %v404_v10, %s10806_s25  ;;  %473 = vrot.lane.b32.xlu1 %v406_v11, %s10806_s25  ;;  %v10937_v21 = vld [vmem:[%s10895_s20 + $0x28] sm:$0xff]  ;;  %v10944_v22 = vld [vmem:[%s10895_s20 + $0x30] sm:$0xff]  ;;  %374 = vst.msk [vmem:[#allocation5 + $0x78] sm:$0xff] %vm370_vm0, %v10931_v19  ;;  %375 = vst.msk [vmem:[#allocation5 + $0xa0] sm:$0xff] %vm370_vm0, %v10934_v20 }
  0x1c   : > { %376 = vst.msk [vmem:[#allocation5 + $0xc8] sm:$0xff] %vm370_vm0, %v10937_v21  ;;  %v10956_v24 = vld [vmem:[%s10895_s20 + $0x40] sm:$0xff]  ;;  %v10959_v25 = vld [vmem:[%s10895_s20 + $0x48] sm:$0xff]  ;;  %v10962_v26 = vld [vmem:[%s10895_s20 + $0x50] sm:$0xff]  ;;  %10459 = vmatprep.subr.bf16.mxu0 %v16187_v4 }
  0x1d   : > { %377 = vst.msk [vmem:[#allocation5 + $0xf0] sm:$0xff] %vm370_vm0, %v10944_v22  ;;  %378 = vst.msk [vmem:[#allocation5 + $0x118] sm:$0xff] %vm370_vm0, %v10947_v23  ;;  %v10969_v27 = vld [vmem:[%s10895_s20 + $0x58] sm:$0xff]  ;;  %v10972_v28 = vld [vmem:[%s10895_s20 + $0x60] sm:$0xff] }
  0x1e   : > { %v10975_v29 = vld [vmem:[%s10895_s20 + $0x68] sm:$0xff]  ;;  %379 = vst.msk [vmem:[#allocation5 + $0x140] sm:$0xff] %vm370_vm0, %v10956_v24  ;;  %380 = vst.msk [vmem:[#allocation5 + $0x168] sm:$0xff] %vm370_vm0, %v10959_v25  ;;  %v413_v30 = vld [vmem:[%s10895_s20 + $0x51] sm:$0xff]  ;;  %10461 = vmatpush1.bf16.msra.mxu0 %v10460_v1 }
  0x1f   : > { %475 = vrot.lane.b32.xlu0 %v10914_v12, %s10806_s25  ;;  %477 = vrot.lane.b32.xlu1 %v10917_v13, %s10806_s25  ;;  %381 = vst.msk [vmem:[#allocation5 + $0x190] sm:$0xff] %vm370_vm0, %v10962_v26  ;;  %v414_v31 = vld [vmem:[%s10895_s20 + $0x59] sm:$0xff]  ;;  %v10986_v32 = vld [vmem:[%s10895_s20 + $0x70] sm:$0xff]  ;;  %382 = vst.msk [vmem:[#allocation5 + $0x1b8] sm:$0xff] %vm370_vm0, %v10969_v27  ;;  %v16207_v13 = vmov 0.0|0.0  }
  0x20   : > { %v10989_v33 = vld [vmem:[%s10895_s20 + $0x78] sm:$0xff]  ;;  %v10992_v34 = vld [vmem:[%s10895_s20 + $0x80] sm:$0xff]  ;;  %383 = vst.msk [vmem:[#allocation5 + $0x1e0] sm:$0xff] %vm370_vm0, %v10972_v28  ;;  %384 = vst.msk [vmem:[#allocation5 + $0x208] sm:$0xff] %vm370_vm0, %v10975_v29  ;;  %10462 = vmatprep.subr.bf16.mxu0 %v16187_v4 }
  0x21   : > { %v11003_v35 = vld [vmem:[%s10895_s20 + $0x88] sm:$0xff]  ;;  %v11006_v36 = vld [vmem:[%s10895_s20 + $0x90] sm:$0xff]  ;;  %385 = vst.msk [vmem:[#allocation5 + $0x230] sm:$0xff] %vm370_vm0, %v10986_v32  ;;  %386 = vst.msk [vmem:[#allocation5 + $0x258] sm:$0xff] %vm370_vm0, %v10989_v33 }
  0x22   : > { %387 = vst.msk [vmem:[#allocation5 + $0x280] sm:$0xff] %vm370_vm0, %v10992_v34  ;;  %v11015_v37 = vld [vmem:[%s10895_s20 + $0x98] sm:$0xff]  ;;  %v11018_v38 = vld [vmem:[%s10895_s20 + $0xa0] sm:$0xff]  ;;  %v11021_v39 = vld [vmem:[%s10895_s20 + $0xa8] sm:$0xff] }
  0x23   : > { %479 = vrot.lane.b32.xlu0 %v409_v14, %s10806_s25  ;;  %481 = vrot.lane.b32.xlu1 %v410_v15, %s10806_s25  ;;  %388 = vst.msk [vmem:[#allocation5 + $0x2a8] sm:$0xff] %vm370_vm0, %v11003_v35  ;;  %389 = vst.msk [vmem:[#allocation5 + $0x2d0] sm:$0xff] %vm370_vm0, %v11006_v36  ;;  %v11028_v40 = vld [vmem:[%s10895_s20 + $0xb0] sm:$0xff]  ;;  %v11031_v41 = vld [vmem:[%s10895_s20 + $0xb8] sm:$0xff]  ;;  %v10463_v14 = vpack.c.bf16 %v1597_v5, %v1596_v3 }
  0x24   : > { %v11034_v42 = vld [vmem:[%s10895_s20 + $0xc0] sm:$0xff]  ;;  %390 = vst.msk [vmem:[#allocation5 + $0x2f8] sm:$0xff] %vm370_vm0, %v11015_v37  ;;  %391 = vst.msk [vmem:[#allocation5 + $0x320] sm:$0xff] %vm370_vm0, %v11018_v38  ;;  %v416_v44 = vld [vmem:[%s10895_s20 + $0x69] sm:$0xff] }
  0x25   : > { %392 = vst.msk [vmem:[#allocation5 + $0x348] sm:$0xff] %vm370_vm0, %v11021_v39  ;;  %v415_v43 = vld [vmem:[%s10895_s20 + $0x61] sm:$0xff]  ;;  %v11048_v46 = vld [vmem:[%s10895_s20 + $0xd0] sm:$0xff]  ;;  %393 = vst.msk [vmem:[#allocation5 + $0x370] sm:$0xff] %vm370_vm0, %v11028_v40  ;;  %10464 = vmatpush1.bf16.msra.mxu0 %v10463_v14 }
  0x26   : > { %v11045_v45 = vld [vmem:[%s10895_s20 + $0xc8] sm:$0xff]  ;;  %v338_v47 = vld [vmem:[%s10895_s20] sm:$0xff]  ;;  %394 = vst.msk [vmem:[#allocation5 + $0x398] sm:$0xff] %vm370_vm0, %v11031_v41  ;;  %395 = vst.msk [vmem:[#allocation5 + $0x3c0] sm:$0xff] %vm370_vm0, %v11034_v42  ;;  %10465 = vmatprep.subr.bf16.mxu0 %v16187_v4 }
  0x27   : > { %483 = vrot.lane.b32.xlu0 %v411_v17, %s10806_s25  ;;  %485 = vrot.lane.b32.xlu1 %v412_v18, %s10806_s25  ;;  %371 = vst.msk [vmem:[#allocation5] sm:$0xff] %vm370_vm0, %v338_v47  ;;  %v11061_v48 = vld [vmem:[%s10895_s20 + $0xd8] sm:$0xff]  ;;  %v11064_v49 = vld [vmem:[%s10895_s20 + $0xe0] sm:$0xff]  ;;  %396 = vst.msk [vmem:[#allocation5 + $0x3e8] sm:$0xff] %vm370_vm0, %v11045_v45 }
  0x28   : > { %397 = vst.msk [vmem:[#allocation5 + $0x410] sm:$0xff] %vm370_vm0, %v11048_v46  ;;  %v339_v50 = vld [vmem:[%s10895_s20 + $0x8] sm:$0xff]  ;;  %v11075_v52 = vld [vmem:[%s10895_s20 + $0xf0] sm:$0xff]  ;;  %398 = vst.msk [vmem:[#allocation5 + $0x438] sm:$0xff] %vm370_vm0, %v11061_v48 }
  0x29   : > { %v11072_v51 = vld [vmem:[%s10895_s20 + $0xe8] sm:$0xff]  ;;  %399 = vst.msk [vmem:[#allocation5 + $0x460] sm:$0xff] %vm370_vm0, %v11064_v49  ;;  %372 = vst.msk [vmem:[#allocation5 + $0x28] sm:$0xff] %vm370_vm0, %v339_v50  ;;  %v11083_v53 = vld [vmem:[%s10895_s20 + $0xf8] sm:$0xff] }
  0x2a   : > { %400 = vst.msk [vmem:[#allocation5 + $0x488] sm:$0xff] %vm370_vm0, %v11072_v51  ;;  %401 = vst.msk [vmem:[#allocation5 + $0x4b0] sm:$0xff] %vm370_vm0, %v11075_v52  ;;  %v417_v54 = vld [vmem:[%s10895_s20 + $0x71] sm:$0xff]  ;;  %v418_v55 = vld [vmem:[%s10895_s20 + $0x79] sm:$0xff] }
  0x2b   : > { %487 = vrot.lane.b32.xlu0 %v413_v30, %s10806_s25  ;;  %489 = vrot.lane.b32.xlu1 %v414_v31, %s10806_s25  ;;  %v11092_v56 = vld [vmem:[%s10895_s20 + $0x12] sm:$0xff]  ;;  %402 = vst.msk [vmem:[#allocation5 + $0x4d8] sm:$0xff] %vm370_vm0, %v11083_v53  ;;  %v11105_v60 = vld [vmem:[%s10895_s20 + $0x1a] sm:$0xff] }
  0x2c   : > { %v11108_v61 = vld [vmem:[%s10895_s20 + $0x22] sm:$0xff]  ;;  %630 = vst.msk [vmem:[#allocation5 + $0x58] sm:$0xff] %vm370_vm0, %v11092_v56  ;;  %v11119_v0 = vld [vmem:[%s10895_s20 + $0x2a] sm:$0xff]  ;;  %631 = vst.msk [vmem:[#allocation5 + $0x80] sm:$0xff] %vm370_vm0, %v11105_v60 }
  0x2d   : > { %632 = vst.msk [vmem:[#allocation5 + $0xa8] sm:$0xff] %vm370_vm0, %v11108_v61  ;;  %v11126_v2 = vld [vmem:[%s10895_s20 + $0x32] sm:$0xff]  ;;  %633 = vst.msk [vmem:[#allocation5 + $0xd0] sm:$0xff] %vm370_vm0, %v11119_v0  ;;  %v11138_v6 = vld [vmem:[%s10895_s20 + $0x3a] sm:$0xff] }
  0x2e   : > { %v11141_v7 = vld [vmem:[%s10895_s20 + $0x42] sm:$0xff]  ;;  %634 = vst.msk [vmem:[#allocation5 + $0xf8] sm:$0xff] %vm370_vm0, %v11126_v2  ;;  %v11148_v8 = vld [vmem:[%s10895_s20 + $0x4a] sm:$0xff]  ;;  %635 = vst.msk [vmem:[#allocation5 + $0x120] sm:$0xff] %vm370_vm0, %v11138_v6 }
  0x2f   : > { %491 = vrot.lane.b32.xlu0 %v415_v43, %s10806_s25  ;;  %493 = vrot.lane.b32.xlu1 %v416_v44, %s10806_s25  ;;  %636 = vst.msk [vmem:[#allocation5 + $0x148] sm:$0xff] %vm370_vm0, %v11141_v7  ;;  %v419_v9 = vld [vmem:[%s10895_s20 + $0x81] sm:$0xff]  ;;  %v420_v10 = vld [vmem:[%s10895_s20 + $0x89] sm:$0xff]  ;;  %637 = vst.msk [vmem:[#allocation5 + $0x170] sm:$0xff] %vm370_vm0, %v11148_v8 }
  0x30   : > { %v11157_v11 = vld [vmem:[%s10895_s20 + $0x52] sm:$0xff]  ;;  %v11165_v17 = vld [vmem:[%s10895_s20 + $0x5a] sm:$0xff]  ;;  %v11168_v18 = vld [vmem:[%s10895_s20 + $0x62] sm:$0xff] }
  0x31   : > { %v1598_v15 = vld [vmem:[%s16178_s1 + $0x50] sm:$0xff]  ;;  %638 = vst.msk [vmem:[#allocation5 + $0x198] sm:$0xff] %vm370_vm0, %v11157_v11  ;;  %v1599_v30 = vld [vmem:[%s16178_s1 + $0x58] sm:$0xff]  ;;  %639 = vst.msk [vmem:[#allocation5 + $0x1c0] sm:$0xff] %vm370_vm0, %v11165_v17 }
  0x32   : > { %v11177_v31 = vld [vmem:[%s10895_s20 + $0x6a] sm:$0xff]  ;;  %v11180_v43 = vld [vmem:[%s10895_s20 + $0x72] sm:$0xff]  ;;  %640 = vst.msk [vmem:[#allocation5 + $0x1e8] sm:$0xff] %vm370_vm0, %v11168_v18  ;;  %v11195_v50 = vld [vmem:[%s10895_s20 + $0x7a] sm:$0xff] }
  0x33   : > { %495 = vrot.lane.b32.xlu0 %v417_v54, %s10806_s25  ;;  %497 = vrot.lane.b32.xlu1 %v418_v55, %s10806_s25  ;;  %v421_v44 = vld [vmem:[%s10895_s20 + $0x91] sm:$0xff]  ;;  %641 = vst.msk [vmem:[#allocation5 + $0x210] sm:$0xff] %vm370_vm0, %v11177_v31  ;;  %642 = vst.msk [vmem:[#allocation5 + $0x238] sm:$0xff] %vm370_vm0, %v11180_v43  ;;  %v422_v47 = vld [vmem:[%s10895_s20 + $0x99] sm:$0xff]  ;;  %v10466_v55 = vpack.c.bf16 %v1599_v30, %v1598_v15 }
  0x34   : > { %v11198_v54 = vld [vmem:[%s10895_s20 + $0x82] sm:$0xff]  ;;  %v11201_v57 = vld [vmem:[%s10895_s20 + $0x8a] sm:$0xff]  ;;  %v11204_v58 = vld [vmem:[%s10895_s20 + $0x92] sm:$0xff]  ;;  %643 = vst.msk [vmem:[#allocation5 + $0x260] sm:$0xff] %vm370_vm0, %v11195_v50 }
  0x35   : > { %644 = vst.msk [vmem:[#allocation5 + $0x288] sm:$0xff] %vm370_vm0, %v11198_v54  ;;  %v1600_v59 = vld [vmem:[%s16178_s1 + $0x60] sm:$0xff]  ;;  %645 = vst.msk [vmem:[#allocation5 + $0x2b0] sm:$0xff] %vm370_vm0, %v11201_v57  ;;  %v424_v5 = vld [vmem:[%s10895_s20 + $0xa9] sm:$0xff]  ;;  %10467 = vmatpush1.bf16.msra.mxu0 %v10466_v55 }
  0x36   : > { %v11218_v63 = vld [vmem:[%s10895_s20 + $0x9a] sm:$0xff]  ;;  %646 = vst.msk [vmem:[#allocation5 + $0x2d8] sm:$0xff] %vm370_vm0, %v11204_v58  ;;  %v11227_v1 = vld [vmem:[%s10895_s20 + $0xa2] sm:$0xff]  ;;  %10468 = vmatprep.subr.bf16.mxu0 %v16187_v4  ;;  %v11243_v15 = vld [vmem:[%s10895_s20 + $0xaa] sm:$0xff] }
  0x37   : > { %499 = vrot.lane.b32.xlu0 %v419_v9, %s10806_s25  ;;  %501 = vrot.lane.b32.xlu1 %v420_v10, %s10806_s25  ;;  %647 = vst.msk [vmem:[#allocation5 + $0x300] sm:$0xff] %vm370_vm0, %v11218_v63  ;;  %v423_v3 = vld [vmem:[%s10895_s20 + $0xa1] sm:$0xff]  ;;  %648 = vst.msk [vmem:[#allocation5 + $0x328] sm:$0xff] %vm370_vm0, %v11227_v1  ;;  %v10469_v9 = vpack.c.bf16 %v1601_v62, %v1600_v59  ;;  %v1602_v10 = vld [vmem:[%s16178_s1 + $0x70] sm:$0xff] }
  0x38   : > { %v1603_v14 = vld [vmem:[%s16178_s1 + $0x78] sm:$0xff]  ;;  %649 = vst.msk [vmem:[#allocation5 + $0x350] sm:$0xff] %vm370_vm0, %v11243_v15  ;;  %v1604_v59 = vld [vmem:[%s16178_s1 + $0x80] sm:$0xff]  ;;  %v1605_v62 = vld [vmem:[%s16178_s1 + $0x88] sm:$0xff] }
  0x39   : > { %v11246_v30 = vld [vmem:[%s10895_s20 + $0xb2] sm:$0xff]  ;;  %10470 = vmatpush1.bf16.msra.mxu0 %v10469_v9  ;;  %v10472_v55 = vpack.c.bf16 %v1603_v14, %v1602_v10  ;;  %v427_v9 = vld [vmem:[%s10895_s20 + $0xc1] sm:$0xff]  ;;  %v428_v10 = vld [vmem:[%s10895_s20 + $0xc9] sm:$0xff]  ;;  %v10475_v14 = vpack.c.bf16 %v1605_v62, %v1604_v59 }
  0x3a   : > { %650 = vst.msk [vmem:[#allocation5 + $0x378] sm:$0xff] %vm370_vm0, %v11246_v30  ;;  %10471 = vmatprep.subr.bf16.mxu0 %v16187_v4  ;;  %v1606_v4 = vld [vmem:[%s16178_s1 + $0x90] sm:$0xff]  ;;  %v430_v62 = vld [vmem:[%s10895_s20 + $0xd9] sm:$0xff] }
  0x3b   : > { %503 = vrot.lane.b32.xlu0 %v421_v44, %s10806_s25  ;;  %505 = vrot.lane.b32.xlu1 %v422_v47, %s10806_s25  ;;  %v425_v44 = vld [vmem:[%s10895_s20 + $0xb1] sm:$0xff]  ;;  %v426_v47 = vld [vmem:[%s10895_s20 + $0xb9] sm:$0xff] }
  0x3c   : > { %v11288_v12 = vld [vmem:[%s10895_s20 + $0xd2] sm:$0xff] }
  0x3d   : > { %10473 = vmatpush1.bf16.msra.mxu0 %v10472_v55  ;;  %16209 = vst [vmem:[#allocation14_spill] sm:$0xff] %v11288_v12  ;;  %v596_v55 = vld [vmem:[%s10895_s20 + $0x2] sm:$0xff]  ;;  %654 = vst.msk [vmem:[#allocation5 + $0x418] sm:$0xff] %vm370_vm0, %v11288_v12  ;;  %v429_v59 = vld [vmem:[%s10895_s20 + $0xd1] sm:$0xff] }
  0x3e   : > { %10474 = vmatprep.subr.bf16.mxu0 %v16207_v13  ;;  %628 = vst.msk [vmem:[#allocation5 + $0x8] sm:$0xff] %vm370_vm0, %v596_v55  ;;  %v11308_v12 = vld [vmem:[%s10895_s20 + $0xda] sm:$0xff] }
  0x3f   : > { %507 = vrot.lane.b32.xlu0 %v423_v3, %s10806_s25  ;;  %509 = vrot.lane.b32.xlu1 %v424_v5, %s10806_s25  ;;  %v11264_v3 = vld [vmem:[%s10895_s20 + $0xba] sm:$0xff]  ;;  %v11267_v5 = vld [vmem:[%s10895_s20 + $0xc2] sm:$0xff]  ;;  %16210 = vst [vmem:[#allocation15_spill] sm:$0xff] %v11308_v12  ;;  %655 = vst.msk [vmem:[#allocation5 + $0x440] sm:$0xff] %vm370_vm0, %v11308_v12 }
  0x40   : > { %16206 = vst [vmem:[#allocation12_spill] sm:$0xff] %v11267_v5  ;;  %651 = vst.msk [vmem:[#allocation5 + $0x3a0] sm:$0xff] %vm370_vm0, %v11264_v3  ;;  %v11331_v12 = vld [vmem:[%s10895_s20 + $0xea] sm:$0xff] }
  0x41   : > { %652 = vst.msk [vmem:[#allocation5 + $0x3c8] sm:$0xff] %vm370_vm0, %v11267_v5  ;;  %10476 = vmatpush1.bf16.msra.mxu0 %v10475_v14  ;;  %v431_v14 = vld [vmem:[%s10895_s20 + $0xe1] sm:$0xff]  ;;  %657 = vst.msk [vmem:[#allocation5 + $0x490] sm:$0xff] %vm370_vm0, %v11331_v12 }
  0x42   : > { %10477 = vmatprep.subr.bf16.mxu0 %v16207_v13 }
  0x43   : > { %511 = vrot.lane.b32.xlu0 %v425_v44, %s10806_s25  ;;  %513 = vrot.lane.b32.xlu1 %v426_v47, %s10806_s25  ;;  %v1607_v44 = vld [vmem:[%s16178_s1 + $0x98] sm:$0xff]  ;;  %v11285_v47 = vld [vmem:[%s10895_s20 + $0xca] sm:$0xff] }
  0x44   : > { %16208 = vst [vmem:[#allocation13_spill] sm:$0xff] %v11285_v47  ;;  %653 = vst.msk [vmem:[#allocation5 + $0x3f0] sm:$0xff] %vm370_vm0, %v11285_v47  ;;  %v10478_v5 = vpack.c.bf16 %v1607_v44, %v1606_v4  ;;  %v11311_v47 = vld [vmem:[%s10895_s20 + $0xe2] sm:$0xff]  ;;  %v597_v4 = vld [vmem:[%s10895_s20 + $0xa] sm:$0xff] }
  0x45   : > { %16211 = vst [vmem:[#allocation16_spill] sm:$0xff] %v11311_v47  ;;  %656 = vst.msk [vmem:[#allocation5 + $0x468] sm:$0xff] %vm370_vm0, %v11311_v47  ;;  %v432_v44 = vld [vmem:[%s10895_s20 + $0xe9] sm:$0xff]  ;;  %v11334_v47 = vld [vmem:[%s10895_s20 + $0xf2] sm:$0xff] }
  0x46   : > { %629 = vst.msk [vmem:[#allocation5 + $0x30] sm:$0xff] %vm370_vm0, %v597_v4  ;;  %10479 = vmatpush1.bf16.msra.mxu0 %v10478_v5  ;;  %658 = vst.msk [vmem:[#allocation5 + $0x4b8] sm:$0xff] %vm370_vm0, %v11334_v47  ;;  %v433_v5 = vld [vmem:[%s10895_s20 + $0xf1] sm:$0xff]  ;;  %v1612_v4 = vld [vmem:[%s16178_s1 + $0xc0] sm:$0xff] }
  0x47   : > { %515 = vrot.lane.b32.xlu0 %v427_v9, %s10806_s25  ;;  %517 = vrot.lane.b32.xlu1 %v428_v10, %s10806_s25  ;;  %v1608_v9 = vld [vmem:[%s16178_s1 + $0xa0] sm:$0xff]  ;;  %v1609_v10 = vld [vmem:[%s16178_s1 + $0xa8] sm:$0xff] }
  0x48   : > { %v10481_v55 = vpack.c.bf16 %v1609_v10, %v1608_v9  ;;  %10480 = vmatprep.subr.bf16.mxu0 %v16207_v13  ;;  %v434_v9 = vld [vmem:[%s10895_s20 + $0xf9] sm:$0xff] }
  0x4a   : > { %10482 = vmatpush1.bf16.msra.mxu0 %v10481_v55 }
  0x4b   : > { %519 = vrot.lane.b32.xlu0 %v429_v59, %s10806_s25  ;;  %521 = vrot.lane.b32.xlu1 %v430_v62, %s10806_s25  ;;  %v1610_v59 = vld [vmem:[%s16178_s1 + $0xb0] sm:$0xff]  ;;  %v1611_v62 = vld [vmem:[%s16178_s1 + $0xb8] sm:$0xff] }
  0x4c   : > { %v10484_v10 = vpack.c.bf16 %v1611_v62, %v1610_v59  ;;  %10483 = vmatprep.subr.bf16.mxu0 %v16207_v13  ;;  %v1614_v59 = vld [vmem:[%s16178_s1 + $0xd0] sm:$0xff]  ;;  %v1615_v62 = vld [vmem:[%s16178_s1 + $0xd8] sm:$0xff] }
  0x4e   : > { %10485 = vmatpush1.bf16.msra.mxu0 %v10484_v10  ;;  %v1617_v10 = vld [vmem:[%s16178_s1 + $0xe8] sm:$0xff] }
  0x4f   : > { %523 = vrot.lane.b32.xlu0 %v431_v14, %s10806_s25  ;;  %525 = vrot.lane.b32.xlu1 %v432_v44, %s10806_s25  ;;  %v1613_v14 = vld [vmem:[%s16178_s1 + $0xc8] sm:$0xff]  ;;  %v11352_v44 = vld [vmem:[%s10895_s20 + $0xfa] sm:$0xff] }
  0x50   : > { %659 = vst.msk [vmem:[#allocation5 + $0x4e0] sm:$0xff] %vm370_vm0, %v11352_v44  ;;  %v10487_v55 = vpack.c.bf16 %v1613_v14, %v1612_v4  ;;  %10486 = vmatprep.subr.bf16.mxu0 %v16207_v13  ;;  %v1619_v4 = vld [vmem:[%s16178_s1 + $0xf8] sm:$0xff]  ;;  %v11518_v14 = vld [vmem:[%s10895_s20 + $0xa1] sm:$0xff] }
  0x51   : > { %902 = vst.msk [vmem:[#allocation5 + $0x2e0] sm:$0xff] %vm370_vm0, %v11518_v14 }
  0x52   : > { %10488 = vmatpush1.bf16.msra.mxu0 %v10487_v55  ;;  %v859_v55 = vld [vmem:[%s10895_s20 + $0x49] sm:$0xff] }
  0x53   : > { %527 = vrot.lane.b32.xlu0 %v433_v5, %s10806_s25  ;;  %529 = vrot.lane.b32.xlu1 %v434_v9, %s10806_s25  ;;  %v10490_v5 = vpack.c.bf16 %v1615_v62, %v1614_v59  ;;  %v1616_v9 = vld [vmem:[%s16178_s1 + $0xe0] sm:$0xff]  ;;  %891 = vst.msk [vmem:[#allocation5 + $0x128] sm:$0xff] %vm370_vm0, %v859_v55 }
  0x54   : > { %10489 = vmatprep.subr.bf16.mxu0 %v16207_v13  ;;  %v1620_v55 = vld [vmem:[%s16178_s1 + $0x100] sm:$0xff] }
  0x56   : > { %10491 = vmatpush1.bf16.msra.mxu0 %v10490_v5  ;;  %v11531_v5 = vld [vmem:[%s10895_s20 + $0xa9] sm:$0xff] }
  0x57   : > { %724 = vrot.lane.b32.xlu0 %v10926_v16, %s10806_s25  ;;  %726 = vrot.lane.b32.xlu1 %v10931_v19, %s10806_s25  ;;  %v10493_v16 = vpack.c.bf16 %v1617_v10, %v1616_v9  ;;  %v1618_v19 = vld [vmem:[%s16178_s1 + $0xf0] sm:$0xff]  ;;  %903 = vst.msk [vmem:[#allocation5 + $0x308] sm:$0xff] %vm370_vm0, %v11531_v5  ;;  %v11553_v10 = vld [vmem:[%s10895_s20 + $0xb9] sm:$0xff] }
  0x58   : > { %10492 = vmatprep.subr.bf16.mxu0 %v16207_v13  ;;  %v11542_v9 = vld [vmem:[%s10895_s20 + $0xb1] sm:$0xff]  ;;  %905 = vst.msk [vmem:[#allocation5 + $0x358] sm:$0xff] %vm370_vm0, %v11553_v10 }
  0x59   : > { %904 = vst.msk [vmem:[#allocation5 + $0x330] sm:$0xff] %vm370_vm0, %v11542_v9 }
  0x5a   : > { %10494 = vmatpush1.bf16.msra.mxu0 %v10493_v16  ;;  %v11564_v16 = vld [vmem:[%s10895_s20 + $0xc1] sm:$0xff] }
  0x5b   : > { %728 = vrot.lane.b32.xlu0 %v10934_v20, %s10806_s25  ;;  %730 = vrot.lane.b32.xlu1 %v10937_v21, %s10806_s25  ;;  %v10496_v20 = vpack.c.bf16 %v1619_v4, %v1618_v19  ;;  %v11406_v21 = vld [vmem:[%s10895_s20 + $0x51] sm:$0xff]  ;;  %906 = vst.msk [vmem:[#allocation5 + $0x380] sm:$0xff] %vm370_vm0, %v11564_v16  ;;  %v11575_v19 = vld [vmem:[%s10895_s20 + $0xc9] sm:$0xff] }
  0x5c   : > { %10495 = vmatprep.subr.bf16.mxu0 %v16207_v13  ;;  %892 = vst.msk [vmem:[#allocation5 + $0x150] sm:$0xff] %vm370_vm0, %v11406_v21  ;;  %907 = vst.msk [vmem:[#allocation5 + $0x3a8] sm:$0xff] %vm370_vm0, %v11575_v19  ;;  %v11586_v4 = vld [vmem:[%s10895_s20 + $0xd1] sm:$0xff] }
  0x5d   : > { %908 = vst.msk [vmem:[#allocation5 + $0x3d0] sm:$0xff] %vm370_vm0, %v11586_v4 }
  0x5e   : > { %10497 = vmatpush1.bf16.msra.mxu0 %v10496_v20  ;;  %v11597_v20 = vld [vmem:[%s10895_s20 + $0xd9] sm:$0xff] }
  0x5f   : > { %732 = vrot.lane.b32.xlu0 %v10944_v22, %s10806_s25  ;;  %734 = vrot.lane.b32.xlu1 %v10947_v23, %s10806_s25  ;;  %v11415_v22 = vld [vmem:[%s10895_s20 + $0x59] sm:$0xff]  ;;  %v11424_v23 = vld [vmem:[%s10895_s20 + $0x61] sm:$0xff]  ;;  %909 = vst.msk [vmem:[#allocation5 + $0x3f8] sm:$0xff] %vm370_vm0, %v11597_v20 }
  0x60   : > { %10498 = vmatprep.subr.bf16.mxu0 %v16207_v13  ;;  %893 = vst.msk [vmem:[#allocation5 + $0x178] sm:$0xff] %vm370_vm0, %v11415_v22  ;;  %894 = vst.msk [vmem:[#allocation5 + $0x1a0] sm:$0xff] %vm370_vm0, %v11424_v23 }
  0x63   : > { %736 = vrot.lane.b32.xlu0 %v10956_v24, %s10806_s25  ;;  %738 = vrot.lane.b32.xlu1 %v10959_v25, %s10806_s25  ;;  %v11433_v24 = vld [vmem:[%s10895_s20 + $0x69] sm:$0xff]  ;;  %v11442_v25 = vld [vmem:[%s10895_s20 + $0x71] sm:$0xff] }
  0x64   : > { %895 = vst.msk [vmem:[#allocation5 + $0x1c8] sm:$0xff] %vm370_vm0, %v11433_v24  ;;  %896 = vst.msk [vmem:[#allocation5 + $0x1f0] sm:$0xff] %vm370_vm0, %v11442_v25 }
  0x67   : > { %740 = vrot.lane.b32.xlu0 %v10962_v26, %s10806_s25  ;;  %742 = vrot.lane.b32.xlu1 %v10969_v27, %s10806_s25  ;;  %v11451_v26 = vld [vmem:[%s10895_s20 + $0x79] sm:$0xff]  ;;  %v11460_v27 = vld [vmem:[%s10895_s20 + $0x81] sm:$0xff] }
  0x68   : > { %897 = vst.msk [vmem:[#allocation5 + $0x218] sm:$0xff] %vm370_vm0, %v11451_v26  ;;  %898 = vst.msk [vmem:[#allocation5 + $0x240] sm:$0xff] %vm370_vm0, %v11460_v27 }
  0x6b   : > { %744 = vrot.lane.b32.xlu0 %v10972_v28, %s10806_s25  ;;  %746 = vrot.lane.b32.xlu1 %v10975_v29, %s10806_s25  ;;  %v852_v28 = vld [vmem:[%s10895_s20 + $0x11] sm:$0xff] }
  0x6c   : > { %884 = vst.msk [vmem:[#allocation5 + $0x10] sm:$0xff] %vm370_vm0, %v852_v28  ;;  %v11608_v28 = vld [vmem:[%s10895_s20 + $0xe1] sm:$0xff] }
  0x6d   : > { %910 = vst.msk [vmem:[#allocation5 + $0x420] sm:$0xff] %vm370_vm0, %v11608_v28 }
  0x6f   : > { %748 = vrot.lane.b32.xlu0 %v10986_v32, %s10806_s25  ;;  %750 = vrot.lane.b32.xlu1 %v10989_v33, %s10806_s25  ;;  %v11473_v33 = vld [vmem:[%s10895_s20 + $0x89] sm:$0xff] }
  0x70   : > { %899 = vst.msk [vmem:[#allocation5 + $0x268] sm:$0xff] %vm370_vm0, %v11473_v33 }
  0x73   : > { %752 = vrot.lane.b32.xlu0 %v10992_v34, %s10806_s25  ;;  %754 = vrot.lane.b32.xlu1 %v11003_v35, %s10806_s25  ;;  %v853_v34 = vld [vmem:[%s10895_s20 + $0x19] sm:$0xff]  ;;  %v854_v35 = vld [vmem:[%s10895_s20 + $0x21] sm:$0xff] }
  0x74   : > { %885 = vst.msk [vmem:[#allocation5 + $0x38] sm:$0xff] %vm370_vm0, %v853_v34  ;;  %886 = vst.msk [vmem:[#allocation5 + $0x60] sm:$0xff] %vm370_vm0, %v854_v35  ;;  %v11641_v34 = vld [vmem:[%s10895_s20 + $0xf9] sm:$0xff]  ;;  %v16212_v35 = vld [vmem:[#allocation12_spill] sm:$0xff] }
  0x75   : > { %913 = vst.msk [vmem:[#allocation5 + $0x498] sm:$0xff] %vm370_vm0, %v11641_v34 }
  0x77   : > { %756 = vrot.lane.b32.xlu0 %v11006_v36, %s10806_s25  ;;  %758 = vrot.lane.b32.xlu1 %v11015_v37, %s10806_s25 }
  0x7b   : > { %760 = vrot.lane.b32.xlu0 %v11018_v38, %s10806_s25  ;;  %762 = vrot.lane.b32.xlu1 %v11021_v39, %s10806_s25  ;;  %v11488_v38 = vld [vmem:[%s10895_s20 + $0x91] sm:$0xff]  ;;  %v690_v39 = vld [vmem:[%s10895_s20 + $0x100] sm:$0xff] }
  0x7c   : > { %900 = vst.msk [vmem:[#allocation5 + $0x290] sm:$0xff] %vm370_vm0, %v11488_v38 }
  0x7f   : > { %764 = vrot.lane.b32.xlu0 %v11028_v40, %s10806_s25  ;;  %766 = vrot.lane.b32.xlu1 %v11031_v41, %s10806_s25  ;;  %v691_v40 = vld [vmem:[%s10895_s20 + $0x108] sm:$0xff] }
  0x80   : > { %v855_v41 = vld [vmem:[%s10895_s20 + $0x29] sm:$0xff] }
  0x81   : > { %887 = vst.msk [vmem:[#allocation5 + $0x88] sm:$0xff] %vm370_vm0, %v855_v41  ;;  %v11661_v41 = vld [vmem:[%s10895_s20 + $0x109] sm:$0xff] }
  0x82   : > { %915 = vst.msk [vmem:[#allocation5 + $0x4e8] sm:$0xff] %vm370_vm0, %v11661_v41 }
  0x83   : > { %768 = vrot.lane.b32.xlu0 %v11034_v42, %s10806_s25  ;;  %770 = vrot.lane.b32.xlu1 %v11045_v45, %s10806_s25  ;;  %v856_v42 = vld [vmem:[%s10895_s20 + $0x31] sm:$0xff] }
  0x84   : > { %888 = vst.msk [vmem:[#allocation5 + $0xb0] sm:$0xff] %vm370_vm0, %v856_v42  ;;  %v1108_v42 = vld [vmem:[%s10895_s20 + $0x20] sm:$0xff] }
  0x85   : > { %1140 = vst.msk [vmem:[#allocation5 + $0x18] sm:$0xff] %vm370_vm0, %v1108_v42  ;;  %v1626_v42 = vld [vmem:[%s16178_s1 + $0x130] sm:$0xff] }
  0x87   : > { %772 = vrot.lane.b32.xlu0 %v11048_v46, %s10806_s25  ;;  %774 = vrot.lane.b32.xlu1 %v11061_v48, %s10806_s25  ;;  %v11505_v48 = vld [vmem:[%s10895_s20 + $0x99] sm:$0xff] }
  0x88   : > { %901 = vst.msk [vmem:[#allocation5 + $0x2b8] sm:$0xff] %vm370_vm0, %v11505_v48 }
  0x89   : > { %v468_v29 = vpop.permute.xlu0 %467  ;;  %v472_v32 = vpop.permute.xlu1 %471 }
  0x8a   : > { %564 = vst.msk [vmem:[#allocation5] sm:$0xff] %vm563_vm1, %v468_v29  ;;  %566 = vst.msk [vmem:[#allocation5 + $0x50] sm:$0xff] %vm563_vm1, %v472_v32  ;;  %v11619_v29 = vld [vmem:[%s10895_s20 + $0xe9] sm:$0xff]  ;;  %v11630_v32 = vld [vmem:[%s10895_s20 + $0xf1] sm:$0xff] }
  0x8b   : > { %776 = vrot.lane.b32.xlu0 %v11064_v49, %s10806_s25  ;;  %778 = vrot.lane.b32.xlu1 %v11072_v51, %s10806_s25  ;;  %v857_v49 = vld [vmem:[%s10895_s20 + $0x39] sm:$0xff]  ;;  %v858_v51 = vld [vmem:[%s10895_s20 + $0x41] sm:$0xff]  ;;  %911 = vst.msk [vmem:[#allocation5 + $0x448] sm:$0xff] %vm370_vm0, %v11619_v29  ;;  %912 = vst.msk [vmem:[#allocation5 + $0x470] sm:$0xff] %vm370_vm0, %v11630_v32 }
  0x8c   : > { %889 = vst.msk [vmem:[#allocation5 + $0xd8] sm:$0xff] %vm370_vm0, %v857_v49  ;;  %890 = vst.msk [vmem:[#allocation5 + $0x100] sm:$0xff] %vm370_vm0, %v858_v51  ;;  %v16216_v49 = vld [vmem:[#allocation16_spill] sm:$0xff] }
  0x8d   : > { %v470_v36 = vpop.permute.xlu0 %469  ;;  %v474_v37 = vpop.permute.xlu1 %473  ;;  %v1109_v51 = vld [vmem:[%s10895_s20 + $0x28] sm:$0xff] }
  0x8e   : > { %565 = vst.msk [vmem:[#allocation5 + $0x28] sm:$0xff] %vm563_vm1, %v470_v36  ;;  %567 = vst.msk [vmem:[#allocation5 + $0x78] sm:$0xff] %vm563_vm1, %v474_v37 }
  0x8f   : > { %780 = vrot.lane.b32.xlu0 %v11075_v52, %s10806_s25  ;;  %782 = vrot.lane.b32.xlu1 %v11083_v53, %s10806_s25  ;;  %1141 = vst.msk [vmem:[#allocation5 + $0x40] sm:$0xff] %vm370_vm0, %v1109_v51 }
  0x91   : > { %v476_v45 = vpop.permute.xlu0 %475  ;;  %v478_v46 = vpop.permute.xlu1 %477 }
  0x92   : > { %568 = vst.msk [vmem:[#allocation5 + $0xa0] sm:$0xff] %vm563_vm1, %v476_v45  ;;  %569 = vst.msk [vmem:[#allocation5 + $0xc8] sm:$0xff] %vm563_vm1, %v478_v46 }
  0x93   : > { %784 = vrot.lane.b32.xlu0 %v690_v39, %s10806_s25  ;;  %786 = vrot.lane.b32.xlu1 %v691_v40, %s10806_s25  ;;  %v16214_v39 = vld [vmem:[#allocation14_spill] sm:$0xff]  ;;  %v16215_v40 = vld [vmem:[#allocation15_spill] sm:$0xff] }
  0x95   : > { %v480_v52 = vpop.permute.xlu0 %479  ;;  %v482_v53 = vpop.permute.xlu1 %481 }
  0x96   : > { %570 = vst.msk [vmem:[#allocation5 + $0xf0] sm:$0xff] %vm563_vm1, %v480_v52  ;;  %571 = vst.msk [vmem:[#allocation5 + $0x118] sm:$0xff] %vm563_vm1, %v482_v53 }
  0x97   : > { %980 = vrot.lane.b32.xlu0 %v11092_v56, %s10806_s25  ;;  %982 = vrot.lane.b32.xlu1 %v11105_v60, %s10806_s25 }
  0x99   : > { %v484_v59 = vpop.permute.xlu0 %483  ;;  %v486_v62 = vpop.permute.xlu1 %485 }
  0x9a   : > { %572 = vst.msk [vmem:[#allocation5 + $0x140] sm:$0xff] %vm563_vm1, %v484_v59  ;;  %573 = vst.msk [vmem:[#allocation5 + $0x168] sm:$0xff] %vm563_vm1, %v486_v62  ;;  %v1621_v59 = vld [vmem:[%s16178_s1 + $0x108] sm:$0xff]  ;;  %v1110_v62 = vld [vmem:[%s10895_s20 + $0x30] sm:$0xff] }
  0x9b   : > { %984 = vrot.lane.b32.xlu0 %v11108_v61, %s10806_s25  ;;  %986 = vrot.lane.b32.xlu1 %v11119_v0, %s10806_s25  ;;  %1142 = vst.msk [vmem:[#allocation5 + $0x68] sm:$0xff] %vm370_vm0, %v1110_v62 }
  0x9d   : > { %v488_v56 = vpop.permute.xlu0 %487  ;;  %v490_v60 = vpop.permute.xlu1 %489 }
  0x9e   : > { %574 = vst.msk [vmem:[#allocation5 + $0x190] sm:$0xff] %vm563_vm1, %v488_v56  ;;  %575 = vst.msk [vmem:[#allocation5 + $0x1b8] sm:$0xff] %vm563_vm1, %v490_v60  ;;  %v10499_v56 = vpack.c.bf16 %v1621_v59, %v1620_v55  ;;  %v1622_v60 = vld [vmem:[%s16178_s1 + $0x110] sm:$0xff]  ;;  %v1113_v59 = vld [vmem:[%s10895_s20 + $0x48] sm:$0xff] }
  0x9f   : > { %988 = vrot.lane.b32.xlu0 %v11126_v2, %s10806_s25  ;;  %990 = vrot.lane.b32.xlu1 %v11138_v6, %s10806_s25  ;;  %v10792_v55 = vld [vmem:[%s10895_s20 + $0x31] sm:$0xff]  ;;  %1145 = vst.msk [vmem:[#allocation5 + $0xe0] sm:$0xff] %vm370_vm0, %v1113_v59 }
  0xa1   : > { %v492_v61 = vpop.permute.xlu0 %491  ;;  %v494_v0 = vpop.permute.xlu1 %493 }
  0xa2   : > { %576 = vst.msk [vmem:[#allocation5 + $0x1e0] sm:$0xff] %vm563_vm1, %v492_v61  ;;  %577 = vst.msk [vmem:[#allocation5 + $0x208] sm:$0xff] %vm563_vm1, %v494_v0  ;;  %v1652_v61 = vld [vmem:[%s16178_s1 + $0x200] sm:$0xff] }
  0xa3   : > { %992 = vrot.lane.b32.xlu0 %v11141_v7, %s10806_s25  ;;  %994 = vrot.lane.b32.xlu1 %v11148_v8, %s10806_s25 }
  0xa5   : > { %v496_v2 = vpop.permute.xlu0 %495  ;;  %v498_v6 = vpop.permute.xlu1 %497 }
  0xa6   : > { %578 = vst.msk [vmem:[#allocation5 + $0x230] sm:$0xff] %vm563_vm1, %v496_v2  ;;  %579 = vst.msk [vmem:[#allocation5 + $0x258] sm:$0xff] %vm563_vm1, %v498_v6 }
  0xa7   : > { %996 = vrot.lane.b32.xlu0 %v11157_v11, %s10806_s25  ;;  %998 = vrot.lane.b32.xlu1 %v11165_v17, %s10806_s25 }
  0xa9   : > { %v500_v7 = vpop.permute.xlu0 %499  ;;  %v502_v8 = vpop.permute.xlu1 %501 }
  0xaa   : > { %580 = vst.msk [vmem:[#allocation5 + $0x280] sm:$0xff] %vm563_vm1, %v500_v7  ;;  %581 = vst.msk [vmem:[#allocation5 + $0x2a8] sm:$0xff] %vm563_vm1, %v502_v8  ;;  %v1623_v7 = vld [vmem:[%s16178_s1 + $0x118] sm:$0xff] }
  0xab   : > { %1000 = vrot.lane.b32.xlu0 %v11168_v18, %s10806_s25  ;;  %1002 = vrot.lane.b32.xlu1 %v11177_v31, %s10806_s25  ;;  %v1428_v8 = vld [vmem:[#allocation5] sm:$0xff] }
  0xad   : > { %v504_v11 = vpop.permute.xlu0 %503  ;;  %v506_v17 = vpop.permute.xlu1 %505 }
  0xae   : > { %582 = vst.msk [vmem:[#allocation5 + $0x2d0] sm:$0xff] %vm563_vm1, %v504_v11  ;;  %583 = vst.msk [vmem:[#allocation5 + $0x2f8] sm:$0xff] %vm563_vm1, %v506_v17  ;;  %v947_v11 = vld [vmem:[%s10895_s20 + $0x10a] sm:$0xff] }
  0xaf   : > { %1004 = vrot.lane.b32.xlu0 %v11180_v43, %s10806_s25  ;;  %1006 = vrot.lane.b32.xlu1 %v11195_v50, %s10806_s25 }
  0xb1   : > { %v508_v18 = vpop.permute.xlu0 %507  ;;  %v510_v31 = vpop.permute.xlu1 %509 }
  0xb2   : > { %584 = vst.msk [vmem:[#allocation5 + $0x320] sm:$0xff] %vm563_vm1, %v508_v18  ;;  %585 = vst.msk [vmem:[#allocation5 + $0x348] sm:$0xff] %vm563_vm1, %v510_v31  ;;  %v1111_v18 = vld [vmem:[%s10895_s20 + $0x38] sm:$0xff]  ;;  %v10502_v31 = vpack.c.bf16 %v1623_v7, %v1622_v60 }
  0xb3   : > { %1008 = vrot.lane.b32.xlu0 %v11198_v54, %s10806_s25  ;;  %1010 = vrot.lane.b32.xlu1 %v11201_v57, %s10806_s25  ;;  %1143 = vst.msk [vmem:[#allocation5 + $0x90] sm:$0xff] %vm370_vm0, %v1111_v18  ;;  %v10793_v60 = vld [vmem:[%s10895_s20 + $0x39] sm:$0xff] }
  0xb5   : > { %v512_v43 = vpop.permute.xlu0 %511  ;;  %v514_v50 = vpop.permute.xlu1 %513 }
  0xb6   : > { %586 = vst.msk [vmem:[#allocation5 + $0x370] sm:$0xff] %vm563_vm1, %v512_v43  ;;  %587 = vst.msk [vmem:[#allocation5 + $0x398] sm:$0xff] %vm563_vm1, %v514_v50 }
  0xb7   : > { %1012 = vrot.lane.b32.xlu0 %v11204_v58, %s10806_s25  ;;  %1014 = vrot.lane.b32.xlu1 %v11218_v63, %s10806_s25 }
  0xb9   : > { %v516_v54 = vpop.permute.xlu0 %515  ;;  %v518_v57 = vpop.permute.xlu1 %517 }
  0xba   : > { %588 = vst.msk [vmem:[#allocation5 + $0x3c0] sm:$0xff] %vm563_vm1, %v516_v54  ;;  %589 = vst.msk [vmem:[#allocation5 + $0x3e8] sm:$0xff] %vm563_vm1, %v518_v57  ;;  %v1624_v54 = vld [vmem:[%s16178_s1 + $0x120] sm:$0xff]  ;;  %v1625_v57 = vld [vmem:[%s16178_s1 + $0x128] sm:$0xff] }
  0xbb   : > { %1016 = vrot.lane.b32.xlu0 %v11227_v1, %s10806_s25  ;;  %1018 = vrot.lane.b32.xlu1 %v11243_v15, %s10806_s25 }
  0xbd   : > { %v520_v58 = vpop.permute.xlu0 %519  ;;  %v522_v63 = vpop.permute.xlu1 %521 }
  0xbe   : > { %590 = vst.msk [vmem:[#allocation5 + $0x410] sm:$0xff] %vm563_vm1, %v520_v58  ;;  %591 = vst.msk [vmem:[#allocation5 + $0x438] sm:$0xff] %vm563_vm1, %v522_v63  ;;  %v1433_v58 = vld [vmem:[#allocation5 + $0x28] sm:$0xff]  ;;  %v1654_v63 = vld [vmem:[%s16178_s1 + $0x210] sm:$0xff] }
  0xbf   : > { %1020 = vrot.lane.b32.xlu0 %v11246_v30, %s10806_s25  ;;  %1022 = vrot.lane.b32.xlu1 %v11264_v3, %s10806_s25  ;;  %v16213_v30 = vld [vmem:[#allocation13_spill] sm:$0xff]  ;;  %v11650_v3 = vld [vmem:[%s10895_s20 + $0x101] sm:$0xff] }
  0xc0   : > { %914 = vst.msk [vmem:[#allocation5 + $0x4c0] sm:$0xff] %vm370_vm0, %v11650_v3 }
  0xc1   : > { %v524_v1 = vpop.permute.xlu0 %523  ;;  %v526_v15 = vpop.permute.xlu1 %525 }
  0xc2   : > { %592 = vst.msk [vmem:[#allocation5 + $0x460] sm:$0xff] %vm563_vm1, %v524_v1  ;;  %593 = vst.msk [vmem:[#allocation5 + $0x488] sm:$0xff] %vm563_vm1, %v526_v15  ;;  %v16217_v1 = vld [vmem:[#allocation10_spill] sm:$0xff] }
  0xc3   : > { %1024 = vrot.lane.b32.xlu0 %v16212_v35, %s10806_s25  ;;  %1026 = vrot.lane.b32.xlu1 %v16213_v30, %s10806_s25  ;;  %v1655_v35 = vld [vmem:[%s16178_s1 + $0x218] sm:$0xff]  ;;  %v1112_v30 = vld [vmem:[%s10895_s20 + $0x40] sm:$0xff] }
  0xc4   : > { %1144 = vst.msk [vmem:[#allocation5 + $0xb8] sm:$0xff] %vm370_vm0, %v1112_v30  ;;  %v10550_v51 = vpack.c.bf16 %v1655_v35, %v1654_v63  ;;  %v1448_v63 = vld [vmem:[#allocation5 + $0xa0] sm:$0xff]  ;;  %v1369_v35 = vld [vmem:[%s10895_s20 + $0x4a] sm:$0xff] }
  0xc5   : > { %v528_v36 = vpop.permute.xlu0 %527  ;;  %v530_v37 = vpop.permute.xlu1 %529  ;;  %1401 = vst.msk [vmem:[#allocation5 + $0xe8] sm:$0xff] %vm370_vm0, %v1369_v35 }
  0xc6   : > { %594 = vst.msk [vmem:[#allocation5 + $0x4b0] sm:$0xff] %vm563_vm1, %v528_v36  ;;  %595 = vst.msk [vmem:[#allocation5 + $0x4d8] sm:$0xff] %vm563_vm1, %v530_v37  ;;  %v10505_v36 = vpack.c.bf16 %v1625_v57, %v1624_v54  ;;  %v1630_v54 = vld [vmem:[%s16178_s1 + $0x150] sm:$0xff]  ;;  %v1631_v57 = vld [vmem:[%s16178_s1 + $0x158] sm:$0xff] }
  0xc7   : > { %1028 = vrot.lane.b32.xlu0 %v16214_v39, %s10806_s25  ;;  %1030 = vrot.lane.b32.xlu1 %v16215_v40, %s10806_s25  ;;  %v16218_v39 = vld [vmem:[#allocation11_spill] sm:$0xff] }
  0xc9   : > { %v725_v45 = vpop.permute.xlu0 %724  ;;  %v727_v46 = vpop.permute.xlu1 %726 }
  0xca   : > { %820 = vst.msk [vmem:[#allocation5 + $0x8] sm:$0xff] %vm563_vm1, %v725_v45  ;;  %821 = vst.msk [vmem:[#allocation5 + $0x30] sm:$0xff] %vm563_vm1, %v727_v46  ;;  %v1627_v45 = vld [vmem:[%s16178_s1 + $0x138] sm:$0xff]  ;;  %v1364_v46 = vld [vmem:[%s10895_s20 + $0x22] sm:$0xff] }
  0xcb   : > { %1032 = vrot.lane.b32.xlu0 %v16216_v49, %s10806_s25  ;;  %1034 = vrot.lane.b32.xlu1 %v11331_v12, %s10806_s25  ;;  %v946_v12 = vld [vmem:[%s10895_s20 + $0x102] sm:$0xff]  ;;  %1396 = vst.msk [vmem:[#allocation5 + $0x20] sm:$0xff] %vm370_vm0, %v1364_v46  ;;  %v1658_v46 = vld [vmem:[%s16178_s1 + $0x230] sm:$0xff] }
  0xcc   : > { %v1438_v49 = vld [vmem:[#allocation5 + $0x50] sm:$0xff] }
  0xcd   : > { %v729_v52 = vpop.permute.xlu0 %728  ;;  %v731_v53 = vpop.permute.xlu1 %730 }
  0xce   : > { %822 = vst.msk [vmem:[#allocation5 + $0x58] sm:$0xff] %vm563_vm1, %v729_v52  ;;  %823 = vst.msk [vmem:[#allocation5 + $0x80] sm:$0xff] %vm563_vm1, %v731_v53  ;;  %v1365_v52 = vld [vmem:[%s10895_s20 + $0x2a] sm:$0xff] }
  0xcf   : > { %1036 = vrot.lane.b32.xlu0 %v11334_v47, %s10806_s25  ;;  %1038 = vrot.lane.b32.xlu1 %v11352_v44, %s10806_s25  ;;  %v1653_v47 = vld [vmem:[%s16178_s1 + $0x208] sm:$0xff]  ;;  %1397 = vst.msk [vmem:[#allocation5 + $0x48] sm:$0xff] %vm370_vm0, %v1365_v52  ;;  %v1659_v52 = vld [vmem:[%s16178_s1 + $0x238] sm:$0xff] }
  0xd0   : > { %v10546_v17 = vpack.c.bf16 %v1653_v47, %v1652_v61  ;;  %v1628_v61 = vld [vmem:[%s16178_s1 + $0x140] sm:$0xff]  ;;  %v1629_v47 = vld [vmem:[%s16178_s1 + $0x148] sm:$0xff] }
  0xd1   : > { %v733_v44 = vpop.permute.xlu0 %732  ;;  %v1429_v0 = vld [vmem:[#allocation5 + $0x8] sm:$0xff]  ;;  %v735_v2 = vpop.permute.xlu1 %734  ;;  %v1434_v6 = vld [vmem:[#allocation5 + $0x30] sm:$0xff]  ;;  %v10511_v18 = vpack.c.bf16 %v1629_v47, %v1628_v61  ;;  %v10558_v61 = vpack.c.bf16 %v1659_v52, %v1658_v46 }
  0xd2   : > { %824 = vst.msk [vmem:[#allocation5 + $0xa8] sm:$0xff] %vm563_vm1, %v733_v44  ;;  %1827 = vmatprep.mubr.f32.mxu0 %v1429_v0  ;;  %825 = vst.msk [vmem:[#allocation5 + $0xd0] sm:$0xff] %vm563_vm1, %v735_v2  ;;  %10547 = vmatprep.subr.bf16.mxu1 %v10546_v17  ;;  %v1366_v44 = vld [vmem:[%s10895_s20 + $0x32] sm:$0xff]  ;;  %v1656_v2 = vld [vmem:[%s16178_s1 + $0x220] sm:$0xff] }
  0xd3   : > { %1040 = vrot.lane.b32.xlu0 %v946_v12, %s10806_s25  ;;  %1828 = vmatmul.mubr.f32.vlgmr.msra.gmra.mrb[0].mxu0 %v1428_v8  ;;  %v10508_v12 = vpack.c.bf16 %v1627_v45, %v1626_v42  ;;  %v1443_v0 = vld [vmem:[#allocation5 + $0x78] sm:$0xff]  ;;  %1398 = vst.msk [vmem:[#allocation5 + $0x70] sm:$0xff] %vm370_vm0, %v1366_v44  ;;  %v10794_v8 = vld [vmem:[%s10895_s20 + $0x41] sm:$0xff] }
  0xd4   : > { %10500 = vmatpush1.bf16.msra.mxu0 %v10499_v56  ;;  %1832 = vmatprep.mubr.f32.mxu0 %v1434_v6  ;;  %v1367_v6 = vld [vmem:[%s10895_s20 + $0x3a] sm:$0xff]  ;;  %v1633_v45 = vld [vmem:[%s16178_s1 + $0x168] sm:$0xff] }
  0xd5   : > { %v737_v43 = vpop.permute.xlu0 %736  ;;  %1042 = vrot.lane.b32.xlu1 %v947_v11, %s10806_s25  ;;  %v739_v50 = vpop.permute.xlu1 %738  ;;  %10501 = vmatprep.subr.bf16.mxu0 %v16207_v13  ;;  %v1439_v15 = vld [vmem:[#allocation5 + $0x58] sm:$0xff]  ;;  %v1444_v53 = vld [vmem:[#allocation5 + $0x80] sm:$0xff]  ;;  %v1657_v11 = vld [vmem:[%s16178_s1 + $0x228] sm:$0xff]  ;;  %1399 = vst.msk [vmem:[#allocation5 + $0x98] sm:$0xff] %vm370_vm0, %v1367_v6 }
  0xd6   : > { %826 = vst.msk [vmem:[#allocation5 + $0xf8] sm:$0xff] %vm563_vm1, %v737_v43  ;;  %827 = vst.msk [vmem:[#allocation5 + $0x120] sm:$0xff] %vm563_vm1, %v739_v50  ;;  %10549 = vmatpush3.bf16.msra.mxu1 %v10546_v17  ;;  %v1114_v17 = vld [vmem:[%s10895_s20 + $0x50] sm:$0xff]  ;;  %v1117_v44 = vld [vmem:[%s10895_s20 + $0x68] sm:$0xff] }
  0xd7   : > { %1236 = vrot.lane.b32.xlu0 %v16217_v1, %s10806_s25  ;;  %1833 = vmatmul.mubr.f32.gmra.mrb[2].mxu0 %v1433_v58  ;;  %1146 = vst.msk [vmem:[#allocation5 + $0x108] sm:$0xff] %vm370_vm0, %v1114_v17  ;;  %v10795_v50 = vld [vmem:[%s10895_s20 + $0x49] sm:$0xff]  ;;  %v1432_v58 = vld [vmem:[#allocation5 + $0x20] sm:$0xff]  ;;  %v10554_v1 = vpack.c.bf16 %v1657_v11, %v1656_v2  ;;  %1149 = vst.msk [vmem:[#allocation5 + $0x180] sm:$0xff] %vm370_vm0, %v1117_v44 }
  0xd8   : > { %1837 = vmatprep.mubr.f32.mxu0 %v1439_v15  ;;  %10503 = vmatpush1.bf16.msra.mxu0 %v10502_v31  ;;  %v1368_v15 = vld [vmem:[%s10895_s20 + $0x42] sm:$0xff]  ;;  %v1377_v52 = vld [vmem:[%s10895_s20 + $0x8a] sm:$0xff]  ;;  %v1488_v44 = vld [vmem:[#allocation5 + $0x1e0] sm:$0xff] }
  0xd9   : > { %v741_v37 = vpop.permute.xlu0 %740  ;;  %1238 = vrot.lane.b32.xlu1 %v16218_v39, %s10806_s25  ;;  %v743_v40 = vpop.permute.xlu1 %742  ;;  %10504 = vmatprep.subr.bf16.mxu0 %v16207_v13  ;;  %v1449_v7 = vld [vmem:[#allocation5 + $0xa8] sm:$0xff]  ;;  %v1454_v30 = vld [vmem:[#allocation5 + $0xd0] sm:$0xff]  ;;  %1400 = vst.msk [vmem:[#allocation5 + $0xc0] sm:$0xff] %vm370_vm0, %v1368_v15  ;;  %1409 = vst.msk [vmem:[#allocation5 + $0x228] sm:$0xff] %vm370_vm0, %v1377_v52 }
  0xda   : > { %828 = vst.msk [vmem:[#allocation5 + $0x148] sm:$0xff] %vm563_vm1, %v741_v37  ;;  %829 = vst.msk [vmem:[#allocation5 + $0x170] sm:$0xff] %vm563_vm1, %v743_v40  ;;  %10551 = vmatprep.subr.bf16.mxu1 %v10550_v51  ;;  %10346 = vmatprep.mubr.msk.f32.mxu1 %vm370_vm0, %v1432_v58  ;;  %v10514_v37 = vpack.c.bf16 %v1631_v57, %v1630_v54  ;;  %v1453_v40 = vld [vmem:[#allocation5 + $0xc8] sm:$0xff]  ;;  %v1374_v57 = vld [vmem:[%s10895_s20 + $0x72] sm:$0xff] }
  0xdb   : > { %1838 = vmatmul.mubr.f32.gmra.mrb[4].mxu0 %v1438_v49  ;;  %1240 = vrot.lane.b32.xlu0 %v10792_v55, %s10806_s25  ;;  %v1371_v49 = vld [vmem:[%s10895_s20 + $0x5a] sm:$0xff]  ;;  %1406 = vst.msk [vmem:[#allocation5 + $0x1b0] sm:$0xff] %vm370_vm0, %v1374_v57  ;;  %v1478_v46 = vld [vmem:[#allocation5 + $0x190] sm:$0xff] }
  0xdc   : > { %1842 = vmatprep.mubr.f32.mxu0 %v1444_v53  ;;  %10506 = vmatpush1.bf16.msra.mxu0 %v10505_v36  ;;  %v1115_v36 = vld [vmem:[%s10895_s20 + $0x58] sm:$0xff]  ;;  %v1116_v53 = vld [vmem:[%s10895_s20 + $0x60] sm:$0xff]  ;;  %1403 = vst.msk [vmem:[#allocation5 + $0x138] sm:$0xff] %vm370_vm0, %v1371_v49 }
  0xdd   : > { %v745_v62 = vpop.permute.xlu0 %744  ;;  %v747_v56 = vpop.permute.xlu1 %746  ;;  %1242 = vrot.lane.b32.xlu1 %v10793_v60, %s10806_s25  ;;  %10507 = vmatprep.subr.bf16.mxu0 %v16207_v13  ;;  %1147 = vst.msk [vmem:[#allocation5 + $0x130] sm:$0xff] %vm370_vm0, %v1115_v36  ;;  %1148 = vst.msk [vmem:[#allocation5 + $0x158] sm:$0xff] %vm370_vm0, %v1116_v53  ;;  %v1458_v60 = vld [vmem:[#allocation5 + $0xf0] sm:$0xff]  ;;  %v1464_v47 = vld [vmem:[#allocation5 + $0x120] sm:$0xff] }
  0xde   : > { %830 = vst.msk [vmem:[#allocation5 + $0x198] sm:$0xff] %vm563_vm1, %v745_v62  ;;  %831 = vst.msk [vmem:[#allocation5 + $0x1c0] sm:$0xff] %vm563_vm1, %v747_v56  ;;  %10553 = vmatpush3.bf16.msra.mxu1 %v10550_v51  ;;  %v1459_v51 = vld [vmem:[#allocation5 + $0xf8] sm:$0xff]  ;;  %v1635_v62 = vld [vmem:[%s16178_s1 + $0x178] sm:$0xff] }
  0xdf   : > { %1843 = vmatmul.mubr.f32.gmra.mrb[6].mxu0 %v1443_v0  ;;  %1244 = vrot.lane.b32.xlu0 %v10794_v8, %s10806_s25  ;;  %v1372_v56 = vld [vmem:[%s10895_s20 + $0x62] sm:$0xff]  ;;  %v1463_v8 = vld [vmem:[#allocation5 + $0x118] sm:$0xff]  ;;  %v1119_v58 = vld [vmem:[%s10895_s20 + $0x78] sm:$0xff] }
  0xe0   : > { %1847 = vmatprep.mubr.f32.mxu0 %v1449_v7  ;;  %10509 = vmatpush1.bf16.msra.mxu0 %v10508_v12  ;;  %1404 = vst.msk [vmem:[#allocation5 + $0x160] sm:$0xff] %vm370_vm0, %v1372_v56  ;;  %v1637_v7 = vld [vmem:[%s16178_s1 + $0x188] sm:$0xff]  ;;  %1151 = vst.msk [vmem:[#allocation5 + $0x1d0] sm:$0xff] %vm370_vm0, %v1119_v58  ;;  %v1473_v36 = vld [vmem:[#allocation5 + $0x168] sm:$0xff] }
  0xe1   : > { %v749_v31 = vpop.permute.xlu0 %748  ;;  %v751_v43 = vpop.permute.xlu1 %750  ;;  %1246 = vrot.lane.b32.xlu1 %v10795_v50, %s10806_s25  ;;  %10510 = vmatprep.subr.bf16.mxu0 %v16207_v13  ;;  %v1469_v11 = vld [vmem:[#allocation5 + $0x148] sm:$0xff]  ;;  %v1468_v50 = vld [vmem:[#allocation5 + $0x140] sm:$0xff]  ;;  %v1474_v54 = vld [vmem:[#allocation5 + $0x170] sm:$0xff] }
  0xe2   : > { %832 = vst.msk [vmem:[#allocation5 + $0x1e8] sm:$0xff] %vm563_vm1, %v749_v31  ;;  %833 = vst.msk [vmem:[#allocation5 + $0x210] sm:$0xff] %vm563_vm1, %v751_v43  ;;  %10555 = vmatprep.subr.bf16.mxu1 %v10554_v1  ;;  %v1639_v43 = vld [vmem:[%s16178_s1 + $0x198] sm:$0xff]  ;;  %v1376_v49 = vld [vmem:[%s10895_s20 + $0x82] sm:$0xff] }
  0xe3   : > { %1848 = vmatmul.mubr.f32.gmra.mrb[8].mxu0 %v1448_v63  ;;  %1248 = vrot.lane.b32.xlu0 %v11406_v21, %s10806_s25  ;;  %v1632_v21 = vld [vmem:[%s16178_s1 + $0x160] sm:$0xff]  ;;  %1408 = vst.msk [vmem:[#allocation5 + $0x200] sm:$0xff] %vm370_vm0, %v1376_v49  ;;  %v1122_v56 = vld [vmem:[%s10895_s20 + $0x90] sm:$0xff]  ;;  %v1651_v57 = vld [vmem:[%s16178_s1 + $0x1f8] sm:$0xff] }
  0xe4   : > { %1852 = vmatprep.mubr.f32.mxu0 %v1454_v30  ;;  %10512 = vmatpush1.bf16.msra.mxu0 %v10511_v18  ;;  %v10517_v55 = vpack.c.bf16 %v1633_v45, %v1632_v21  ;;  %v1375_v63 = vld [vmem:[%s10895_s20 + $0x7a] sm:$0xff]  ;;  %v1641_v30 = vld [vmem:[%s16178_s1 + $0x1a8] sm:$0xff]  ;;  %1154 = vst.msk [vmem:[#allocation5 + $0x248] sm:$0xff] %vm370_vm0, %v1122_v56 }
  0xe5   : > { %v753_v39 = vpop.permute.xlu0 %752  ;;  %v755_v42 = vpop.permute.xlu1 %754  ;;  %1250 = vrot.lane.b32.xlu1 %v11415_v22, %s10806_s25  ;;  %10513 = vmatprep.subr.bf16.mxu0 %v16207_v13  ;;  %v1370_v22 = vld [vmem:[%s10895_s20 + $0x52] sm:$0xff]  ;;  %1407 = vst.msk [vmem:[#allocation5 + $0x1d8] sm:$0xff] %vm370_vm0, %v1375_v63  ;;  %v1380_v63 = vld [vmem:[%s10895_s20 + $0xa2] sm:$0xff] }
  0xe6   : > { %834 = vst.msk [vmem:[#allocation5 + $0x238] sm:$0xff] %vm563_vm1, %v753_v39  ;;  %835 = vst.msk [vmem:[#allocation5 + $0x260] sm:$0xff] %vm563_vm1, %v755_v42  ;;  %10557 = vmatpush3.bf16.msra.mxu1 %v10554_v1  ;;  %v1120_v39 = vld [vmem:[%s10895_s20 + $0x80] sm:$0xff]  ;;  %v1643_v45 = vld [vmem:[%s16178_s1 + $0x1b8] sm:$0xff] }
  0xe7   : > { %1853 = vmatmul.mubr.f32.gmra.mrb[10].mxu0 %v1453_v40  ;;  %1252 = vrot.lane.b32.xlu0 %v11424_v23, %s10806_s25  ;;  %1402 = vst.msk [vmem:[#allocation5 + $0x110] sm:$0xff] %vm370_vm0, %v1370_v22  ;;  %v1634_v23 = vld [vmem:[%s16178_s1 + $0x170] sm:$0xff]  ;;  %1152 = vst.msk [vmem:[#allocation5 + $0x1f8] sm:$0xff] %vm370_vm0, %v1120_v39  ;;  %v1484_v22 = vld [vmem:[#allocation5 + $0x1c0] sm:$0xff] }
  0xe8   : > { %1857 = vmatprep.mubr.f32.mxu0 %v1459_v51  ;;  %10515 = vmatpush1.bf16.msra.mxu0 %v10514_v37  ;;  %v10520_v0 = vpack.c.bf16 %v1635_v62, %v1634_v23  ;;  %v1442_v37 = vld [vmem:[#allocation5 + $0x70] sm:$0xff]  ;;  %v1483_v23 = vld [vmem:[#allocation5 + $0x1b8] sm:$0xff]  ;;  %1412 = vst.msk [vmem:[#allocation5 + $0x2a0] sm:$0xff] %vm370_vm0, %v1380_v63  ;;  %v1127_v49 = vld [vmem:[%s10895_s20 + $0xb8] sm:$0xff] }
  0xe9   : > { %v757_v59 = vpop.permute.xlu0 %756  ;;  %v759_v12 = vpop.permute.xlu1 %758  ;;  %1254 = vrot.lane.b32.xlu1 %v11433_v24, %s10806_s25  ;;  %10516 = vmatprep.subr.bf16.mxu0 %v16207_v13  ;;  %v1373_v24 = vld [vmem:[%s10895_s20 + $0x6a] sm:$0xff]  ;;  %v1489_v62 = vld [vmem:[#allocation5 + $0x1e8] sm:$0xff]  ;;  %1159 = vst.msk [vmem:[#allocation5 + $0x310] sm:$0xff] %vm370_vm0, %v1127_v49  ;;  %v1131_v63 = vld [vmem:[%s10895_s20 + $0xd8] sm:$0xff] }
  0xea   : > { %836 = vst.msk [vmem:[#allocation5 + $0x288] sm:$0xff] %vm563_vm1, %v757_v59  ;;  %837 = vst.msk [vmem:[#allocation5 + $0x2b0] sm:$0xff] %vm563_vm1, %v759_v12  ;;  %10559 = vmatprep.subr.bf16.mxu1 %v10558_v61  ;;  %v1121_v51 = vld [vmem:[%s10895_s20 + $0x88] sm:$0xff]  ;;  %v1126_v39 = vld [vmem:[%s10895_s20 + $0xb0] sm:$0xff] }
  0xeb   : > { %1858 = vmatmul.mubr.f32.gmra.mrb[12].mxu0 %v1458_v60  ;;  %1256 = vrot.lane.b32.xlu0 %v11442_v25, %s10806_s25  ;;  %1405 = vst.msk [vmem:[#allocation5 + $0x188] sm:$0xff] %vm370_vm0, %v1373_v24  ;;  %v1636_v25 = vld [vmem:[%s16178_s1 + $0x180] sm:$0xff]  ;;  %1153 = vst.msk [vmem:[#allocation5 + $0x220] sm:$0xff] %vm370_vm0, %v1121_v51  ;;  %v1645_v12 = vld [vmem:[%s16178_s1 + $0x1c8] sm:$0xff] }
  0xec   : > { %1862 = vmatprep.mubr.f32.mxu0 %v1464_v47  ;;  %10518 = vmatpush1.bf16.msra.mxu0 %v10517_v55  ;;  %v10523_v17 = vpack.c.bf16 %v1637_v7, %v1636_v25  ;;  %v1647_v47 = vld [vmem:[%s16178_s1 + $0x1d8] sm:$0xff]  ;;  %1158 = vst.msk [vmem:[#allocation5 + $0x2e8] sm:$0xff] %vm370_vm0, %v1126_v39  ;;  %1163 = vst.msk [vmem:[#allocation5 + $0x3b0] sm:$0xff] %vm370_vm0, %v1131_v63  ;;  %v1538_v39 = vld [vmem:[#allocation5 + $0x370] sm:$0xff] }
  0xed   : > { %v761_v2 = vpop.permute.xlu0 %760  ;;  %v763_v6 = vpop.permute.xlu1 %762  ;;  %1258 = vrot.lane.b32.xlu1 %v11451_v26, %s10806_s25  ;;  %10519 = vmatprep.subr.bf16.mxu0 %v16207_v13  ;;  %v1118_v26 = vld [vmem:[%s10895_s20 + $0x70] sm:$0xff]  ;;  %v1379_v25 = vld [vmem:[%s10895_s20 + $0x9a] sm:$0xff] }
  0xee   : > { %838 = vst.msk [vmem:[#allocation5 + $0x2d8] sm:$0xff] %vm563_vm1, %v761_v2  ;;  %839 = vst.msk [vmem:[#allocation5 + $0x300] sm:$0xff] %vm563_vm1, %v763_v6  ;;  %10561 = vmatpush3.bf16.msra.mxu1 %v10558_v61  ;;  %v1378_v2 = vld [vmem:[%s10895_s20 + $0x92] sm:$0xff]  ;;  %v1383_v51 = vld [vmem:[%s10895_s20 + $0xba] sm:$0xff] }
  0xef   : > { %1863 = vmatmul.mubr.f32.gmra.mrb[14].mxu0 %v1463_v8  ;;  %1260 = vrot.lane.b32.xlu0 %v11460_v27, %s10806_s25  ;;  %1150 = vst.msk [vmem:[#allocation5 + $0x1a8] sm:$0xff] %vm370_vm0, %v1118_v26  ;;  %v1638_v27 = vld [vmem:[%s16178_s1 + $0x190] sm:$0xff]  ;;  %v1123_v6 = vld [vmem:[%s10895_s20 + $0x98] sm:$0xff]  ;;  %1410 = vst.msk [vmem:[#allocation5 + $0x250] sm:$0xff] %vm370_vm0, %v1378_v2 }
  0xf0   : > { %1867 = vmatprep.mubr.f32.mxu0 %v1469_v11  ;;  %10521 = vmatpush1.bf16.msra.mxu0 %v10520_v0  ;;  %v10526_v1 = vpack.c.bf16 %v1639_v43, %v1638_v27  ;;  %v1494_v0 = vld [vmem:[#allocation5 + $0x210] sm:$0xff]  ;;  %1155 = vst.msk [vmem:[#allocation5 + $0x270] sm:$0xff] %vm370_vm0, %v1123_v6  ;;  %1411 = vst.msk [vmem:[#allocation5 + $0x278] sm:$0xff] %vm370_vm0, %v1379_v25  ;;  %v16196_v43 = vmov 0.0   ;;  %v1504_v58 = vld [vmem:[#allocation5 + $0x260] sm:$0xff] }
  0xf1   : > { %v765_v18 = vpop.permute.xlu0 %764  ;;  %v767_v31 = vpop.permute.xlu1 %766  ;;  %1262 = vrot.lane.b32.xlu1 %v11473_v33, %s10806_s25  ;;  %10522 = vmatprep.subr.bf16.mxu0 %v16207_v13  ;;  %v1437_v33 = vld [vmem:[#allocation5 + $0x48] sm:$0xff]  ;;  %v1649_v26 = vld [vmem:[%s16178_s1 + $0x1e8] sm:$0xff]  ;;  %2760 = vst.msk [vmem:[#allocation2] sm:$0xff] %vm2759_vm2, %v16196_v43  ;;  %2761 = vst.msk [vmem:[#allocation2 + $0x8] sm:$0xff] %vm2759_vm2, %v16196_v43 }
  0xf2   : > { %840 = vst.msk [vmem:[#allocation5 + $0x328] sm:$0xff] %vm563_vm1, %v765_v18  ;;  %841 = vst.msk [vmem:[#allocation5 + $0x350] sm:$0xff] %vm563_vm1, %v767_v31  ;;  %10347 = vmatmul.mubr.msk.f32.vlgmr.msra.gmra.mrb[0].mxu1 %vm370_vm0, %v1437_v33  ;;  %10562 = vmatprep.subr.bf16.mxu1 %v16207_v13  ;;  %v1499_v18 = vld [vmem:[#allocation5 + $0x238] sm:$0xff]  ;;  %v1124_v31 = vld [vmem:[%s10895_s20 + $0xa0] sm:$0xff] }
  0xf3   : > { %1868 = vmatmul.mubr.f32.gmra.mrb[16].mxu0 %v1468_v50  ;;  %1264 = vrot.lane.b32.xlu0 %v11488_v38, %s10806_s25  ;;  %v1640_v38 = vld [vmem:[%s16178_s1 + $0x1a0] sm:$0xff]  ;;  %1156 = vst.msk [vmem:[#allocation5 + $0x298] sm:$0xff] %vm370_vm0, %v1124_v31  ;;  %v1498_v33 = vld [vmem:[#allocation5 + $0x230] sm:$0xff]  ;;  %1415 = vst.msk [vmem:[#allocation5 + $0x318] sm:$0xff] %vm370_vm0, %v1383_v51 }
  0xf4   : > { %1872 = vmatprep.mubr.f32.mxu0 %v1474_v54  ;;  %10524 = vmatpush1.bf16.msra.mxu0 %v10523_v17  ;;  %v10529_v40 = vpack.c.bf16 %v1641_v30, %v1640_v38  ;;  %v1493_v17 = vld [vmem:[#allocation5 + $0x208] sm:$0xff]  ;;  %2762 = vst.msk [vmem:[#allocation2 + $0x10] sm:$0xff] %vm2759_vm2, %v16196_v43  ;;  %2763 = vst.msk [vmem:[#allocation2 + $0x18] sm:$0xff] %vm2759_vm2, %v16196_v43  ;;  %v1650_v54 = vld [vmem:[%s16178_s1 + $0x1f0] sm:$0xff] }
  0xf5   : > { %v769_v15 = vpop.permute.xlu0 %768  ;;  %v771_v35 = vpop.permute.xlu1 %770  ;;  %1266 = vrot.lane.b32.xlu1 %v11505_v48, %s10806_s25  ;;  %10525 = vmatprep.subr.bf16.mxu0 %v16207_v13  ;;  %v1479_v48 = vld [vmem:[#allocation5 + $0x198] sm:$0xff]  ;;  %2764 = vst.msk [vmem:[#allocation2 + $0x20] sm:$0xff] %vm2759_vm2, %v16196_v43  ;;  %2765 = vst.msk [vmem:[#allocation2 + $0x28] sm:$0xff] %vm2759_vm2, %v16196_v43 }
  0xf6   : > { %842 = vst.msk [vmem:[#allocation5 + $0x378] sm:$0xff] %vm563_vm1, %v769_v15  ;;  %843 = vst.msk [vmem:[#allocation5 + $0x3a0] sm:$0xff] %vm563_vm1, %v771_v35  ;;  %10349 = vmatprep.mubr.msk.f32.mxu1 %vm370_vm0, %v1442_v37  ;;  %v1381_v15 = vld [vmem:[%s10895_s20 + $0xaa] sm:$0xff]  ;;  %v10544_v35 = vpack.c.bf16 %v1651_v57, %v1650_v54  ;;  %v1477_v37 = vld [vmem:[#allocation5 + $0x188] sm:$0xff] }
  0xf7   : > { %1873 = vmatmul.mubr.f32.gmra.mrb[18].mxu0 %v1473_v36  ;;  %1268 = vrot.lane.b32.xlu0 %v11518_v14, %s10806_s25  ;;  %v1642_v14 = vld [vmem:[%s16178_s1 + $0x1b0] sm:$0xff]  ;;  %2766 = vst.msk [vmem:[#allocation2 + $0x30] sm:$0xff] %vm2759_vm2, %v16196_v43  ;;  %2767 = vst.msk [vmem:[#allocation2 + $0x38] sm:$0xff] %vm2759_vm2, %v16196_v43  ;;  %v1472_v36 = vld [vmem:[#allocation5 + $0x160] sm:$0xff] }
  0xf8   : > { %1877 = vmatprep.mubr.f32.mxu0 %v1479_v48  ;;  %10527 = vmatpush1.bf16.msra.mxu0 %v10526_v1  ;;  %v10532_v53 = vpack.c.bf16 %v1643_v45, %v1642_v14  ;;  %2788 = vst.msk [vmem:[#allocation2 + $0xe0] sm:$0xff] %vm2759_vm2, %v16196_v43  ;;  %2789 = vst.msk [vmem:[#allocation2 + $0xe8] sm:$0xff] %vm2759_vm2, %v16196_v43  ;;  %v1125_v1 = vld [vmem:[%s10895_s20 + $0xa8] sm:$0xff]  ;;  %v1509_v48 = vld [vmem:[#allocation5 + $0x288] sm:$0xff] }
  0xf9   : > { %v773_v42 = vpop.permute.xlu0 %772  ;;  %v775_v21 = vpop.permute.xlu1 %774  ;;  %1270 = vrot.lane.b32.xlu1 %v11531_v5, %s10806_s25  ;;  %10528 = vmatprep.subr.bf16.mxu0 %v16207_v13  ;;  %v1447_v5 = vld [vmem:[#allocation5 + $0x98] sm:$0xff]  ;;  %2790 = vst.msk [vmem:[#allocation2 + $0xf0] sm:$0xff] %vm2759_vm2, %v16196_v43  ;;  %2791 = vst.msk [vmem:[#allocation2 + $0xf8] sm:$0xff] %vm2759_vm2, %v16196_v43  ;;  %v1482_v14 = vld [vmem:[#allocation5 + $0x1b0] sm:$0xff] }
  0xfa   : > { %844 = vst.msk [vmem:[#allocation5 + $0x3c8] sm:$0xff] %vm563_vm1, %v773_v42  ;;  %845 = vst.msk [vmem:[#allocation5 + $0x3f0] sm:$0xff] %vm563_vm1, %v775_v21  ;;  %10350 = vmatmul.mubr.msk.f32.gmra.mrb[2].mxu1 %vm370_vm0, %v1447_v5  ;;  %v1508_v42 = vld [vmem:[#allocation5 + $0x280] sm:$0xff]  ;;  %v1385_v2 = vld [vmem:[%s10895_s20 + $0xca] sm:$0xff] }
  0xfb   : > { %1878 = vmatmul.mubr.f32.gmra.mrb[20].mxu0 %v1478_v46  ;;  %1272 = vrot.lane.b32.xlu0 %v11542_v9, %s10806_s25  ;;  %v1644_v9 = vld [vmem:[%s16178_s1 + $0x1c0] sm:$0xff]  ;;  %1157 = vst.msk [vmem:[#allocation5 + $0x2c0] sm:$0xff] %vm370_vm0, %v1125_v1  ;;  %1413 = vst.msk [vmem:[#allocation5 + $0x2c8] sm:$0xff] %vm370_vm0, %v1381_v15  ;;  %v1382_v46 = vld [vmem:[%s10895_s20 + $0xb2] sm:$0xff] }
  0xfc   : > { %1882 = vmatprep.mubr.f32.mxu0 %v1484_v22  ;;  %10530 = vmatpush1.bf16.msra.mxu0 %v10529_v40  ;;  %v10535_v60 = vpack.c.bf16 %v1645_v12, %v1644_v9  ;;  %v1203_v45 = vld [vmem:[%s10895_s20 + $0x119] sm:$0xff]  ;;  %v1487_v22 = vld [vmem:[#allocation5 + $0x1d8] sm:$0xff]  ;;  %1414 = vst.msk [vmem:[#allocation5 + $0x2f0] sm:$0xff] %vm370_vm0, %v1382_v46  ;;  %1417 = vst.msk [vmem:[#allocation5 + $0x368] sm:$0xff] %vm370_vm0, %v1385_v2 }
  0xfd   : > { %v777_v55 = vpop.permute.xlu0 %776  ;;  %v779_v59 = vpop.permute.xlu1 %778  ;;  %1274 = vrot.lane.b32.xlu1 %v11553_v10, %s10806_s25  ;;  %10531 = vmatprep.subr.bf16.mxu0 %v16207_v13  ;;  %v1452_v10 = vld [vmem:[#allocation5 + $0xc0] sm:$0xff]  ;;  %v1519_v9 = vld [vmem:[#allocation5 + $0x2d8] sm:$0xff]  ;;  %v1497_v12 = vld [vmem:[#allocation5 + $0x228] sm:$0xff] }
  0xfe   : > { %846 = vst.msk [vmem:[#allocation5 + $0x418] sm:$0xff] %vm563_vm1, %v777_v55  ;;  %847 = vst.msk [vmem:[#allocation5 + $0x440] sm:$0xff] %vm563_vm1, %v779_v59  ;;  %10352 = vmatprep.mubr.msk.f32.mxu1 %vm370_vm0, %v1452_v10  ;;  %v1492_v5 = vld [vmem:[#allocation5 + $0x200] sm:$0xff]  ;;  %v2856_v55 = vld [vmem:[#allocation2 + $0x1] sm:$0xff] }
  0xff   : > { %1883 = vmatmul.mubr.f32.gmra.mrb[22].mxu0 %v1483_v23  ;;  %1276 = vrot.lane.b32.xlu0 %v11564_v16, %s10806_s25  ;;  %v1646_v16 = vld [vmem:[%s16178_s1 + $0x1d0] sm:$0xff]  ;;  %v1513_v59 = vld [vmem:[#allocation5 + $0x2a8] sm:$0xff]  ;;  %v1502_v10 = vld [vmem:[#allocation5 + $0x250] sm:$0xff] }
 0x100   : > { %1887 = vmatprep.mubr.f32.mxu0 %v1489_v62  ;;  %10533 = vmatpush1.bf16.msra.mxu0 %v10532_v53  ;;  %v10538_v7 = vpack.c.bf16 %v1647_v47, %v1646_v16  ;;  %v12036_v23 = vld [vmem:[#allocation2 + $0x21] sm:$0xff]  ;;  %v1507_v16 = vld [vmem:[#allocation5 + $0x278] sm:$0xff]  ;;  %v2859_v57 = vld [vmem:[#allocation2 + $0x19] sm:$0xff] }
 0x101   : > { %v781_v61 = vpop.permute.xlu0 %780  ;;  %v783_v24 = vpop.permute.xlu1 %782  ;;  %1278 = vrot.lane.b32.xlu1 %v11575_v19, %s10806_s25  ;;  %10534 = vmatprep.subr.bf16.mxu0 %v16207_v13  ;;  %v1457_v19 = vld [vmem:[#allocation5 + $0xe8] sm:$0xff]  ;;  %3469 = vst.msk [vmem:[#allocation6 + $0x38] sm:$0xff] %vm2759_vm2, %v12036_v23  ;;  %v1527_v54 = vld [vmem:[#allocation5 + $0x318] sm:$0xff]  ;;  %3468 = vst.msk [vmem:[#allocation6 + $0x20] sm:$0xff] %vm2759_vm2, %v2859_v57 }
 0x102   : > { %848 = vst.msk [vmem:[#allocation5 + $0x468] sm:$0xff] %vm563_vm1, %v781_v61  ;;  %849 = vst.msk [vmem:[#allocation5 + $0x490] sm:$0xff] %vm563_vm1, %v783_v24  ;;  %10353 = vmatmul.mubr.msk.f32.gmra.mrb[4].mxu1 %vm370_vm0, %v1457_v19  ;;  %v1128_v62 = vld [vmem:[%s10895_s20 + $0xc0] sm:$0xff]  ;;  %v1524_v24 = vld [vmem:[#allocation5 + $0x300] sm:$0xff] }
 0x103   : > { %1888 = vmatmul.mubr.f32.gmra.mrb[24].mxu0 %v1488_v44  ;;  %1280 = vrot.lane.b32.xlu0 %v11586_v4, %s10806_s25  ;;  %v1648_v4 = vld [vmem:[%s16178_s1 + $0x1e0] sm:$0xff]  ;;  %1160 = vst.msk [vmem:[#allocation5 + $0x338] sm:$0xff] %vm370_vm0, %v1128_v62  ;;  %v12048_v44 = vld [vmem:[#allocation2 + $0x31] sm:$0xff] }
 0x104   : > { %1892 = vmatprep.mubr.f32.mxu0 %v1494_v0  ;;  %10536 = vmatpush1.bf16.msra.mxu0 %v10535_v60  ;;  %v10541_v27 = vpack.c.bf16 %v1649_v26, %v1648_v4  ;;  %v1518_v60 = vld [vmem:[#allocation5 + $0x2d0] sm:$0xff]  ;;  %v1512_v19 = vld [vmem:[#allocation5 + $0x2a0] sm:$0xff]  ;;  %3471 = vst.msk [vmem:[#allocation6 + $0x68] sm:$0xff] %vm2759_vm2, %v12048_v44  ;;  %v1543_v49 = vld [vmem:[#allocation5 + $0x398] sm:$0xff] }
 0x105   : > { %v785_v8 = vpop.permute.xlu0 %784  ;;  %v787_v11 = vpop.permute.xlu1 %786  ;;  %1282 = vrot.lane.b32.xlu1 %v11597_v20, %s10806_s25  ;;  %10537 = vmatprep.subr.bf16.mxu0 %v16207_v13  ;;  %v1462_v20 = vld [vmem:[#allocation5 + $0x110] sm:$0xff]  ;;  %v2887_v51 = vld [vmem:[#allocation2 + $0xf9] sm:$0xff]  ;;  %v1138_v63 = vld [vmem:[%s10895_s20 + $0x110] sm:$0xff] }
 0x106   : > { %850 = vst.msk [vmem:[#allocation5 + $0x4b8] sm:$0xff] %vm563_vm1, %v785_v8  ;;  %851 = vst.msk [vmem:[#allocation5 + $0x4e0] sm:$0xff] %vm563_vm1, %v787_v11  ;;  %10355 = vmatprep.mubr.msk.f32.mxu1 %vm370_vm0, %v1462_v20  ;;  %v1384_v47 = vld [vmem:[%s10895_s20 + $0xc2] sm:$0xff]  ;;  %v1390_v62 = vld [vmem:[%s10895_s20 + $0xf2] sm:$0xff] }
 0x107   : > { %1893 = vmatmul.mubr.f32.gmra.mrb[26].mxu0 %v1493_v17  ;;  %1284 = vrot.lane.b32.xlu0 %v11608_v28, %s10806_s25  ;;  %v1129_v0 = vld [vmem:[%s10895_s20 + $0xc8] sm:$0xff]  ;;  %1416 = vst.msk [vmem:[#allocation5 + $0x340] sm:$0xff] %vm370_vm0, %v1384_v47  ;;  %v1529_v8 = vld [vmem:[#allocation5 + $0x328] sm:$0xff]  ;;  %v1130_v17 = vld [vmem:[%s10895_s20 + $0xd0] sm:$0xff] }
 0x108   : > { %1897 = vmatprep.mubr.f32.mxu0 %v1499_v18  ;;  %10539 = vmatpush1.bf16.msra.mxu0 %v10538_v7  ;;  %1161 = vst.msk [vmem:[#allocation5 + $0x360] sm:$0xff] %vm370_vm0, %v1129_v0  ;;  %v1523_v7 = vld [vmem:[#allocation5 + $0x2f8] sm:$0xff]  ;;  %v1517_v11 = vld [vmem:[#allocation5 + $0x2c8] sm:$0xff]  ;;  %v1522_v18 = vld [vmem:[#allocation5 + $0x2f0] sm:$0xff] }
 0x109   : > { %v981_v28 = vpop.permute.xlu0 %980  ;;  %v983_v50 = vpop.permute.xlu1 %982  ;;  %1286 = vrot.lane.b32.xlu1 %v11619_v29, %s10806_s25  ;;  %10540 = vmatprep.subr.bf16.mxu0 %v16207_v13  ;;  %v1467_v29 = vld [vmem:[#allocation5 + $0x138] sm:$0xff]  ;;  %v2884_v26 = vld [vmem:[#allocation2 + $0xe1] sm:$0xff]  ;;  %1162 = vst.msk [vmem:[#allocation5 + $0x388] sm:$0xff] %vm370_vm0, %v1130_v17  ;;  %1422 = vst.msk [vmem:[#allocation5 + $0x430] sm:$0xff] %vm370_vm0, %v1390_v62 }
 0x10a   : > { %1076 = vst.msk [vmem:[#allocation5 + $0x10] sm:$0xff] %vm563_vm1, %v981_v28  ;;  %1077 = vst.msk [vmem:[#allocation5 + $0x38] sm:$0xff] %vm563_vm1, %v983_v50  ;;  %10356 = vmatmul.mubr.msk.f32.gmra.mrb[6].mxu1 %vm370_vm0, %v1467_v29  ;;  %v2857_v4 = vld [vmem:[#allocation2 + $0x9] sm:$0xff]  ;;  %v1386_v50 = vld [vmem:[%s10895_s20 + $0xd2] sm:$0xff] }
 0x10b   : > { %1898 = vmatmul.mubr.f32.gmra.mrb[28].mxu0 %v1498_v33  ;;  %1288 = vrot.lane.b32.xlu0 %v11630_v32, %s10806_s25  ;;  %v1503_v32 = vld [vmem:[#allocation5 + $0x258] sm:$0xff]  ;;  %3493 = vst.msk [vmem:[#allocation6 + $0x278] sm:$0xff] %vm2759_vm2, %v2884_v26  ;;  %v1534_v28 = vld [vmem:[#allocation5 + $0x350] sm:$0xff]  ;;  %v1387_v29 = vld [vmem:[%s10895_s20 + $0xda] sm:$0xff] }
 0x10c   : > { %1902 = vmatprep.mubr.f32.mxu0 %v1504_v58  ;;  %10542 = vmatpush1.bf16.msra.mxu0 %v10541_v27  ;;  %v1528_v27 = vld [vmem:[#allocation5 + $0x320] sm:$0xff]  ;;  %1418 = vst.msk [vmem:[#allocation5 + $0x390] sm:$0xff] %vm370_vm0, %v1386_v50  ;;  %1419 = vst.msk [vmem:[#allocation5 + $0x3b8] sm:$0xff] %vm370_vm0, %v1387_v29  ;;  %v12129_v0 = vld [vmem:[#allocation2 + $0x22] sm:$0xff] }
 0x10d   : > { %v985_v38 = vpop.permute.xlu0 %984  ;;  %v987_v30 = vpop.permute.xlu1 %986  ;;  %1290 = vrot.lane.b32.xlu1 %v11641_v34, %s10806_s25  ;;  %10543 = vmatprep.subr.bf16.mxu0 %v16207_v13  ;;  %v1202_v34 = vld [vmem:[%s10895_s20 + $0x111] sm:$0xff]  ;;  %3496 = vst.msk [vmem:[#allocation6 + $0x2c0] sm:$0xff] %vm2759_vm2, %v2887_v51  ;;  %v1553_v2 = vld [vmem:[#allocation5 + $0x3e8] sm:$0xff] }
 0x10e   : > { %1078 = vst.msk [vmem:[#allocation5 + $0x60] sm:$0xff] %vm563_vm1, %v985_v38  ;;  %1079 = vst.msk [vmem:[#allocation5 + $0x88] sm:$0xff] %vm563_vm1, %v987_v30  ;;  %10358 = vmatprep.mubr.msk.f32.mxu1 %vm370_vm0, %v1472_v36  ;;  %v2886_v33 = vld [vmem:[#allocation2 + $0xf1] sm:$0xff]  ;;  %v1537_v30 = vld [vmem:[#allocation5 + $0x368] sm:$0xff] }
 0x10f   : > { %1903 = vmatmul.mubr.f32.gmra.mrb[30].mxu0 %v1503_v32  ;;  %1292 = vrot.lane.b32.xlu0 %v11650_v3, %s10806_s25  ;;  %v1514_v3 = vld [vmem:[#allocation5 + $0x2b0] sm:$0xff]  ;;  %v1532_v58 = vld [vmem:[#allocation5 + $0x340] sm:$0xff]  ;;  %3495 = vst.msk [vmem:[#allocation6 + $0x2a8] sm:$0xff] %vm2759_vm2, %v2886_v33  ;;  %v1539_v38 = vld [vmem:[#allocation5 + $0x378] sm:$0xff] }
 0x110   : > { %1907 = vmatprep.mubr.f32.mxu0 %v1509_v48  ;;  %10545 = vmatpush1.bf16.msra.mxu0 %v10544_v35  ;;  %v1533_v35 = vld [vmem:[#allocation5 + $0x348] sm:$0xff]  ;;  %v12087_v32 = vld [vmem:[#allocation2 + $0x29] sm:$0xff]  ;;  %v1564_v17 = vld [vmem:[#allocation5 + $0x440] sm:$0xff]  ;;  %1170 = vst.msk [vmem:[#allocation5 + $0x4c8] sm:$0xff] %vm370_vm0, %v1138_v63 }
 0x111   : > { %v989_v40 = vpop.permute.xlu0 %988  ;;  %v991_v21 = vpop.permute.xlu1 %990  ;;  %1294 = vrot.lane.b32.xlu1 %v11661_v41, %s10806_s25  ;;  %10359 = vmatmul.mubr.msk.f32.gmra.mrb[8].mxu1 %vm370_vm0, %v1477_v37  ;;  %v2858_v41 = vld [vmem:[#allocation2 + $0x11] sm:$0xff]  ;;  %v1132_v36 = vld [vmem:[%s10895_s20 + $0xe0] sm:$0xff]  ;;  %3470 = vst.msk [vmem:[#allocation6 + $0x50] sm:$0xff] %vm2759_vm2, %v12087_v32 }
 0x112   : > { %1080 = vst.msk [vmem:[#allocation5 + $0xb0] sm:$0xff] %vm563_vm1, %v989_v40  ;;  %1081 = vst.msk [vmem:[#allocation5 + $0xd8] sm:$0xff] %vm563_vm1, %v991_v21  ;;  %10645 = vmatprep.subr.bf16.mxu0 %v16207_v13  ;;  %10361 = vmatprep.mubr.msk.f32.mxu1 %vm370_vm0, %v1482_v14  ;;  %v1388_v40 = vld [vmem:[%s10895_s20 + $0xe2] sm:$0xff] }
 0x113   : > { %1908 = vmatmul.mubr.f32.gmra.mrb[32].mxu0 %v1508_v42  ;;  %1296 = vrot.lane.b32.xlu0 %v1202_v34, %s10806_s25  ;;  %3467 = vst.msk [vmem:[#allocation6 + $0x8] sm:$0xff] %vm2759_vm2, %v2858_v41  ;;  %v1542_v34 = vld [vmem:[#allocation5 + $0x390] sm:$0xff]  ;;  %v1544_v42 = vld [vmem:[#allocation5 + $0x3a0] sm:$0xff] }
 0x114   : > { %1912 = vmatprep.mubr.f32.mxu0 %v1514_v3  ;;  %1164 = vst.msk [vmem:[#allocation5 + $0x3d8] sm:$0xff] %vm370_vm0, %v1132_v36  ;;  %v2885_v21 = vld [vmem:[#allocation2 + $0xe9] sm:$0xff]  ;;  %1420 = vst.msk [vmem:[#allocation5 + $0x3e0] sm:$0xff] %vm370_vm0, %v1388_v40  ;;  %v12177_v36 = vld [vmem:[#allocation2 + $0x20] sm:$0xff] }
 0x115   : > { %v993_v52 = vpop.permute.xlu0 %992  ;;  %v995_v53 = vpop.permute.xlu1 %994  ;;  %1298 = vrot.lane.b32.xlu1 %v1203_v45, %s10806_s25  ;;  %10362 = vmatmul.mubr.msk.f32.gmra.mrb[10].mxu1 %vm370_vm0, %v1487_v22  ;;  %v1133_v14 = vld [vmem:[%s10895_s20 + $0xe8] sm:$0xff]  ;;  %v1547_v3 = vld [vmem:[#allocation5 + $0x3b8] sm:$0xff]  ;;  %3494 = vst.msk [vmem:[#allocation6 + $0x290] sm:$0xff] %vm2759_vm2, %v2885_v21  ;;  %2828 = vst.msk [vmem:[#allocation6 + $0x60] sm:$0xff] %vm2759_vm2, %v12177_v36 }
 0x116   : > { %1082 = vst.msk [vmem:[#allocation5 + $0x100] sm:$0xff] %vm563_vm1, %v993_v52  ;;  %1083 = vst.msk [vmem:[#allocation5 + $0x128] sm:$0xff] %vm563_vm1, %v995_v53  ;;  %10364 = vmatprep.mubr.msk.f32.mxu1 %vm370_vm0, %v1492_v5  ;;  %v1389_v45 = vld [vmem:[%s10895_s20 + $0xea] sm:$0xff]  ;;  %v1549_v5 = vld [vmem:[#allocation5 + $0x3c8] sm:$0xff] }
 0x117   : > { %1913 = vmatmul.mubr.f32.gmra.mrb[34].mxu0 %v1513_v59  ;;  %2920 = vrot.lane.b32.xlu0 %v2856_v55, %s10808_s16  ;;  %1165 = vst.msk [vmem:[#allocation5 + $0x400] sm:$0xff] %vm370_vm0, %v1133_v14  ;;  %1421 = vst.msk [vmem:[#allocation5 + $0x408] sm:$0xff] %vm370_vm0, %v1389_v45  ;;  %v1134_v52 = vld [vmem:[%s10895_s20 + $0xf0] sm:$0xff]  ;;  %v12155_v50 = vld [vmem:[#allocation2 + $0xe2] sm:$0xff] }
 0x118   : > { %1917 = vmatprep.mubr.f32.mxu0 %v1519_v9  ;;  %1166 = vst.msk [vmem:[#allocation5 + $0x428] sm:$0xff] %vm370_vm0, %v1134_v52  ;;  %v12116_v59 = vld [vmem:[#allocation2 + $0x12] sm:$0xff] }
 0x119   : > { %v997_v56 = vpop.permute.xlu0 %996  ;;  %v999_v61 = vpop.permute.xlu1 %998  ;;  %10365 = vmatmul.mubr.msk.f32.gmra.mrb[12].mxu1 %vm370_vm0, %v1497_v12  ;;  %2922 = vrot.lane.b32.xlu1 %v2857_v4, %s10808_s16  ;;  %v1548_v9 = vld [vmem:[#allocation5 + $0x3c0] sm:$0xff]  ;;  %v1558_v4 = vld [vmem:[#allocation5 + $0x410] sm:$0xff] }
 0x11a   : > { %1084 = vst.msk [vmem:[#allocation5 + $0x150] sm:$0xff] %vm563_vm1, %v997_v56  ;;  %1085 = vst.msk [vmem:[#allocation5 + $0x178] sm:$0xff] %vm563_vm1, %v999_v61  ;;  %10367 = vmatprep.mubr.msk.f32.mxu1 %vm370_vm0, %v1502_v10  ;;  %v1554_v10 = vld [vmem:[#allocation5 + $0x3f0] sm:$0xff]  ;;  %v1584_v45 = vld [vmem:[#allocation5 + $0x4e0] sm:$0xff] }
 0x11b   : > { %1918 = vmatmul.mubr.f32.gmra.mrb[36].mxu0 %v1518_v60  ;;  %2924 = vrot.lane.b32.xlu0 %v2858_v41, %s10808_s16  ;;  %v3049_v41 = vld [vmem:[#allocation2 + $0x2] sm:$0xff]  ;;  %v1552_v12 = vld [vmem:[#allocation5 + $0x3e0] sm:$0xff]  ;;  %v3050_v56 = vld [vmem:[#allocation2 + $0xa] sm:$0xff] }
 0x11c   : > { %1922 = vmatprep.mubr.f32.mxu0 %v1524_v24  ;;  %v1135_v60 = vld [vmem:[%s10895_s20 + $0xf8] sm:$0xff] }
 0x11d   : > { %v1001_v6 = vpop.permute.xlu0 %1000  ;;  %v1003_v25 = vpop.permute.xlu1 %1002  ;;  %10368 = vmatmul.mubr.msk.f32.gmra.mrb[14].mxu1 %vm370_vm0, %v1507_v16  ;;  %2926 = vrot.lane.b32.xlu1 %v2859_v57, %s10808_s16  ;;  %1167 = vst.msk [vmem:[#allocation5 + $0x450] sm:$0xff] %vm370_vm0, %v1135_v60  ;;  %v1391_v24 = vld [vmem:[%s10895_s20 + $0xfa] sm:$0xff] }
 0x11e   : > { %1086 = vst.msk [vmem:[#allocation5 + $0x1a0] sm:$0xff] %vm563_vm1, %v1001_v6  ;;  %1087 = vst.msk [vmem:[#allocation5 + $0x1c8] sm:$0xff] %vm563_vm1, %v1003_v25  ;;  %10370 = vmatprep.mubr.msk.f32.mxu1 %vm370_vm0, %v1512_v19  ;;  %v1557_v61 = vld [vmem:[#allocation5 + $0x408] sm:$0xff]  ;;  %v1559_v19 = vld [vmem:[#allocation5 + $0x418] sm:$0xff] }
 0x11f   : > { %1923 = vmatmul.mubr.f32.gmra.mrb[38].mxu0 %v1523_v7  ;;  %2928 = vrot.lane.b32.xlu0 %v12036_v23, %s10808_s16  ;;  %1423 = vst.msk [vmem:[#allocation5 + $0x458] sm:$0xff] %vm370_vm0, %v1391_v24  ;;  %v12136_v6 = vld [vmem:[#allocation2 + $0x1a] sm:$0xff]  ;;  %v2793_v24 = vld [vmem:[#allocation2 + $0x8] sm:$0xff] }
 0x120   : > { %1927 = vmatprep.mubr.f32.mxu0 %v1529_v8  ;;  %v1136_v25 = vld [vmem:[%s10895_s20 + $0x100] sm:$0xff]  ;;  %v12211_v52 = vld [vmem:[#allocation2 + $0x38] sm:$0xff]  ;;  %2825 = vst.msk [vmem:[#allocation6 + $0x18] sm:$0xff] %vm2759_vm2, %v2793_v24 }
 0x121   : > { %v1005_v20 = vpop.permute.xlu0 %1004  ;;  %v1007_v31 = vpop.permute.xlu1 %1006  ;;  %10371 = vmatmul.mubr.msk.f32.gmra.mrb[16].mxu1 %vm370_vm0, %v1517_v11  ;;  %2930 = vrot.lane.b32.xlu1 %v12087_v32, %s10808_s16  ;;  %1168 = vst.msk [vmem:[#allocation5 + $0x478] sm:$0xff] %vm370_vm0, %v1136_v25  ;;  %v12142_v11 = vld [vmem:[#allocation2 + $0x32] sm:$0xff]  ;;  %v1569_v57 = vld [vmem:[#allocation5 + $0x468] sm:$0xff] }
 0x122   : > { %1088 = vst.msk [vmem:[#allocation5 + $0x1f0] sm:$0xff] %vm563_vm1, %v1005_v20  ;;  %1089 = vst.msk [vmem:[#allocation5 + $0x218] sm:$0xff] %vm563_vm1, %v1007_v31  ;;  %10373 = vmatprep.mubr.msk.f32.mxu1 %vm370_vm0, %v1522_v18  ;;  %v12149_v18 = vld [vmem:[#allocation2 + $0x2a] sm:$0xff] }
 0x123   : > { %1928 = vmatmul.mubr.f32.gmra.mrb[40].mxu0 %v1528_v27  ;;  %2932 = vrot.lane.b32.xlu0 %v12048_v44, %s10808_s16  ;;  %v1137_v20 = vld [vmem:[%s10895_s20 + $0x108] sm:$0xff] }
 0x124   : > { %1932 = vmatprep.mubr.f32.mxu0 %v1534_v28  ;;  %1169 = vst.msk [vmem:[#allocation5 + $0x4a0] sm:$0xff] %vm370_vm0, %v1137_v20 }
 0x125   : > { %v1009_v1 = vpop.permute.xlu0 %1008  ;;  %v1011_v15 = vpop.permute.xlu1 %1010  ;;  %10374 = vmatmul.mubr.msk.f32.gmra.mrb[18].mxu1 %vm370_vm0, %v1527_v54  ;;  %2978 = vrot.lane.b32.xlu1 %v2885_v21, %s10808_s16  ;;  %v1563_v54 = vld [vmem:[#allocation5 + $0x438] sm:$0xff] }
 0x126   : > { %1090 = vst.msk [vmem:[#allocation5 + $0x240] sm:$0xff] %vm563_vm1, %v1009_v1  ;;  %1091 = vst.msk [vmem:[#allocation5 + $0x268] sm:$0xff] %vm563_vm1, %v1011_v15  ;;  %10376 = vmatprep.mubr.msk.f32.mxu1 %vm370_vm0, %v1532_v58  ;;  %v1567_v31 = vld [vmem:[#allocation5 + $0x458] sm:$0xff] }
 0x127   : > { %1933 = vmatmul.mubr.f32.gmra.mrb[42].mxu0 %v1533_v35  ;;  %2976 = vrot.lane.b32.xlu0 %v2884_v26, %s10808_s16  ;;  %v1562_v26 = vld [vmem:[#allocation5 + $0x430] sm:$0xff]  ;;  %v3242_v58 = vld [vmem:[#allocation2 + $0x10] sm:$0xff]  ;;  %v1568_v35 = vld [vmem:[#allocation5 + $0x460] sm:$0xff] }
 0x128   : > { %1937 = vmatprep.mubr.f32.mxu0 %v1539_v38  ;;  %2826 = vst.msk [vmem:[#allocation6 + $0x30] sm:$0xff] %vm2759_vm2, %v3242_v58  ;;  %v12169_v15 = vld [vmem:[#allocation2 + $0xf2] sm:$0xff]  ;;  %v1574_v38 = vld [vmem:[#allocation5 + $0x490] sm:$0xff] }
 0x129   : > { %v1013_v48 = vpop.permute.xlu0 %1012  ;;  %v1015_v37 = vpop.permute.xlu1 %1014  ;;  %10377 = vmatmul.mubr.msk.f32.gmra.mrb[20].mxu1 %vm370_vm0, %v1537_v30  ;;  %2982 = vrot.lane.b32.xlu1 %v2887_v51, %s10808_s16  ;;  %v12175_v30 = vld [vmem:[#allocation2 + $0xfa] sm:$0xff]  ;;  %v12188_v21 = vld [vmem:[#allocation2 + $0x30] sm:$0xff] }
 0x12a   : > { %1092 = vst.msk [vmem:[#allocation5 + $0x290] sm:$0xff] %vm563_vm1, %v1013_v48  ;;  %1093 = vst.msk [vmem:[#allocation5 + $0x2b8] sm:$0xff] %vm563_vm1, %v1015_v37  ;;  %10379 = vmatprep.mubr.msk.f32.mxu1 %vm370_vm0, %v1542_v34  ;;  %v1139_v48 = vld [vmem:[%s10895_s20 + $0x118] sm:$0xff]  ;;  %v1579_v34 = vld [vmem:[#allocation5 + $0x4b8] sm:$0xff] }
 0x12b   : > { %1938 = vmatmul.mubr.f32.gmra.mrb[44].mxu0 %v1538_v39  ;;  %2980 = vrot.lane.b32.xlu0 %v2886_v33, %s10808_s16  ;;  %v12162_v33 = vld [vmem:[#allocation2 + $0xea] sm:$0xff]  ;;  %1171 = vst.msk [vmem:[#allocation5 + $0x4f0] sm:$0xff] %vm370_vm0, %v1139_v48  ;;  %v1573_v39 = vld [vmem:[#allocation5 + $0x488] sm:$0xff] }
 0x12c   : > { %1942 = vmatprep.mubr.f32.mxu0 %v1544_v42  ;;  %v3243_v42 = vld [vmem:[#allocation2 + $0x18] sm:$0xff]  ;;  %2830 = vst.msk [vmem:[#allocation6 + $0x90] sm:$0xff] %vm2759_vm2, %v12188_v21 }
 0x12d   : > { %v1017_v46 = vpop.permute.xlu0 %1016  ;;  %v1019_v22 = vpop.permute.xlu1 %1018  ;;  %10380 = vmatmul.mubr.msk.f32.gmra.mrb[22].mxu1 %vm370_vm0, %v1547_v3  ;;  %3115 = vrot.lane.b32.xlu1 %v3050_v56, %s10806_s25  ;;  %2827 = vst.msk [vmem:[#allocation6 + $0x48] sm:$0xff] %vm2759_vm2, %v3243_v42  ;;  %v1578_v3 = vld [vmem:[#allocation5 + $0x4b0] sm:$0xff]  ;;  %v2792_v56 = vld [vmem:[#allocation2] sm:$0xff] }
 0x12e   : > { %1094 = vst.msk [vmem:[#allocation5 + $0x2e0] sm:$0xff] %vm563_vm1, %v1017_v46  ;;  %1095 = vst.msk [vmem:[#allocation5 + $0x308] sm:$0xff] %vm563_vm1, %v1019_v22  ;;  %10382 = vmatprep.mubr.msk.f32.mxu1 %vm370_vm0, %v1552_v12  ;;  %v12197_v22 = vld [vmem:[#allocation2 + $0x28] sm:$0xff] }
 0x12f   : > { %1943 = vmatmul.mubr.f32.gmra.mrb[46].mxu0 %v1543_v49  ;;  %3113 = vrot.lane.b32.xlu0 %v3049_v41, %s10806_s25  ;;  %v12199_v41 = vld [vmem:[#allocation2 + $0xe0] sm:$0xff]  ;;  %2829 = vst.msk [vmem:[#allocation6 + $0x78] sm:$0xff] %vm2759_vm2, %v12197_v22  ;;  %2824 = vst.msk [vmem:[#allocation6] sm:$0xff] %vm2759_vm2, %v2792_v56 }
 0x130   : > { %1947 = vmatprep.mubr.f32.mxu0 %v1549_v5  ;;  %2852 = vst.msk [vmem:[#allocation6 + $0x2a0] sm:$0xff] %vm2759_vm2, %v12199_v41  ;;  %v1583_v5 = vld [vmem:[#allocation5 + $0x4d8] sm:$0xff] }
 0x131   : > { %v1021_v53 = vpop.permute.xlu0 %1020  ;;  %v1023_v55 = vpop.permute.xlu1 %1022  ;;  %10383 = vmatmul.mubr.msk.f32.gmra.mrb[24].mxu1 %vm370_vm0, %v1557_v61  ;;  %3119 = vrot.lane.b32.xlu1 %v12136_v6, %s10806_s25 }
 0x132   : > { %1096 = vst.msk [vmem:[#allocation5 + $0x330] sm:$0xff] %vm563_vm1, %v1021_v53  ;;  %1097 = vst.msk [vmem:[#allocation5 + $0x358] sm:$0xff] %vm563_vm1, %v1023_v55  ;;  %10385 = vmatprep.mubr.msk.f32.mxu1 %vm370_vm0, %v1562_v26  ;;  %v12213_v53 = vld [vmem:[#allocation2 + $0xf0] sm:$0xff]  ;;  %v12218_v55 = vld [vmem:[#allocation2 + $0xe8] sm:$0xff] }
 0x133   : > { %1948 = vmatmul.mubr.f32.gmra.mrb[48].mxu0 %v1548_v9  ;;  %3117 = vrot.lane.b32.xlu0 %v12116_v59, %s10806_s25  ;;  %v12220_v9 = vld [vmem:[#allocation2 + $0xf8] sm:$0xff]  ;;  %2854 = vst.msk [vmem:[#allocation6 + $0x2d0] sm:$0xff] %vm2759_vm2, %v12213_v53  ;;  %2853 = vst.msk [vmem:[#allocation6 + $0x2b8] sm:$0xff] %vm2759_vm2, %v12218_v55  ;;  %v12247_v26 = vld [vmem:[#allocation2 + $0x108] sm:$0xff] }
 0x134   : > { %1952 = vmatprep.mubr.f32.mxu0 %v1554_v10  ;;  %2855 = vst.msk [vmem:[#allocation6 + $0x2e8] sm:$0xff] %vm2759_vm2, %v12220_v9  ;;  %v1430_v10 = vld [vmem:[#allocation5 + $0x10] sm:$0xff] }
 0x135   : > { %v1025_v16 = vpop.permute.xlu0 %1024  ;;  %v1027_v47 = vpop.permute.xlu1 %1026  ;;  %10386 = vmatmul.mubr.msk.f32.gmra.mrb[26].mxu1 %vm370_vm0, %v1567_v31  ;;  %3123 = vrot.lane.b32.xlu1 %v12149_v18, %s10806_s25 }
 0x136   : > { %1098 = vst.msk [vmem:[#allocation5 + $0x380] sm:$0xff] %vm563_vm1, %v1025_v16  ;;  %1099 = vst.msk [vmem:[#allocation5 + $0x3a8] sm:$0xff] %vm563_vm1, %v1027_v47 }
 0x137   : > { %1953 = vmatmul.mubr.f32.gmra.mrb[50].mxu0 %v1553_v2  ;;  %3121 = vrot.lane.b32.xlu0 %v12129_v0, %s10806_s25  ;;  %v1435_v2 = vld [vmem:[#allocation5 + $0x38] sm:$0xff] }
 0x138   : > { %1957 = vmatprep.mubr.f32.mxu0 %v1559_v19 }
 0x139   : > { %v1029_v7 = vpop.permute.xlu0 %1028  ;;  %v1031_v8 = vpop.permute.xlu1 %1030  ;;  %3171 = vrot.lane.b32.xlu1 %v12162_v33, %s10806_s25 }
 0x13a   : > { %1100 = vst.msk [vmem:[#allocation5 + $0x3d0] sm:$0xff] %vm563_vm1, %v1029_v7  ;;  %1101 = vst.msk [vmem:[#allocation5 + $0x3f8] sm:$0xff] %vm563_vm1, %v1031_v8  ;;  %v12242_v8 = vld [vmem:[#allocation2 + $0x100] sm:$0xff] }
 0x13b   : > { %1958 = vmatmul.mubr.f32.gmra.mrb[52].mxu0 %v1558_v4  ;;  %3125 = vrot.lane.b32.xlu0 %v12142_v11, %s10806_s25  ;;  %v1440_v4 = vld [vmem:[#allocation5 + $0x60] sm:$0xff] }
 0x13c   : > { %1962 = vmatprep.mubr.f32.mxu0 %v1564_v17 }
 0x13d   : > { %v1033_v27 = vpop.permute.xlu0 %1032  ;;  %v1035_v28 = vpop.permute.xlu1 %1034  ;;  %3175 = vrot.lane.b32.xlu1 %v12175_v30, %s10806_s25 }
 0x13e   : > { %1102 = vst.msk [vmem:[#allocation5 + $0x420] sm:$0xff] %vm563_vm1, %v1033_v27  ;;  %1103 = vst.msk [vmem:[#allocation5 + $0x448] sm:$0xff] %vm563_vm1, %v1035_v28  ;;  %v1445_v27 = vld [vmem:[#allocation5 + $0x88] sm:$0xff] }
 0x13f   : > { %1963 = vmatmul.mubr.f32.gmra.mrb[54].mxu0 %v1563_v54  ;;  %3169 = vrot.lane.b32.xlu0 %v12155_v50, %s10806_s25 }
 0x140   : > { %1967 = vmatprep.mubr.f32.mxu0 %v1569_v57 }
 0x141   : > { %v1037_v29 = vpop.permute.xlu0 %1036  ;;  %v1039_v1 = vpop.permute.xlu1 %1038  ;;  %3308 = vrot.lane.b32.xlu1 %v3243_v42, %s10809_s17  ;;  %v1470_v42 = vld [vmem:[#allocation5 + $0x150] sm:$0xff] }
 0x142   : > { %1104 = vst.msk [vmem:[#allocation5 + $0x470] sm:$0xff] %vm563_vm1, %v1037_v29  ;;  %1105 = vst.msk [vmem:[#allocation5 + $0x498] sm:$0xff] %vm563_vm1, %v1039_v1 }
 0x143   : > { %1968 = vmatmul.mubr.f32.gmra.mrb[56].mxu0 %v1568_v35  ;;  %3173 = vrot.lane.b32.xlu0 %v12169_v15, %s10806_s25 }
 0x144   : > { %1972 = vmatprep.mubr.f32.mxu0 %v1574_v38 }
 0x145   : > { %v1041_v37 = vpop.permute.xlu0 %1040  ;;  %3312 = vrot.lane.b32.xlu1 %v12197_v22, %s10809_s17 }
 0x146   : > { %1106 = vst.msk [vmem:[#allocation5 + $0x4c0] sm:$0xff] %vm563_vm1, %v1041_v37 }
 0x147   : > { %1973 = vmatmul.mubr.f32.gmra.mrb[58].mxu0 %v1573_v39  ;;  %v1043_v40 = vpop.permute.xlu1 %1042  ;;  %3306 = vrot.lane.b32.xlu0 %v3242_v58, %s10809_s17  ;;  %v1450_v58 = vld [vmem:[#allocation5 + $0xb0] sm:$0xff] }
 0x148   : > { %1977 = vmatprep.mubr.f32.mxu0 %v1579_v34  ;;  %1107 = vst.msk [vmem:[#allocation5 + $0x4e8] sm:$0xff] %vm563_vm1, %v1043_v40 }
 0x149   : > { %v1237_v14 = vpop.permute.xlu0 %1236  ;;  %3316 = vrot.lane.b32.xlu1 %v12211_v52, %s10809_s17 }
 0x14a   : > { %1332 = vst.msk [vmem:[#allocation5 + $0x18] sm:$0xff] %vm563_vm1, %v1237_v14 }
 0x14b   : > { %1978 = vmatmul.mubr.f32.gmra.mrb[60].mxu0 %v1578_v3  ;;  %v1239_v46 = vpop.permute.xlu1 %1238  ;;  %3310 = vrot.lane.b32.xlu0 %v12177_v36, %s10809_s17 }
 0x14c   : > { %1982 = vmatprep.mubr.f32.mxu0 %v1584_v45  ;;  %1333 = vst.msk [vmem:[#allocation5 + $0x40] sm:$0xff] %vm563_vm1, %v1239_v46 }
 0x14d   : > { %v1241_v49 = vpop.permute.xlu0 %1240  ;;  %3360 = vrot.lane.b32.xlu1 %v12218_v55, %s10809_s17 }
 0x14e   : > { %1334 = vst.msk [vmem:[#allocation5 + $0x68] sm:$0xff] %vm563_vm1, %v1241_v49 }
 0x14f   : > { %1983 = vmatmul.mubr.f32.gmra.mrb[62].mxu0 %v1583_v5  ;;  %v1243_v51 = vpop.permute.xlu1 %1242  ;;  %3314 = vrot.lane.b32.xlu0 %v12188_v21, %s10809_s17  ;;  %v1480_v5 = vld [vmem:[#allocation5 + $0x1a0] sm:$0xff] }
 0x150   : > { %1335 = vst.msk [vmem:[#allocation5 + $0x90] sm:$0xff] %vm563_vm1, %v1243_v51 }
 0x151   : > { %v1431_v12 = vld [vmem:[#allocation5 + $0x18] sm:$0xff]  ;;  %v1245_v62 = vpop.permute.xlu0 %1244  ;;  %3364 = vrot.lane.b32.xlu1 %v12220_v9, %s10809_s17 }
 0x152   : > { %2052 = vmatprep.mubr.f32.mxu0 %v1431_v12  ;;  %1336 = vst.msk [vmem:[#allocation5 + $0xb8] sm:$0xff] %vm563_vm1, %v1245_v62 }
 0x153   : > { %2053 = vmatmul.mubr.f32.vlgmr.msra.gmra.mrb[64].mxu0 %v1430_v10  ;;  %v1436_v60 = vld [vmem:[#allocation5 + $0x40] sm:$0xff]  ;;  %v1247_v61 = vpop.permute.xlu1 %1246  ;;  %3358 = vrot.lane.b32.xlu0 %v12199_v41, %s10809_s17 }
 0x154   : > { %2057 = vmatprep.mubr.f32.mxu0 %v1436_v60  ;;  %1337 = vst.msk [vmem:[#allocation5 + $0xe0] sm:$0xff] %vm563_vm1, %v1247_v61 }
 0x155   : > { %v1441_v16 = vld [vmem:[#allocation5 + $0x68] sm:$0xff]  ;;  %v1249_v47 = vpop.permute.xlu0 %1248  ;;  %3368 = vrot.lane.b32.xlu1 %v12247_v26, %s10809_s17 }
 0x156   : > { %1338 = vst.msk [vmem:[#allocation5 + $0x108] sm:$0xff] %vm563_vm1, %v1249_v47 }
 0x157   : > { %2058 = vmatmul.mubr.f32.gmra.mrb[66].mxu0 %v1435_v2  ;;  %v1251_v19 = vpop.permute.xlu1 %1250  ;;  %3362 = vrot.lane.b32.xlu0 %v12213_v53, %s10809_s17  ;;  %v1446_v25 = vld [vmem:[#allocation5 + $0x90] sm:$0xff] }
 0x158   : > { %2062 = vmatprep.mubr.f32.mxu0 %v1441_v16  ;;  %1339 = vst.msk [vmem:[#allocation5 + $0x130] sm:$0xff] %vm563_vm1, %v1251_v19  ;;  %v1500_v16 = vld [vmem:[#allocation5 + $0x240] sm:$0xff]  ;;  %v1505_v19 = vld [vmem:[#allocation5 + $0x268] sm:$0xff] }
 0x159   : > { %v1253_v7 = vpop.permute.xlu0 %1252  ;;  %v1451_v20 = vld [vmem:[#allocation5 + $0xb8] sm:$0xff]  ;;  %3565 = vrot.lane.b32.xlu1 %v12136_v6, %s10808_s16 }
 0x15a   : > { %1340 = vst.msk [vmem:[#allocation5 + $0x158] sm:$0xff] %vm563_vm1, %v1253_v7 }
 0x15b   : > { %2063 = vmatmul.mubr.f32.gmra.mrb[68].mxu0 %v1440_v4  ;;  %v1255_v17 = vpop.permute.xlu1 %1254  ;;  %3366 = vrot.lane.b32.xlu0 %v12242_v8, %s10809_s17  ;;  %v1456_v54 = vld [vmem:[#allocation5 + $0xe0] sm:$0xff] }
 0x15c   : > { %2067 = vmatprep.mubr.f32.mxu0 %v1446_v25  ;;  %1341 = vst.msk [vmem:[#allocation5 + $0x180] sm:$0xff] %vm563_vm1, %v1255_v17  ;;  %v1515_v17 = vld [vmem:[#allocation5 + $0x2b8] sm:$0xff] }
 0x15d   : > { %v1257_v31 = vpop.permute.xlu0 %1256  ;;  %v1461_v29 = vld [vmem:[#allocation5 + $0x108] sm:$0xff]  ;;  %3569 = vrot.lane.b32.xlu1 %v12149_v18, %s10808_s16 }
 0x15e   : > { %1342 = vst.msk [vmem:[#allocation5 + $0x1a8] sm:$0xff] %vm563_vm1, %v1257_v31 }
 0x15f   : > { %2068 = vmatmul.mubr.f32.gmra.mrb[70].mxu0 %v1445_v27  ;;  %v1259_v28 = vpop.permute.xlu1 %1258  ;;  %3563 = vrot.lane.b32.xlu0 %v12116_v59, %s10808_s16  ;;  %v1455_v59 = vld [vmem:[#allocation5 + $0xd8] sm:$0xff]  ;;  %v1466_v35 = vld [vmem:[#allocation5 + $0x130] sm:$0xff]  ;;  %v1520_v27 = vld [vmem:[#allocation5 + $0x2e0] sm:$0xff] }
 0x160   : > { %2072 = vmatprep.mubr.f32.mxu0 %v1451_v20  ;;  %1343 = vst.msk [vmem:[#allocation5 + $0x1d0] sm:$0xff] %vm563_vm1, %v1259_v28 }
 0x161   : > { %v1261_v57 = vpop.permute.xlu0 %1260  ;;  %3617 = vrot.lane.b32.xlu1 %v12162_v33, %s10808_s16  ;;  %v1471_v48 = vld [vmem:[#allocation5 + $0x158] sm:$0xff] }
 0x162   : > { %1344 = vst.msk [vmem:[#allocation5 + $0x1f8] sm:$0xff] %vm563_vm1, %v1261_v57  ;;  %v3530_v33 = vld [vmem:[#allocation2 + $0x10a] sm:$0xff]  ;;  %v1525_v57 = vld [vmem:[#allocation5 + $0x308] sm:$0xff] }
 0x163   : > { %2073 = vmatmul.mubr.f32.gmra.mrb[72].mxu0 %v1450_v58  ;;  %v1263_v63 = vpop.permute.xlu1 %1262  ;;  %3567 = vrot.lane.b32.xlu0 %v12129_v0, %s10808_s16  ;;  %v1460_v0 = vld [vmem:[#allocation5 + $0x100] sm:$0xff] }
 0x164   : > { %2077 = vmatprep.mubr.f32.mxu0 %v1456_v54  ;;  %1345 = vst.msk [vmem:[#allocation5 + $0x220] sm:$0xff] %vm563_vm1, %v1263_v63  ;;  %v1476_v34 = vld [vmem:[#allocation5 + $0x180] sm:$0xff] }
 0x165   : > { %v1265_v1 = vpop.permute.xlu0 %1264  ;;  %3621 = vrot.lane.b32.xlu1 %v12175_v30, %s10808_s16  ;;  %v1481_v14 = vld [vmem:[#allocation5 + $0x1a8] sm:$0xff] }
 0x166   : > { %1346 = vst.msk [vmem:[#allocation5 + $0x248] sm:$0xff] %vm563_vm1, %v1265_v1  ;;  %v1530_v1 = vld [vmem:[#allocation5 + $0x330] sm:$0xff] }
 0x167   : > { %2078 = vmatmul.mubr.f32.gmra.mrb[74].mxu0 %v1455_v59  ;;  %v1267_v6 = vpop.permute.xlu1 %1266  ;;  %3571 = vrot.lane.b32.xlu0 %v12142_v11, %s10808_s16  ;;  %v1465_v11 = vld [vmem:[#allocation5 + $0x128] sm:$0xff]  ;;  %v1486_v46 = vld [vmem:[#allocation5 + $0x1d0] sm:$0xff] }
 0x168   : > { %2082 = vmatprep.mubr.f32.mxu0 %v1461_v29  ;;  %1347 = vst.msk [vmem:[#allocation5 + $0x270] sm:$0xff] %vm563_vm1, %v1267_v6 }
 0x169   : > { %v1269_v38 = vpop.permute.xlu0 %1268  ;;  %3625 = vrot.lane.b32.xlu1 %v3530_v33, %s10808_s16  ;;  %v1491_v51 = vld [vmem:[#allocation5 + $0x1f8] sm:$0xff] }
 0x16a   : > { %1348 = vst.msk [vmem:[#allocation5 + $0x298] sm:$0xff] %vm563_vm1, %v1269_v38 }
 0x16b   : > { %2083 = vmatmul.mubr.f32.gmra.mrb[76].mxu0 %v1460_v0  ;;  %v1271_v18 = vpop.permute.xlu1 %1270  ;;  %3615 = vrot.lane.b32.xlu0 %v12155_v50, %s10808_s16  ;;  %v3529_v50 = vld [vmem:[#allocation2 + $0x102] sm:$0xff]  ;;  %v1496_v62 = vld [vmem:[#allocation5 + $0x220] sm:$0xff]  ;;  %v1535_v0 = vld [vmem:[#allocation5 + $0x358] sm:$0xff] }
 0x16c   : > { %2087 = vmatprep.mubr.f32.mxu0 %v1466_v35  ;;  %1349 = vst.msk [vmem:[#allocation5 + $0x2c0] sm:$0xff] %vm563_vm1, %v1271_v18 }
 0x16d   : > { %v1273_v37 = vpop.permute.xlu0 %1272  ;;  %3757 = vrot.lane.b32.xlu1 %v12197_v22, %s10806_s25  ;;  %v1501_v56 = vld [vmem:[#allocation5 + $0x248] sm:$0xff] }
 0x16e   : > { %1350 = vst.msk [vmem:[#allocation5 + $0x2e8] sm:$0xff] %vm563_vm1, %v1273_v37 }
 0x16f   : > { %2088 = vmatmul.mubr.f32.gmra.mrb[78].mxu0 %v1465_v11  ;;  %v1275_v39 = vpop.permute.xlu1 %1274  ;;  %3619 = vrot.lane.b32.xlu0 %v12169_v15, %s10808_s16  ;;  %v1475_v15 = vld [vmem:[#allocation5 + $0x178] sm:$0xff]  ;;  %v1506_v24 = vld [vmem:[#allocation5 + $0x270] sm:$0xff] }
 0x170   : > { %2092 = vmatprep.mubr.f32.mxu0 %v1471_v48  ;;  %1351 = vst.msk [vmem:[#allocation5 + $0x310] sm:$0xff] %vm563_vm1, %v1275_v39  ;;  %v1540_v39 = vld [vmem:[#allocation5 + $0x380] sm:$0xff] }
 0x171   : > { %v1277_v40 = vpop.permute.xlu0 %1276  ;;  %3761 = vrot.lane.b32.xlu1 %v12211_v52, %s10806_s25  ;;  %v1511_v2 = vld [vmem:[#allocation5 + $0x298] sm:$0xff] }
 0x172   : > { %1352 = vst.msk [vmem:[#allocation5 + $0x338] sm:$0xff] %vm563_vm1, %v1277_v40 }
 0x173   : > { %2093 = vmatmul.mubr.f32.gmra.mrb[16].mxu0 %v1470_v42  ;;  %v1279_v30 = vpop.permute.xlu1 %1278  ;;  %3623 = vrot.lane.b32.xlu0 %v3529_v50, %s10808_s16  ;;  %v1516_v7 = vld [vmem:[#allocation5 + $0x2c0] sm:$0xff] }
 0x174   : > { %2097 = vmatprep.mubr.f32.mxu0 %v1476_v34  ;;  %1353 = vst.msk [vmem:[#allocation5 + $0x360] sm:$0xff] %vm563_vm1, %v1279_v30 }
 0x175   : > { %v1281_v3 = vpop.permute.xlu0 %1280  ;;  %3805 = vrot.lane.b32.xlu1 %v12218_v55, %s10806_s25 }
 0x176   : > { %1354 = vst.msk [vmem:[#allocation5 + $0x388] sm:$0xff] %vm563_vm1, %v1281_v3 }
 0x177   : > { %2098 = vmatmul.mubr.f32.gmra.mrb[18].mxu0 %v1475_v15  ;;  %v1283_v45 = vpop.permute.xlu1 %1282  ;;  %3755 = vrot.lane.b32.xlu0 %v12177_v36, %s10806_s25  ;;  %v1485_v36 = vld [vmem:[#allocation5 + $0x1c8] sm:$0xff]  ;;  %v1526_v31 = vld [vmem:[#allocation5 + $0x310] sm:$0xff] }
 0x178   : > { %2102 = vmatprep.mubr.f32.mxu0 %v1481_v14  ;;  %1355 = vst.msk [vmem:[#allocation5 + $0x3b0] sm:$0xff] %vm563_vm1, %v1283_v45  ;;  %v1545_v14 = vld [vmem:[#allocation5 + $0x3a8] sm:$0xff] }
 0x179   : > { %v1285_v49 = vpop.permute.xlu0 %1284  ;;  %3809 = vrot.lane.b32.xlu1 %v12220_v9, %s10806_s25  ;;  %v3722_v9 = vld [vmem:[#allocation2 + $0x118] sm:$0xff] }
 0x17a   : > { %1356 = vst.msk [vmem:[#allocation5 + $0x3d8] sm:$0xff] %vm563_vm1, %v1285_v49 }
 0x17b   : > { %2103 = vmatmul.mubr.f32.gmra.mrb[20].mxu0 %v1480_v5  ;;  %v1287_v22 = vpop.permute.xlu1 %1286  ;;  %3759 = vrot.lane.b32.xlu0 %v12188_v21, %s10806_s25  ;;  %v1490_v21 = vld [vmem:[#allocation5 + $0x1f0] sm:$0xff]  ;;  %v1536_v29 = vld [vmem:[#allocation5 + $0x360] sm:$0xff] }
 0x17c   : > { %2107 = vmatprep.mubr.f32.mxu0 %v1486_v46  ;;  %1357 = vst.msk [vmem:[#allocation5 + $0x400] sm:$0xff] %vm563_vm1, %v1287_v22  ;;  %v1550_v5 = vld [vmem:[#allocation5 + $0x3d0] sm:$0xff] }
 0x17d   : > { %v1289_v12 = vpop.permute.xlu0 %1288  ;;  %3813 = vrot.lane.b32.xlu1 %v12247_v26, %s10806_s25  ;;  %v1541_v35 = vld [vmem:[#allocation5 + $0x388] sm:$0xff] }
 0x17e   : > { %1358 = vst.msk [vmem:[#allocation5 + $0x428] sm:$0xff] %vm563_vm1, %v1289_v12 }
 0x17f   : > { %2108 = vmatmul.mubr.f32.gmra.mrb[22].mxu0 %v1485_v36  ;;  %v1291_v52 = vpop.permute.xlu1 %1290  ;;  %3803 = vrot.lane.b32.xlu0 %v12199_v41, %s10806_s25  ;;  %v1495_v41 = vld [vmem:[#allocation5 + $0x218] sm:$0xff]  ;;  %v1546_v11 = vld [vmem:[#allocation5 + $0x3b0] sm:$0xff] }
 0x180   : > { %2112 = vmatprep.mubr.f32.mxu0 %v1491_v51  ;;  %1359 = vst.msk [vmem:[#allocation5 + $0x450] sm:$0xff] %vm563_vm1, %v1291_v52 }
 0x181   : > { %v1293_v10 = vpop.permute.xlu0 %1292  ;;  %3817 = vrot.lane.b32.xlu1 %v3722_v9, %s10806_s25  ;;  %v1551_v42 = vld [vmem:[#allocation5 + $0x3d8] sm:$0xff] }
 0x182   : > { %1360 = vst.msk [vmem:[#allocation5 + $0x478] sm:$0xff] %vm563_vm1, %v1293_v10 }
 0x183   : > { %2113 = vmatmul.mubr.f32.gmra.mrb[24].mxu0 %v1490_v21  ;;  %v1295_v55 = vpop.permute.xlu1 %1294  ;;  %3807 = vrot.lane.b32.xlu0 %v12213_v53, %s10806_s25  ;;  %v3721_v53 = vld [vmem:[#allocation2 + $0x110] sm:$0xff]  ;;  %v1556_v46 = vld [vmem:[#allocation5 + $0x400] sm:$0xff] }
 0x184   : > { %2117 = vmatprep.mubr.f32.mxu0 %v1496_v62  ;;  %1361 = vst.msk [vmem:[#allocation5 + $0x4a0] sm:$0xff] %vm563_vm1, %v1295_v55  ;;  %v1555_v62 = vld [vmem:[#allocation5 + $0x3f8] sm:$0xff] }
 0x185   : > { %v1297_v60 = vpop.permute.xlu0 %1296  ;;  %3949 = vrot.lane.b32.xlu1 %v12087_v32, %s10809_s17  ;;  %v1521_v32 = vld [vmem:[#allocation5 + $0x2e8] sm:$0xff] }
 0x186   : > { %1362 = vst.msk [vmem:[#allocation5 + $0x4c8] sm:$0xff] %vm563_vm1, %v1297_v60  ;;  %v1561_v36 = vld [vmem:[#allocation5 + $0x428] sm:$0xff] }
 0x187   : > { %2118 = vmatmul.mubr.f32.gmra.mrb[26].mxu0 %v1495_v41  ;;  %v1299_v61 = vpop.permute.xlu1 %1298  ;;  %3811 = vrot.lane.b32.xlu0 %v12242_v8, %s10806_s25  ;;  %v1510_v8 = vld [vmem:[#allocation5 + $0x290] sm:$0xff]  ;;  %v1560_v41 = vld [vmem:[#allocation5 + $0x420] sm:$0xff] }
 0x188   : > { %2122 = vmatprep.mubr.f32.mxu0 %v1501_v56  ;;  %1363 = vst.msk [vmem:[#allocation5 + $0x4f0] sm:$0xff] %vm563_vm1, %v1299_v61  ;;  %v1566_v56 = vld [vmem:[#allocation5 + $0x450] sm:$0xff] }
 0x189   : > { %v2921_v47 = vpop.permute.xlu0 %2920 }
 0x18a   : > { %3017 = vst.msk [vmem:[#allocation6] sm:$0xff] %vm3016_vm3, %v2921_v47  ;;  %v1565_v47 = vld [vmem:[#allocation5 + $0x448] sm:$0xff] }
 0x18b   : > { %2123 = vmatmul.mubr.f32.gmra.mrb[28].mxu0 %v1500_v16  ;;  %3815 = vrot.lane.b32.xlu0 %v3721_v53, %s10806_s25  ;;  %v2923_v26 = vpop.permute.xlu1 %2922  ;;  %v1571_v53 = vld [vmem:[#allocation5 + $0x478] sm:$0xff] }
 0x18c   : > { %2127 = vmatprep.mubr.f32.mxu0 %v1506_v24  ;;  %3018 = vst.msk [vmem:[#allocation6 + $0x18] sm:$0xff] %vm3016_vm3, %v2923_v26 }
 0x18d   : > { %v2925_v25 = vpop.permute.xlu0 %2924 }
 0x18e   : > { %3019 = vst.msk [vmem:[#allocation6 + $0x30] sm:$0xff] %vm3016_vm3, %v2925_v25 }
 0x18f   : > { %2128 = vmatmul.mubr.f32.gmra.mrb[30].mxu0 %v1505_v19  ;;  %3947 = vrot.lane.b32.xlu0 %v12036_v23, %s10809_s17  ;;  %v2927_v23 = vpop.permute.xlu1 %2926 }
 0x190   : > { %2132 = vmatprep.mubr.f32.mxu0 %v1511_v2  ;;  %3020 = vst.msk [vmem:[#allocation6 + $0x48] sm:$0xff] %vm3016_vm3, %v2927_v23 }
 0x191   : > { %v2929_v4 = vpop.permute.xlu0 %2928 }
 0x192   : > { %3021 = vst.msk [vmem:[#allocation6 + $0x60] sm:$0xff] %vm3016_vm3, %v2929_v4  ;;  %v1570_v4 = vld [vmem:[#allocation5 + $0x470] sm:$0xff] }
 0x193   : > { %2133 = vmatmul.mubr.f32.gmra.mrb[32].mxu0 %v1510_v8  ;;  %3951 = vrot.lane.b32.xlu0 %v12048_v44, %s10809_s17  ;;  %v2931_v54 = vpop.permute.xlu1 %2930  ;;  %v1531_v44 = vld [vmem:[#allocation5 + $0x338] sm:$0xff] }
 0x194   : > { %2137 = vmatprep.mubr.f32.mxu0 %v1516_v7  ;;  %3022 = vst.msk [vmem:[#allocation6 + $0x78] sm:$0xff] %vm3016_vm3, %v2931_v54  ;;  %v1576_v7 = vld [vmem:[#allocation5 + $0x4a0] sm:$0xff] }
 0x195   : > { %v2933_v20 = vpop.permute.xlu0 %2932 }
 0x196   : > { %3023 = vst.msk [vmem:[#allocation6 + $0x90] sm:$0xff] %vm3016_vm3, %v2933_v20 }
 0x197   : > { %2138 = vmatmul.mubr.f32.gmra.mrb[34].mxu0 %v1515_v17  ;;  %v2979_v63 = vpop.permute.xlu1 %2978  ;;  %v4236_v17 = vld [vmem:[%s16180_s3 + $0x8] sm:$0xff] }
 0x198   : > { %2142 = vmatprep.mubr.f32.mxu0 %v1521_v32  ;;  %3046 = vst.msk [vmem:[#allocation6 + $0x2b8] sm:$0xff] %vm3016_vm3, %v2979_v63  ;;  %v4235_v32 = vld [vmem:[%s16180_s3] sm:$0xff] }
 0x199   : > { %v2977_v28 = vpop.permute.xlu0 %2976 }
 0x19a   : > { %3045 = vst.msk [vmem:[#allocation6 + $0x2a0] sm:$0xff] %vm3016_vm3, %v2977_v28  ;;  %v1575_v28 = vld [vmem:[#allocation5 + $0x498] sm:$0xff] }
 0x19b   : > { %2143 = vmatmul.mubr.f32.gmra.mrb[36].mxu0 %v1520_v27  ;;  %v2983_v6 = vpop.permute.xlu1 %2982  ;;  %v1581_v27 = vld [vmem:[#allocation5 + $0x4c8] sm:$0xff] }
 0x19c   : > { %2147 = vmatprep.mubr.f32.mxu0 %v1526_v31  ;;  %3048 = vst.msk [vmem:[#allocation6 + $0x2e8] sm:$0xff] %vm3016_vm3, %v2983_v6  ;;  %v10563_v31 = vpack.c.bf16 %v4236_v17, %v4235_v32  ;;  %v4253_v32 = vld [vmem:[%s16180_s3 + $0x90] sm:$0xff]  ;;  %v4254_v17 = vld [vmem:[%s16180_s3 + $0x98] sm:$0xff] }
 0x19d   : > { %v2981_v58 = vpop.permute.xlu0 %2980 }
 0x19e   : > { %3047 = vst.msk [vmem:[#allocation6 + $0x2d0] sm:$0xff] %vm3016_vm3, %v2981_v58  ;;  %10564 = vmatpush1.bf16.msra.mxu1 %v10563_v31 }
 0x19f   : > { %2148 = vmatmul.mubr.f32.gmra.mrb[38].mxu0 %v1525_v57  ;;  %v3116_v37 = vpop.permute.xlu1 %3115  ;;  %10565 = vmatprep.subr.bf16.mxu1 %v16207_v13  ;;  %v4238_v57 = vld [vmem:[%s16180_s3 + $0x18] sm:$0xff] }
 0x1a0   : > { %2152 = vmatprep.mubr.f32.mxu0 %v1531_v44  ;;  %3211 = vst.msk [vmem:[#allocation6 + $0x18] sm:$0xff] %vm3209_vm4, %v3116_v37  ;;  %v4237_v44 = vld [vmem:[%s16180_s3 + $0x10] sm:$0xff]  ;;  %v1585_v37 = vld [vmem:[#allocation5 + $0x4e8] sm:$0xff] }
 0x1a1   : > { %v3114_v59 = vpop.permute.xlu0 %3113  ;;  %v10566_v63 = vpack.c.bf16 %v4238_v57, %v4237_v44  ;;  %v4255_v44 = vld [vmem:[%s16180_s3 + $0xa0] sm:$0xff]  ;;  %v4256_v57 = vld [vmem:[%s16180_s3 + $0xa8] sm:$0xff] }
 0x1a2   : > { %3210 = vst.msk [vmem:[#allocation6] sm:$0xff] %vm3209_vm4, %v3114_v59  ;;  %v1580_v59 = vld [vmem:[#allocation5 + $0x4c0] sm:$0xff] }
 0x1a3   : > { %2153 = vmatmul.mubr.f32.gmra.mrb[40].mxu0 %v1530_v1  ;;  %v3120_v50 = vpop.permute.xlu1 %3119  ;;  %10567 = vmatpush1.bf16.msra.mxu1 %v10566_v63 }
 0x1a4   : > { %2157 = vmatprep.mubr.f32.mxu0 %v1536_v29  ;;  %3213 = vst.msk [vmem:[#allocation6 + $0x48] sm:$0xff] %vm3209_vm4, %v3120_v50  ;;  %v1586_v29 = vld [vmem:[#allocation5 + $0x4f0] sm:$0xff]  ;;  %10568 = vmatprep.subr.bf16.mxu1 %v16207_v13 }
 0x1a5   : > { %v3118_v18 = vpop.permute.xlu0 %3117 }
 0x1a6   : > { %v1829_v38 = vpop.f32.mrb[0].mxu0  ;;  %3212 = vst.msk [vmem:[#allocation6 + $0x30] sm:$0xff] %vm3209_vm4, %v3118_v18 }
 0x1a7   : > { %v1831_v48 = vpop.f32.mrb[1].mxu0  ;;  %2158 = vmatmul.mubr.f32.gmra.mrb[42].mxu0 %v1535_v0  ;;  %v3124_v45 = vpop.permute.xlu1 %3123  ;;  %v4239_v38 = vld [vmem:[%s16180_s3 + $0x20] sm:$0xff]  ;;  %v4240_v0 = vld [vmem:[%s16180_s3 + $0x28] sm:$0xff] }
 0x1a8   : > { %2162 = vmatprep.mubr.f32.mxu0 %v1541_v35  ;;  %3215 = vst.msk [vmem:[#allocation6 + $0x78] sm:$0xff] %vm3209_vm4, %v3124_v45  ;;  %v10569_v48 = vpack.c.bf16 %v4240_v0, %v4239_v38  ;;  %v4257_v38 = vld [vmem:[%s16180_s3 + $0xb0] sm:$0xff]  ;;  %v4258_v0 = vld [vmem:[%s16180_s3 + $0xb8] sm:$0xff] }
 0x1a9   : > { %v3122_v34 = vpop.permute.xlu0 %3121 }
 0x1aa   : > { %v1834_v33 = vpop.f32.mrb[2].mxu0  ;;  %3214 = vst.msk [vmem:[#allocation6 + $0x60] sm:$0xff] %vm3209_vm4, %v3122_v34  ;;  %10570 = vmatpush1.bf16.msra.mxu1 %v10569_v48  ;;  %v10596_v48 = vpack.c.bf16 %v4258_v0, %v4257_v38 }
 0x1ab   : > { %v1836_v40 = vpop.f32.mrb[3].mxu0  ;;  %2163 = vmatmul.mubr.f32.gmra.mrb[44].mxu0 %v1540_v39  ;;  %v3172_v12 = vpop.permute.xlu1 %3171  ;;  %10571 = vmatprep.subr.bf16.mxu1 %v16207_v13  ;;  %v4241_v33 = vld [vmem:[%s16180_s3 + $0x30] sm:$0xff]  ;;  %v4242_v39 = vld [vmem:[%s16180_s3 + $0x38] sm:$0xff] }
 0x1ac   : > { %2167 = vmatprep.mubr.f32.mxu0 %v1546_v11  ;;  %3239 = vst.msk [vmem:[#allocation6 + $0x2b8] sm:$0xff] %vm3209_vm4, %v3172_v12  ;;  %v10572_v40 = vpack.c.bf16 %v4242_v39, %v4241_v33  ;;  %v4259_v39 = vld [vmem:[%s16180_s3 + $0xc0] sm:$0xff] }
 0x1ad   : > { %v3126_v3 = vpop.permute.xlu0 %3125 }
 0x1ae   : > { %v1839_v30 = vpop.f32.mrb[4].mxu0  ;;  %3216 = vst.msk [vmem:[#allocation6 + $0x90] sm:$0xff] %vm3209_vm4, %v3126_v3  ;;  %10573 = vmatpush1.bf16.msra.mxu1 %v10572_v40  ;;  %v4244_v3 = vld [vmem:[%s16180_s3 + $0x48] sm:$0xff] }
 0x1af   : > { %v1841_v15 = vpop.f32.mrb[5].mxu0  ;;  %2168 = vmatmul.mubr.f32.gmra.mrb[46].mxu0 %v1545_v14  ;;  %v3176_v55 = vpop.permute.xlu1 %3175  ;;  %10574 = vmatprep.subr.bf16.mxu1 %v16207_v13  ;;  %v4243_v14 = vld [vmem:[%s16180_s3 + $0x40] sm:$0xff] }
 0x1b0   : > { %2172 = vmatprep.mubr.f32.mxu0 %v1551_v42  ;;  %3241 = vst.msk [vmem:[#allocation6 + $0x2e8] sm:$0xff] %vm3209_vm4, %v3176_v55  ;;  %v10575_v45 = vpack.c.bf16 %v4244_v3, %v4243_v14  ;;  %v1392_v40 = vld [vmem:[%s10895_s20 + $0x102] sm:$0xff] }
 0x1b1   : > { %v3170_v22 = vpop.permute.xlu0 %3169  ;;  %1424 = vst.msk [vmem:[#allocation5 + $0x480] sm:$0xff] %vm370_vm0, %v1392_v40 }
 0x1b2   : > { %v1844_v49 = vpop.f32.mrb[6].mxu0  ;;  %3238 = vst.msk [vmem:[#allocation6 + $0x2a0] sm:$0xff] %vm3209_vm4, %v3170_v22  ;;  %10576 = vmatpush1.bf16.msra.mxu1 %v10575_v45  ;;  %v4261_v45 = vld [vmem:[%s16180_s3 + $0xd0] sm:$0xff] }
 0x1b3   : > { %v1846_v51 = vpop.f32.mrb[7].mxu0  ;;  %2173 = vmatmul.mubr.f32.gmra.mrb[48].mxu0 %v1550_v5  ;;  %v3309_v24 = vpop.permute.xlu1 %3308  ;;  %10577 = vmatprep.subr.bf16.mxu1 %v16207_v13  ;;  %v4245_v49 = vld [vmem:[%s16180_s3 + $0x50] sm:$0xff]  ;;  %v4246_v5 = vld [vmem:[%s16180_s3 + $0x58] sm:$0xff] }
 0x1b4   : > { %2177 = vmatprep.mubr.f32.mxu0 %v1556_v46  ;;  %3404 = vst.msk [vmem:[#allocation6 + $0x18] sm:$0xff] %vm3402_vm5, %v3309_v24  ;;  %v10578_v51 = vpack.c.bf16 %v4246_v5, %v4245_v49  ;;  %v1394_v49 = vld [vmem:[%s10895_s20 + $0x112] sm:$0xff] }
 0x1b5   : > { %v3174_v10 = vpop.permute.xlu0 %3173  ;;  %1426 = vst.msk [vmem:[#allocation5 + $0x4d0] sm:$0xff] %vm370_vm0, %v1394_v49 }
 0x1b6   : > { %v1849_v52 = vpop.f32.mrb[8].mxu0  ;;  %3240 = vst.msk [vmem:[#allocation6 + $0x2d0] sm:$0xff] %vm3209_vm4, %v3174_v10  ;;  %10579 = vmatpush1.bf16.msra.mxu1 %v10578_v51  ;;  %v4248_v10 = vld [vmem:[%s16180_s3 + $0x68] sm:$0xff]  ;;  %v1395_v51 = vld [vmem:[%s10895_s20 + $0x11a] sm:$0xff] }
 0x1b7   : > { %v1851_v21 = vpop.f32.mrb[9].mxu0  ;;  %2178 = vmatmul.mubr.f32.gmra.mrb[50].mxu0 %v1555_v62  ;;  %v3313_v25 = vpop.permute.xlu1 %3312  ;;  %10580 = vmatprep.subr.bf16.mxu1 %v16207_v13  ;;  %v4247_v62 = vld [vmem:[%s16180_s3 + $0x60] sm:$0xff]  ;;  %1427 = vst.msk [vmem:[#allocation5 + $0x4f8] sm:$0xff] %vm370_vm0, %v1395_v51 }
 0x1b8   : > { %2182 = vmatprep.mubr.f32.mxu0 %v1561_v36  ;;  %3406 = vst.msk [vmem:[#allocation6 + $0x48] sm:$0xff] %vm3402_vm5, %v3313_v25  ;;  %v10581_v55 = vpack.c.bf16 %v4248_v10, %v4247_v62  ;;  %v1572_v62 = vld [vmem:[#allocation5 + $0x480] sm:$0xff]  ;;  %v4263_v10 = vld [vmem:[%s16180_s3 + $0xe0] sm:$0xff] }
 0x1b9   : > { %v3307_v9 = vpop.permute.xlu0 %3306  ;;  %10388 = vmatprep.mubr.msk.f32.mxu1 %vm370_vm0, %v1572_v62 }
 0x1ba   : > { %v1854_v60 = vpop.f32.mrb[10].mxu0  ;;  %3403 = vst.msk [vmem:[#allocation6] sm:$0xff] %vm3402_vm5, %v3307_v9  ;;  %10582 = vmatpush1.bf16.msra.mxu1 %v10581_v55 }
 0x1bb   : > { %v1856_v61 = vpop.f32.mrb[11].mxu0  ;;  %2183 = vmatmul.mubr.f32.gmra.mrb[52].mxu0 %v1560_v41  ;;  %v3317_v23 = vpop.permute.xlu1 %3316  ;;  %10583 = vmatprep.subr.bf16.mxu1 %v16207_v13  ;;  %v4249_v60 = vld [vmem:[%s16180_s3 + $0x70] sm:$0xff]  ;;  %v4250_v41 = vld [vmem:[%s16180_s3 + $0x78] sm:$0xff] }
 0x1bc   : > { %2187 = vmatprep.mubr.f32.mxu0 %v1566_v56  ;;  %3408 = vst.msk [vmem:[#allocation6 + $0x78] sm:$0xff] %vm3402_vm5, %v3317_v23  ;;  %v10584_v61 = vpack.c.bf16 %v4250_v41, %v4249_v60  ;;  %v10590_v23 = vpack.c.bf16 %v4254_v17, %v4253_v32 }
 0x1bd   : > { %v3311_v2 = vpop.permute.xlu0 %3310 }
 0x1be   : > { %v1859_v16 = vpop.f32.mrb[12].mxu0  ;;  %3405 = vst.msk [vmem:[#allocation6 + $0x30] sm:$0xff] %vm3402_vm5, %v3311_v2  ;;  %10585 = vmatpush1.bf16.msra.mxu1 %v10584_v61  ;;  %v4252_v2 = vld [vmem:[%s16180_s3 + $0x88] sm:$0xff] }
 0x1bf   : > { %v1861_v19 = vpop.f32.mrb[13].mxu0  ;;  %2188 = vmatmul.mubr.f32.gmra.mrb[54].mxu0 %v1565_v47  ;;  %v12367_v58 = vpop.permute.xlu1 %3360  ;;  %10586 = vmatprep.subr.bf16.mxu1 %v16207_v13  ;;  %v4251_v47 = vld [vmem:[%s16180_s3 + $0x80] sm:$0xff] }
 0x1c0   : > { %2192 = vmatprep.mubr.f32.mxu0 %v1571_v53  ;;  %v10587_v25 = vpack.c.bf16 %v4252_v2, %v4251_v47  ;;  %v1587_v2 = vld [vmem:[#allocation5 + $0x4f8] sm:$0xff] }
 0x1c1   : > { %v3315_v26 = vpop.permute.xlu0 %3314 }
 0x1c2   : > { %v1864_v8 = vpop.f32.mrb[14].mxu0  ;;  %3407 = vst.msk [vmem:[#allocation6 + $0x60] sm:$0xff] %vm3402_vm5, %v3315_v26  ;;  %10588 = vmatpush1.bf16.msra.mxu1 %v10587_v25 }
 0x1c3   : > { %v1866_v20 = vpop.f32.mrb[15].mxu0  ;;  %2193 = vmatmul.mubr.f32.gmra.mrb[80].mxu0 %v1570_v4  ;;  %v3365_v18 = vpop.permute.xlu1 %3364  ;;  %v3465_v4 = vld [vmem:[#allocation2 + $0x101] sm:$0xff]  ;;  %10589 = vmatprep.subr.bf16.mxu1 %v16207_v13 }
 0x1c4   : > { %2197 = vmatprep.mubr.f32.mxu0 %v1576_v7  ;;  %3432 = vst.msk [vmem:[#allocation6 + $0x2b8] sm:$0xff] %vm3402_vm5, %v3365_v18 }
 0x1c5   : > { %v12358_v54 = vpop.permute.xlu0 %3358  ;;  %v10348_v1 = vpop.f32.mrb[0].mxu1  ;;  %3497 = vst.msk [vmem:[#allocation6 + $0x2d8] sm:$0xff] %vm2759_vm2, %v3465_v4 }
 0x1c6   : > { %v2279_v6 = vpop.f32.mrb[1].mxu1  ;;  %10591 = vmatpush1.bf16.msra.mxu1 %v10590_v23 }
 0x1c7   : > { %2198 = vmatmul.mubr.f32.gmra.mrb[82].mxu0 %v1575_v28  ;;  %v3369_v34 = vpop.permute.xlu1 %3368  ;;  %10592 = vmatprep.subr.bf16.mxu1 %v16207_v13  ;;  %v3466_v6 = vld [vmem:[#allocation2 + $0x109] sm:$0xff] }
 0x1c8   : > { %2202 = vmatprep.mubr.f32.mxu0 %v1581_v27  ;;  %3434 = vst.msk [vmem:[#allocation6 + $0x2e8] sm:$0xff] %vm3402_vm5, %v3369_v34  ;;  %v4260_v34 = vld [vmem:[%s16180_s3 + $0xc8] sm:$0xff] }
 0x1c9   : > { %v3363_v35 = vpop.permute.xlu0 %3362  ;;  %3498 = vst.msk [vmem:[#allocation6 + $0x2f0] sm:$0xff] %vm2759_vm2, %v3466_v6 }
 0x1ca   : > { %3431 = vst.msk [vmem:[#allocation6 + $0x2a0] sm:$0xff] %vm3402_vm5, %v3363_v35 }
 0x1cb   : > { %2203 = vmatmul.mubr.f32.gmra.mrb[84].mxu0 %v1580_v59  ;;  %v3566_v15 = vpop.permute.xlu1 %3565 }
 0x1cc   : > { %2207 = vmatprep.mubr.f32.mxu0 %v1586_v29  ;;  %3660 = vst.msk [vmem:[#allocation6 + $0x20] sm:$0xff] %vm3016_vm3, %v3566_v15  ;;  %v10593_v29 = vpack.c.bf16 %v4256_v57, %v4255_v44  ;;  %v4142_v57 = vld [vmem:[#allocation6 + $0x18] sm:$0xff] }
 0x1cd   : > { %v3367_v11 = vpop.permute.xlu0 %3366  ;;  %v10351_v50 = vpop.f32.mrb[2].mxu1 }
 0x1ce   : > { %3433 = vst.msk [vmem:[#allocation6 + $0x2d0] sm:$0xff] %vm3402_vm5, %v3367_v11  ;;  %v2289_v42 = vpop.f32.mrb[3].mxu1  ;;  %10594 = vmatpush1.bf16.msra.mxu1 %v10593_v29 }
 0x1cf   : > { %2208 = vmatmul.mubr.f32.gmra.mrb[86].mxu0 %v1585_v37  ;;  %v3570_v22 = vpop.permute.xlu1 %3569  ;;  %10595 = vmatprep.subr.bf16.mxu1 %v16207_v13  ;;  %v10599_v42 = vpack.c.bf16 %v4260_v34, %v4259_v39 }
 0x1d0   : > { %3662 = vst.msk [vmem:[#allocation6 + $0x50] sm:$0xff] %vm3016_vm3, %v3570_v22 }
 0x1d1   : > { %v3564_v30 = vpop.permute.xlu0 %3563 }
 0x1d2   : > { %3659 = vst.msk [vmem:[#allocation6 + $0x8] sm:$0xff] %vm3016_vm3, %v3564_v30  ;;  %10597 = vmatpush1.bf16.msra.mxu1 %v10596_v48  ;;  %v1393_v30 = vld [vmem:[%s10895_s20 + $0x10a] sm:$0xff]  ;;  %s10813_s20 = smov 112  }
 0x1d3   : > { %v3618_v21 = vpop.permute.xlu1 %3617  ;;  %10598 = vmatprep.subr.bf16.mxu1 %v16207_v13  ;;  %1425 = vst.msk [vmem:[#allocation5 + $0x4a8] sm:$0xff] %vm370_vm0, %v1393_v30 }
 0x1d4   : > { %3686 = vst.msk [vmem:[#allocation6 + $0x290] sm:$0xff] %vm3016_vm3, %v3618_v21  ;;  %v4264_v21 = vld [vmem:[%s16180_s3 + $0xe8] sm:$0xff] }
 0x1d5   : > { %v3568_v46 = vpop.permute.xlu0 %3567  ;;  %v10354_v12 = vpop.f32.mrb[4].mxu1  ;;  %v10605_v60 = vpack.c.bf16 %v4264_v21, %v4263_v10 }
 0x1d6   : > { %3661 = vst.msk [vmem:[#allocation6 + $0x38] sm:$0xff] %vm3016_vm3, %v3568_v46  ;;  %v2299_v36 = vpop.f32.mrb[5].mxu1  ;;  %10600 = vmatpush1.bf16.msra.mxu1 %v10599_v42  ;;  %v4262_v46 = vld [vmem:[%s16180_s3 + $0xd8] sm:$0xff] }
 0x1d7   : > { %v3622_v9 = vpop.permute.xlu1 %3621  ;;  %10601 = vmatprep.subr.bf16.mxu1 %v16207_v13  ;;  %v10602_v22 = vpack.c.bf16 %v4262_v46, %v4261_v45 }
 0x1d8   : > { %3688 = vst.msk [vmem:[#allocation6 + $0x2c0] sm:$0xff] %vm3016_vm3, %v3622_v9 }
 0x1d9   : > { %v3572_v52 = vpop.permute.xlu0 %3571 }
 0x1da   : > { %3663 = vst.msk [vmem:[#allocation6 + $0x68] sm:$0xff] %vm3016_vm3, %v3572_v52  ;;  %10603 = vmatpush1.bf16.msra.mxu1 %v10602_v22 }
 0x1db   : > { %v3626_v19 = vpop.permute.xlu1 %3625  ;;  %10604 = vmatprep.subr.bf16.mxu1 %v16207_v13 }
 0x1dc   : > { %3690 = vst.msk [vmem:[#allocation6 + $0x2f0] sm:$0xff] %vm3016_vm3, %v3626_v19 }
 0x1dd   : > { %v3616_v56 = vpop.permute.xlu0 %3615  ;;  %v10357_v24 = vpop.f32.mrb[6].mxu1 }
 0x1de   : > { %3685 = vst.msk [vmem:[#allocation6 + $0x278] sm:$0xff] %vm3016_vm3, %v3616_v56  ;;  %v2309_v53 = vpop.f32.mrb[7].mxu1  ;;  %v1577_v56 = vld [vmem:[#allocation5 + $0x4a8] sm:$0xff]  ;;  %10606 = vmatpush1.bf16.msra.mxu1 %v10605_v60  ;;  %v1582_v24 = vld [vmem:[#allocation5 + $0x4d0] sm:$0xff] }
 0x1df   : > { %v3758_v20 = vpop.permute.xlu1 %3757  ;;  %10389 = vmatmul.mubr.msk.f32.gmra.mrb[28].mxu1 %vm370_vm0, %v1577_v56  ;;  %10607 = vmatprep.subr.bf16.mxu1 %v16207_v13  ;;  %v4265_v53 = vld [vmem:[%s16180_s3 + $0xf0] sm:$0xff] }
 0x1e0   : > { %3852 = vst.msk [vmem:[#allocation6 + $0x20] sm:$0xff] %vm3209_vm4, %v3758_v20  ;;  %10391 = vmatprep.mubr.msk.f32.mxu1 %vm370_vm0, %v1582_v24  ;;  %v4139_v20 = vld [vmem:[#allocation6] sm:$0xff] }
 0x1e1   : > { %v3620_v16 = vpop.permute.xlu0 %3619 }
 0x1e2   : > { %3687 = vst.msk [vmem:[#allocation6 + $0x2a8] sm:$0xff] %vm3016_vm3, %v3620_v16  ;;  %v4266_v16 = vld [vmem:[%s16180_s3 + $0xf8] sm:$0xff] }
 0x1e3   : > { %v3762_v63 = vpop.permute.xlu1 %3761  ;;  %v10608_v19 = vpack.c.bf16 %v4266_v16, %v4265_v53  ;;  %10392 = vmatmul.mubr.msk.f32.gmra.mrb[30].mxu1 %vm370_vm0, %v1587_v2 }
 0x1e4   : > { %v12431_v7 = vpop.f32.mrb[8].mxu1  ;;  %3854 = vst.msk [vmem:[#allocation6 + $0x50] sm:$0xff] %vm3209_vm4, %v3762_v63 }
 0x1e5   : > { %v12433_v8 = vpop.f32.mrb[9].mxu1  ;;  %v3624_v26 = vpop.permute.xlu0 %3623  ;;  %10609 = vmatpush1.bf16.msra.mxu1 %v10608_v19 }
 0x1e6   : > { %3689 = vst.msk [vmem:[#allocation6 + $0x2d8] sm:$0xff] %vm3016_vm3, %v3624_v26 }
 0x1e7   : > { %v12471_v18 = vpop.permute.xlu1 %3805 }
 0x1e8   : > { %v12445_v31 = vpop.f32.mrb[10].mxu1 }
 0x1e9   : > { %v12447_v27 = vpop.f32.mrb[11].mxu1  ;;  %v3756_v28 = vpop.permute.xlu0 %3755 }
 0x1ea   : > { %3851 = vst.msk [vmem:[#allocation6 + $0x8] sm:$0xff] %vm3209_vm4, %v3756_v28 }
 0x1eb   : > { %v3810_v50 = vpop.permute.xlu1 %3809 }
 0x1ec   : > { %v12458_v1 = vpop.f32.mrb[12].mxu1  ;;  %3878 = vst.msk [vmem:[#allocation6 + $0x290] sm:$0xff] %vm3209_vm4, %v3810_v50 }
 0x1ed   : > { %v12460_v59 = vpop.f32.mrb[13].mxu1  ;;  %v3760_v35 = vpop.permute.xlu0 %3759 }
 0x1ee   : > { %3853 = vst.msk [vmem:[#allocation6 + $0x38] sm:$0xff] %vm3209_vm4, %v3760_v35  ;;  %v4145_v35 = vld [vmem:[#allocation6 + $0x30] sm:$0xff] }
 0x1ef   : > { %v3814_v5 = vpop.permute.xlu1 %3813 }
 0x1f0   : > { %v12474_v37 = vpop.f32.mrb[14].mxu1  ;;  %3880 = vst.msk [vmem:[#allocation6 + $0x2c0] sm:$0xff] %vm3209_vm4, %v3814_v5 }
 0x1f1   : > { %v12476_v11 = vpop.f32.mrb[15].mxu1  ;;  %v12478_v33 = vpop.permute.xlu0 %3803 }
 0x1f3   : > { %v3818_v55 = vpop.permute.xlu1 %3817 }
 0x1f4   : > { %v12492_v14 = vpop.f32.mrb[16].mxu1  ;;  %3882 = vst.msk [vmem:[#allocation6 + $0x2f0] sm:$0xff] %vm3209_vm4, %v3818_v55 }
 0x1f5   : > { %v12494_v3 = vpop.f32.mrb[17].mxu1  ;;  %v3808_v15 = vpop.permute.xlu0 %3807 }
 0x1f6   : > { %3877 = vst.msk [vmem:[#allocation6 + $0x278] sm:$0xff] %vm3209_vm4, %v3808_v15 }
 0x1f7   : > { %v3950_v47 = vpop.permute.xlu1 %3949 }
 0x1f8   : > { %v12509_v12 = vpop.f32.mrb[18].mxu1  ;;  %4044 = vst.msk [vmem:[#allocation6 + $0x20] sm:$0xff] %vm3402_vm5, %v3950_v47 }
 0x1f9   : > { %v12511_v36 = vpop.f32.mrb[19].mxu1  ;;  %v3812_v52 = vpop.permute.xlu0 %3811 }
 0x1fa   : > { %3879 = vst.msk [vmem:[#allocation6 + $0x2a8] sm:$0xff] %vm3209_vm4, %v3812_v52  ;;  %v2470_v52 = vlaneseq }
 0x1fc   : > { %v12524_v41 = vpop.f32.mrb[20].mxu1  ;;  %v12553_v21 = vshrl.u32 %v2470_v52, 7 }
 0x1fd   : > { %v3816_v9 = vpop.permute.xlu0 %3815  ;;  %v12526_v61 = vpop.f32.mrb[21].mxu1 }
 0x1fe   : > { %3881 = vst.msk [vmem:[#allocation6 + $0x2d8] sm:$0xff] %vm3209_vm4, %v3816_v9  ;;  %v12556_v60 = vadd.s32 64, %v12553_v21  ;;  %v12560_v47 = vadd.s32 72, %v12553_v21 }
 0x1ff   : > { %v4143_v44 = vld [vmem:[#allocation6 + $0x20] sm:$0xff] }
 0x200   : > { %v12539_v25 = vpop.f32.mrb[22].mxu1  ;;  %v10113_v53 = vadd.s32 4294967228, %v12556_v60  ;;  %vm2607_vm7 = vcmp.ge.s32.totalorder %v12556_v60, 68 }
 0x201   : > { %v3948_v4 = vpop.permute.xlu0 %3947  ;;  %v12541_v26 = vpop.f32.mrb[23].mxu1 }
 0x202   : > { %4043 = vst.msk [vmem:[#allocation6 + $0x8] sm:$0xff] %vm3402_vm5, %v3948_v4  ;;  %v2543_v19 = vand.u32 15, %v10113_v53  ;;  %v12565_v4 = vld [vmem:[%s16179_s2] ss:$0 sm:$0xff] }
 0x204   : > { %v12545_v17 = vpop.f32.mrb[24].mxu1  ;;  %vm2575_vm6 = vcmp.lt.s32.totalorder %v2543_v19, 10 }
 0x205   : > { %v3952_v32 = vpop.permute.xlu0 %3951  ;;  %v12547_v23 = vpop.f32.mrb[25].mxu1  ;;  %vm2703_vm8 = vmand %vm2575_vm6, %vm2607_vm7 }
 0x206   : > { %4045 = vst.msk [vmem:[#allocation6 + $0x38] sm:$0xff] %vm3402_vm5, %v3952_v32 }
 0x208   : > { %v12549_v29 = vpop.f32.mrb[26].mxu1 }
 0x209   : > { %v4140_v28 = vld [vmem:[#allocation6 + $0x8] sm:$0xff]  ;;  %v12551_v6 = vpop.f32.mrb[27].mxu1 }
 0x20a   : > { %4438 = vmatprep.mubr.f32.mxu1 %v4140_v28  ;;  %v12569_v28 = vadd.s32 80, %v12553_v21 }
 0x20b   : > { %4439 = vmatmul.mubr.f32.vlgmr.msra.gmra.mrb[32].mxu1 %v4139_v20  ;;  %v10114_v20 = vadd.s32 4294967228, %v12560_v47 }
 0x20c   : > { %4443 = vmatprep.mubr.f32.mxu1 %v4143_v44 }
 0x20d   : > { %v4146_v63 = vld [vmem:[#allocation6 + $0x38] sm:$0xff] }
 0x20f   : > { %4444 = vmatmul.mubr.f32.gmra.mrb[34].mxu1 %v4142_v57 }
 0x210   : > { %4448 = vmatprep.mubr.f32.mxu1 %v4146_v63  ;;  %v2799_v63 = vld [vmem:[#allocation2 + $0x38] sm:$0xff] }
 0x211   : > { %2831 = vst.msk [vmem:[#allocation6 + $0xa8] sm:$0xff] %vm2759_vm2, %v2799_v63 }
 0x213   : > { %4449 = vmatmul.mubr.f32.gmra.mrb[36].mxu1 %v4145_v35 }
 0x216   : > { %v1969_v38 = vpop.f32.mrb[56].mxu0 }
 0x217   : > { %v1971_v0 = vpop.f32.mrb[57].mxu0 }
 0x218   : > { %v2544_v0 = vand.u32 15, %v10114_v20 }
 0x21a   : > { %v1974_v48 = vpop.f32.mrb[58].mxu0  ;;  %vm2576_vm9 = vcmp.lt.s32.totalorder %v2544_v0, 10 }
 0x21b   : > { %v1976_v39 = vpop.f32.mrb[59].mxu0  ;;  %v10115_v48 = vadd.s32 4294967228, %v12569_v28 }
 0x21c   : > { %v12577_v39 = vadd.s32 88, %v12553_v21 }
 0x21e   : > { %v1979_v34 = vpop.f32.mrb[60].mxu0 }
 0x21f   : > { %v1981_v40 = vpop.f32.mrb[61].mxu0 }
 0x222   : > { %v1984_v50 = vpop.f32.mrb[62].mxu0 }
 0x223   : > { %v1986_v42 = vpop.f32.mrb[63].mxu0 }
 0x226   : > { %v2054_v30 = vpop.f32.mrb[64].mxu0 }
 0x227   : > { %v2056_v15 = vpop.f32.mrb[65].mxu0 }
 0x22a   : > { %v2059_v45 = vpop.f32.mrb[66].mxu0 }
 0x22b   : > { %v2061_v46 = vpop.f32.mrb[67].mxu0  ;;  %v10116_v45 = vadd.s32 4294967228, %v12577_v39 }
 0x22c   : > { %v12584_v46 = vadd.s32 96, %v12553_v21 }
 0x22e   : > { %v2064_v49 = vpop.f32.mrb[68].mxu0 }
 0x22f   : > { %v2066_v5 = vpop.f32.mrb[69].mxu0 }
 0x232   : > { %v2069_v22 = vpop.f32.mrb[70].mxu0 }
 0x233   : > { %v2071_v51 = vpop.f32.mrb[71].mxu0 }
 0x236   : > { %v2074_v62 = vpop.f32.mrb[72].mxu0 }
 0x237   : > { %v2076_v10 = vpop.f32.mrb[73].mxu0  ;;  %v2546_v62 = vand.u32 15, %v10116_v45 }
 0x238   : > { %v10117_v10 = vadd.s32 4294967228, %v12584_v46 }
 0x239   : > { %vm2578_vm11 = vcmp.lt.s32.totalorder %v2546_v62, 10 }
 0x23a   : > { %v2079_v55 = vpop.f32.mrb[74].mxu0  ;;  %v2547_v20 = vand.u32 15, %v10117_v10 }
 0x23b   : > { %v2081_v56 = vpop.f32.mrb[75].mxu0  ;;  %v12591_v55 = vadd.s32 104, %v12553_v21 }
 0x23c   : > { %vm2579_vm12 = vcmp.lt.s32.totalorder %v2547_v20, 10 }
 0x23e   : > { %v2084_v9 = vpop.f32.mrb[76].mxu0 }
 0x23f   : > { %v2086_v24 = vpop.f32.mrb[77].mxu0 }
 0x242   : > { %v2089_v16 = vpop.f32.mrb[78].mxu0 }
 0x243   : > { %v2091_v2 = vpop.f32.mrb[79].mxu0 }
 0x246   : > { %v2094_v32 = vpop.f32.mrb[16].mxu0 }
 0x247   : > { %v10707_v44 = vadd.f32 %v12565_v4, %v2094_v32  ;;  %v2096_v57 = vpop.f32.mrb[17].mxu0 }
 0x248   : > { %v12601_v57 = vadd.s32 112, %v12553_v21 }
 0x249   : > { %v2320_v35 = vadd.f32 %v10707_v44, %v12433_v8  ;;  %v2545_v8 = vand.u32 15, %v10115_v48  ;;  %v10118_v44 = vadd.s32 4294967228, %v12591_v55 }
 0x24a   : > { %v2099_v38 = vpop.f32.mrb[18].mxu0 }
 0x24b   : > { %v2446_v34 = vmax.f32 %v2320_v35, 0.0  ;;  %v10708_v40 = vadd.f32 %v12565_v4, %v2099_v38  ;;  %v2101_v50 = vpop.f32.mrb[19].mxu0  ;;  %vm2577_vm10 = vcmp.lt.s32.totalorder %v2545_v8, 10 }
 0x24c   : > { %v2548_v50 = vand.u32 15, %v10118_v44 }
 0x24d   : > { %v2735_v42 = vsel %vm2703_vm8, %v2446_v34, 0.0  ;;  %v2325_v30 = vadd.f32 %v10708_v40, %v12431_v7 }
 0x24e   : > { %2768 = vst.msk [vmem:[#allocation2 + $0x40] sm:$0xff] %vm2759_vm2, %v2735_v42  ;;  %v2104_v15 = vpop.f32.mrb[20].mxu0  ;;  %v10119_v42 = vadd.s32 4294967228, %v12601_v57  ;;  %vm2580_vm13 = vcmp.lt.s32.totalorder %v2548_v50, 10 }
 0x24f   : > { %v2447_v49 = vmax.f32 %v2325_v30, 0.0  ;;  %v10709_v5 = vadd.f32 %v12565_v4, %v2104_v15  ;;  %v2106_v22 = vpop.f32.mrb[21].mxu0  ;;  %v12616_v30 = vadd.s32 120, %v12553_v21 }
 0x250   : > { %v2549_v62 = vand.u32 15, %v10119_v42 }
 0x251   : > { %v2736_v51 = vsel %vm2576_vm9, %v2447_v49, 0.0  ;;  %v2330_v52 = vadd.f32 %v10709_v5, %v12447_v27  ;;  %v10120_v10 = vadd.s32 4294967228, %v12616_v30 }
 0x252   : > { %2769 = vst.msk [vmem:[#allocation2 + $0x48] sm:$0xff] %vm2759_vm2, %v2736_v51  ;;  %v2109_v7 = vpop.f32.mrb[22].mxu0  ;;  %vm2581_vm14 = vcmp.lt.s32.totalorder %v2549_v62, 10 }
 0x253   : > { %v2448_v56 = vmax.f32 %v2330_v52, 0.0  ;;  %v10710_v9 = vadd.f32 %v12565_v4, %v2109_v7  ;;  %v2111_v24 = vpop.f32.mrb[23].mxu0  ;;  %v2550_v44 = vand.u32 15, %v10120_v10 }
 0x255   : > { %v4078_v53 = vld [vmem:[#allocation2 + $0x3a] sm:$0xff]  ;;  %v2737_v16 = vsel %vm2577_vm10, %v2448_v56, 0.0  ;;  %v2335_v2 = vadd.f32 %v10710_v9, %v12445_v31  ;;  %vm2582_vm15 = vcmp.lt.s32.totalorder %v2550_v44, 10 }
 0x256   : > { %v3248_v19 = vld [vmem:[#allocation2 + $0x40] sm:$0xff]  ;;  %4110 = vst.msk [vmem:[#allocation6 + $0x58] sm:$0xff] %vm2759_vm2, %v4078_v53  ;;  %2770 = vst.msk [vmem:[#allocation2 + $0x50] sm:$0xff] %vm2759_vm2, %v2737_v16  ;;  %v2114_v32 = vpop.f32.mrb[24].mxu0 }
 0x257   : > { %v2863_v27 = vld [vmem:[#allocation2 + $0x39] sm:$0xff]  ;;  %3318 = vrot.lane.b32.xlu0 %v3248_v19, %s10809_s17  ;;  %2832 = vst.msk [vmem:[#allocation6 + $0xc0] sm:$0xff] %vm2759_vm2, %v3248_v19  ;;  %v2449_v31 = vmax.f32 %v2335_v2, 0.0  ;;  %v10711_v63 = vadd.f32 %v12565_v4, %v2114_v32  ;;  %v2116_v35 = vpop.f32.mrb[25].mxu0 }
 0x258   : > { %2934 = vrot.lane.b32.xlu1 %v2863_v27, %s10808_s16  ;;  %3472 = vst.msk [vmem:[#allocation6 + $0x80] sm:$0xff] %vm2759_vm2, %v2863_v27 }
 0x259   : > { %v2738_v38 = vsel %vm2578_vm11, %v2449_v31, 0.0  ;;  %v2340_v0 = vadd.f32 %v10711_v63, %v12460_v59  ;;  %v12607_v48 = vld [vmem:[#allocation2 + $0x41] sm:$0xff]  ;;  %v12656_v63 = vadd.s32 136, %v12553_v21 }
 0x25a   : > { %v12609_v34 = vld [vmem:[#allocation2 + $0x48] sm:$0xff]  ;;  %2771 = vst.msk [vmem:[#allocation2 + $0x58] sm:$0xff] %vm2759_vm2, %v2738_v38  ;;  %v2119_v40 = vpop.f32.mrb[26].mxu0  ;;  %3473 = vst.msk [vmem:[#allocation6 + $0x98] sm:$0xff] %vm2759_vm2, %v12607_v48 }
 0x25b   : > { %3763 = vrot.lane.b32.xlu0 %v3248_v19, %s10806_s25  ;;  %2833 = vst.msk [vmem:[#allocation6 + $0xd8] sm:$0xff] %vm2759_vm2, %v12609_v34  ;;  %v4079_v59 = vld [vmem:[#allocation2 + $0x42] sm:$0xff]  ;;  %v2450_v15 = vmax.f32 %v2340_v0, 0.0  ;;  %v10712_v8 = vadd.f32 %v12565_v4, %v2119_v40  ;;  %v2121_v45 = vpop.f32.mrb[27].mxu0 }
 0x25c   : > { %3127 = vrot.lane.b32.xlu1 %v4078_v53, %s10806_s25  ;;  %4111 = vst.msk [vmem:[#allocation6 + $0x70] sm:$0xff] %vm2759_vm2, %v4079_v59  ;;  %v10122_v45 = vadd.s32 4294967228, %v12656_v63 }
 0x25d   : > { %v12624_v49 = vld [vmem:[#allocation2 + $0x4a] sm:$0xff]  ;;  %v2739_v5 = vsel %vm2579_vm12, %v2450_v15, 0.0  ;;  %v2345_v22 = vadd.f32 %v10712_v8, %v12458_v1  ;;  %v12639_v1 = vadd.s32 128, %v12553_v21 }
 0x25e   : > { %v12627_v51 = vld [vmem:[#allocation2 + $0x50] sm:$0xff]  ;;  %4112 = vst.msk [vmem:[#allocation6 + $0x88] sm:$0xff] %vm2759_vm2, %v12624_v49  ;;  %2772 = vst.msk [vmem:[#allocation2 + $0x60] sm:$0xff] %vm2759_vm2, %v2739_v5  ;;  %v2124_v7 = vpop.f32.mrb[28].mxu0 }
 0x25f   : > { %v12629_v52 = vld [vmem:[#allocation2 + $0x49] sm:$0xff]  ;;  %2936 = vrot.lane.b32.xlu0 %v12607_v48, %s10808_s16  ;;  %2834 = vst.msk [vmem:[#allocation6 + $0xf0] sm:$0xff] %vm2759_vm2, %v12627_v51  ;;  %v2451_v56 = vmax.f32 %v2345_v22, 0.0  ;;  %v10713_v9 = vadd.f32 %v12565_v4, %v2124_v7  ;;  %v2126_v24 = vpop.f32.mrb[29].mxu0  ;;  %v10121_v31 = vadd.s32 4294967228, %v12639_v1 }
 0x260   : > { %3573 = vrot.lane.b32.xlu1 %v4078_v53, %s10808_s16  ;;  %3474 = vst.msk [vmem:[#allocation6 + $0xb0] sm:$0xff] %vm2759_vm2, %v12629_v52  ;;  %v3057_v53 = vld [vmem:[#allocation2 + $0x42] sm:$0xff] }
 0x261   : > { %v2740_v16 = vsel %vm2580_vm13, %v2451_v56, 0.0  ;;  %v2350_v2 = vadd.f32 %v10713_v9, %v12476_v11  ;;  %v12647_v19 = vld [vmem:[#allocation2 + $0x51] sm:$0xff]  ;;  %v2551_v8 = vand.u32 15, %v10121_v31 }
 0x262   : > { %v12649_v32 = vld [vmem:[#allocation2 + $0x58] sm:$0xff]  ;;  %2773 = vst.msk [vmem:[#allocation2 + $0x68] sm:$0xff] %vm2759_vm2, %v2740_v16  ;;  %v2129_v20 = vpop.f32.mrb[30].mxu0  ;;  %3475 = vst.msk [vmem:[#allocation6 + $0xc8] sm:$0xff] %vm2759_vm2, %v12647_v19  ;;  %v2552_v16 = vand.u32 15, %v10122_v45 }
 0x263   : > { %3129 = vrot.lane.b32.xlu0 %v3057_v53, %s10806_s25  ;;  %2835 = vst.msk [vmem:[#allocation6 + $0x108] sm:$0xff] %vm2759_vm2, %v12649_v32  ;;  %v4081_v11 = vld [vmem:[#allocation2 + $0x52] sm:$0xff]  ;;  %v2452_v35 = vmax.f32 %v2350_v2, 0.0  ;;  %v10714_v38 = vadd.f32 %v12565_v4, %v2129_v20  ;;  %v2131_v0 = vpop.f32.mrb[31].mxu0  ;;  %vm2583_vm0 = vcmp.lt.s32.totalorder %v2551_v8, 10 }
 0x264   : > { %3953 = vrot.lane.b32.xlu1 %v2863_v27, %s10809_s17  ;;  %4113 = vst.msk [vmem:[#allocation6 + $0xa0] sm:$0xff] %vm2759_vm2, %v4081_v11  ;;  %vm2584_vm1 = vcmp.lt.s32.totalorder %v2552_v16, 10 }
 0x265   : > { %v12664_v40 = vld [vmem:[#allocation2 + $0x5a] sm:$0xff]  ;;  %v2741_v27 = vsel %vm2581_vm14, %v2452_v35, 0.0  ;;  %v2355_v50 = vadd.f32 %v10714_v38, %v12474_v37  ;;  %v12679_v37 = vadd.s32 144, %v12553_v21 }
 0x266   : > { %v12667_v42 = vld [vmem:[#allocation2 + $0x60] sm:$0xff]  ;;  %4114 = vst.msk [vmem:[#allocation6 + $0xb8] sm:$0xff] %vm2759_vm2, %v12664_v40  ;;  %2774 = vst.msk [vmem:[#allocation2 + $0x70] sm:$0xff] %vm2759_vm2, %v2741_v27  ;;  %v2134_v15 = vpop.f32.mrb[32].mxu0 }
 0x267   : > { %v12669_v59 = vld [vmem:[#allocation2 + $0x59] sm:$0xff]  ;;  %3575 = vrot.lane.b32.xlu0 %v3057_v53, %s10808_s16  ;;  %2836 = vst.msk [vmem:[#allocation6 + $0x120] sm:$0xff] %vm2759_vm2, %v12667_v42  ;;  %v2453_v5 = vmax.f32 %v2355_v50, 0.0  ;;  %v10715_v22 = vadd.f32 %v12565_v4, %v2134_v15  ;;  %v2136_v7 = vpop.f32.mrb[33].mxu0  ;;  %v10123_v2 = vadd.s32 4294967228, %v12679_v37  ;;  %v12698_v53 = vadd.s32 152, %v12553_v21 }
 0x268   : > { %3320 = vrot.lane.b32.xlu1 %v12609_v34, %s10809_s17  ;;  %3476 = vst.msk [vmem:[#allocation6 + $0xe0] sm:$0xff] %vm2759_vm2, %v12669_v59  ;;  %v12722_v50 = vadd.s32 160, %v12553_v21 }
 0x269   : > { %v2742_v62 = vsel %vm2582_vm15, %v2453_v5, 0.0  ;;  %v2360_v10 = vadd.f32 %v10715_v22, %v12494_v3  ;;  %v12687_v56 = vld [vmem:[#allocation2 + $0x61] sm:$0xff]  ;;  %v2553_v27 = vand.u32 15, %v10123_v2  ;;  %v12741_v2 = vadd.s32 168, %v12553_v21 }
 0x26a   : > { %v12689_v9 = vld [vmem:[#allocation2 + $0x68] sm:$0xff]  ;;  %2775 = vst.msk [vmem:[#allocation2 + $0x78] sm:$0xff] %vm2759_vm2, %v2742_v62  ;;  %v2139_v24 = vpop.f32.mrb[34].mxu0  ;;  %3477 = vst.msk [vmem:[#allocation6 + $0xf8] sm:$0xff] %vm2759_vm2, %v12687_v56  ;;  %v10125_v16 = vadd.s32 4294967228, %v12722_v50 }
 0x26b   : > { %3955 = vrot.lane.b32.xlu0 %v12607_v48, %s10809_s17  ;;  %2837 = vst.msk [vmem:[#allocation6 + $0x138] sm:$0xff] %vm2759_vm2, %v12689_v9  ;;  %v4083_v3 = vld [vmem:[#allocation2 + $0x62] sm:$0xff]  ;;  %v2454_v20 = vmax.f32 %v2360_v10, 0.0  ;;  %v10716_v44 = vadd.f32 %v12565_v4, %v2139_v24  ;;  %v2141_v31 = vpop.f32.mrb[35].mxu0  ;;  %16219 = vst [vmem:[#allocation12_spill] sm:$0xff] %v12722_v50  ;;  %vm2585_vm6 = vcmp.lt.s32.totalorder %v2553_v27, 10 }
 0x26c   : > { %3765 = vrot.lane.b32.xlu1 %v12609_v34, %s10806_s25  ;;  %4115 = vst.msk [vmem:[#allocation6 + $0xd0] sm:$0xff] %vm2759_vm2, %v4083_v3 }
 0x26d   : > { %v12706_v48 = vld [vmem:[#allocation2 + $0x6a] sm:$0xff]  ;;  %v2743_v34 = vsel %vm2583_vm0, %v2454_v20, 0.0  ;;  %v2365_v11 = vadd.f32 %v10716_v44, %v12492_v14  ;;  %v10124_v14 = vadd.s32 4294967228, %v12698_v53 }
 0x26e   : > { %v12709_v35 = vld [vmem:[#allocation2 + $0x70] sm:$0xff]  ;;  %4116 = vst.msk [vmem:[#allocation6 + $0xe8] sm:$0xff] %vm2759_vm2, %v12706_v48  ;;  %2776 = vst.msk [vmem:[#allocation2 + $0x80] sm:$0xff] %vm2759_vm2, %v2743_v34  ;;  %v2144_v0 = vpop.f32.mrb[36].mxu0 }
 0x26f   : > { %v12711_v38 = vld [vmem:[#allocation2 + $0x69] sm:$0xff]  ;;  %3322 = vrot.lane.b32.xlu0 %v12627_v51, %s10809_s17  ;;  %2838 = vst.msk [vmem:[#allocation6 + $0x150] sm:$0xff] %vm2759_vm2, %v12709_v35  ;;  %v2455_v15 = vmax.f32 %v2365_v11, 0.0  ;;  %v10717_v8 = vadd.f32 %v12565_v4, %v2144_v0  ;;  %v2146_v45 = vpop.f32.mrb[37].mxu0  ;;  %v2554_v24 = vand.u32 15, %v10124_v14  ;;  %v2555_v14 = vand.u32 15, %v10125_v16 }
 0x270   : > { %2938 = vrot.lane.b32.xlu1 %v12629_v52, %s10808_s16  ;;  %3478 = vst.msk [vmem:[#allocation6 + $0x110] sm:$0xff] %vm2759_vm2, %v12711_v38 }
 0x271   : > { %v2744_v5 = vsel %vm2584_vm1, %v2455_v15, 0.0  ;;  %v2370_v22 = vadd.f32 %v10717_v8, %v12511_v36  ;;  %v12730_v7 = vld [vmem:[#allocation2 + $0x71] sm:$0xff]  ;;  %vm2586_vm7 = vcmp.lt.s32.totalorder %v2554_v24, 10  ;;  %v12765_v15 = vadd.s32 176, %v12553_v21 }
 0x272   : > { %v12732_v62 = vld [vmem:[#allocation2 + $0x78] sm:$0xff]  ;;  %2777 = vst.msk [vmem:[#allocation2 + $0x88] sm:$0xff] %vm2759_vm2, %v2744_v5  ;;  %v2149_v10 = vpop.f32.mrb[38].mxu0  ;;  %3479 = vst.msk [vmem:[#allocation6 + $0x128] sm:$0xff] %vm2759_vm2, %v12730_v7  ;;  %vm2587_vm8 = vcmp.lt.s32.totalorder %v2555_v14, 10 }
 0x273   : > { %3767 = vrot.lane.b32.xlu0 %v12627_v51, %s10806_s25  ;;  %2839 = vst.msk [vmem:[#allocation6 + $0x168] sm:$0xff] %vm2759_vm2, %v12732_v62  ;;  %v4085_v36 = vld [vmem:[#allocation2 + $0x72] sm:$0xff]  ;;  %v2456_v3 = vmax.f32 %v2370_v22, 0.0  ;;  %v10718_v20 = vadd.f32 %v12565_v4, %v2149_v10  ;;  %v2151_v44 = vpop.f32.mrb[39].mxu0  ;;  %16220 = vst [vmem:[#allocation13_spill] sm:$0xff] %v12765_v15 }
 0x274   : > { %3131 = vrot.lane.b32.xlu1 %v12624_v49, %s10806_s25  ;;  %4117 = vst.msk [vmem:[#allocation6 + $0x100] sm:$0xff] %vm2759_vm2, %v4085_v36  ;;  %v12783_v44 = vadd.s32 184, %v12553_v21 }
 0x275   : > { %v12749_v51 = vld [vmem:[#allocation2 + $0x7a] sm:$0xff]  ;;  %v2745_v31 = vsel %vm2585_vm6, %v2456_v3, 0.0  ;;  %v2375_v34 = vadd.f32 %v10718_v20, %v12509_v12  ;;  %v10126_v12 = vadd.s32 4294967228, %v12741_v2  ;;  %v10127_v20 = vadd.s32 4294967228, %v12765_v15 }
 0x276   : > { %v12752_v11 = vld [vmem:[#allocation2 + $0x80] sm:$0xff]  ;;  %4118 = vst.msk [vmem:[#allocation6 + $0x118] sm:$0xff] %vm2759_vm2, %v12749_v51  ;;  %2778 = vst.msk [vmem:[#allocation2 + $0x90] sm:$0xff] %vm2759_vm2, %v2745_v31  ;;  %v2154_v27 = vpop.f32.mrb[40].mxu0  ;;  %vm5816_vm6 = vcmask 654848  }
 0x277   : > { %v12754_v0 = vld [vmem:[#allocation2 + $0x79] sm:$0xff]  ;;  %2940 = vrot.lane.b32.xlu0 %v12647_v19, %s10808_s16  ;;  %2840 = vst.msk [vmem:[#allocation6 + $0x180] sm:$0xff] %vm2759_vm2, %v12752_v11  ;;  %v2457_v8 = vmax.f32 %v2375_v34, 0.0  ;;  %v10719_v45 = vadd.f32 %v12565_v4, %v2154_v27  ;;  %v2156_v5 = vpop.f32.mrb[41].mxu0  ;;  %v2556_v3 = vand.u32 15, %v10126_v12  ;;  %16221 = vst [vmem:[#allocation14_spill] sm:$0xff] %v12783_v44 }
 0x278   : > { %3577 = vrot.lane.b32.xlu1 %v12624_v49, %s10808_s16  ;;  %3480 = vst.msk [vmem:[#allocation6 + $0x140] sm:$0xff] %vm2759_vm2, %v12754_v0  ;;  %v3059_v49 = vld [vmem:[#allocation2 + $0x52] sm:$0xff] }
 0x279   : > { %v2746_v22 = vsel %vm2586_vm7, %v2457_v8, 0.0  ;;  %v2380_v10 = vadd.f32 %v10719_v45, %v12526_v61  ;;  %v12773_v24 = vld [vmem:[#allocation2 + $0x81] sm:$0xff]  ;;  %vm2588_vm9 = vcmp.lt.s32.totalorder %v2556_v3, 10  ;;  %vm5985_vm7 = vcmask 786048  }
 0x27a   : > { %v12775_v16 = vld [vmem:[#allocation2 + $0x88] sm:$0xff]  ;;  %2779 = vst.msk [vmem:[#allocation2 + $0x98] sm:$0xff] %vm2759_vm2, %v2746_v22  ;;  %v2159_v36 = vpop.f32.mrb[42].mxu0  ;;  %3481 = vst.msk [vmem:[#allocation6 + $0x158] sm:$0xff] %vm2759_vm2, %v12773_v24  ;;  %v2557_v22 = vand.u32 15, %v10127_v20 }
 0x27b   : > { %3133 = vrot.lane.b32.xlu0 %v3059_v49, %s10806_s25  ;;  %2841 = vst.msk [vmem:[#allocation6 + $0x198] sm:$0xff] %vm2759_vm2, %v12775_v16  ;;  %v4087_v61 = vld [vmem:[#allocation2 + $0x82] sm:$0xff]  ;;  %v2458_v31 = vmax.f32 %v2380_v10, 0.0  ;;  %v10720_v34 = vadd.f32 %v12565_v4, %v2159_v36  ;;  %v2161_v27 = vpop.f32.mrb[43].mxu0  ;;  %v10128_v10 = vadd.s32 4294967228, %v12783_v44 }
 0x27c   : > { %3957 = vrot.lane.b32.xlu1 %v12629_v52, %s10809_s17  ;;  %4119 = vst.msk [vmem:[#allocation6 + $0x130] sm:$0xff] %vm2759_vm2, %v4087_v61  ;;  %vm2589_vm10 = vcmp.lt.s32.totalorder %v2557_v22, 10 }
 0x27d   : > { %v12791_v14 = vld [vmem:[#allocation2 + $0x8a] sm:$0xff]  ;;  %v2747_v52 = vsel %vm2587_vm8, %v2458_v31, 0.0  ;;  %v2385_v12 = vadd.f32 %v10720_v34, %v12524_v41  ;;  %v12806_v41 = vadd.s32 192, %v12553_v21 }
 0x27e   : > { %v12794_v8 = vld [vmem:[#allocation2 + $0x90] sm:$0xff]  ;;  %4120 = vst.msk [vmem:[#allocation6 + $0x148] sm:$0xff] %vm2759_vm2, %v12791_v14  ;;  %2780 = vst.msk [vmem:[#allocation2 + $0xa0] sm:$0xff] %vm2759_vm2, %v2747_v52  ;;  %v2164_v5 = vpop.f32.mrb[44].mxu0  ;;  %v2558_v52 = vand.u32 15, %v10128_v10 }
 0x27f   : > { %v12796_v45 = vld [vmem:[#allocation2 + $0x89] sm:$0xff]  ;;  %3579 = vrot.lane.b32.xlu0 %v3059_v49, %s10808_s16  ;;  %16222 = vst [vmem:[#allocation15_spill] sm:$0xff] %v12806_v41  ;;  %2842 = vst.msk [vmem:[#allocation6 + $0x1b0] sm:$0xff] %vm2759_vm2, %v12794_v8  ;;  %v2459_v36 = vmax.f32 %v2385_v12, 0.0  ;;  %v10721_v3 = vadd.f32 %v12565_v4, %v2164_v5  ;;  %v2166_v61 = vpop.f32.mrb[45].mxu0  ;;  %v10129_v12 = vadd.s32 4294967228, %v12806_v41 }
 0x280   : > { %3324 = vrot.lane.b32.xlu1 %v12649_v32, %s10809_s17  ;;  %3482 = vst.msk [vmem:[#allocation6 + $0x170] sm:$0xff] %vm2759_vm2, %v12796_v45  ;;  %v12825_v5 = vadd.s32 200, %v12553_v21  ;;  %vm2590_vm11 = vcmp.lt.s32.totalorder %v2558_v52, 10 }
 0x281   : > { %v2748_v49 = vsel %vm2588_vm9, %v2459_v36, 0.0  ;;  %v2390_v31 = vadd.f32 %v10721_v3, %v12541_v26  ;;  %v12814_v34 = vld [vmem:[#allocation2 + $0x91] sm:$0xff] }
 0x282   : > { %v12816_v20 = vld [vmem:[#allocation2 + $0x98] sm:$0xff]  ;;  %2781 = vst.msk [vmem:[#allocation2 + $0xa8] sm:$0xff] %vm2759_vm2, %v2748_v49  ;;  %v2169_v27 = vpop.f32.mrb[46].mxu0  ;;  %16223 = vst [vmem:[#allocation16_spill] sm:$0xff] %v12825_v5 }
 0x283   : > { %3959 = vrot.lane.b32.xlu0 %v12647_v19, %s10809_s17  ;;  %3483 = vst.msk [vmem:[#allocation6 + $0x188] sm:$0xff] %vm2759_vm2, %v12814_v34  ;;  %2843 = vst.msk [vmem:[#allocation6 + $0x1c8] sm:$0xff] %vm2759_vm2, %v12816_v20  ;;  %v4089_v26 = vld [vmem:[#allocation2 + $0x92] sm:$0xff]  ;;  %v2460_v22 = vmax.f32 %v2390_v31, 0.0  ;;  %v10722_v10 = vadd.f32 %v12565_v4, %v2169_v27  ;;  %v2171_v36 = vpop.f32.mrb[47].mxu0  ;;  %v2559_v27 = vand.u32 15, %v10129_v12 }
 0x284   : > { %3769 = vrot.lane.b32.xlu1 %v12649_v32, %s10806_s25  ;;  %4121 = vst.msk [vmem:[#allocation6 + $0x160] sm:$0xff] %vm2759_vm2, %v4089_v26  ;;  %v12849_v26 = vadd.s32 208, %v12553_v21  ;;  %v12857_v36 = vadd.s32 216, %v12553_v21 }
 0x285   : > { %v12833_v19 = vld [vmem:[#allocation2 + $0x9a] sm:$0xff]  ;;  %v2749_v32 = vsel %vm2589_vm10, %v2460_v22, 0.0  ;;  %v2395_v3 = vadd.f32 %v10722_v10, %v12539_v25  ;;  %v10130_v25 = vadd.s32 4294967228, %v12825_v5  ;;  %vm2591_vm12 = vcmp.lt.s32.totalorder %v2559_v27, 10 }
 0x286   : > { %v12836_v61 = vld [vmem:[#allocation2 + $0xa0] sm:$0xff]  ;;  %4122 = vst.msk [vmem:[#allocation6 + $0x178] sm:$0xff] %vm2759_vm2, %v12833_v19  ;;  %2782 = vst.msk [vmem:[#allocation2 + $0xb0] sm:$0xff] %vm2759_vm2, %v2749_v32  ;;  %v2174_v31 = vpop.f32.mrb[48].mxu0  ;;  %vm2658_vm0 = vcmp.lt.s32.totalorder %v12857_v36, 222 }
 0x287   : > { %v12838_v49 = vld [vmem:[#allocation2 + $0x99] sm:$0xff]  ;;  %3326 = vrot.lane.b32.xlu0 %v12667_v42, %s10809_s17  ;;  %16224 = vst [vmem:[#allocation10_spill] sm:$0xff] %v12849_v26  ;;  %2844 = vst.msk [vmem:[#allocation6 + $0x1e0] sm:$0xff] %vm2759_vm2, %v12836_v61  ;;  %v2461_v52 = vmax.f32 %v2395_v3, 0.0  ;;  %v10723_v22 = vadd.f32 %v12565_v4, %v2174_v31  ;;  %v2176_v10 = vpop.f32.mrb[49].mxu0  ;;  %v2560_v15 = vand.u32 15, %v10130_v25 }
 0x288   : > { %2942 = vrot.lane.b32.xlu1 %v12669_v59, %s10808_s16  ;;  %3484 = vst.msk [vmem:[#allocation6 + $0x1a0] sm:$0xff] %vm2759_vm2, %v12838_v49  ;;  %v10131_v3 = vadd.s32 4294967228, %v12849_v26  ;;  %v10132_v25 = vadd.s32 4294967228, %v12857_v36 }
 0x289   : > { %v2750_v32 = vsel %vm2590_vm11, %v2461_v52, 0.0  ;;  %v2400_v12 = vadd.f32 %v10723_v22, %v12547_v23  ;;  %v12860_v43 = vld [vmem:[#allocation2 + $0xa1] sm:$0xff]  ;;  %vm2592_vm13 = vcmp.lt.s32.totalorder %v2560_v15, 10 }
 0x28a   : > { %v12862_v41 = vld [vmem:[#allocation2 + $0xa8] sm:$0xff]  ;;  %2783 = vst.msk [vmem:[#allocation2 + $0xb8] sm:$0xff] %vm2759_vm2, %v2750_v32  ;;  %v2179_v5 = vpop.f32.mrb[50].mxu0  ;;  %3485 = vst.msk [vmem:[#allocation6 + $0x1b8] sm:$0xff] %vm2759_vm2, %v12860_v43 }
 0x28b   : > { %3771 = vrot.lane.b32.xlu0 %v12667_v42, %s10806_s25  ;;  %2845 = vst.msk [vmem:[#allocation6 + $0x1f8] sm:$0xff] %vm2759_vm2, %v12862_v41  ;;  %v4091_v23 = vld [vmem:[#allocation2 + $0xa2] sm:$0xff]  ;;  %v2462_v31 = vmax.f32 %v2400_v12, 0.0  ;;  %v10724_v27 = vadd.f32 %v12565_v4, %v2179_v5  ;;  %v2181_v52 = vpop.f32.mrb[51].mxu0  ;;  %v2561_v12 = vand.u32 15, %v10131_v3 }
 0x28c   : > { %3135 = vrot.lane.b32.xlu1 %v12664_v40, %s10806_s25  ;;  %4123 = vst.msk [vmem:[#allocation6 + $0x190] sm:$0xff] %vm2759_vm2, %v4091_v23 }
 0x28d   : > { %v12877_v42 = vld [vmem:[#allocation2 + $0xaa] sm:$0xff]  ;;  %v2751_v22 = vsel %vm2591_vm12, %v2462_v31, 0.0  ;;  %v2405_v10 = vadd.f32 %v10724_v27, %v12545_v17  ;;  %v2562_v27 = vand.u32 15, %v10132_v25  ;;  %vm2593_vm14 = vcmp.lt.s32.totalorder %v2561_v12, 10 }
 0x28e   : > { %v12880_v32 = vld [vmem:[#allocation2 + $0xb0] sm:$0xff]  ;;  %4124 = vst.msk [vmem:[#allocation6 + $0x1a8] sm:$0xff] %vm2759_vm2, %v12877_v42  ;;  %2784 = vst.msk [vmem:[#allocation2 + $0xc0] sm:$0xff] %vm2759_vm2, %v2751_v22  ;;  %v2184_v5 = vpop.f32.mrb[52].mxu0  ;;  %v3061_v22 = vld [vmem:[#allocation2 + $0x62] sm:$0xff] }
 0x28f   : > { %v12882_v26 = vld [vmem:[#allocation2 + $0xa9] sm:$0xff]  ;;  %2944 = vrot.lane.b32.xlu0 %v12687_v56, %s10808_s16  ;;  %2846 = vst.msk [vmem:[#allocation6 + $0x210] sm:$0xff] %vm2759_vm2, %v12880_v32  ;;  %v2463_v17 = vmax.f32 %v2405_v10, 0.0  ;;  %v10725_v23 = vadd.f32 %v12565_v4, %v2184_v5  ;;  %v2186_v31 = vpop.f32.mrb[53].mxu0  ;;  %vm2594_vm15 = vcmp.lt.s32.totalorder %v2562_v27, 10 }
 0x290   : > { %3581 = vrot.lane.b32.xlu1 %v12664_v40, %s10808_s16  ;;  %3486 = vst.msk [vmem:[#allocation6 + $0x1d0] sm:$0xff] %vm2759_vm2, %v12882_v26  ;;  %vm2722_vm1 = vmand %vm2594_vm15, %vm2658_vm0 }
 0x291   : > { %v2752_v15 = vsel %vm2592_vm13, %v2463_v17, 0.0  ;;  %v2410_v52 = vadd.f32 %v10725_v23, %v12551_v6  ;;  %v12897_v44 = vld [vmem:[#allocation2 + $0xb1] sm:$0xff] }
 0x292   : > { %v12899_v50 = vld [vmem:[#allocation2 + $0xb8] sm:$0xff]  ;;  %2785 = vst.msk [vmem:[#allocation2 + $0xc8] sm:$0xff] %vm2759_vm2, %v2752_v15  ;;  %v2189_v40 = vpop.f32.mrb[54].mxu0  ;;  %3487 = vst.msk [vmem:[#allocation6 + $0x1e8] sm:$0xff] %vm2759_vm2, %v12897_v44 }
 0x293   : > { %3137 = vrot.lane.b32.xlu0 %v3061_v22, %s10806_s25  ;;  %2847 = vst.msk [vmem:[#allocation6 + $0x228] sm:$0xff] %vm2759_vm2, %v12899_v50  ;;  %v4093_v6 = vld [vmem:[#allocation2 + $0xb2] sm:$0xff]  ;;  %v2464_v3 = vmax.f32 %v2410_v52, 0.0  ;;  %v10726_v25 = vadd.f32 %v12565_v4, %v2189_v40  ;;  %v2191_v10 = vpop.f32.mrb[55].mxu0 }
 0x294   : > { %3961 = vrot.lane.b32.xlu1 %v12669_v59, %s10809_s17  ;;  %4125 = vst.msk [vmem:[#allocation6 + $0x1c0] sm:$0xff] %vm2759_vm2, %v4093_v6 }
 0x295   : > { %v12912_v5 = vld [vmem:[#allocation2 + $0xba] sm:$0xff]  ;;  %v2753_v12 = vsel %vm2593_vm14, %v2464_v3, 0.0  ;;  %v2415_v59 = vadd.f32 %v10726_v25, %v12549_v29 }
 0x296   : > { %v12915_v17 = vld [vmem:[#allocation2 + $0xc0] sm:$0xff]  ;;  %4126 = vst.msk [vmem:[#allocation6 + $0x1d8] sm:$0xff] %vm2759_vm2, %v12912_v5  ;;  %2786 = vst.msk [vmem:[#allocation2 + $0xd0] sm:$0xff] %vm2759_vm2, %v2753_v12  ;;  %v2194_v4 = vpop.f32.mrb[80].mxu0 }
 0x297   : > { %v12917_v23 = vld [vmem:[#allocation2 + $0xb9] sm:$0xff]  ;;  %3583 = vrot.lane.b32.xlu0 %v3061_v22, %s10808_s16  ;;  %2848 = vst.msk [vmem:[#allocation6 + $0x240] sm:$0xff] %vm2759_vm2, %v12915_v17  ;;  %v2465_v29 = vmax.f32 %v2415_v59, 0.0  ;;  %v2196_v31 = vpop.f32.mrb[81].mxu0 }
 0x298   : > { %3328 = vrot.lane.b32.xlu1 %v12689_v9, %s10809_s17  ;;  %3488 = vst.msk [vmem:[#allocation6 + $0x200] sm:$0xff] %vm2759_vm2, %v12917_v23 }
 0x299   : > { %v2754_v27 = vsel %vm2722_vm1, %v2465_v29, 0.0  ;;  %v12931_v15 = vld [vmem:[#allocation2 + $0xc1] sm:$0xff] }
 0x29a   : > { %v12933_v52 = vld [vmem:[#allocation2 + $0xc8] sm:$0xff]  ;;  %2787 = vst.msk [vmem:[#allocation2 + $0xd8] sm:$0xff] %vm2759_vm2, %v2754_v27  ;;  %v2199_v40 = vpop.f32.mrb[82].mxu0  ;;  %3489 = vst.msk [vmem:[#allocation6 + $0x218] sm:$0xff] %vm2759_vm2, %v12931_v15 }
 0x29b   : > { %3963 = vrot.lane.b32.xlu0 %v12687_v56, %s10809_s17  ;;  %2849 = vst.msk [vmem:[#allocation6 + $0x258] sm:$0xff] %vm2759_vm2, %v12933_v52  ;;  %v4095_v22 = vld [vmem:[#allocation2 + $0xc2] sm:$0xff]  ;;  %v2201_v6 = vpop.f32.mrb[83].mxu0 }
 0x29c   : > { %3773 = vrot.lane.b32.xlu1 %v12689_v9, %s10806_s25  ;;  %4127 = vst.msk [vmem:[#allocation6 + $0x1f0] sm:$0xff] %vm2759_vm2, %v4095_v22 }
 0x29d   : > { %v12945_v3 = vld [vmem:[#allocation2 + $0xca] sm:$0xff] }
 0x29e   : > { %v12947_v25 = vld [vmem:[#allocation2 + $0xd0] sm:$0xff]  ;;  %4128 = vst.msk [vmem:[#allocation6 + $0x208] sm:$0xff] %vm2759_vm2, %v12945_v3  ;;  %v2204_v56 = vpop.f32.mrb[84].mxu0 }
 0x29f   : > { %v12949_v10 = vld [vmem:[#allocation2 + $0xc9] sm:$0xff]  ;;  %3330 = vrot.lane.b32.xlu0 %v12709_v35, %s10809_s17  ;;  %2850 = vst.msk [vmem:[#allocation6 + $0x270] sm:$0xff] %vm2759_vm2, %v12947_v25  ;;  %v2206_v9 = vpop.f32.mrb[85].mxu0 }
 0x2a0   : > { %2946 = vrot.lane.b32.xlu1 %v12711_v38, %s10808_s16  ;;  %3490 = vst.msk [vmem:[#allocation6 + $0x230] sm:$0xff] %vm2759_vm2, %v12949_v10  ;;  %v3067_v9 = vld [vmem:[#allocation2 + $0x92] sm:$0xff] }
 0x2a1   : > { %v12961_v12 = vld [vmem:[#allocation2 + $0xd1] sm:$0xff]  ;;  %v12965_v4 = vld [vmem:[#allocation2 + $0xd9] sm:$0xff] }
 0x2a2   : > { %v12963_v59 = vld [vmem:[#allocation2 + $0xd2] sm:$0xff]  ;;  %v2209_v29 = vpop.f32.mrb[86].mxu0  ;;  %v12971_v31 = vld [vmem:[#allocation2 + $0xda] sm:$0xff]  ;;  %3491 = vst.msk [vmem:[#allocation6 + $0x248] sm:$0xff] %vm2759_vm2, %v12961_v12  ;;  %3492 = vst.msk [vmem:[#allocation6 + $0x260] sm:$0xff] %vm2759_vm2, %v12965_v4 }
 0x2a3   : > { %3775 = vrot.lane.b32.xlu0 %v12709_v35, %s10806_s25  ;;  %v12973_v27 = vld [vmem:[#allocation2 + $0xd8] sm:$0xff]  ;;  %4129 = vst.msk [vmem:[#allocation6 + $0x220] sm:$0xff] %vm2759_vm2, %v12963_v59  ;;  %v2211_v40 = vpop.f32.mrb[87].mxu0  ;;  %4130 = vst.msk [vmem:[#allocation6 + $0x238] sm:$0xff] %vm2759_vm2, %v12971_v31 }
 0x2a4   : > { %3139 = vrot.lane.b32.xlu1 %v12706_v48, %s10806_s25  ;;  %2851 = vst.msk [vmem:[#allocation6 + $0x288] sm:$0xff] %vm2759_vm2, %v12973_v27  ;;  %v3063_v35 = vld [vmem:[#allocation2 + $0x72] sm:$0xff] }
 0x2a7   : > { %2948 = vrot.lane.b32.xlu0 %v12730_v7, %s10808_s16 }
 0x2a8   : > { %3585 = vrot.lane.b32.xlu1 %v12706_v48, %s10808_s16  ;;  %v3065_v48 = vld [vmem:[#allocation2 + $0x82] sm:$0xff] }
 0x2ab   : > { %3141 = vrot.lane.b32.xlu0 %v3063_v35, %s10806_s25 }
 0x2ac   : > { %3965 = vrot.lane.b32.xlu1 %v12711_v38, %s10809_s17 }
 0x2af   : > { %3587 = vrot.lane.b32.xlu0 %v3063_v35, %s10808_s16 }
 0x2b0   : > { %3332 = vrot.lane.b32.xlu1 %v12732_v62, %s10809_s17 }
 0x2b3   : > { %3967 = vrot.lane.b32.xlu0 %v12730_v7, %s10809_s17 }
 0x2b4   : > { %3777 = vrot.lane.b32.xlu1 %v12732_v62, %s10806_s25 }
 0x2b7   : > { %3334 = vrot.lane.b32.xlu0 %v12752_v11, %s10809_s17 }
 0x2b8   : > { %2950 = vrot.lane.b32.xlu1 %v12754_v0, %s10808_s16 }
 0x2bb   : > { %3779 = vrot.lane.b32.xlu0 %v12752_v11, %s10806_s25  ;;  %v10390_v11 = vpop.f32.mrb[28].mxu1 }
 0x2bc   : > { %3143 = vrot.lane.b32.xlu1 %v12749_v51, %s10806_s25 }
 0x2bf   : > { %2952 = vrot.lane.b32.xlu0 %v12773_v24, %s10808_s16 }
 0x2c0   : > { %3589 = vrot.lane.b32.xlu1 %v12749_v51, %s10808_s16 }
 0x2c3   : > { %3145 = vrot.lane.b32.xlu0 %v3065_v48, %s10806_s25 }
 0x2c4   : > { %3969 = vrot.lane.b32.xlu1 %v12754_v0, %s10809_s17 }
 0x2c7   : > { %3591 = vrot.lane.b32.xlu0 %v3065_v48, %s10808_s16 }
 0x2c8   : > { %3336 = vrot.lane.b32.xlu1 %v12775_v16, %s10809_s17 }
 0x2c9   : > { %v3319_v38 = vpop.permute.xlu0 %3318 }
 0x2ca   : > { %v2935_v7 = vpop.permute.xlu1 %2934  ;;  %3409 = vst.msk [vmem:[#allocation6 + $0x90] sm:$0xff] %vm3402_vm5, %v3319_v38 }
 0x2cb   : > { %3024 = vst.msk [vmem:[#allocation6 + $0xa8] sm:$0xff] %vm3016_vm3, %v2935_v7  ;;  %3338 = vrot.lane.b32.xlu0 %v12794_v8, %s10809_s17 }
 0x2cc   : > { %3781 = vrot.lane.b32.xlu1 %v12775_v16, %s10806_s25  ;;  %v2419_v16 = vpop.f32.mrb[29].mxu1 }
 0x2cd   : > { %v3764_v62 = vpop.permute.xlu0 %3763  ;;  %v10393_v6 = vpop.f32.mrb[30].mxu1 }
 0x2ce   : > { %v3128_v51 = vpop.permute.xlu1 %3127  ;;  %3855 = vst.msk [vmem:[#allocation6 + $0x68] sm:$0xff] %vm3209_vm4, %v3764_v62  ;;  %v2429_v29 = vpop.f32.mrb[31].mxu1 }
 0x2cf   : > { %3217 = vst.msk [vmem:[#allocation6 + $0xa8] sm:$0xff] %vm3209_vm4, %v3128_v51  ;;  %3783 = vrot.lane.b32.xlu0 %v12794_v8, %s10806_s25 }
 0x2d0   : > { %2954 = vrot.lane.b32.xlu1 %v12796_v45, %s10808_s16 }
 0x2d1   : > { %v2937_v0 = vpop.permute.xlu0 %2936 }
 0x2d2   : > { %v3574_v22 = vpop.permute.xlu1 %3573  ;;  %3025 = vst.msk [vmem:[#allocation6 + $0xc0] sm:$0xff] %vm3016_vm3, %v2937_v0 }
 0x2d3   : > { %3664 = vst.msk [vmem:[#allocation6 + $0x80] sm:$0xff] %vm3016_vm3, %v3574_v22  ;;  %2956 = vrot.lane.b32.xlu0 %v12814_v34, %s10808_s16 }
 0x2d4   : > { %3147 = vrot.lane.b32.xlu1 %v12791_v14, %s10806_s25 }
 0x2d5   : > { %v3130_v56 = vpop.permute.xlu0 %3129 }
 0x2d6   : > { %v3954_v8 = vpop.permute.xlu1 %3953  ;;  %3218 = vst.msk [vmem:[#allocation6 + $0xc0] sm:$0xff] %vm3209_vm4, %v3130_v56 }
 0x2d7   : > { %4046 = vst.msk [vmem:[#allocation6 + $0x50] sm:$0xff] %vm3402_vm5, %v3954_v8  ;;  %3149 = vrot.lane.b32.xlu0 %v3067_v9, %s10806_s25 }
 0x2d8   : > { %3593 = vrot.lane.b32.xlu1 %v12791_v14, %s10808_s16  ;;  %v4148_v14 = vld [vmem:[#allocation6 + $0x48] sm:$0xff] }
 0x2d9   : > { %v3576_v40 = vpop.permute.xlu0 %3575 }
 0x2da   : > { %v3321_v35 = vpop.permute.xlu1 %3320  ;;  %3665 = vst.msk [vmem:[#allocation6 + $0x98] sm:$0xff] %vm3016_vm3, %v3576_v40  ;;  %v3069_v40 = vld [vmem:[#allocation2 + $0xa2] sm:$0xff] }
 0x2db   : > { %3410 = vst.msk [vmem:[#allocation6 + $0xa8] sm:$0xff] %vm3402_vm5, %v3321_v35  ;;  %3595 = vrot.lane.b32.xlu0 %v3067_v9, %s10808_s16 }
 0x2dc   : > { %3340 = vrot.lane.b32.xlu1 %v12816_v20, %s10809_s17 }
 0x2dd   : > { %v3956_v48 = vpop.permute.xlu0 %3955 }
 0x2de   : > { %v3766_v38 = vpop.permute.xlu1 %3765  ;;  %v4149_v7 = vld [vmem:[#allocation6 + $0x50] sm:$0xff]  ;;  %4047 = vst.msk [vmem:[#allocation6 + $0x68] sm:$0xff] %vm3402_vm5, %v3956_v48  ;;  %v4440_v62 = vpop.f32.mrb[32].mxu1 }
 0x2df   : > { %3856 = vst.msk [vmem:[#allocation6 + $0x80] sm:$0xff] %vm3209_vm4, %v3766_v38  ;;  %4453 = vmatprep.mubr.f32.mxu1 %v4149_v7  ;;  %3342 = vrot.lane.b32.xlu0 %v12836_v61, %s10809_s17  ;;  %v4442_v0 = vpop.f32.mrb[33].mxu1 }
 0x2e0   : > { %3785 = vrot.lane.b32.xlu1 %v12816_v20, %s10806_s25  ;;  %4454 = vmatmul.mubr.f32.gmra.mrb[38].mxu1 %v4148_v14 }
 0x2e1   : > { %v3323_v51 = vpop.permute.xlu0 %3322 }
 0x2e2   : > { %v2939_v11 = vpop.permute.xlu1 %2938  ;;  %3411 = vst.msk [vmem:[#allocation6 + $0xc0] sm:$0xff] %vm3402_vm5, %v3323_v51  ;;  %v4445_v22 = vpop.f32.mrb[34].mxu1 }
 0x2e3   : > { %3026 = vst.msk [vmem:[#allocation6 + $0xd8] sm:$0xff] %vm3016_vm3, %v2939_v11  ;;  %3787 = vrot.lane.b32.xlu0 %v12836_v61, %s10806_s25  ;;  %v4447_v56 = vpop.f32.mrb[35].mxu1  ;;  %v4151_v61 = vld [vmem:[#allocation6 + $0x60] sm:$0xff]  ;;  %v4154_v11 = vld [vmem:[#allocation6 + $0x78] sm:$0xff] }
 0x2e4   : > { %2958 = vrot.lane.b32.xlu1 %v12838_v49, %s10808_s16 }
 0x2e5   : > { %v3768_v16 = vpop.permute.xlu0 %3767  ;;  %v4152_v20 = vld [vmem:[#allocation6 + $0x68] sm:$0xff] }
 0x2e6   : > { %v3132_v6 = vpop.permute.xlu1 %3131  ;;  %3857 = vst.msk [vmem:[#allocation6 + $0x98] sm:$0xff] %vm3209_vm4, %v3768_v16  ;;  %4458 = vmatprep.mubr.f32.mxu1 %v4152_v20  ;;  %v4450_v8 = vpop.f32.mrb[36].mxu1  ;;  %v4157_v20 = vld [vmem:[#allocation6 + $0x90] sm:$0xff] }
 0x2e7   : > { %3219 = vst.msk [vmem:[#allocation6 + $0xd8] sm:$0xff] %vm3209_vm4, %v3132_v6  ;;  %2960 = vrot.lane.b32.xlu0 %v12860_v43, %s10808_s16  ;;  %4459 = vmatmul.mubr.f32.gmra.mrb[40].mxu1 %v4151_v61  ;;  %v4452_v35 = vpop.f32.mrb[37].mxu1  ;;  %v3071_v6 = vld [vmem:[#allocation2 + $0xb2] sm:$0xff] }
 0x2e8   : > { %3151 = vrot.lane.b32.xlu1 %v12833_v19, %s10806_s25 }
 0x2e9   : > { %v2941_v9 = vpop.permute.xlu0 %2940 }
 0x2ea   : > { %v3578_v29 = vpop.permute.xlu1 %3577  ;;  %3027 = vst.msk [vmem:[#allocation6 + $0xf0] sm:$0xff] %vm3016_vm3, %v2941_v9 }
 0x2eb   : > { %3666 = vst.msk [vmem:[#allocation6 + $0xb0] sm:$0xff] %vm3016_vm3, %v3578_v29  ;;  %3153 = vrot.lane.b32.xlu0 %v3069_v40, %s10806_s25  ;;  %v4268_v29 = vld [vmem:[%s16180_s3 + $0x108] sm:$0xff] }
 0x2ec   : > { %3597 = vrot.lane.b32.xlu1 %v12833_v19, %s10808_s16 }
 0x2ed   : > { %v3134_v48 = vpop.permute.xlu0 %3133 }
 0x2ee   : > { %v3958_v38 = vpop.permute.xlu1 %3957  ;;  %3220 = vst.msk [vmem:[#allocation6 + $0xf0] sm:$0xff] %vm3209_vm4, %v3134_v48 }
 0x2ef   : > { %4048 = vst.msk [vmem:[#allocation6 + $0x80] sm:$0xff] %vm3402_vm5, %v3958_v38  ;;  %3599 = vrot.lane.b32.xlu0 %v3069_v40, %s10808_s16 }
 0x2f0   : > { %3344 = vrot.lane.b32.xlu1 %v12862_v41, %s10809_s17 }
 0x2f1   : > { %v3580_v7 = vpop.permute.xlu0 %3579 }
 0x2f2   : > { %v3325_v14 = vpop.permute.xlu1 %3324  ;;  %3667 = vst.msk [vmem:[#allocation6 + $0xc8] sm:$0xff] %vm3016_vm3, %v3580_v7 }
 0x2f3   : > { %3412 = vst.msk [vmem:[#allocation6 + $0xd8] sm:$0xff] %vm3402_vm5, %v3325_v14  ;;  %3346 = vrot.lane.b32.xlu0 %v12880_v32, %s10809_s17 }
 0x2f4   : > { %3789 = vrot.lane.b32.xlu1 %v12862_v41, %s10806_s25 }
 0x2f5   : > { %v3960_v19 = vpop.permute.xlu0 %3959 }
 0x2f6   : > { %v3770_v62 = vpop.permute.xlu1 %3769  ;;  %v4155_v51 = vld [vmem:[#allocation6 + $0x80] sm:$0xff]  ;;  %4049 = vst.msk [vmem:[#allocation6 + $0x98] sm:$0xff] %vm3402_vm5, %v3960_v19 }
 0x2f7   : > { %3858 = vst.msk [vmem:[#allocation6 + $0xb0] sm:$0xff] %vm3209_vm4, %v3770_v62  ;;  %4463 = vmatprep.mubr.f32.mxu1 %v4155_v51  ;;  %3791 = vrot.lane.b32.xlu0 %v12880_v32, %s10806_s25  ;;  %v3073_v62 = vld [vmem:[#allocation2 + $0xc2] sm:$0xff] }
 0x2f8   : > { %2962 = vrot.lane.b32.xlu1 %v12882_v26, %s10808_s16  ;;  %4464 = vmatmul.mubr.f32.gmra.mrb[42].mxu1 %v4154_v11 }
 0x2f9   : > { %v3327_v0 = vpop.permute.xlu0 %3326 }
 0x2fa   : > { %v2943_v22 = vpop.permute.xlu1 %2942  ;;  %3413 = vst.msk [vmem:[#allocation6 + $0xf0] sm:$0xff] %vm3402_vm5, %v3327_v0 }
 0x2fb   : > { %3028 = vst.msk [vmem:[#allocation6 + $0x108] sm:$0xff] %vm3016_vm3, %v2943_v22  ;;  %2964 = vrot.lane.b32.xlu0 %v12897_v44, %s10808_s16  ;;  %v4163_v22 = vld [vmem:[#allocation6 + $0xc0] sm:$0xff] }
 0x2fc   : > { %3155 = vrot.lane.b32.xlu1 %v12877_v42, %s10806_s25 }
 0x2fd   : > { %v3772_v41 = vpop.permute.xlu0 %3771  ;;  %v4158_v32 = vld [vmem:[#allocation6 + $0x98] sm:$0xff] }
 0x2fe   : > { %v3136_v16 = vpop.permute.xlu1 %3135  ;;  %3859 = vst.msk [vmem:[#allocation6 + $0xc8] sm:$0xff] %vm3209_vm4, %v3772_v41  ;;  %4468 = vmatprep.mubr.f32.mxu1 %v4158_v32 }
 0x2ff   : > { %3221 = vst.msk [vmem:[#allocation6 + $0x108] sm:$0xff] %vm3209_vm4, %v3136_v16  ;;  %3157 = vrot.lane.b32.xlu0 %v3071_v6, %s10806_s25  ;;  %4469 = vmatmul.mubr.f32.gmra.mrb[44].mxu1 %v4157_v20 }
 0x300   : > { %3601 = vrot.lane.b32.xlu1 %v12877_v42, %s10808_s16  ;;  %v4267_v42 = vld [vmem:[%s16180_s3 + $0x100] sm:$0xff] }
 0x301   : > { %v2945_v56 = vpop.permute.xlu0 %2944  ;;  %v10610_v40 = vpack.c.bf16 %v4268_v29, %v4267_v42 }
 0x302   : > { %v3582_v61 = vpop.permute.xlu1 %3581  ;;  %3029 = vst.msk [vmem:[#allocation6 + $0x120] sm:$0xff] %vm3016_vm3, %v2945_v56 }
 0x303   : > { %3668 = vst.msk [vmem:[#allocation6 + $0xe0] sm:$0xff] %vm3016_vm3, %v3582_v61  ;;  %3603 = vrot.lane.b32.xlu0 %v3071_v6, %s10808_s16  ;;  %10611 = vmatprep.subr.bf16.mxu1 %v10610_v40 }
 0x304   : > { %3348 = vrot.lane.b32.xlu1 %v12899_v50, %s10809_s17  ;;  %10613 = vmatpush3.bf16.msra.mxu1 %v10610_v40 }
 0x305   : > { %v3138_v8 = vpop.permute.xlu0 %3137 }
 0x306   : > { %v3962_v9 = vpop.permute.xlu1 %3961  ;;  %3222 = vst.msk [vmem:[#allocation6 + $0x120] sm:$0xff] %vm3209_vm4, %v3138_v8 }
 0x307   : > { %4050 = vst.msk [vmem:[#allocation6 + $0xb0] sm:$0xff] %vm3402_vm5, %v3962_v9  ;;  %3350 = vrot.lane.b32.xlu0 %v12915_v17, %s10809_s17 }
 0x308   : > { %3793 = vrot.lane.b32.xlu1 %v12899_v50, %s10806_s25  ;;  %v4160_v50 = vld [vmem:[#allocation6 + $0xa8] sm:$0xff] }
 0x309   : > { %v3584_v35 = vpop.permute.xlu0 %3583 }
 0x30a   : > { %v3329_v48 = vpop.permute.xlu1 %3328  ;;  %3669 = vst.msk [vmem:[#allocation6 + $0xf8] sm:$0xff] %vm3016_vm3, %v3584_v35 }
 0x30b   : > { %3414 = vst.msk [vmem:[#allocation6 + $0x108] sm:$0xff] %vm3402_vm5, %v3329_v48  ;;  %3795 = vrot.lane.b32.xlu0 %v12915_v17, %s10806_s25 }
 0x30c   : > { %2966 = vrot.lane.b32.xlu1 %v12917_v23, %s10808_s16 }
 0x30d   : > { %v3964_v38 = vpop.permute.xlu0 %3963 }
 0x30e   : > { %v3774_v7 = vpop.permute.xlu1 %3773  ;;  %v4161_v14 = vld [vmem:[#allocation6 + $0xb0] sm:$0xff]  ;;  %4051 = vst.msk [vmem:[#allocation6 + $0xc8] sm:$0xff] %vm3402_vm5, %v3964_v38 }
 0x30f   : > { %3860 = vst.msk [vmem:[#allocation6 + $0xe0] sm:$0xff] %vm3209_vm4, %v3774_v7  ;;  %4473 = vmatprep.mubr.f32.mxu1 %v4161_v14  ;;  %2968 = vrot.lane.b32.xlu0 %v12931_v15, %s10808_s16 }
 0x310   : > { %3159 = vrot.lane.b32.xlu1 %v12912_v5, %s10806_s25  ;;  %4474 = vmatmul.mubr.f32.gmra.mrb[46].mxu1 %v4160_v50 }
 0x311   : > { %v3331_v17 = vpop.permute.xlu0 %3330 }
 0x312   : > { %v2947_v19 = vpop.permute.xlu1 %2946  ;;  %3415 = vst.msk [vmem:[#allocation6 + $0x120] sm:$0xff] %vm3402_vm5, %v3331_v17 }
 0x313   : > { %3030 = vst.msk [vmem:[#allocation6 + $0x138] sm:$0xff] %vm3016_vm3, %v2947_v19  ;;  %3161 = vrot.lane.b32.xlu0 %v3073_v62, %s10806_s25  ;;  %v4270_v19 = vld [vmem:[%s16180_s3 + $0x118] sm:$0xff] }
 0x314   : > { %3605 = vrot.lane.b32.xlu1 %v12912_v5, %s10808_s16 }
 0x315   : > { %v3776_v51 = vpop.permute.xlu0 %3775  ;;  %v4164_v0 = vld [vmem:[#allocation6 + $0xc8] sm:$0xff] }
 0x316   : > { %v3140_v11 = vpop.permute.xlu1 %3139  ;;  %3861 = vst.msk [vmem:[#allocation6 + $0xf8] sm:$0xff] %vm3209_vm4, %v3776_v51  ;;  %4478 = vmatprep.mubr.f32.mxu1 %v4164_v0 }
 0x317   : > { %3223 = vst.msk [vmem:[#allocation6 + $0x138] sm:$0xff] %vm3209_vm4, %v3140_v11  ;;  %3607 = vrot.lane.b32.xlu0 %v3073_v62, %s10808_s16  ;;  %4479 = vmatmul.mubr.f32.gmra.mrb[48].mxu1 %v4163_v22  ;;  %v3911_v11 = vld [vmem:[#allocation2 + $0x101] sm:$0xff]  ;;  %v3913_v22 = vld [vmem:[#allocation2 + $0x111] sm:$0xff] }
 0x318   : > { %3352 = vrot.lane.b32.xlu1 %v12933_v52, %s10809_s17 }
 0x319   : > { %v2949_v41 = vpop.permute.xlu0 %2948 }
 0x31a   : > { %v3586_v16 = vpop.permute.xlu1 %3585  ;;  %3031 = vst.msk [vmem:[#allocation6 + $0x150] sm:$0xff] %vm3016_vm3, %v2949_v41 }
 0x31b   : > { %3670 = vst.msk [vmem:[#allocation6 + $0x110] sm:$0xff] %vm3016_vm3, %v3586_v16  ;;  %3354 = vrot.lane.b32.xlu0 %v12947_v25, %s10809_s17 }
 0x31c   : > { %3797 = vrot.lane.b32.xlu1 %v12933_v52, %s10806_s25 }
 0x31d   : > { %v3142_v5 = vpop.permute.xlu0 %3141 }
 0x31e   : > { %v3966_v32 = vpop.permute.xlu1 %3965  ;;  %3224 = vst.msk [vmem:[#allocation6 + $0x150] sm:$0xff] %vm3209_vm4, %v3142_v5 }
 0x31f   : > { %4052 = vst.msk [vmem:[#allocation6 + $0xe0] sm:$0xff] %vm3402_vm5, %v3966_v32  ;;  %3799 = vrot.lane.b32.xlu0 %v12947_v25, %s10806_s25  ;;  %v4166_v25 = vld [vmem:[#allocation6 + $0xd8] sm:$0xff] }
 0x320   : > { %2970 = vrot.lane.b32.xlu1 %v12949_v10, %s10808_s16 }
 0x321   : > { %v3588_v6 = vpop.permute.xlu0 %3587 }
 0x322   : > { %v3333_v20 = vpop.permute.xlu1 %3332  ;;  %3671 = vst.msk [vmem:[#allocation6 + $0x128] sm:$0xff] %vm3016_vm3, %v3588_v6 }
 0x323   : > { %3416 = vst.msk [vmem:[#allocation6 + $0x138] sm:$0xff] %vm3402_vm5, %v3333_v20  ;;  %2972 = vrot.lane.b32.xlu0 %v12961_v12, %s10808_s16 }
 0x324   : > { %3163 = vrot.lane.b32.xlu1 %v12945_v3, %s10806_s25 }
 0x325   : > { %v3968_v52 = vpop.permute.xlu0 %3967 }
 0x326   : > { %v3778_v56 = vpop.permute.xlu1 %3777  ;;  %v4167_v61 = vld [vmem:[#allocation6 + $0xe0] sm:$0xff]  ;;  %4053 = vst.msk [vmem:[#allocation6 + $0xf8] sm:$0xff] %vm3402_vm5, %v3968_v52 }
 0x327   : > { %3862 = vst.msk [vmem:[#allocation6 + $0x110] sm:$0xff] %vm3209_vm4, %v3778_v56  ;;  %4483 = vmatprep.mubr.f32.mxu1 %v4167_v61  ;;  %3165 = vrot.lane.b32.xlu0 %v12963_v59, %s10806_s25  ;;  %v3914_v61 = vld [vmem:[#allocation2 + $0x119] sm:$0xff] }
 0x328   : > { %3609 = vrot.lane.b32.xlu1 %v12945_v3, %s10808_s16  ;;  %4484 = vmatmul.mubr.f32.gmra.mrb[50].mxu1 %v4166_v25  ;;  %v4169_v3 = vld [vmem:[#allocation6 + $0xf0] sm:$0xff] }
 0x329   : > { %v3335_v8 = vpop.permute.xlu0 %3334 }
 0x32a   : > { %v2951_v9 = vpop.permute.xlu1 %2950  ;;  %3417 = vst.msk [vmem:[#allocation6 + $0x150] sm:$0xff] %vm3402_vm5, %v3335_v8 }
 0x32b   : > { %3032 = vst.msk [vmem:[#allocation6 + $0x168] sm:$0xff] %vm3016_vm3, %v2951_v9  ;;  %3611 = vrot.lane.b32.xlu0 %v12963_v59, %s10808_s16 }
 0x32c   : > { %2974 = vrot.lane.b32.xlu1 %v12965_v4, %s10808_s16 }
 0x32d   : > { %v3780_v42 = vpop.permute.xlu0 %3779  ;;  %v4170_v40 = vld [vmem:[#allocation6 + $0xf8] sm:$0xff] }
 0x32e   : > { %v3144_v29 = vpop.permute.xlu1 %3143  ;;  %3863 = vst.msk [vmem:[#allocation6 + $0x128] sm:$0xff] %vm3209_vm4, %v3780_v42  ;;  %4488 = vmatprep.mubr.f32.mxu1 %v4170_v40 }
 0x32f   : > { %3225 = vst.msk [vmem:[#allocation6 + $0x168] sm:$0xff] %vm3209_vm4, %v3144_v29  ;;  %3971 = vrot.lane.b32.xlu0 %v12773_v24, %s10809_s17  ;;  %4489 = vmatmul.mubr.f32.gmra.mrb[52].mxu1 %v4169_v3 }
 0x330   : > { %3167 = vrot.lane.b32.xlu1 %v12971_v31, %s10806_s25 }
 0x331   : > { %v2953_v59 = vpop.permute.xlu0 %2952 }
 0x332   : > { %v3590_v35 = vpop.permute.xlu1 %3589  ;;  %3033 = vst.msk [vmem:[#allocation6 + $0x180] sm:$0xff] %vm3016_vm3, %v2953_v59 }
 0x333   : > { %3672 = vst.msk [vmem:[#allocation6 + $0x140] sm:$0xff] %vm3016_vm3, %v3590_v35  ;;  %3975 = vrot.lane.b32.xlu0 %v12814_v34, %s10809_s17 }
 0x334   : > { %3356 = vrot.lane.b32.xlu1 %v12973_v27, %s10809_s17 }
 0x335   : > { %v3146_v48 = vpop.permute.xlu0 %3145 }
 0x336   : > { %v3970_v38 = vpop.permute.xlu1 %3969  ;;  %3226 = vst.msk [vmem:[#allocation6 + $0x180] sm:$0xff] %vm3209_vm4, %v3146_v48 }
 0x337   : > { %4054 = vst.msk [vmem:[#allocation6 + $0x110] sm:$0xff] %vm3402_vm5, %v3970_v38  ;;  %3979 = vrot.lane.b32.xlu0 %v12860_v43, %s10809_s17  ;;  %v4172_v43 = vld [vmem:[#allocation6 + $0x108] sm:$0xff] }
 0x338   : > { %3613 = vrot.lane.b32.xlu1 %v12971_v31, %s10808_s16 }
 0x339   : > { %v3592_v24 = vpop.permute.xlu0 %3591 }
 0x33a   : > { %v3337_v7 = vpop.permute.xlu1 %3336  ;;  %3673 = vst.msk [vmem:[#allocation6 + $0x158] sm:$0xff] %vm3016_vm3, %v3592_v24 }
 0x33b   : > { %3418 = vst.msk [vmem:[#allocation6 + $0x168] sm:$0xff] %vm3402_vm5, %v3337_v7  ;;  %3983 = vrot.lane.b32.xlu0 %v12897_v44, %s10809_s17 }
 0x33c   : > { %3801 = vrot.lane.b32.xlu1 %v12973_v27, %s10806_s25  ;;  %v3907_v27 = vld [vmem:[#allocation2 + $0xe1] sm:$0xff] }
 0x33d   : > { %v3339_v34 = vpop.permute.xlu0 %3338 }
 0x33e   : > { %v3782_v14 = vpop.permute.xlu1 %3781  ;;  %v4173_v50 = vld [vmem:[#allocation6 + $0x110] sm:$0xff]  ;;  %3419 = vst.msk [vmem:[#allocation6 + $0x180] sm:$0xff] %vm3402_vm5, %v3339_v34 }
 0x33f   : > { %3864 = vst.msk [vmem:[#allocation6 + $0x140] sm:$0xff] %vm3209_vm4, %v3782_v14  ;;  %4493 = vmatprep.mubr.f32.mxu1 %v4173_v50  ;;  %3987 = vrot.lane.b32.xlu0 %v12931_v15, %s10809_s17 }
 0x340   : > { %3973 = vrot.lane.b32.xlu1 %v12796_v45, %s10809_s17  ;;  %4494 = vmatmul.mubr.f32.gmra.mrb[54].mxu1 %v4172_v43  ;;  %v4269_v45 = vld [vmem:[%s16180_s3 + $0x110] sm:$0xff]  ;;  %v4075_v43 = vld [vmem:[#allocation2 + $0x22] sm:$0xff] }
 0x341   : > { %v3784_v44 = vpop.permute.xlu0 %3783  ;;  %4107 = vst.msk [vmem:[#allocation6 + $0x10] sm:$0xff] %vm2759_vm2, %v4075_v43  ;;  %v4181_v43 = vld [vmem:[#allocation6 + $0x150] sm:$0xff] }
 0x342   : > { %v2955_v31 = vpop.permute.xlu1 %2954  ;;  %3865 = vst.msk [vmem:[#allocation6 + $0x158] sm:$0xff] %vm3209_vm4, %v3784_v44  ;;  %v4076_v44 = vld [vmem:[#allocation2 + $0x2a] sm:$0xff] }
 0x343   : > { %3034 = vst.msk [vmem:[#allocation6 + $0x198] sm:$0xff] %vm3016_vm3, %v2955_v31  ;;  %3991 = vrot.lane.b32.xlu0 %v12961_v12, %s10809_s17  ;;  %v3909_v12 = vld [vmem:[#allocation2 + $0xf1] sm:$0xff] }
 0x344   : > { %3977 = vrot.lane.b32.xlu1 %v12838_v49, %s10809_s17  ;;  %v10614_v49 = vpack.c.bf16 %v4270_v19, %v4269_v45  ;;  %4108 = vst.msk [vmem:[#allocation6 + $0x28] sm:$0xff] %vm2759_vm2, %v4076_v44 }
 0x345   : > { %v2957_v17 = vpop.permute.xlu0 %2956 }
 0x346   : > { %v3148_v15 = vpop.permute.xlu1 %3147  ;;  %3035 = vst.msk [vmem:[#allocation6 + $0x1b0] sm:$0xff] %vm3016_vm3, %v2957_v17  ;;  %10615 = vmatprep.subr.bf16.mxu1 %v10614_v49  ;;  %v4077_v17 = vld [vmem:[#allocation2 + $0x32] sm:$0xff] }
 0x347   : > { %3227 = vst.msk [vmem:[#allocation6 + $0x198] sm:$0xff] %vm3209_vm4, %v3148_v15  ;;  %3995 = vrot.lane.b32.xlu0 %v3907_v27, %s10809_s17  ;;  %10617 = vmatpush3.bf16.msra.mxu1 %v10614_v49 }
 0x348   : > { %3981 = vrot.lane.b32.xlu1 %v12882_v26, %s10809_s17  ;;  %10618 = vmatprep.subr.bf16.mxu1 %v16207_v13  ;;  %4109 = vst.msk [vmem:[#allocation6 + $0x40] sm:$0xff] %vm2759_vm2, %v4077_v17  ;;  %v4184_v17 = vld [vmem:[#allocation6 + $0x168] sm:$0xff] }
 0x349   : > { %v3150_v62 = vpop.permute.xlu0 %3149 }
 0x34a   : > { %v3594_v51 = vpop.permute.xlu1 %3593  ;;  %3228 = vst.msk [vmem:[#allocation6 + $0x1b0] sm:$0xff] %vm3209_vm4, %v3150_v62 }
 0x34b   : > { %3674 = vst.msk [vmem:[#allocation6 + $0x170] sm:$0xff] %vm3016_vm3, %v3594_v51  ;;  %3999 = vrot.lane.b32.xlu0 %v3909_v12, %s10809_s17 }
 0x34c   : > { %3985 = vrot.lane.b32.xlu1 %v12917_v23, %s10809_s17  ;;  %v3908_v23 = vld [vmem:[#allocation2 + $0xe9] sm:$0xff] }
 0x34d   : > { %v3596_v26 = vpop.permute.xlu0 %3595 }
 0x34e   : > { %v3341_v0 = vpop.permute.xlu1 %3340  ;;  %3675 = vst.msk [vmem:[#allocation6 + $0x188] sm:$0xff] %vm3016_vm3, %v3596_v26 }
 0x34f   : > { %3420 = vst.msk [vmem:[#allocation6 + $0x198] sm:$0xff] %vm3402_vm5, %v3341_v0  ;;  %4003 = vrot.lane.b32.xlu0 %v3911_v11, %s10809_s17 }
 0x350   : > { %3989 = vrot.lane.b32.xlu1 %v12949_v10, %s10809_s17  ;;  %v3910_v10 = vld [vmem:[#allocation2 + $0xf9] sm:$0xff] }
 0x351   : > { %v3343_v41 = vpop.permute.xlu0 %3342 }
 0x352   : > { %v3786_v16 = vpop.permute.xlu1 %3785  ;;  %3421 = vst.msk [vmem:[#allocation6 + $0x1b0] sm:$0xff] %vm3402_vm5, %v3343_v41 }
 0x353   : > { %3866 = vst.msk [vmem:[#allocation6 + $0x170] sm:$0xff] %vm3209_vm4, %v3786_v16  ;;  %4007 = vrot.lane.b32.xlu0 %v3913_v22, %s10809_s17 }
 0x354   : > { %3993 = vrot.lane.b32.xlu1 %v12965_v4, %s10809_s17  ;;  %v3912_v4 = vld [vmem:[#allocation2 + $0x109] sm:$0xff] }
 0x355   : > { %v3788_v5 = vpop.permute.xlu0 %3787 }
 0x356   : > { %v2959_v32 = vpop.permute.xlu1 %2958  ;;  %3867 = vst.msk [vmem:[#allocation6 + $0x188] sm:$0xff] %vm3209_vm4, %v3788_v5 }
 0x357   : > { %3036 = vst.msk [vmem:[#allocation6 + $0x1c8] sm:$0xff] %vm3016_vm3, %v2959_v32 }
 0x358   : > { %3997 = vrot.lane.b32.xlu1 %v3908_v23, %s10809_s17 }
 0x359   : > { %v2961_v6 = vpop.permute.xlu0 %2960 }
 0x35a   : > { %v3152_v20 = vpop.permute.xlu1 %3151  ;;  %3037 = vst.msk [vmem:[#allocation6 + $0x1e0] sm:$0xff] %vm3016_vm3, %v2961_v6 }
 0x35b   : > { %3229 = vst.msk [vmem:[#allocation6 + $0x1c8] sm:$0xff] %vm3209_vm4, %v3152_v20 }
 0x35c   : > { %4001 = vrot.lane.b32.xlu1 %v3910_v10, %s10809_s17 }
 0x35d   : > { %v3154_v52 = vpop.permute.xlu0 %3153 }
 0x35e   : > { %v3598_v56 = vpop.permute.xlu1 %3597  ;;  %3230 = vst.msk [vmem:[#allocation6 + $0x1e0] sm:$0xff] %vm3209_vm4, %v3154_v52 }
 0x35f   : > { %3676 = vst.msk [vmem:[#allocation6 + $0x1a0] sm:$0xff] %vm3016_vm3, %v3598_v56  ;;  %v4099_v56 = vld [vmem:[#allocation2 + $0xe2] sm:$0xff] }
 0x360   : > { %4005 = vrot.lane.b32.xlu1 %v3912_v4, %s10809_s17  ;;  %4131 = vst.msk [vmem:[#allocation6 + $0x250] sm:$0xff] %vm2759_vm2, %v4099_v56 }
 0x361   : > { %v3600_v25 = vpop.permute.xlu0 %3599 }
 0x362   : > { %v3345_v8 = vpop.permute.xlu1 %3344  ;;  %3677 = vst.msk [vmem:[#allocation6 + $0x1b8] sm:$0xff] %vm3016_vm3, %v3600_v25 }
 0x363   : > { %3422 = vst.msk [vmem:[#allocation6 + $0x1c8] sm:$0xff] %vm3402_vm5, %v3345_v8 }
 0x364   : > { %4009 = vrot.lane.b32.xlu1 %v3914_v61, %s10809_s17  ;;  %v4100_v61 = vld [vmem:[#allocation2 + $0xea] sm:$0xff] }
 0x365   : > { %v3347_v9 = vpop.permute.xlu0 %3346  ;;  %4132 = vst.msk [vmem:[#allocation6 + $0x268] sm:$0xff] %vm2759_vm2, %v4100_v61 }
 0x366   : > { %v3790_v42 = vpop.permute.xlu1 %3789  ;;  %3423 = vst.msk [vmem:[#allocation6 + $0x1e0] sm:$0xff] %vm3402_vm5, %v3347_v9 }
 0x367   : > { %3868 = vst.msk [vmem:[#allocation6 + $0x1a0] sm:$0xff] %vm3209_vm4, %v3790_v42  ;;  %v4102_v42 = vld [vmem:[#allocation2 + $0xfa] sm:$0xff] }
 0x368   : > { %4134 = vst.msk [vmem:[#allocation6 + $0x298] sm:$0xff] %vm2759_vm2, %v4102_v42 }
 0x369   : > { %v3792_v29 = vpop.permute.xlu0 %3791 }
 0x36a   : > { %v2963_v40 = vpop.permute.xlu1 %2962  ;;  %3869 = vst.msk [vmem:[#allocation6 + $0x1b8] sm:$0xff] %vm3209_vm4, %v3792_v29 }
 0x36b   : > { %3038 = vst.msk [vmem:[#allocation6 + $0x1f8] sm:$0xff] %vm3016_vm3, %v2963_v40 }
 0x36d   : > { %v2965_v3 = vpop.permute.xlu0 %2964 }
 0x36e   : > { %v3156_v59 = vpop.permute.xlu1 %3155  ;;  %3039 = vst.msk [vmem:[#allocation6 + $0x210] sm:$0xff] %vm3016_vm3, %v2965_v3 }
 0x36f   : > { %3231 = vst.msk [vmem:[#allocation6 + $0x1f8] sm:$0xff] %vm3209_vm4, %v3156_v59 }
 0x371   : > { %v3158_v35 = vpop.permute.xlu0 %3157 }
 0x372   : > { %v3602_v48 = vpop.permute.xlu1 %3601  ;;  %3232 = vst.msk [vmem:[#allocation6 + $0x210] sm:$0xff] %vm3209_vm4, %v3158_v35 }
 0x373   : > { %3678 = vst.msk [vmem:[#allocation6 + $0x1d0] sm:$0xff] %vm3016_vm3, %v3602_v48 }
 0x375   : > { %v3604_v38 = vpop.permute.xlu0 %3603 }
 0x376   : > { %v3349_v24 = vpop.permute.xlu1 %3348  ;;  %3679 = vst.msk [vmem:[#allocation6 + $0x1e8] sm:$0xff] %vm3016_vm3, %v3604_v38  ;;  %v4178_v38 = vld [vmem:[#allocation6 + $0x138] sm:$0xff] }
 0x377   : > { %3424 = vst.msk [vmem:[#allocation6 + $0x1f8] sm:$0xff] %vm3402_vm5, %v3349_v24 }
 0x379   : > { %v3351_v7 = vpop.permute.xlu0 %3350 }
 0x37a   : > { %v3794_v34 = vpop.permute.xlu1 %3793  ;;  %3425 = vst.msk [vmem:[#allocation6 + $0x210] sm:$0xff] %vm3402_vm5, %v3351_v7 }
 0x37b   : > { %3870 = vst.msk [vmem:[#allocation6 + $0x1d0] sm:$0xff] %vm3209_vm4, %v3794_v34 }
 0x37d   : > { %v3796_v14 = vpop.permute.xlu0 %3795 }
 0x37e   : > { %v2967_v50 = vpop.permute.xlu1 %2966  ;;  %3871 = vst.msk [vmem:[#allocation6 + $0x1e8] sm:$0xff] %vm3209_vm4, %v3796_v14 }
 0x37f   : > { %3040 = vst.msk [vmem:[#allocation6 + $0x228] sm:$0xff] %vm3016_vm3, %v2967_v50 }
 0x381   : > { %v2969_v31 = vpop.permute.xlu0 %2968 }
 0x382   : > { %v3160_v27 = vpop.permute.xlu1 %3159  ;;  %3041 = vst.msk [vmem:[#allocation6 + $0x240] sm:$0xff] %vm3016_vm3, %v2969_v31 }
 0x383   : > { %3233 = vst.msk [vmem:[#allocation6 + $0x228] sm:$0xff] %vm3209_vm4, %v3160_v27 }
 0x385   : > { %v3162_v15 = vpop.permute.xlu0 %3161 }
 0x386   : > { %v3606_v45 = vpop.permute.xlu1 %3605  ;;  %3234 = vst.msk [vmem:[#allocation6 + $0x240] sm:$0xff] %vm3209_vm4, %v3162_v15 }
 0x387   : > { %3680 = vst.msk [vmem:[#allocation6 + $0x200] sm:$0xff] %vm3016_vm3, %v3606_v45 }
 0x389   : > { %v3608_v19 = vpop.permute.xlu0 %3607 }
 0x38a   : > { %v3353_v49 = vpop.permute.xlu1 %3352  ;;  %3681 = vst.msk [vmem:[#allocation6 + $0x218] sm:$0xff] %vm3016_vm3, %v3608_v19 }
 0x38b   : > { %3426 = vst.msk [vmem:[#allocation6 + $0x228] sm:$0xff] %vm3402_vm5, %v3353_v49  ;;  %v4187_v49 = vld [vmem:[#allocation6 + $0x180] sm:$0xff] }
 0x38d   : > { %v3355_v12 = vpop.permute.xlu0 %3354 }
 0x38e   : > { %v3798_v62 = vpop.permute.xlu1 %3797  ;;  %3427 = vst.msk [vmem:[#allocation6 + $0x240] sm:$0xff] %vm3402_vm5, %v3355_v12 }
 0x38f   : > { %3872 = vst.msk [vmem:[#allocation6 + $0x200] sm:$0xff] %vm3209_vm4, %v3798_v62 }
 0x391   : > { %v3800_v51 = vpop.permute.xlu0 %3799 }
 0x392   : > { %v2971_v11 = vpop.permute.xlu1 %2970  ;;  %3873 = vst.msk [vmem:[#allocation6 + $0x218] sm:$0xff] %vm3209_vm4, %v3800_v51  ;;  %v4190_v51 = vld [vmem:[#allocation6 + $0x198] sm:$0xff] }
 0x393   : > { %3042 = vst.msk [vmem:[#allocation6 + $0x258] sm:$0xff] %vm3016_vm3, %v2971_v11 }
 0x395   : > { %v2973_v26 = vpop.permute.xlu0 %2972  ;;  %v4211_v42 = vld [vmem:[#allocation6 + $0x240] sm:$0xff] }
 0x396   : > { %v3164_v0 = vpop.permute.xlu1 %3163  ;;  %3043 = vst.msk [vmem:[#allocation6 + $0x270] sm:$0xff] %vm3016_vm3, %v2973_v26 }
 0x397   : > { %3235 = vst.msk [vmem:[#allocation6 + $0x258] sm:$0xff] %vm3209_vm4, %v3164_v0 }
 0x399   : > { %v3166_v22 = vpop.permute.xlu0 %3165 }
 0x39a   : > { %v3610_v41 = vpop.permute.xlu1 %3609  ;;  %3236 = vst.msk [vmem:[#allocation6 + $0x270] sm:$0xff] %vm3209_vm4, %v3166_v22 }
 0x39b   : > { %3682 = vst.msk [vmem:[#allocation6 + $0x230] sm:$0xff] %vm3016_vm3, %v3610_v41  ;;  %v4193_v41 = vld [vmem:[#allocation6 + $0x1b0] sm:$0xff] }
 0x39c   : > { %3429 = vst.msk [vmem:[#allocation6 + $0x270] sm:$0xff] %vm3402_vm5, %v12358_v54 }
 0x39d   : > { %v3612_v16 = vpop.permute.xlu0 %3611 }
 0x39e   : > { %v2975_v23 = vpop.permute.xlu1 %2974  ;;  %3683 = vst.msk [vmem:[#allocation6 + $0x248] sm:$0xff] %vm3016_vm3, %v3612_v16 }
 0x39f   : > { %3044 = vst.msk [vmem:[#allocation6 + $0x288] sm:$0xff] %vm3016_vm3, %v2975_v23 }
 0x3a0   : > { %3875 = vst.msk [vmem:[#allocation6 + $0x248] sm:$0xff] %vm3209_vm4, %v12478_v33  ;;  %v4175_v33 = vld [vmem:[#allocation6 + $0x120] sm:$0xff] }
 0x3a1   : > { %v3972_v5 = vpop.permute.xlu0 %3971 }
 0x3a2   : > { %v3168_v32 = vpop.permute.xlu1 %3167  ;;  %4055 = vst.msk [vmem:[#allocation6 + $0x128] sm:$0xff] %vm3402_vm5, %v3972_v5  ;;  %v4196_v5 = vld [vmem:[#allocation6 + $0x1c8] sm:$0xff] }
 0x3a3   : > { %3237 = vst.msk [vmem:[#allocation6 + $0x288] sm:$0xff] %vm3209_vm4, %v3168_v32 }
 0x3a4   : > { %3430 = vst.msk [vmem:[#allocation6 + $0x288] sm:$0xff] %vm3402_vm5, %v12367_v58 }
 0x3a5   : > { %v3976_v10 = vpop.permute.xlu0 %3975 }
 0x3a6   : > { %v3357_v54 = vpop.permute.xlu1 %3356  ;;  %4057 = vst.msk [vmem:[#allocation6 + $0x158] sm:$0xff] %vm3402_vm5, %v3976_v10 }
 0x3a7   : > { %3428 = vst.msk [vmem:[#allocation6 + $0x258] sm:$0xff] %vm3402_vm5, %v3357_v54 }
 0x3a9   : > { %v3980_v6 = vpop.permute.xlu0 %3979  ;;  %v4176_v4 = vld [vmem:[#allocation6 + $0x128] sm:$0xff] }
 0x3aa   : > { %v3614_v20 = vpop.permute.xlu1 %3613  ;;  %4059 = vst.msk [vmem:[#allocation6 + $0x188] sm:$0xff] %vm3402_vm5, %v3980_v6  ;;  %4498 = vmatprep.mubr.f32.mxu1 %v4176_v4 }
 0x3ab   : > { %3684 = vst.msk [vmem:[#allocation6 + $0x260] sm:$0xff] %vm3016_vm3, %v3614_v20  ;;  %4499 = vmatmul.mubr.f32.gmra.mrb[56].mxu1 %v4175_v33  ;;  %v4199_v20 = vld [vmem:[#allocation6 + $0x1e0] sm:$0xff]  ;;  %v4202_v33 = vld [vmem:[#allocation6 + $0x1f8] sm:$0xff]  ;;  %vm5080_vm3 = vcmask 130048  }
 0x3ac   : > { %3876 = vst.msk [vmem:[#allocation6 + $0x260] sm:$0xff] %vm3209_vm4, %v12471_v18  ;;  %v4101_v18 = vld [vmem:[#allocation2 + $0xf2] sm:$0xff] }
 0x3ad   : > { %v3984_v58 = vpop.permute.xlu0 %3983  ;;  %4133 = vst.msk [vmem:[#allocation6 + $0x280] sm:$0xff] %vm2759_vm2, %v4101_v18  ;;  %v4182_v7 = vld [vmem:[#allocation6 + $0x158] sm:$0xff] }
 0x3ae   : > { %v3802_v52 = vpop.permute.xlu1 %3801  ;;  %4061 = vst.msk [vmem:[#allocation6 + $0x1b8] sm:$0xff] %vm3402_vm5, %v3984_v58 }
 0x3af   : > { %3874 = vst.msk [vmem:[#allocation6 + $0x230] sm:$0xff] %vm3209_vm4, %v3802_v52  ;;  %v4205_v52 = vld [vmem:[#allocation6 + $0x210] sm:$0xff]  ;;  %vm5478_vm4 = vcmask 392448  }
 0x3b1   : > { %v3988_v25 = vpop.permute.xlu0 %3987  ;;  %v4188_v15 = vld [vmem:[#allocation6 + $0x188] sm:$0xff] }
 0x3b2   : > { %v3974_v8 = vpop.permute.xlu1 %3973  ;;  %4063 = vst.msk [vmem:[#allocation6 + $0x1e8] sm:$0xff] %vm3402_vm5, %v3988_v25  ;;  %v4208_v25 = vld [vmem:[#allocation6 + $0x228] sm:$0xff] }
 0x3b3   : > { %4056 = vst.msk [vmem:[#allocation6 + $0x140] sm:$0xff] %vm3402_vm5, %v3974_v8  ;;  %v4455_v9 = vpop.f32.mrb[38].mxu1 }
 0x3b4   : > { %v4457_v29 = vpop.f32.mrb[39].mxu1 }
 0x3b5   : > { %v3992_v40 = vpop.permute.xlu0 %3991  ;;  %v4194_v26 = vld [vmem:[#allocation6 + $0x1b8] sm:$0xff] }
 0x3b6   : > { %v3978_v3 = vpop.permute.xlu1 %3977  ;;  %4065 = vst.msk [vmem:[#allocation6 + $0x218] sm:$0xff] %vm3402_vm5, %v3992_v40  ;;  %v4214_v40 = vld [vmem:[#allocation6 + $0x258] sm:$0xff] }
 0x3b7   : > { %4058 = vst.msk [vmem:[#allocation6 + $0x170] sm:$0xff] %vm3402_vm5, %v3978_v3 }
 0x3b9   : > { %v3996_v48 = vpop.permute.xlu0 %3995  ;;  %v4200_v10 = vld [vmem:[#allocation6 + $0x1e8] sm:$0xff] }
 0x3ba   : > { %v3982_v59 = vpop.permute.xlu1 %3981  ;;  %v4179_v35 = vld [vmem:[#allocation6 + $0x140] sm:$0xff]  ;;  %4067 = vst.msk [vmem:[#allocation6 + $0x248] sm:$0xff] %vm3402_vm5, %v3996_v48  ;;  %v13299_v24 = vpop.f32.mrb[40].mxu1  ;;  %v4217_v48 = vld [vmem:[#allocation6 + $0x270] sm:$0xff] }
 0x3bb   : > { %4060 = vst.msk [vmem:[#allocation6 + $0x1a0] sm:$0xff] %vm3402_vm5, %v3982_v59  ;;  %4503 = vmatprep.mubr.f32.mxu1 %v4179_v35  ;;  %v4462_v34 = vpop.f32.mrb[41].mxu1 }
 0x3bc   : > { %4504 = vmatmul.mubr.f32.gmra.mrb[58].mxu1 %v4178_v38 }
 0x3bd   : > { %4508 = vmatprep.mubr.f32.mxu1 %v4182_v7  ;;  %v4000_v50 = vpop.permute.xlu0 %3999  ;;  %v4206_v58 = vld [vmem:[#allocation6 + $0x218] sm:$0xff]  ;;  %v4220_v7 = vld [vmem:[#allocation6 + $0x288] sm:$0xff] }
 0x3be   : > { %v3986_v14 = vpop.permute.xlu1 %3985  ;;  %4069 = vst.msk [vmem:[#allocation6 + $0x278] sm:$0xff] %vm3402_vm5, %v4000_v50  ;;  %v4185_v44 = vld [vmem:[#allocation6 + $0x170] sm:$0xff] }
 0x3bf   : > { %4062 = vst.msk [vmem:[#allocation6 + $0x1d0] sm:$0xff] %vm3402_vm5, %v3986_v14  ;;  %v4223_v14 = vld [vmem:[#allocation6 + $0x2a0] sm:$0xff] }
 0x3c0   : > { %4509 = vmatmul.mubr.f32.gmra.mrb[60].mxu1 %v4181_v43  ;;  %v4226_v43 = vld [vmem:[#allocation6 + $0x2b8] sm:$0xff] }
 0x3c1   : > { %4513 = vmatprep.mubr.f32.mxu1 %v4185_v44  ;;  %v4004_v27 = vpop.permute.xlu0 %4003  ;;  %v4212_v61 = vld [vmem:[#allocation6 + $0x248] sm:$0xff] }
 0x3c2   : > { %v3990_v31 = vpop.permute.xlu1 %3989  ;;  %4071 = vst.msk [vmem:[#allocation6 + $0x2a8] sm:$0xff] %vm3402_vm5, %v4004_v27  ;;  %v4191_v12 = vld [vmem:[#allocation6 + $0x1a0] sm:$0xff] }
 0x3c3   : > { %4064 = vst.msk [vmem:[#allocation6 + $0x200] sm:$0xff] %vm3402_vm5, %v3990_v31 }
 0x3c4   : > { %4514 = vmatmul.mubr.f32.gmra.mrb[62].mxu1 %v4184_v17  ;;  %v4229_v17 = vld [vmem:[#allocation6 + $0x2d0] sm:$0xff] }
 0x3c5   : > { %4518 = vmatprep.mubr.f32.mxu1 %v4188_v15  ;;  %v4008_v19 = vpop.permute.xlu0 %4007  ;;  %v4218_v29 = vld [vmem:[#allocation6 + $0x278] sm:$0xff]  ;;  %v4141_v15 = vld [vmem:[#allocation6 + $0x10] sm:$0xff] }
 0x3c6   : > { %v3994_v45 = vpop.permute.xlu1 %3993  ;;  %4073 = vst.msk [vmem:[#allocation6 + $0x2d8] sm:$0xff] %vm3402_vm5, %v4008_v19  ;;  %v4197_v16 = vld [vmem:[#allocation6 + $0x1d0] sm:$0xff] }
 0x3c7   : > { %4066 = vst.msk [vmem:[#allocation6 + $0x230] sm:$0xff] %vm3402_vm5, %v3994_v45  ;;  %v4232_v45 = vld [vmem:[#allocation6 + $0x2e8] sm:$0xff] }
 0x3c8   : > { %4519 = vmatmul.mubr.f32.gmra.mrb[64].mxu1 %v4187_v49 }
 0x3c9   : > { %4523 = vmatprep.mubr.f32.mxu1 %v4191_v12  ;;  %v4224_v38 = vld [vmem:[#allocation6 + $0x2a8] sm:$0xff] }
 0x3ca   : > { %v3998_v62 = vpop.permute.xlu1 %3997  ;;  %v4203_v4 = vld [vmem:[#allocation6 + $0x200] sm:$0xff]  ;;  %v4144_v12 = vld [vmem:[#allocation6 + $0x28] sm:$0xff] }
 0x3cb   : > { %4068 = vst.msk [vmem:[#allocation6 + $0x260] sm:$0xff] %vm3402_vm5, %v3998_v62  ;;  %v13308_v11 = vpop.f32.mrb[42].mxu1  ;;  %v4147_v62 = vld [vmem:[#allocation6 + $0x40] sm:$0xff] }
 0x3cc   : > { %4524 = vmatmul.mubr.f32.gmra.mrb[66].mxu1 %v4190_v51  ;;  %v4467_v0 = vpop.f32.mrb[43].mxu1  ;;  %v4150_v51 = vld [vmem:[#allocation6 + $0x58] sm:$0xff] }
 0x3cd   : > { %4528 = vmatprep.mubr.f32.mxu1 %v4194_v26  ;;  %v4230_v50 = vld [vmem:[#allocation6 + $0x2d8] sm:$0xff]  ;;  %v4153_v26 = vld [vmem:[#allocation6 + $0x70] sm:$0xff]  ;;  %v4156_v0 = vld [vmem:[#allocation6 + $0x88] sm:$0xff] }
 0x3ce   : > { %v4002_v22 = vpop.permute.xlu1 %4001  ;;  %v4209_v56 = vld [vmem:[#allocation6 + $0x230] sm:$0xff] }
 0x3cf   : > { %4070 = vst.msk [vmem:[#allocation6 + $0x290] sm:$0xff] %vm3402_vm5, %v4002_v22  ;;  %v4159_v22 = vld [vmem:[#allocation6 + $0xa0] sm:$0xff] }
 0x3d0   : > { %4529 = vmatmul.mubr.f32.gmra.mrb[68].mxu1 %v4193_v41  ;;  %v4162_v41 = vld [vmem:[#allocation6 + $0xb8] sm:$0xff] }
 0x3d1   : > { %4533 = vmatprep.mubr.f32.mxu1 %v4197_v16 }
 0x3d2   : > { %v4006_v23 = vpop.permute.xlu1 %4005  ;;  %v13312_v32 = vpop.f32.mrb[44].mxu1  ;;  %v4215_v9 = vld [vmem:[#allocation6 + $0x260] sm:$0xff] }
 0x3d3   : > { %4072 = vst.msk [vmem:[#allocation6 + $0x2c0] sm:$0xff] %vm3402_vm5, %v4006_v23  ;;  %v4472_v54 = vpop.f32.mrb[45].mxu1  ;;  %v4165_v23 = vld [vmem:[#allocation6 + $0xd0] sm:$0xff] }
 0x3d4   : > { %4534 = vmatmul.mubr.f32.gmra.mrb[70].mxu1 %v4196_v5  ;;  %v4171_v54 = vld [vmem:[#allocation6 + $0x100] sm:$0xff] }
 0x3d5   : > { %4538 = vmatprep.mubr.f32.mxu1 %v4200_v10  ;;  %v4168_v10 = vld [vmem:[#allocation6 + $0xe8] sm:$0xff] }
 0x3d6   : > { %v4010_v6 = vpop.permute.xlu1 %4009  ;;  %v4221_v35 = vld [vmem:[#allocation6 + $0x290] sm:$0xff] }
 0x3d7   : > { %4074 = vst.msk [vmem:[#allocation6 + $0x2f0] sm:$0xff] %vm3402_vm5, %v4010_v6  ;;  %v4174_v6 = vld [vmem:[#allocation6 + $0x118] sm:$0xff]  ;;  %vm5647_vm5 = vcmask 523648  }
 0x3d8   : > { %4539 = vmatmul.mubr.f32.gmra.mrb[72].mxu1 %v4199_v20  ;;  %v4177_v20 = vld [vmem:[#allocation6 + $0x130] sm:$0xff] }
 0x3d9   : > { %4543 = vmatprep.mubr.f32.mxu1 %v4203_v4  ;;  %v4180_v4 = vld [vmem:[#allocation6 + $0x148] sm:$0xff] }
 0x3da   : > { %v4227_v34 = vld [vmem:[#allocation6 + $0x2c0] sm:$0xff] }
 0x3dc   : > { %4544 = vmatmul.mubr.f32.gmra.mrb[74].mxu1 %v4202_v33  ;;  %v4183_v33 = vld [vmem:[#allocation6 + $0x160] sm:$0xff] }
 0x3dd   : > { %4548 = vmatprep.mubr.f32.mxu1 %v4206_v58  ;;  %v4186_v58 = vld [vmem:[#allocation6 + $0x178] sm:$0xff] }
 0x3de   : > { %v4233_v27 = vld [vmem:[#allocation6 + $0x2f0] sm:$0xff] }
 0x3e0   : > { %4549 = vmatmul.mubr.f32.gmra.mrb[76].mxu1 %v4205_v52  ;;  %v4189_v52 = vld [vmem:[#allocation6 + $0x190] sm:$0xff] }
 0x3e1   : > { %4553 = vmatprep.mubr.f32.mxu1 %v4209_v56  ;;  %v4192_v56 = vld [vmem:[#allocation6 + $0x1a8] sm:$0xff] }
 0x3e3   : > { %v13315_v8 = vpop.f32.mrb[46].mxu1 }
 0x3e4   : > { %4554 = vmatmul.mubr.f32.gmra.mrb[78].mxu1 %v4208_v25  ;;  %v4477_v18 = vpop.f32.mrb[47].mxu1  ;;  %v4198_v25 = vld [vmem:[#allocation6 + $0x1d8] sm:$0xff] }
 0x3e5   : > { %4558 = vmatprep.mubr.f32.mxu1 %v4212_v61  ;;  %v4195_v61 = vld [vmem:[#allocation6 + $0x1c0] sm:$0xff]  ;;  %v4201_v18 = vld [vmem:[#allocation6 + $0x1f0] sm:$0xff] }
 0x3e8   : > { %4559 = vmatmul.mubr.f32.gmra.mrb[80].mxu1 %v4211_v42  ;;  %v4207_v42 = vld [vmem:[#allocation6 + $0x220] sm:$0xff] }
 0x3e9   : > { %4563 = vmatprep.mubr.f32.mxu1 %v4215_v9  ;;  %v4204_v9 = vld [vmem:[#allocation6 + $0x208] sm:$0xff] }
 0x3ea   : > { %v13317_v3 = vpop.f32.mrb[48].mxu1 }
 0x3eb   : > { %v4482_v59 = vpop.f32.mrb[49].mxu1 }
 0x3ec   : > { %4564 = vmatmul.mubr.f32.gmra.mrb[82].mxu1 %v4214_v40  ;;  %v4210_v40 = vld [vmem:[#allocation6 + $0x238] sm:$0xff]  ;;  %v16225_v59 = vmov 0.0  }
 0x3ed   : > { %4568 = vmatprep.mubr.f32.mxu1 %v4218_v29  ;;  %v4213_v29 = vld [vmem:[#allocation6 + $0x250] sm:$0xff]  ;;  %5081 = vst.msk [vmem:[#allocation3] sm:$0xff] %vm5080_vm3, %v16225_v59  ;;  %5082 = vst.msk [vmem:[#allocation3 + $0x8] sm:$0xff] %vm5080_vm3, %v16225_v59 }
 0x3ee   : > { %5083 = vst.msk [vmem:[#allocation3 + $0x10] sm:$0xff] %vm5080_vm3, %v16225_v59  ;;  %5084 = vst.msk [vmem:[#allocation3 + $0x18] sm:$0xff] %vm5080_vm3, %v16225_v59 }
 0x3ef   : > { %5109 = vst.msk [vmem:[#allocation3 + $0xe0] sm:$0xff] %vm5080_vm3, %v16225_v59  ;;  %5110 = vst.msk [vmem:[#allocation3 + $0xe8] sm:$0xff] %vm5080_vm3, %v16225_v59 }
 0x3f0   : > { %4569 = vmatmul.mubr.f32.gmra.mrb[84].mxu1 %v4217_v48  ;;  %5111 = vst.msk [vmem:[#allocation3 + $0xf0] sm:$0xff] %vm5080_vm3, %v16225_v59  ;;  %5112 = vst.msk [vmem:[#allocation3 + $0xf8] sm:$0xff] %vm5080_vm3, %v16225_v59  ;;  %v4219_v48 = vld [vmem:[#allocation6 + $0x280] sm:$0xff] }
 0x3f1   : > { %4573 = vmatprep.mubr.f32.mxu1 %v4221_v35  ;;  %v4216_v35 = vld [vmem:[#allocation6 + $0x268] sm:$0xff] }
 0x3f4   : > { %4574 = vmatmul.mubr.f32.gmra.mrb[86].mxu1 %v4220_v7  ;;  %v5169_v7 = vld [vmem:[#allocation3 + $0x1] sm:$0xff] }
 0x3f5   : > { %4578 = vmatprep.mubr.f32.mxu1 %v4224_v38  ;;  %v4222_v38 = vld [vmem:[#allocation6 + $0x298] sm:$0xff]  ;;  %5225 = vrot.lane.b32.xlu0 %v5169_v7, %s10810_s29 }
 0x3f8   : > { %4579 = vmatmul.mubr.f32.gmra.mrb[88].mxu1 %v4223_v14  ;;  %v5338_v14 = vld [vmem:[#allocation3 + $0x2] sm:$0xff] }
 0x3f9   : > { %4583 = vmatprep.mubr.f32.mxu1 %v4227_v34  ;;  %v5171_v34 = vld [vmem:[#allocation3 + $0x11] sm:$0xff] }
 0x3fa   : > { %5229 = vrot.lane.b32.xlu0 %v5171_v34, %s10810_s29 }
 0x3fb   : > { %v13319_v44 = vpop.f32.mrb[50].mxu1 }
 0x3fc   : > { %4584 = vmatmul.mubr.f32.gmra.mrb[90].mxu1 %v4226_v43  ;;  %v4487_v31 = vpop.f32.mrb[51].mxu1  ;;  %v5170_v43 = vld [vmem:[#allocation3 + $0x9] sm:$0xff] }
 0x3fd   : > { %4588 = vmatprep.mubr.f32.mxu1 %v4230_v50  ;;  %v5340_v50 = vld [vmem:[#allocation3 + $0x12] sm:$0xff]  ;;  %5227 = vrot.lane.b32.xlu1 %v5170_v43, %s10810_s29 }
 0x3fe   : > { %5394 = vrot.lane.b32.xlu0 %v5338_v14, %s10808_s16  ;;  %v5507_v31 = vld [vmem:[#allocation3 + $0x10] sm:$0xff] }
 0x3ff   : > { %5143 = vst.msk [vmem:[#allocation7 + $0x20] sm:$0xff] %vm5080_vm3, %v5507_v31 }
 0x400   : > { %4589 = vmatmul.mubr.f32.gmra.mrb[92].mxu1 %v4229_v17  ;;  %v5533_v17 = vld [vmem:[#allocation3 + $0xe0] sm:$0xff] }
 0x401   : > { %4593 = vmatprep.mubr.f32.mxu1 %v4233_v27  ;;  %v5339_v27 = vld [vmem:[#allocation3 + $0xa] sm:$0xff] }
 0x402   : > { %v13321_v19 = vpop.f32.mrb[52].mxu1  ;;  %5398 = vrot.lane.b32.xlu0 %v5340_v50, %s10808_s16  ;;  %5396 = vrot.lane.b32.xlu1 %v5339_v27, %s10808_s16 }
 0x403   : > { %v4492_v49 = vpop.f32.mrb[53].mxu1 }
 0x404   : > { %4594 = vmatmul.mubr.f32.gmra.mrb[94].mxu1 %v4232_v45  ;;  %v5534_v45 = vld [vmem:[#allocation3 + $0xe8] sm:$0xff] }
 0x405   : > { %10402 = vmatprep.mubr.msk.f32.mxu1 %vm2759_vm2, %v4141_v15  ;;  %v5508_v15 = vld [vmem:[#allocation3 + $0x18] sm:$0xff]  ;;  %v5702_v49 = vld [vmem:[#allocation3 + $0xe1] sm:$0xff] }
 0x406   : > { %5563 = vrot.lane.b32.xlu0 %v5507_v31, %s10811_s30  ;;  %5565 = vrot.lane.b32.xlu1 %v5508_v15, %s10811_s30  ;;  %5144 = vst.msk [vmem:[#allocation7 + $0x30] sm:$0xff] %vm5080_vm3, %v5508_v15 }
 0x408   : > { %10403 = vmatmul.mubr.msk.f32.vlgmr.msra.gmra.mrb[96].mxu1 %vm2759_vm2, %v4144_v12  ;;  %v5703_v12 = vld [vmem:[#allocation3 + $0xe9] sm:$0xff] }
 0x409   : > { %10405 = vmatprep.mubr.msk.f32.mxu1 %vm2759_vm2, %v4147_v62  ;;  %v5872_v62 = vld [vmem:[#allocation3 + $0xea] sm:$0xff] }
 0x40a   : > { %5615 = vrot.lane.b32.xlu0 %v5533_v17, %s10811_s30  ;;  %5617 = vrot.lane.b32.xlu1 %v5534_v45, %s10811_s30 }
 0x40c   : > { %10406 = vmatmul.mubr.msk.f32.gmra.mrb[98].mxu1 %vm2759_vm2, %v4150_v51  ;;  %v5871_v51 = vld [vmem:[#allocation3 + $0xe2] sm:$0xff] }
 0x40d   : > { %10408 = vmatprep.mubr.msk.f32.mxu1 %vm2759_vm2, %v4153_v26  ;;  %v6041_v26 = vld [vmem:[#allocation3 + $0xf8] sm:$0xff] }
 0x40e   : > { %5732 = vrot.lane.b32.xlu0 %v5171_v34, %s10806_s25  ;;  %5786 = vrot.lane.b32.xlu1 %v5703_v12, %s10806_s25 }
 0x410   : > { %10409 = vmatmul.mubr.msk.f32.gmra.mrb[100].mxu1 %vm2759_vm2, %v4156_v0  ;;  %v6040_v0 = vld [vmem:[#allocation3 + $0xf0] sm:$0xff] }
 0x411   : > { %10411 = vmatprep.mubr.msk.f32.mxu1 %vm2759_vm2, %v4159_v22  ;;  %v4103_v22 = vld [vmem:[#allocation2 + $0x102] sm:$0xff] }
 0x412   : > { %5784 = vrot.lane.b32.xlu0 %v5702_v49, %s10806_s25  ;;  %5955 = vrot.lane.b32.xlu1 %v5872_v62, %s10812_s10  ;;  %4135 = vst.msk [vmem:[#allocation6 + $0x2b0] sm:$0xff] %vm2759_vm2, %v4103_v22  ;;  %v5114_v22 = vld [vmem:[#allocation3 + $0x8] sm:$0xff] }
 0x413   : > { %v13330_v16 = vpop.f32.mrb[54].mxu1  ;;  %5142 = vst.msk [vmem:[#allocation7 + $0x10] sm:$0xff] %vm5080_vm3, %v5114_v22 }
 0x414   : > { %10412 = vmatmul.mubr.msk.f32.gmra.mrb[102].mxu1 %vm2759_vm2, %v4162_v41  ;;  %v4497_v5 = vpop.f32.mrb[55].mxu1  ;;  %v6210_v41 = vld [vmem:[#allocation3 + $0xf9] sm:$0xff] }
 0x415   : > { %10414 = vmatprep.mubr.msk.f32.mxu1 %vm2759_vm2, %v4165_v23  ;;  %v4104_v23 = vld [vmem:[#allocation2 + $0x10a] sm:$0xff]  ;;  %v6209_v5 = vld [vmem:[#allocation3 + $0xf1] sm:$0xff] }
 0x416   : > { %5901 = vrot.lane.b32.xlu0 %v5340_v50, %s10812_s10  ;;  %6120 = vrot.lane.b32.xlu1 %v5534_v45, %s10809_s17  ;;  %4136 = vst.msk [vmem:[#allocation6 + $0x2c8] sm:$0xff] %vm2759_vm2, %v4104_v23  ;;  %v5113_v50 = vld [vmem:[#allocation3] sm:$0xff] }
 0x417   : > { %5141 = vst.msk [vmem:[#allocation7] sm:$0xff] %vm5080_vm3, %v5113_v50 }
 0x418   : > { %10415 = vmatmul.mubr.msk.f32.gmra.mrb[104].mxu1 %vm2759_vm2, %v4168_v10  ;;  %v4105_v10 = vld [vmem:[#allocation2 + $0x112] sm:$0xff] }
 0x419   : > { %10417 = vmatprep.mubr.msk.f32.mxu1 %vm2759_vm2, %v4171_v54  ;;  %4137 = vst.msk [vmem:[#allocation6 + $0x2e0] sm:$0xff] %vm2759_vm2, %v4105_v10  ;;  %v4106_v54 = vld [vmem:[#allocation2 + $0x11a] sm:$0xff] }
 0x41a   : > { %5953 = vrot.lane.b32.xlu0 %v5871_v51, %s10812_s10  ;;  %6124 = vrot.lane.b32.xlu1 %v6041_v26, %s10809_s17  ;;  %4138 = vst.msk [vmem:[#allocation6 + $0x2f8] sm:$0xff] %vm2759_vm2, %v4106_v54 }
 0x41c   : > { %10418 = vmatmul.mubr.msk.f32.gmra.mrb[106].mxu1 %vm2759_vm2, %v4174_v6  ;;  %v4225_v6 = vld [vmem:[#allocation6 + $0x2b0] sm:$0xff] }
 0x41d   : > { %10420 = vmatprep.mubr.msk.f32.mxu1 %vm2759_vm2, %v4177_v20  ;;  %v4228_v20 = vld [vmem:[#allocation6 + $0x2c8] sm:$0xff] }
 0x41e   : > { %6118 = vrot.lane.b32.xlu0 %v5533_v17, %s10809_s17  ;;  %6289 = vrot.lane.b32.xlu1 %v5703_v12, %s10813_s20 }
 0x420   : > { %10421 = vmatmul.mubr.msk.f32.gmra.mrb[108].mxu1 %vm2759_vm2, %v4180_v4  ;;  %v4231_v4 = vld [vmem:[#allocation6 + $0x2e0] sm:$0xff] }
 0x421   : > { %10423 = vmatprep.mubr.msk.f32.mxu1 %vm2759_vm2, %v4183_v33  ;;  %v4234_v33 = vld [vmem:[#allocation6 + $0x2f8] sm:$0xff] }
 0x422   : > { %6122 = vrot.lane.b32.xlu0 %v6040_v0, %s10809_s17  ;;  %6293 = vrot.lane.b32.xlu1 %v6210_v41, %s10813_s20 }
 0x424   : > { %10424 = vmatmul.mubr.msk.f32.gmra.mrb[110].mxu1 %vm2759_vm2, %v4186_v58 }
 0x425   : > { %10426 = vmatprep.mubr.msk.f32.mxu1 %vm2759_vm2, %v4189_v52 }
 0x426   : > { %6287 = vrot.lane.b32.xlu0 %v5702_v49, %s10813_s20 }
 0x428   : > { %10427 = vmatmul.mubr.msk.f32.gmra.mrb[112].mxu1 %vm2759_vm2, %v4192_v56 }
 0x429   : > { %10429 = vmatprep.mubr.msk.f32.mxu1 %vm2759_vm2, %v4195_v61 }
 0x42a   : > { %6291 = vrot.lane.b32.xlu0 %v6209_v5, %s10813_s20 }
 0x42c   : > { %10430 = vmatmul.mubr.msk.f32.gmra.mrb[114].mxu1 %vm2759_vm2, %v4198_v25 }
 0x42d   : > { %10432 = vmatprep.mubr.msk.f32.mxu1 %vm2759_vm2, %v4201_v18 }
 0x430   : > { %10433 = vmatmul.mubr.msk.f32.gmra.mrb[116].mxu1 %vm2759_vm2, %v4204_v9 }
 0x431   : > { %10435 = vmatprep.mubr.msk.f32.mxu1 %vm2759_vm2, %v4207_v42 }
 0x434   : > { %10436 = vmatmul.mubr.msk.f32.gmra.mrb[118].mxu1 %vm2759_vm2, %v4210_v40 }
 0x435   : > { %10438 = vmatprep.mubr.msk.f32.mxu1 %vm2759_vm2, %v4213_v29 }
 0x438   : > { %10439 = vmatmul.mubr.msk.f32.gmra.mrb[120].mxu1 %vm2759_vm2, %v4216_v35 }
 0x439   : > { %10441 = vmatprep.mubr.msk.f32.mxu1 %vm2759_vm2, %v4219_v48 }
 0x43c   : > { %10442 = vmatmul.mubr.msk.f32.gmra.mrb[122].mxu1 %vm2759_vm2, %v4222_v38 }
 0x43d   : > { %10444 = vmatprep.mubr.msk.f32.mxu1 %vm2759_vm2, %v4225_v6 }
 0x440   : > { %10445 = vmatmul.mubr.msk.f32.gmra.mrb[124].mxu1 %vm2759_vm2, %v4228_v20 }
 0x441   : > { %10447 = vmatprep.mubr.msk.f32.mxu1 %vm2759_vm2, %v4231_v4 }
 0x444   : > { %10448 = vmatmul.mubr.msk.f32.gmra.mrb[126].mxu1 %vm2759_vm2, %v4234_v33  ;;  %vm5309_vm2 = vcmask 261248  }
 0x467   : > { %v5226_v27 = vpop.permute.xlu0 %5225 }
 0x468   : > { %5310 = vst.msk [vmem:[#allocation7] sm:$0xff] %vm5309_vm2, %v5226_v27 }
 0x46c   : > { %v5230_v45 = vpop.permute.xlu0 %5229 }
 0x46d   : > { %5312 = vst.msk [vmem:[#allocation7 + $0x20] sm:$0xff] %vm5309_vm2, %v5230_v45 }
 0x46f   : > { %v5228_v23 = vpop.permute.xlu1 %5227 }
 0x470   : > { %v5395_v62 = vpop.permute.xlu0 %5394  ;;  %5311 = vst.msk [vmem:[#allocation7 + $0x10] sm:$0xff] %vm5309_vm2, %v5228_v23 }
 0x471   : > { %5479 = vst.msk [vmem:[#allocation7] sm:$0xff] %vm5478_vm4, %v5395_v62  ;;  %v2475_v62 = vadd.s32 32, %v12553_v21 }
 0x473   : > { %v10174_v23 = vadd.s32 4294967262, %v2475_v62  ;;  %vm4956_vm9 = vcmp.ge.s32.totalorder %v2475_v62, 34 }
 0x474   : > { %v5399_v0 = vpop.permute.xlu0 %5398  ;;  %v5397_v6 = vpop.permute.xlu1 %5396 }
 0x475   : > { %5481 = vst.msk [vmem:[#allocation7 + $0x20] sm:$0xff] %vm5478_vm4, %v5399_v0  ;;  %5480 = vst.msk [vmem:[#allocation7 + $0x10] sm:$0xff] %vm5478_vm4, %v5397_v6  ;;  %v2476_v0 = vadd.s32 40, %v12553_v21  ;;  %v2478_v6 = vadd.s32 56, %v12553_v21 }
 0x478   : > { %v5564_v10 = vpop.permute.xlu0 %5563 }
 0x479   : > { %5648 = vst.msk [vmem:[#allocation7] sm:$0xff] %vm5647_vm5, %v5564_v10  ;;  %v10175_v10 = vadd.s32 4294967262, %v2476_v0 }
 0x47c   : > { %v13440_v4 = vpop.permute.xlu0 %5615 }
 0x47e   : > { %v13403_v58 = vpop.f32.mrb[56].mxu1 }
 0x47f   : > { %v4502_v52 = vpop.f32.mrb[57].mxu1 }
 0x480   : > { %v5566_v52 = vpop.permute.xlu1 %5565 }
 0x481   : > { %5649 = vst.msk [vmem:[#allocation7 + $0x10] sm:$0xff] %vm5647_vm5, %v5566_v52  ;;  %v6464_v52 = vld [vmem:[%s16182_s5] sm:$0xff] }
 0x48f   : > { %v13405_v56 = vpop.f32.mrb[58].mxu1 }
 0x490   : > { %v4507_v61 = vpop.f32.mrb[59].mxu1 }
 0x493   : > { %v13407_v25 = vpop.f32.mrb[60].mxu1 }
 0x494   : > { %v4512_v18 = vpop.f32.mrb[61].mxu1 }
 0x495   : > { %v5733_v18 = vpop.permute.xlu0 %5732 }
 0x496   : > { %5817 = vst.msk [vmem:[#allocation7] sm:$0xff] %vm5816_vm6, %v5733_v18 }
 0x497   : > { %v13409_v9 = vpop.f32.mrb[62].mxu1 }
 0x498   : > { %v4517_v42 = vpop.f32.mrb[63].mxu1 }
 0x49b   : > { %v13411_v29 = vpop.f32.mrb[64].mxu1 }
 0x49c   : > { %v4522_v40 = vpop.f32.mrb[65].mxu1 }
 0x49f   : > { %v13413_v35 = vpop.f32.mrb[66].mxu1 }
 0x4a0   : > { %v4527_v48 = vpop.f32.mrb[67].mxu1 }
 0x4a1   : > { %v13448_v48 = vpop.permute.xlu0 %5784 }
 0x4a3   : > { %v13415_v38 = vpop.f32.mrb[68].mxu1 }
 0x4a4   : > { %v4532_v7 = vpop.f32.mrb[69].mxu1 }
 0x4a5   : > { %v5902_v50 = vpop.permute.xlu0 %5901 }
 0x4a6   : > { %5986 = vst.msk [vmem:[#allocation7] sm:$0xff] %vm5985_vm7, %v5902_v50 }
 0x4a7   : > { %v13417_v34 = vpop.f32.mrb[70].mxu1 }
 0x4a8   : > { %v4537_v14 = vpop.f32.mrb[71].mxu1 }
 0x4ab   : > { %v13419_v43 = vpop.f32.mrb[72].mxu1 }
 0x4ac   : > { %v4542_v31 = vpop.f32.mrb[73].mxu1 }
 0x4af   : > { %v13423_v17 = vpop.f32.mrb[74].mxu1 }
 0x4b0   : > { %v4547_v15 = vpop.f32.mrb[75].mxu1 }
 0x4b3   : > { %v13426_v49 = vpop.f32.mrb[76].mxu1 }
 0x4b4   : > { %v4552_v12 = vpop.f32.mrb[77].mxu1 }
 0x4b7   : > { %v13429_v51 = vpop.f32.mrb[78].mxu1 }
 0x4b8   : > { %v4557_v26 = vpop.f32.mrb[79].mxu1 }
 0x4bb   : > { %v13432_v41 = vpop.f32.mrb[80].mxu1 }
 0x4bc   : > { %v4562_v5 = vpop.f32.mrb[81].mxu1 }
 0x4bf   : > { %v13437_v54 = vpop.f32.mrb[82].mxu1 }
 0x4c0   : > { %v4567_v20 = vpop.f32.mrb[83].mxu1 }
 0x4c1   : > { %v2477_v20 = vadd.s32 48, %v12553_v21 }
 0x4c3   : > { %v13442_v33 = vpop.f32.mrb[84].mxu1 }
 0x4c4   : > { %v4572_v61 = vpop.f32.mrb[85].mxu1 }
 0x4c5   : > { %v6465_v61 = vld [vmem:[%s16182_s5 + $0x8] sm:$0xff] }
 0x4c7   : > { %v13446_v42 = vpop.f32.mrb[86].mxu1 }
 0x4c8   : > { %v4577_v40 = vpop.f32.mrb[87].mxu1 }
 0x4c9   : > { %v4892_v40 = vand.u32 15, %v10174_v23  ;;  %v6466_v23 = vld [vmem:[%s16182_s5 + $0x10] sm:$0xff] }
 0x4cb   : > { %v4580_v7 = vpop.f32.mrb[88].mxu1  ;;  %vm4924_vm8 = vcmp.lt.s32.totalorder %v4892_v40, 12 }
 0x4cc   : > { %v4582_v14 = vpop.f32.mrb[89].mxu1  ;;  %v10619_v7 = vpack.c.bf16 %v6465_v61, %v6464_v52  ;;  %vm13480_vm11 = vmand %vm4924_vm8, %vm4956_vm9  ;;  %v10178_v52 = vadd.s32 4294967262, %v12556_v60  ;;  %v6468_v60 = vld [vmem:[%s16182_s5 + $0x20] sm:$0xff] }
 0x4cd   : > { %v13464_v14 = vld [vmem:[%s16181_s4] ss:$0 sm:$0xff] }
 0x4ce   : > { %10620 = vmatpush1.bf16.msra.mxu1 %v10619_v7  ;;  %v4466_v21 = vadd.f32 %v13464_v14, %v13308_v11  ;;  %v6467_v11 = vld [vmem:[%s16182_s5 + $0x18] sm:$0xff]  ;;  %v4471_v61 = vadd.f32 %v13464_v14, %v13312_v32  ;;  %v10181_v7 = vadd.s32 4294967262, %v12577_v39  ;;  %v6469_v32 = vld [vmem:[%s16182_s5 + $0x28] sm:$0xff] }
 0x4cf   : > { %v4585_v31 = vpop.f32.mrb[90].mxu1  ;;  %10621 = vmatprep.subr.bf16.mxu1 %v16207_v13 }
 0x4d0   : > { %v4587_v27 = vpop.f32.mrb[91].mxu1  ;;  %v4893_v31 = vand.u32 15, %v10175_v10 }
 0x4d1   : > { %v10177_v27 = vadd.s32 4294967262, %v2478_v6  ;;  %v10622_v6 = vpack.c.bf16 %v6467_v11, %v6466_v23 }
 0x4d2   : > { %vm4925_vm10 = vcmp.lt.s32.totalorder %v4893_v31, 12 }
 0x4d3   : > { %v4590_v15 = vpop.f32.mrb[92].mxu1  ;;  %v4895_v10 = vand.u32 15, %v10177_v27  ;;  %10623 = vmatpush1.bf16.msra.mxu1 %v10622_v6 }
 0x4d4   : > { %v4592_v45 = vpop.f32.mrb[93].mxu1  ;;  %v10176_v15 = vadd.s32 4294967262, %v2477_v20  ;;  %10624 = vmatprep.subr.bf16.mxu1 %v16207_v13  ;;  %v6470_v20 = vld [vmem:[%s16182_s5 + $0x30] sm:$0xff] }
 0x4d5   : > { %v4461_v45 = vadd.f32 %v13464_v14, %v13299_v24  ;;  %v4476_v24 = vadd.f32 %v13464_v14, %v13315_v8  ;;  %vm4927_vm12 = vcmp.lt.s32.totalorder %v4895_v10, 12 }
 0x4d7   : > { %v4595_v12 = vpop.f32.mrb[94].mxu1 }
 0x4d8   : > { %v4597_v26 = vpop.f32.mrb[95].mxu1 }
 0x4db   : > { %v10404_v22 = vpop.f32.mrb[96].mxu1 }
 0x4dc   : > { %v4665_v5 = vpop.f32.mrb[97].mxu1  ;;  %v10179_v22 = vadd.s32 4294967262, %v12560_v47  ;;  %v4894_v47 = vand.u32 15, %v10176_v15 }
 0x4de   : > { %v4897_v8 = vand.u32 15, %v10179_v22  ;;  %vm13502_vm13 = vcmp.lt.s32.totalorder %v4894_v47, 12  ;;  %v4481_v22 = vadd.f32 %v13464_v14, %v13317_v3  ;;  %v6471_v3 = vld [vmem:[%s16182_s5 + $0x38] sm:$0xff] }
 0x4df   : > { %v10407_v18 = vpop.f32.mrb[98].mxu1 }
 0x4e0   : > { %v4675_v50 = vpop.f32.mrb[99].mxu1  ;;  %vm13508_vm14 = vcmp.lt.s32.totalorder %v4897_v8, 12 }
 0x4e3   : > { %v10410_v12 = vpop.f32.mrb[100].mxu1 }
 0x4e4   : > { %v4691_v26 = vadd.f32 %v10410_v12, %v4466_v21  ;;  %v4685_v0 = vpop.f32.mrb[101].mxu1  ;;  %v10180_v21 = vadd.s32 4294967262, %v12569_v28  ;;  %v4486_v28 = vadd.f32 %v13464_v14, %v13319_v44 }
 0x4e5   : > { %v4686_v5 = vadd.f32 %v4685_v0, %v4461_v45  ;;  %v10625_v45 = vpack.c.bf16 %v6469_v32, %v6468_v60  ;;  %v4896_v0 = vand.u32 15, %v10178_v52 }
 0x4e6   : > { %v4829_v62 = vmax.f32 %v4691_v26, 0.0 }
 0x4e7   : > { %v4828_v18 = vmax.f32 %v4686_v5, 0.0  ;;  %v10413_v40 = vpop.f32.mrb[102].mxu1  ;;  %v4899_v5 = vand.u32 15, %v10181_v7  ;;  %10626 = vmatpush1.bf16.msra.mxu1 %v10625_v45  ;;  %vm13526_vm15 = vcmp.lt.s32.totalorder %v4896_v0, 12 }
 0x4e8   : > { %v5053_v50 = vsel %vm4925_vm10, %v4829_v62, 0.0  ;;  %v4701_v31 = vadd.f32 %v10413_v40, %v4476_v24  ;;  %v4695_v27 = vpop.f32.mrb[103].mxu1  ;;  %v4898_v62 = vand.u32 15, %v10180_v21  ;;  %10627 = vmatprep.subr.bf16.mxu1 %v16207_v13  ;;  %v4496_v40 = vadd.f32 %v13464_v14, %v13330_v16 }
 0x4e9   : > { %5086 = vst.msk [vmem:[#allocation3 + $0x28] sm:$0xff] %vm5080_vm3, %v5053_v50  ;;  %v5052_v39 = vsel %vm13480_vm11, %v4828_v18, 0.0  ;;  %v4696_v15 = vadd.f32 %v4695_v27, %v4471_v61  ;;  %v10183_v61 = vadd.s32 4294967262, %v12591_v55  ;;  %v10628_v18 = vpack.c.bf16 %v6471_v3, %v6470_v20 }
 0x4ea   : > { %5085 = vst.msk [vmem:[#allocation3 + $0x20] sm:$0xff] %vm5080_vm3, %v5052_v39  ;;  %v4831_v12 = vmax.f32 %v4701_v31, 0.0  ;;  %v10182_v31 = vadd.s32 4294967262, %v12584_v46  ;;  %v4491_v27 = vadd.f32 %v13464_v14, %v13321_v19  ;;  %vm13533_vm1 = vcmp.lt.s32.totalorder %v4899_v5, 12 }
 0x4eb   : > { %v4830_v23 = vmax.f32 %v4696_v15, 0.0  ;;  %v10416_v11 = vpop.f32.mrb[104].mxu1  ;;  %v13538_v16 = vadd.s32 4294967262, %v12616_v30  ;;  %10629 = vmatpush1.bf16.msra.mxu1 %v10628_v18  ;;  %vm13542_vm8 = vcmp.lt.s32.totalorder %v4898_v62, 12  ;;  %v6472_v15 = vld [vmem:[%s16182_s5 + $0x40] sm:$0xff]  ;;  %v6473_v30 = vld [vmem:[%s16182_s5 + $0x48] sm:$0xff]  ;;  %v4501_v24 = vadd.f32 %v13464_v14, %v13403_v58 }
 0x4ec   : > { %v5055_v10 = vsel %vm4927_vm12, %v4831_v12, 0.0  ;;  %v4711_v6 = vadd.f32 %v10416_v11, %v4486_v28  ;;  %v4705_v44 = vpop.f32.mrb[105].mxu1  ;;  %10630 = vmatprep.subr.bf16.mxu1 %v16207_v13  ;;  %v4901_v0 = vand.u32 15, %v10183_v61  ;;  %v4900_v5 = vand.u32 15, %v10182_v31  ;;  %v6475_v61 = vld [vmem:[%s16182_s5 + $0x58] sm:$0xff] }
 0x4ed   : > { %5088 = vst.msk [vmem:[#allocation3 + $0x38] sm:$0xff] %vm5080_vm3, %v5055_v10  ;;  %v5054_v47 = vsel %vm13502_vm13, %v4830_v23, 0.0  ;;  %v4706_v52 = vadd.f32 %v4705_v44, %v4481_v22  ;;  %v10631_v22 = vpack.c.bf16 %v6473_v30, %v6472_v15  ;;  %v4506_v23 = vadd.f32 %v13464_v14, %v13405_v56 }
 0x4ee   : > { %5087 = vst.msk [vmem:[#allocation3 + $0x30] sm:$0xff] %vm5080_vm3, %v5054_v47  ;;  %v4833_v7 = vmax.f32 %v4711_v6, 0.0  ;;  %v13570_v10 = vadd.s32 4294967262, %v12601_v57  ;;  %v4903_v62 = vand.u32 15, %v13538_v16  ;;  %v13578_v20 = vadd.s32 4294967262, %v12656_v63  ;;  %v6474_v63 = vld [vmem:[%s16182_s5 + $0x50] sm:$0xff] }
 0x4ef   : > { %v4832_v8 = vmax.f32 %v4706_v52, 0.0  ;;  %v10419_v21 = vpop.f32.mrb[106].mxu1  ;;  %10632 = vmatpush1.bf16.msra.mxu1 %v10631_v22  ;;  %v13585_v52 = vadd.s32 4294967262, %v12639_v1  ;;  %vm13603_vm9 = vcmp.lt.s32.totalorder %v4901_v0, 12  ;;  %v10634_v31 = vpack.c.bf16 %v6475_v61, %v6474_v63  ;;  %v6476_v0 = vld [vmem:[%s16182_s5 + $0x60] sm:$0xff]  ;;  %v6477_v22 = vld [vmem:[%s16182_s5 + $0x68] sm:$0xff] }
 0x4f0   : > { %v5057_v60 = vsel %vm13508_vm14, %v4833_v7, 0.0  ;;  %v4721_v32 = vadd.f32 %v10419_v21, %v4496_v40  ;;  %v4715_v39 = vpop.f32.mrb[107].mxu1  ;;  %v5510_v19 = vld [vmem:[#allocation3 + $0x28] sm:$0xff]  ;;  %10633 = vmatprep.subr.bf16.mxu1 %v16207_v13  ;;  %vm13617_vm10 = vcmp.lt.s32.totalorder %v4900_v5, 12  ;;  %v4902_v55 = vand.u32 15, %v13570_v10 }
 0x4f1   : > { %v13553_v45 = vld [vmem:[#allocation3 + $0x22] sm:$0xff]  ;;  %5090 = vst.msk [vmem:[#allocation3 + $0x48] sm:$0xff] %vm5080_vm3, %v5057_v60  ;;  %v5056_v28 = vsel %vm13526_vm15, %v4832_v8, 0.0  ;;  %v4716_v12 = vadd.f32 %v4715_v39, %v4491_v27  ;;  %5569 = vrot.lane.b32.xlu1 %v5510_v19, %s10811_s30  ;;  %5146 = vst.msk [vmem:[#allocation7 + $0x50] sm:$0xff] %vm5080_vm3, %v5510_v19  ;;  %v4516_v27 = vadd.f32 %v13464_v14, %v13409_v9  ;;  %vm13628_vm11 = vcmp.lt.s32.totalorder %v4903_v62, 12  ;;  %v13632_v46 = vld [vmem:[#allocation3 + $0x19] sm:$0xff] }
 0x4f2   : > { %v13559_v26 = vld [vmem:[#allocation3 + $0x21] sm:$0xff]  ;;  %6380 = vst.msk [vmem:[#allocation7 + $0x8] sm:$0xff] %vm5080_vm3, %v13553_v45  ;;  %5089 = vst.msk [vmem:[#allocation3 + $0x40] sm:$0xff] %vm5080_vm3, %v5056_v28  ;;  %v4835_v11 = vmax.f32 %v4721_v32, 0.0  ;;  %v4511_v9 = vadd.f32 %v13464_v14, %v13407_v25  ;;  %v4904_v25 = vand.u32 15, %v13585_v52  ;;  %v4526_v62 = vadd.f32 %v13464_v14, %v13413_v35 }
 0x4f3   : > { %5233 = vrot.lane.b32.xlu0 %v13559_v26, %s10810_s29  ;;  %v13572_v6 = vld [vmem:[#allocation3 + $0x20] sm:$0xff]  ;;  %v4834_v44 = vmax.f32 %v4716_v12, 0.0  ;;  %v10422_v56 = vpop.f32.mrb[108].mxu1  ;;  %10635 = vmatpush1.bf16.msra.mxu1 %v10634_v31  ;;  %vm13670_vm12 = vcmp.lt.s32.totalorder %v4902_v55, 12  ;;  %v4536_v39 = vadd.f32 %v13464_v14, %v13417_v34  ;;  %v4531_v34 = vadd.f32 %v13464_v14, %v13415_v38  ;;  %v6480_v38 = vld [vmem:[%s16182_s5 + $0x80] sm:$0xff] }
 0x4f4   : > { %5145 = vst.msk [vmem:[#allocation7 + $0x40] sm:$0xff] %vm5080_vm3, %v13572_v6  ;;  %v5059_v57 = vsel %vm13533_vm1, %v4835_v11, 0.0  ;;  %v4731_v3 = vadd.f32 %v10422_v56, %v4506_v23  ;;  %v4725_v47 = vpop.f32.mrb[109].mxu1  ;;  %v13587_v58 = vld [vmem:[#allocation3 + $0x38] sm:$0xff]  ;;  %10636 = vmatprep.subr.bf16.mxu1 %v16207_v13  ;;  %v10637_v56 = vpack.c.bf16 %v6477_v22, %v6476_v0  ;;  %vm13697_vm14 = vcmp.lt.s32.totalorder %v4904_v25, 12 }
 0x4f5   : > { %v13596_v18 = vld [vmem:[#allocation3 + $0x2a] sm:$0xff]  ;;  %v13598_v40 = vld [vmem:[#allocation3 + $0x32] sm:$0xff]  ;;  %5092 = vst.msk [vmem:[#allocation3 + $0x58] sm:$0xff] %vm5080_vm3, %v5059_v57  ;;  %v5058_v1 = vsel %vm13542_vm8, %v4834_v44, 0.0  ;;  %v4726_v50 = vadd.f32 %v4725_v47, %v4501_v24  ;;  %6072 = vrot.lane.b32.xlu1 %v5510_v19, %s10809_s17  ;;  %5148 = vst.msk [vmem:[#allocation7 + $0x70] sm:$0xff] %vm5080_vm3, %v13587_v58  ;;  %v4905_v19 = vand.u32 15, %v13578_v20 }
 0x4f6   : > { %6381 = vst.msk [vmem:[#allocation7 + $0x18] sm:$0xff] %vm5080_vm3, %v13596_v18  ;;  %6382 = vst.msk [vmem:[#allocation7 + $0x28] sm:$0xff] %vm5080_vm3, %v13598_v40  ;;  %v4837_v8 = vmax.f32 %v4731_v3, 0.0  ;;  %v13624_v16 = vld [vmem:[#allocation3 + $0x30] sm:$0xff]  ;;  %v13659_v44 = vadd.s32 4294967262, %v12698_v53  ;;  %v13678_v53 = vadd.s32 4294967262, %v12679_v37  ;;  %v4521_v3 = vadd.f32 %v13464_v14, %v13411_v29 }
 0x4f7   : > { %5091 = vst.msk [vmem:[#allocation3 + $0x50] sm:$0xff] %vm5080_vm3, %v5058_v1  ;;  %5402 = vrot.lane.b32.xlu0 %v13553_v45, %s10808_s16  ;;  %v4836_v60 = vmax.f32 %v4726_v50, 0.0  ;;  %v10425_v32 = vpop.f32.mrb[110].mxu1  ;;  %5147 = vst.msk [vmem:[#allocation7 + $0x60] sm:$0xff] %vm5080_vm3, %v13624_v16  ;;  %vm13684_vm13 = vcmp.lt.s32.totalorder %v4905_v19, 12  ;;  %v13688_v61 = vld [vmem:[#allocation3 + $0x1a] sm:$0xff]  ;;  %10638 = vmatpush1.bf16.msra.mxu1 %v10637_v56 }
 0x4f8   : > { %v5061_v15 = vsel %vm13603_vm9, %v4837_v8, 0.0  ;;  %v4741_v30 = vadd.f32 %v10425_v32, %v4516_v27  ;;  %v4735_v28 = vpop.f32.mrb[111].mxu1  ;;  %v13640_v12 = vld [vmem:[#allocation3 + $0x48] sm:$0xff]  ;;  %v13691_v1 = vadd.s32 4294967262, %v12741_v2  ;;  %10639 = vmatprep.subr.bf16.mxu1 %v16207_v13  ;;  %v6479_v27 = vld [vmem:[%s16182_s5 + $0x78] sm:$0xff] }
 0x4f9   : > { %v13649_v23 = vld [vmem:[#allocation3 + $0x3a] sm:$0xff]  ;;  %v13651_v11 = vld [vmem:[#allocation3 + $0x42] sm:$0xff]  ;;  %5094 = vst.msk [vmem:[#allocation3 + $0x68] sm:$0xff] %vm5080_vm3, %v5061_v15  ;;  %v5060_v5 = vsel %vm13617_vm10, %v4836_v60, 0.0  ;;  %v4736_v10 = vadd.f32 %v4735_v28, %v4511_v9  ;;  %5231 = vrot.lane.b32.xlu1 %v13632_v46, %s10810_s29  ;;  %5150 = vst.msk [vmem:[#allocation7 + $0x90] sm:$0xff] %vm5080_vm3, %v13640_v12  ;;  %v4907_v60 = vand.u32 15, %v13659_v44 }
 0x4fa   : > { %v6409_v24 = vld [vmem:[#allocation7 + $0x8] sm:$0xff]  ;;  %6383 = vst.msk [vmem:[#allocation7 + $0x38] sm:$0xff] %vm5080_vm3, %v13649_v23  ;;  %6384 = vst.msk [vmem:[#allocation7 + $0x48] sm:$0xff] %vm5080_vm3, %v13651_v11  ;;  %v4839_v20 = vmax.f32 %v4741_v30, 0.0  ;;  %v13680_v35 = vld [vmem:[#allocation3 + $0x40] sm:$0xff]  ;;  %v4906_v15 = vand.u32 15, %v13678_v53 }
 0x4fb   : > { %5093 = vst.msk [vmem:[#allocation3 + $0x60] sm:$0xff] %vm5080_vm3, %v5060_v5  ;;  %10203 = vmatprep.mubr.msk.f32.mxu1 %vm5080_vm3, %v6409_v24  ;;  %5567 = vrot.lane.b32.xlu0 %v13572_v6, %s10811_s30  ;;  %v4838_v47 = vmax.f32 %v4736_v10, 0.0  ;;  %v10428_v52 = vpop.f32.mrb[112].mxu1  ;;  %5149 = vst.msk [vmem:[#allocation7 + $0x80] sm:$0xff] %vm5080_vm3, %v13680_v35  ;;  %v6478_v2 = vld [vmem:[%s16182_s5 + $0x70] sm:$0xff]  ;;  %v4909_v5 = vand.u32 15, %v13691_v1 }
 0x4fc   : > { %v5063_v37 = vsel %vm13628_vm11, %v4839_v20, 0.0  ;;  %v4751_v7 = vadd.f32 %v10428_v52, %v4526_v62  ;;  %v4745_v29 = vpop.f32.mrb[113].mxu1  ;;  %v13701_v31 = vld [vmem:[#allocation3 + $0x58] sm:$0xff]  ;;  %v10640_v32 = vpack.c.bf16 %v6479_v27, %v6478_v2  ;;  %v16250_v30 = vld [vmem:[#allocation12_spill] sm:$0xff]  ;;  %v16252_v20 = vld [vmem:[#allocation13_spill] sm:$0xff]  ;;  %vm13762_vm15 = vcmp.lt.s32.totalorder %v4907_v60, 12 }
 0x4fd   : > { %5096 = vst.msk [vmem:[#allocation3 + $0x78] sm:$0xff] %vm5080_vm3, %v5063_v37  ;;  %v5062_v55 = vsel %vm13670_vm12, %v4838_v47, 0.0  ;;  %v4746_v9 = vadd.f32 %v4745_v29, %v4521_v3  ;;  %5400 = vrot.lane.b32.xlu1 %v13688_v61, %s10808_s16  ;;  %5152 = vst.msk [vmem:[#allocation7 + $0xb0] sm:$0xff] %vm5080_vm3, %v13701_v31  ;;  %v10190_v28 = vadd.s32 4294967262, %v16250_v30  ;;  %v16251_v10 = vld [vmem:[#allocation14_spill] sm:$0xff]  ;;  %v10192_v57 = vadd.s32 4294967262, %v16252_v20 }
 0x4fe   : > { %v13710_v8 = vld [vmem:[#allocation3 + $0x4a] sm:$0xff]  ;;  %v13712_v21 = vld [vmem:[#allocation3 + $0x52] sm:$0xff]  ;;  %5095 = vst.msk [vmem:[#allocation3 + $0x70] sm:$0xff] %vm5080_vm3, %v5062_v55  ;;  %v4841_v19 = vmax.f32 %v4751_v7, 0.0  ;;  %v13739_v24 = vadd.s32 4294967262, %v16251_v10  ;;  %10641 = vmatpush1.bf16.msra.mxu1 %v10640_v32  ;;  %v6481_v3 = vld [vmem:[%s16182_s5 + $0x88] sm:$0xff]  ;;  %v4546_v29 = vadd.f32 %v13464_v14, %v13423_v17  ;;  %v4541_v17 = vadd.f32 %v13464_v14, %v13419_v43 }
 0x4ff   : > { %6385 = vst.msk [vmem:[#allocation7 + $0x58] sm:$0xff] %vm5080_vm3, %v13710_v8  ;;  %6386 = vst.msk [vmem:[#allocation7 + $0x68] sm:$0xff] %vm5080_vm3, %v13712_v21  ;;  %5736 = vrot.lane.b32.xlu0 %v13559_v26, %s10806_s25  ;;  %v13733_v25 = vld [vmem:[#allocation3 + $0x50] sm:$0xff]  ;;  %v4840_v0 = vmax.f32 %v4746_v9, 0.0  ;;  %v10431_v22 = vpop.f32.mrb[114].mxu1  ;;  %10642 = vmatprep.subr.bf16.mxu1 %v16207_v13  ;;  %v10643_v7 = vpack.c.bf16 %v6481_v3, %v6480_v38  ;;  %vm13777_vm1 = vcmp.lt.s32.totalorder %v4906_v15, 12 }
 0x500   : > { %5151 = vst.msk [vmem:[#allocation7 + $0xa0] sm:$0xff] %vm5080_vm3, %v13733_v25  ;;  %v5065_v44 = vsel %vm13684_vm13, %v4841_v19, 0.0  ;;  %v4761_v56 = vadd.f32 %v10431_v22, %v4536_v39  ;;  %v4755_v62 = vpop.f32.mrb[115].mxu1  ;;  %v13746_v53 = vld [vmem:[#allocation3 + $0x68] sm:$0xff]  ;;  %vm13787_vm8 = vcmp.lt.s32.totalorder %v4909_v5, 12  ;;  %v4911_v19 = vand.u32 15, %v13739_v24 }
 0x501   : > { %5098 = vst.msk [vmem:[#allocation3 + $0x88] sm:$0xff] %vm5080_vm3, %v5065_v44  ;;  %v5064_v63 = vsel %vm13697_vm14, %v4840_v0, 0.0  ;;  %v4756_v37 = vadd.f32 %v4755_v62, %v4531_v34  ;;  %5734 = vrot.lane.b32.xlu1 %v13632_v46, %s10806_s25  ;;  %5154 = vst.msk [vmem:[#allocation7 + $0xd0] sm:$0xff] %vm5080_vm3, %v13746_v53  ;;  %v4908_v46 = vand.u32 15, %v10190_v28  ;;  %v4910_v15 = vand.u32 15, %v10192_v57  ;;  %v16259_v22 = vld [vmem:[#allocation16_spill] sm:$0xff] }
 0x502   : > { %v13755_v47 = vld [vmem:[#allocation3 + $0x5a] sm:$0xff]  ;;  %v13757_v52 = vld [vmem:[#allocation3 + $0x62] sm:$0xff]  ;;  %5097 = vst.msk [vmem:[#allocation3 + $0x80] sm:$0xff] %vm5080_vm3, %v5064_v63  ;;  %v4843_v50 = vmax.f32 %v4761_v56, 0.0  ;;  %10644 = vmatpush1.bf16.msra.mxu1 %v10643_v7  ;;  %v10195_v5 = vadd.s32 4294967262, %v16259_v22  ;;  %v4556_v44 = vadd.f32 %v13464_v14, %v13429_v51  ;;  %v10197_v62 = vadd.s32 4294967262, %v12857_v36 }
 0x503   : > { %6387 = vst.msk [vmem:[#allocation7 + $0x78] sm:$0xff] %vm5080_vm3, %v13755_v47  ;;  %6388 = vst.msk [vmem:[#allocation7 + $0x88] sm:$0xff] %vm5080_vm3, %v13757_v52  ;;  %5905 = vrot.lane.b32.xlu0 %v13553_v45, %s10812_s10  ;;  %v13783_v27 = vld [vmem:[#allocation3 + $0x60] sm:$0xff]  ;;  %v4842_v55 = vmax.f32 %v4756_v37, 0.0  ;;  %v10434_v9 = vpop.f32.mrb[116].mxu1  ;;  %10681 = vmatprep.subr.bf16.mxu1 %v16207_v13  ;;  %vm13819_vm9 = vcmp.lt.s32.totalorder %v4908_v46, 12  ;;  %v4551_v51 = vadd.f32 %v13464_v14, %v13426_v49 }
 0x504   : > { %5153 = vst.msk [vmem:[#allocation7 + $0xc0] sm:$0xff] %vm5080_vm3, %v13783_v27  ;;  %v5067_v32 = vsel %vm13762_vm15, %v4843_v50, 0.0  ;;  %v4771_v45 = vadd.f32 %v10434_v9, %v4546_v29  ;;  %v4765_v39 = vpop.f32.mrb[117].mxu1  ;;  %v13796_v30 = vld [vmem:[#allocation3 + $0x78] sm:$0xff]  ;;  %vm13834_vm10 = vcmp.lt.s32.totalorder %v4911_v19, 12  ;;  %vm13838_vm11 = vcmp.lt.s32.totalorder %v4910_v15, 12 }
 0x505   : > { %v13799_v43 = vld [vmem:[#allocation3 + $0x6a] sm:$0xff]  ;;  %v13801_v28 = vld [vmem:[#allocation3 + $0x72] sm:$0xff]  ;;  %5100 = vst.msk [vmem:[#allocation3 + $0x98] sm:$0xff] %vm5080_vm3, %v5067_v32  ;;  %v5066_v34 = vsel %vm13777_vm1, %v4842_v55, 0.0  ;;  %v4766_v0 = vadd.f32 %v4765_v39, %v4541_v17  ;;  %5903 = vrot.lane.b32.xlu1 %v13688_v61, %s10812_s10  ;;  %5156 = vst.msk [vmem:[#allocation7 + $0xf0] sm:$0xff] %vm5080_vm3, %v13796_v30  ;;  %v4913_v46 = vand.u32 15, %v10195_v5  ;;  %v4566_v55 = vadd.f32 %v13464_v14, %v13437_v54 }
 0x506   : > { %v16260_v10 = vld [vmem:[#allocation15_spill] sm:$0xff]  ;;  %6389 = vst.msk [vmem:[#allocation7 + $0x98] sm:$0xff] %vm5080_vm3, %v13799_v43  ;;  %6390 = vst.msk [vmem:[#allocation7 + $0xa8] sm:$0xff] %vm5080_vm3, %v13801_v28  ;;  %v4845_v56 = vmax.f32 %v4771_v45, 0.0  ;;  %v13826_v20 = vld [vmem:[#allocation3 + $0x70] sm:$0xff]  ;;  %v4915_v60 = vand.u32 15, %v10197_v62  ;;  %v4561_v54 = vadd.f32 %v13464_v14, %v13432_v41  ;;  %v4576_v62 = vadd.f32 %v13464_v14, %v13446_v42 }
 0x507   : > { %v10194_v24 = vadd.s32 4294967262, %v16260_v10  ;;  %5099 = vst.msk [vmem:[#allocation3 + $0x90] sm:$0xff] %vm5080_vm3, %v5066_v34  ;;  %6070 = vrot.lane.b32.xlu0 %v13572_v6, %s10809_s17  ;;  %v4844_v57 = vmax.f32 %v4766_v0, 0.0  ;;  %v10437_v38 = vpop.f32.mrb[118].mxu1  ;;  %5155 = vst.msk [vmem:[#allocation7 + $0xe0] sm:$0xff] %vm5080_vm3, %v13826_v20  ;;  %v16267_v32 = vld [vmem:[#allocation10_spill] sm:$0xff]  ;;  %v4571_v42 = vadd.f32 %v13464_v14, %v13442_v33 }
 0x508   : > { %v5069_v3 = vsel %vm13787_vm8, %v4845_v56, 0.0  ;;  %v4781_v63 = vadd.f32 %v10437_v38, %v4556_v44  ;;  %v4775_v6 = vpop.f32.mrb[119].mxu1  ;;  %v13842_v7 = vld [vmem:[#allocation3 + $0x88] sm:$0xff]  ;;  %v10196_v45 = vadd.s32 4294967262, %v16267_v32  ;;  %vm13882_vm12 = vcmp.lt.s32.totalorder %v4913_v46, 12  ;;  %v13892_v61 = vld [vmem:[#allocation3 + $0x31] sm:$0xff] }
 0x509   : > { %v13844_v49 = vld [vmem:[#allocation3 + $0x7a] sm:$0xff]  ;;  %v13846_v29 = vld [vmem:[#allocation3 + $0x82] sm:$0xff]  ;;  %5102 = vst.msk [vmem:[#allocation3 + $0xa8] sm:$0xff] %vm5080_vm3, %v5069_v3  ;;  %v5068_v50 = vsel %vm13819_vm9, %v4844_v57, 0.0  ;;  %v4776_v2 = vadd.f32 %v4775_v6, %v4551_v51  ;;  %5573 = vrot.lane.b32.xlu1 %v13587_v58, %s10811_s30  ;;  %v4912_v17 = vand.u32 15, %v10194_v24  ;;  %5158 = vst.msk [vmem:[#allocation7 + $0x110] sm:$0xff] %vm5080_vm3, %v13842_v7 }
 0x50a   : > { %6391 = vst.msk [vmem:[#allocation7 + $0xb8] sm:$0xff] %vm5080_vm3, %v13844_v49  ;;  %6392 = vst.msk [vmem:[#allocation7 + $0xc8] sm:$0xff] %vm5080_vm3, %v13846_v29  ;;  %v4847_v9 = vmax.f32 %v4781_v63, 0.0  ;;  %v13865_v39 = vld [vmem:[#allocation3 + $0x80] sm:$0xff]  ;;  %vm13905_vm14 = vcmp.lt.s32.totalorder %v4915_v60, 12  ;;  %v4914_v57 = vand.u32 15, %v10196_v45 }
 0x50b   : > { %5101 = vst.msk [vmem:[#allocation3 + $0xa0] sm:$0xff] %vm5080_vm3, %v5068_v50  ;;  %6239 = vrot.lane.b32.xlu0 %v13559_v26, %s10813_s20  ;;  %v4846_v19 = vmax.f32 %v4776_v2, 0.0  ;;  %v10440_v15 = vpop.f32.mrb[120].mxu1  ;;  %5157 = vst.msk [vmem:[#allocation7 + $0x100] sm:$0xff] %vm5080_vm3, %v13865_v39  ;;  %vm13886_vm13 = vcmp.lt.s32.totalorder %v4912_v17, 12  ;;  %v5174_v50 = vld [vmem:[#allocation3 + $0x29] sm:$0xff] }
 0x50c   : > { %v5071_v34 = vsel %vm13834_vm10, %v4847_v9, 0.0  ;;  %v4791_v0 = vadd.f32 %v10440_v15, %v4566_v55  ;;  %v4785_v22 = vpop.f32.mrb[121].mxu1  ;;  %v13873_v5 = vld [vmem:[#allocation3 + $0x98] sm:$0xff]  ;;  %vm5043_vm15 = vmand %vm13905_vm14, %vm2658_vm0  ;;  %vm4946_vm1 = vcmp.lt.s32.totalorder %v4914_v57, 12  ;;  %vm6154_vm0 = vcmask 917248  }
 0x50d   : > { %5104 = vst.msk [vmem:[#allocation3 + $0xb8] sm:$0xff] %vm5080_vm3, %v5071_v34  ;;  %v5070_v41 = vsel %vm13838_vm11, %v4846_v19, 0.0  ;;  %v4786_v44 = vadd.f32 %v4785_v22, %v4561_v54  ;;  %6076 = vrot.lane.b32.xlu1 %v13587_v58, %s10809_s17  ;;  %5160 = vst.msk [vmem:[#allocation7 + $0x130] sm:$0xff] %vm5080_vm3, %v13873_v5  ;;  %v5178_v58 = vld [vmem:[#allocation3 + $0x49] sm:$0xff]  ;;  %vm6323_vm8 = vcmask 1048448   ;;  %vm6806_vm9 = vcmask 64512  }
 0x50e   : > { %v13875_v26 = vld [vmem:[#allocation3 + $0x8a] sm:$0xff]  ;;  %v13877_v10 = vld [vmem:[#allocation3 + $0x92] sm:$0xff]  ;;  %5103 = vst.msk [vmem:[#allocation3 + $0xb0] sm:$0xff] %vm5080_vm3, %v5070_v41  ;;  %v4849_v51 = vmax.f32 %v4791_v0, 0.0  ;;  %vm7701_vm10 = vcmask 523712   ;;  %vm7822_vm11 = vcmask 589312  }
 0x50f   : > { %6393 = vst.msk [vmem:[#allocation7 + $0xd8] sm:$0xff] %vm5080_vm3, %v13875_v26  ;;  %6394 = vst.msk [vmem:[#allocation7 + $0xe8] sm:$0xff] %vm5080_vm3, %v13877_v10  ;;  %5237 = vrot.lane.b32.xlu0 %v13892_v61, %s10810_s29  ;;  %v13909_v38 = vld [vmem:[#allocation3 + $0x90] sm:$0xff]  ;;  %v4848_v3 = vmax.f32 %v4786_v44, 0.0  ;;  %v10443_v63 = vpop.f32.mrb[122].mxu1  ;;  %vm8185_vm14 = vcmask 786112  }
 0x510   : > { %5159 = vst.msk [vmem:[#allocation7 + $0x120] sm:$0xff] %vm5080_vm3, %v13909_v38  ;;  %v5073_v1 = vsel %vm13882_vm12, %v4849_v51, 0.0  ;;  %v4801_v6 = vadd.f32 %v10443_v63, %v4576_v62  ;;  %v4795_v37 = vpop.f32.mrb[123].mxu1  ;;  %v13917_v2 = vld [vmem:[#allocation3 + $0xa8] sm:$0xff]  ;;  %vm7943_vm12 = vcmask 654912  }
 0x511   : > { %5106 = vst.msk [vmem:[#allocation3 + $0xc8] sm:$0xff] %vm5080_vm3, %v5073_v1  ;;  %v5072_v33 = vsel %vm13886_vm13, %v4848_v3, 0.0  ;;  %v4796_v14 = vadd.f32 %v4795_v37, %v4571_v42  ;;  %5235 = vrot.lane.b32.xlu1 %v5174_v50, %s10810_s29  ;;  %5162 = vst.msk [vmem:[#allocation7 + $0x150] sm:$0xff] %vm5080_vm3, %v13917_v2  ;;  %vm8064_vm13 = vcmask 720512  }
 0x512   : > { %v6367_v46 = vld [vmem:[#allocation3 + $0x9a] sm:$0xff]  ;;  %v6368_v17 = vld [vmem:[#allocation3 + $0xa2] sm:$0xff]  ;;  %5105 = vst.msk [vmem:[#allocation3 + $0xc0] sm:$0xff] %vm5080_vm3, %v5072_v33  ;;  %v4851_v55 = vmax.f32 %v4801_v6, 0.0 }
 0x513   : > { %6395 = vst.msk [vmem:[#allocation7 + $0xf8] sm:$0xff] %vm5080_vm3, %v6367_v46  ;;  %6396 = vst.msk [vmem:[#allocation7 + $0x108] sm:$0xff] %vm5080_vm3, %v6368_v17  ;;  %5406 = vrot.lane.b32.xlu0 %v13598_v40, %s10808_s16  ;;  %v4850_v36 = vmax.f32 %v4796_v14, 0.0  ;;  %v13934_v9 = vld [vmem:[#allocation3 + $0xa0] sm:$0xff] }
 0x514   : > { %v5075_v60 = vsel %vm5043_vm15, %v4851_v55, 0.0  ;;  %v13936_v32 = vld [vmem:[#allocation3 + $0xb8] sm:$0xff]  ;;  %5161 = vst.msk [vmem:[#allocation7 + $0x140] sm:$0xff] %vm5080_vm3, %v13934_v9  ;;  %vm8306_vm15 = vcmask 851712  }
 0x515   : > { %v6369_v45 = vld [vmem:[#allocation3 + $0xaa] sm:$0xff]  ;;  %v6370_v54 = vld [vmem:[#allocation3 + $0xb2] sm:$0xff]  ;;  %5108 = vst.msk [vmem:[#allocation3 + $0xd8] sm:$0xff] %vm5080_vm3, %v5075_v60  ;;  %v5074_v19 = vsel %vm4946_vm1, %v4850_v36, 0.0  ;;  %5404 = vrot.lane.b32.xlu1 %v13596_v18, %s10808_s16  ;;  %5164 = vst.msk [vmem:[#allocation7 + $0x170] sm:$0xff] %vm5080_vm3, %v13936_v32  ;;  %vm8427_vm1 = vcmask 917312  }
 0x516   : > { %6397 = vst.msk [vmem:[#allocation7 + $0x118] sm:$0xff] %vm5080_vm3, %v6369_v45  ;;  %6398 = vst.msk [vmem:[#allocation7 + $0x128] sm:$0xff] %vm5080_vm3, %v6370_v54  ;;  %v13950_v15 = vld [vmem:[#allocation3 + $0xb0] sm:$0xff]  ;;  %v5180_v14 = vld [vmem:[#allocation3 + $0x59] sm:$0xff] }
 0x517   : > { %5107 = vst.msk [vmem:[#allocation3 + $0xd0] sm:$0xff] %vm5080_vm3, %v5074_v19  ;;  %5571 = vrot.lane.b32.xlu0 %v13624_v16, %s10811_s30  ;;  %5163 = vst.msk [vmem:[#allocation7 + $0x160] sm:$0xff] %vm5080_vm3, %v13950_v15 }
 0x518   : > { %v13952_v34 = vld [vmem:[#allocation3 + $0xc8] sm:$0xff] }
 0x519   : > { %v6371_v0 = vld [vmem:[#allocation3 + $0xba] sm:$0xff]  ;;  %v6372_v22 = vld [vmem:[#allocation3 + $0xc2] sm:$0xff]  ;;  %5738 = vrot.lane.b32.xlu1 %v5174_v50, %s10806_s25  ;;  %5166 = vst.msk [vmem:[#allocation7 + $0x190] sm:$0xff] %vm5080_vm3, %v13952_v34 }
 0x51a   : > { %6399 = vst.msk [vmem:[#allocation7 + $0x138] sm:$0xff] %vm5080_vm3, %v6371_v0  ;;  %6400 = vst.msk [vmem:[#allocation7 + $0x148] sm:$0xff] %vm5080_vm3, %v6372_v22  ;;  %v13963_v41 = vld [vmem:[#allocation3 + $0xc0] sm:$0xff] }
 0x51b   : > { %5740 = vrot.lane.b32.xlu0 %v13892_v61, %s10806_s25  ;;  %5165 = vst.msk [vmem:[#allocation7 + $0x180] sm:$0xff] %vm5080_vm3, %v13963_v41 }
 0x51c   : > { %v6375_v24 = vld [vmem:[#allocation3 + $0xda] sm:$0xff] }
 0x51d   : > { %6403 = vst.msk [vmem:[#allocation7 + $0x178] sm:$0xff] %vm5080_vm3, %v6375_v24  ;;  %5907 = vrot.lane.b32.xlu1 %v13596_v18, %s10812_s10  ;;  %v13974_v62 = vld [vmem:[#allocation3 + $0xd8] sm:$0xff]  ;;  %v5177_v18 = vld [vmem:[#allocation3 + $0x41] sm:$0xff] }
 0x51e   : > { %v6373_v44 = vld [vmem:[#allocation3 + $0xca] sm:$0xff]  ;;  %v6374_v56 = vld [vmem:[#allocation3 + $0xd2] sm:$0xff]  ;;  %5168 = vst.msk [vmem:[#allocation7 + $0x1b0] sm:$0xff] %vm5080_vm3, %v13974_v62 }
 0x51f   : > { %6401 = vst.msk [vmem:[#allocation7 + $0x158] sm:$0xff] %vm5080_vm3, %v6373_v44  ;;  %6402 = vst.msk [vmem:[#allocation7 + $0x168] sm:$0xff] %vm5080_vm3, %v6374_v56  ;;  %5909 = vrot.lane.b32.xlu0 %v13598_v40, %s10812_s10  ;;  %v13976_v51 = vld [vmem:[#allocation3 + $0xd0] sm:$0xff]  ;;  %v5176_v40 = vld [vmem:[#allocation3 + $0x39] sm:$0xff] }
 0x520   : > { %5167 = vst.msk [vmem:[#allocation7 + $0x1a0] sm:$0xff] %vm5080_vm3, %v13976_v51  ;;  %v5182_v56 = vld [vmem:[#allocation3 + $0x69] sm:$0xff] }
 0x521   : > { %6241 = vrot.lane.b32.xlu1 %v5174_v50, %s10813_s20 }
 0x523   : > { %6074 = vrot.lane.b32.xlu0 %v13624_v16, %s10809_s17  ;;  %v14003_v16 = vpop.permute.xlu1 %5617 }
 0x525   : > { %5577 = vrot.lane.b32.xlu1 %v13640_v12, %s10811_s30 }
 0x527   : > { %6243 = vrot.lane.b32.xlu0 %v13892_v61, %s10813_s20 }
 0x529   : > { %6080 = vrot.lane.b32.xlu1 %v13640_v12, %s10809_s17  ;;  %v14010_v12 = vpop.permute.xlu1 %5786 }
 0x52b   : > { %5241 = vrot.lane.b32.xlu0 %v5177_v18, %s10810_s29 }
 0x52d   : > { %5239 = vrot.lane.b32.xlu1 %v5176_v40, %s10810_s29  ;;  %v14017_v61 = vpop.permute.xlu1 %5955 }
 0x52f   : > { %5410 = vrot.lane.b32.xlu0 %v13651_v11, %s10808_s16 }
 0x531   : > { %5408 = vrot.lane.b32.xlu1 %v13649_v23, %s10808_s16  ;;  %v14025_v42 = vpop.permute.xlu1 %6120 }
 0x533   : > { %5575 = vrot.lane.b32.xlu0 %v13680_v35, %s10811_s30 }
 0x535   : > { %5742 = vrot.lane.b32.xlu1 %v5176_v40, %s10806_s25  ;;  %v14034_v1 = vpop.permute.xlu1 %6124 }
 0x537   : > { %5744 = vrot.lane.b32.xlu0 %v5177_v18, %s10806_s25 }
 0x539   : > { %5911 = vrot.lane.b32.xlu1 %v13649_v23, %s10812_s10  ;;  %v5179_v23 = vld [vmem:[#allocation3 + $0x51] sm:$0xff]  ;;  %v14043_v37 = vpop.permute.xlu1 %6289 }
 0x53b   : > { %5913 = vrot.lane.b32.xlu0 %v13651_v11, %s10812_s10  ;;  %v14020_v11 = vpop.permute.xlu0 %5953 }
 0x53d   : > { %6245 = vrot.lane.b32.xlu1 %v5176_v40, %s10813_s20  ;;  %v14052_v46 = vpop.permute.xlu1 %6293 }
 0x53f   : > { %6078 = vrot.lane.b32.xlu0 %v13680_v35, %s10809_s17  ;;  %v10446_v35 = vpop.f32.mrb[124].mxu1  ;;  %v14027_v3 = vpop.permute.xlu0 %6118 }
 0x540   : > { %v4805_v57 = vpop.f32.mrb[125].mxu1 }
 0x541   : > { %5581 = vrot.lane.b32.xlu1 %v13701_v31, %s10811_s30 }
 0x543   : > { %6247 = vrot.lane.b32.xlu0 %v5177_v18, %s10813_s20  ;;  %v14037_v6 = vpop.permute.xlu0 %6122 }
 0x545   : > { %6084 = vrot.lane.b32.xlu1 %v13701_v31, %s10809_s17  ;;  %v10449_v31 = vpop.f32.mrb[126].mxu1 }
 0x546   : > { %v4815_v63 = vpop.f32.mrb[127].mxu1 }
 0x547   : > { %5245 = vrot.lane.b32.xlu0 %v5179_v23, %s10810_s29  ;;  %v14045_v50 = vpop.permute.xlu0 %6287 }
 0x549   : > { %5243 = vrot.lane.b32.xlu1 %v5178_v58, %s10810_s29 }
 0x54b   : > { %5414 = vrot.lane.b32.xlu0 %v13712_v21, %s10808_s16 }
 0x54d   : > { %5412 = vrot.lane.b32.xlu1 %v13710_v8, %s10808_s16 }
 0x54f   : > { %5579 = vrot.lane.b32.xlu0 %v13733_v25, %s10811_s30 }
 0x551   : > { %5746 = vrot.lane.b32.xlu1 %v5178_v58, %s10806_s25 }
 0x553   : > { %5748 = vrot.lane.b32.xlu0 %v5179_v23, %s10806_s25 }
 0x555   : > { %5915 = vrot.lane.b32.xlu1 %v13710_v8, %s10812_s10  ;;  %v14055_v8 = vpop.permute.xlu0 %6291 }
 0x557   : > { %5917 = vrot.lane.b32.xlu0 %v13712_v21, %s10812_s10  ;;  %v5181_v21 = vld [vmem:[#allocation3 + $0x61] sm:$0xff] }
 0x559   : > { %6249 = vrot.lane.b32.xlu1 %v5178_v58, %s10813_s20 }
 0x55b   : > { %6082 = vrot.lane.b32.xlu0 %v13733_v25, %s10809_s17 }
 0x55d   : > { %5585 = vrot.lane.b32.xlu1 %v13746_v53, %s10811_s30 }
 0x55f   : > { %6251 = vrot.lane.b32.xlu0 %v5179_v23, %s10813_s20 }
 0x561   : > { %6088 = vrot.lane.b32.xlu1 %v13746_v53, %s10809_s17 }
 0x563   : > { %5249 = vrot.lane.b32.xlu0 %v5181_v21, %s10810_s29  ;;  %v5570_v17 = vpop.permute.xlu1 %5569 }
 0x565   : > { %v5234_v33 = vpop.permute.xlu0 %5233  ;;  %5247 = vrot.lane.b32.xlu1 %v5180_v14, %s10810_s29 }
 0x566   : > { %5314 = vst.msk [vmem:[#allocation7 + $0x40] sm:$0xff] %vm5309_vm2, %v5234_v33 }
 0x567   : > { %5418 = vrot.lane.b32.xlu0 %v13757_v52, %s10808_s16  ;;  %v6073_v25 = vpop.permute.xlu1 %6072 }
 0x569   : > { %v5403_v55 = vpop.permute.xlu0 %5402  ;;  %5416 = vrot.lane.b32.xlu1 %v13755_v47, %s10808_s16 }
 0x56a   : > { %5483 = vst.msk [vmem:[#allocation7 + $0x40] sm:$0xff] %vm5478_vm4, %v5403_v55 }
 0x56b   : > { %5583 = vrot.lane.b32.xlu0 %v13783_v27, %s10811_s30  ;;  %v5232_v53 = vpop.permute.xlu1 %5231 }
 0x56c   : > { %5313 = vst.msk [vmem:[#allocation7 + $0x30] sm:$0xff] %vm5309_vm2, %v5232_v53  ;;  %v6413_v53 = vld [vmem:[#allocation7 + $0x28] sm:$0xff] }
 0x56d   : > { %v5568_v36 = vpop.permute.xlu0 %5567  ;;  %5750 = vrot.lane.b32.xlu1 %v5180_v14, %s10806_s25 }
 0x56e   : > { %5650 = vst.msk [vmem:[#allocation7 + $0x20] sm:$0xff] %vm5647_vm5, %v5568_v36  ;;  %v5184_v36 = vld [vmem:[#allocation3 + $0x79] sm:$0xff] }
 0x56f   : > { %5752 = vrot.lane.b32.xlu0 %v5181_v21, %s10806_s25  ;;  %v5401_v60 = vpop.permute.xlu1 %5400 }
 0x570   : > { %5482 = vst.msk [vmem:[#allocation7 + $0x30] sm:$0xff] %vm5478_vm4, %v5401_v60 }
 0x571   : > { %v5737_v45 = vpop.permute.xlu0 %5736  ;;  %5651 = vst.msk [vmem:[#allocation7 + $0x30] sm:$0xff] %vm5647_vm5, %v5570_v17  ;;  %5919 = vrot.lane.b32.xlu1 %v13755_v47, %s10812_s10 }
 0x572   : > { %5819 = vst.msk [vmem:[#allocation7 + $0x20] sm:$0xff] %vm5816_vm6, %v5737_v45 }
 0x573   : > { %5921 = vrot.lane.b32.xlu0 %v13757_v52, %s10812_s10  ;;  %v5735_v54 = vpop.permute.xlu1 %5734 }
 0x574   : > { %5818 = vst.msk [vmem:[#allocation7 + $0x10] sm:$0xff] %vm5816_vm6, %v5735_v54  ;;  %v6415_v54 = vld [vmem:[#allocation7 + $0x38] sm:$0xff] }
 0x575   : > { %v5906_v19 = vpop.permute.xlu0 %5905  ;;  %6253 = vrot.lane.b32.xlu1 %v5180_v14, %s10813_s20  ;;  %v5185_v14 = vld [vmem:[#allocation3 + $0x81] sm:$0xff] }
 0x576   : > { %5988 = vst.msk [vmem:[#allocation7 + $0x20] sm:$0xff] %vm5985_vm7, %v5906_v19 }
 0x577   : > { %6086 = vrot.lane.b32.xlu0 %v13783_v27, %s10809_s17  ;;  %v5904_v0 = vpop.permute.xlu1 %5903  ;;  %v5183_v27 = vld [vmem:[#allocation3 + $0x71] sm:$0xff] }
 0x578   : > { %5987 = vst.msk [vmem:[#allocation7 + $0x10] sm:$0xff] %vm5985_vm7, %v5904_v0 }
 0x579   : > { %v6071_v22 = vpop.permute.xlu0 %6070  ;;  %6156 = vst.msk [vmem:[#allocation7 + $0x10] sm:$0xff] %vm6154_vm0, %v6073_v25  ;;  %5589 = vrot.lane.b32.xlu1 %v13796_v30, %s10811_s30 }
 0x57a   : > { %6155 = vst.msk [vmem:[#allocation7] sm:$0xff] %vm6154_vm0, %v6071_v22 }
 0x57b   : > { %6255 = vrot.lane.b32.xlu0 %v5181_v21, %s10813_s20  ;;  %v5574_v47 = vpop.permute.xlu1 %5573 }
 0x57d   : > { %v6240_v52 = vpop.permute.xlu0 %6239  ;;  %6092 = vrot.lane.b32.xlu1 %v13796_v30, %s10809_s17  ;;  %v6411_v30 = vld [vmem:[#allocation7 + $0x18] sm:$0xff] }
 0x57e   : > { %6324 = vst.msk [vmem:[#allocation7] sm:$0xff] %vm6323_vm8, %v6240_v52 }
 0x57f   : > { %5253 = vrot.lane.b32.xlu0 %v5183_v27, %s10810_s29  ;;  %v6077_v24 = vpop.permute.xlu1 %6076 }
 0x581   : > { %v5238_v44 = vpop.permute.xlu0 %5237  ;;  %5251 = vrot.lane.b32.xlu1 %v5182_v56, %s10810_s29 }
 0x582   : > { %5316 = vst.msk [vmem:[#allocation7 + $0x60] sm:$0xff] %vm5309_vm2, %v5238_v44 }
 0x583   : > { %5422 = vrot.lane.b32.xlu0 %v13801_v28, %s10808_s16  ;;  %v5236_v18 = vpop.permute.xlu1 %5235 }
 0x584   : > { %5315 = vst.msk [vmem:[#allocation7 + $0x50] sm:$0xff] %vm5309_vm2, %v5236_v18 }
 0x585   : > { %v5407_v40 = vpop.permute.xlu0 %5406  ;;  %v6408_v23 = vld [vmem:[#allocation7] sm:$0xff]  ;;  %5420 = vrot.lane.b32.xlu1 %v13799_v43, %s10808_s16 }
 0x586   : > { %5485 = vst.msk [vmem:[#allocation7 + $0x60] sm:$0xff] %vm5478_vm4, %v5407_v40  ;;  %6638 = vmatmul.mubr.f32.vlgmr.msra.gmra.mrb[128].mxu1 %v6408_v23  ;;  %v5186_v23 = vld [vmem:[#allocation3 + $0x89] sm:$0xff] }
 0x587   : > { %10204 = vmatprep.mubr.msk.f32.mxu1 %vm5080_vm3, %v6411_v30  ;;  %5587 = vrot.lane.b32.xlu0 %v13826_v20, %s10811_s30  ;;  %v5405_v58 = vpop.permute.xlu1 %5404  ;;  %v6417_v30 = vld [vmem:[#allocation7 + $0x48] sm:$0xff] }
 0x588   : > { %5484 = vst.msk [vmem:[#allocation7 + $0x50] sm:$0xff] %vm5478_vm4, %v5405_v58 }
 0x589   : > { %v5572_v35 = vpop.permute.xlu0 %5571  ;;  %5653 = vst.msk [vmem:[#allocation7 + $0x50] sm:$0xff] %vm5647_vm5, %v5574_v47  ;;  %5754 = vrot.lane.b32.xlu1 %v5182_v56, %s10806_s25 }
 0x58a   : > { %5652 = vst.msk [vmem:[#allocation7 + $0x40] sm:$0xff] %vm5647_vm5, %v5572_v35 }
 0x58b   : > { %5756 = vrot.lane.b32.xlu0 %v5183_v27, %s10806_s25  ;;  %v5739_v57 = vpop.permute.xlu1 %5738 }
 0x58c   : > { %5820 = vst.msk [vmem:[#allocation7 + $0x30] sm:$0xff] %vm5816_vm6, %v5739_v57  ;;  %v6419_v57 = vld [vmem:[#allocation7 + $0x58] sm:$0xff] }
 0x58d   : > { %v5741_v31 = vpop.permute.xlu0 %5740  ;;  %5923 = vrot.lane.b32.xlu1 %v13799_v43, %s10812_s10 }
 0x58e   : > { %5821 = vst.msk [vmem:[#allocation7 + $0x40] sm:$0xff] %vm5816_vm6, %v5741_v31 }
 0x58f   : > { %5925 = vrot.lane.b32.xlu0 %v13801_v28, %s10812_s10  ;;  %v5908_v63 = vpop.permute.xlu1 %5907 }
 0x590   : > { %5989 = vst.msk [vmem:[#allocation7 + $0x30] sm:$0xff] %vm5985_vm7, %v5908_v63 }
 0x591   : > { %v5910_v21 = vpop.permute.xlu0 %5909  ;;  %6158 = vst.msk [vmem:[#allocation7 + $0x30] sm:$0xff] %vm6154_vm0, %v6077_v24  ;;  %6257 = vrot.lane.b32.xlu1 %v5182_v56, %s10813_s20  ;;  %v5187_v56 = vld [vmem:[#allocation3 + $0x91] sm:$0xff] }
 0x592   : > { %5990 = vst.msk [vmem:[#allocation7 + $0x40] sm:$0xff] %vm5985_vm7, %v5910_v21 }
 0x593   : > { %6090 = vrot.lane.b32.xlu0 %v13826_v20, %s10809_s17  ;;  %v6242_v17 = vpop.permute.xlu1 %6241 }
 0x594   : > { %6325 = vst.msk [vmem:[#allocation7 + $0x10] sm:$0xff] %vm6323_vm8, %v6242_v17 }
 0x595   : > { %v6075_v43 = vpop.permute.xlu0 %6074  ;;  %5593 = vrot.lane.b32.xlu1 %v13842_v7, %s10811_s30 }
 0x596   : > { %6157 = vst.msk [vmem:[#allocation7 + $0x20] sm:$0xff] %vm6154_vm0, %v6075_v43 }
 0x597   : > { %6259 = vrot.lane.b32.xlu0 %v5183_v27, %s10813_s20  ;;  %v5578_v28 = vpop.permute.xlu1 %5577 }
 0x599   : > { %v6244_v33 = vpop.permute.xlu0 %6243  ;;  %6096 = vrot.lane.b32.xlu1 %v13842_v7, %s10809_s17 }
 0x59a   : > { %6326 = vst.msk [vmem:[#allocation7 + $0x20] sm:$0xff] %vm6323_vm8, %v6244_v33 }
 0x59b   : > { %5257 = vrot.lane.b32.xlu0 %v5185_v14, %s10810_s29  ;;  %v6081_v20 = vpop.permute.xlu1 %6080  ;;  %v6410_v25 = vld [vmem:[#allocation7 + $0x10] sm:$0xff] }
 0x59c   : > { %6643 = vmatmul.mubr.f32.gmra.mrb[130].mxu1 %v6410_v25 }
 0x59d   : > { %v5242_v55 = vpop.permute.xlu0 %5241  ;;  %10205 = vmatprep.mubr.msk.f32.mxu1 %vm5080_vm3, %v6413_v53  ;;  %5255 = vrot.lane.b32.xlu1 %v5184_v36, %s10810_s29  ;;  %v5188_v53 = vld [vmem:[#allocation3 + $0x99] sm:$0xff] }
 0x59e   : > { %5318 = vst.msk [vmem:[#allocation7 + $0x80] sm:$0xff] %vm5309_vm2, %v5242_v55 }
 0x59f   : > { %5426 = vrot.lane.b32.xlu0 %v13846_v29, %s10808_s16  ;;  %v5240_v60 = vpop.permute.xlu1 %5239 }
 0x5a0   : > { %5317 = vst.msk [vmem:[#allocation7 + $0x70] sm:$0xff] %vm5309_vm2, %v5240_v60  ;;  %v5358_v60 = vld [vmem:[#allocation3 + $0xa2] sm:$0xff] }
 0x5a1   : > { %v5411_v7 = vpop.permute.xlu0 %5410  ;;  %v6412_v45 = vld [vmem:[#allocation7 + $0x20] sm:$0xff]  ;;  %5424 = vrot.lane.b32.xlu1 %v13844_v49, %s10808_s16 }
 0x5a2   : > { %5487 = vst.msk [vmem:[#allocation7 + $0x80] sm:$0xff] %vm5478_vm4, %v5411_v7  ;;  %6648 = vmatmul.mubr.f32.gmra.mrb[132].mxu1 %v6412_v45  ;;  %v5357_v45 = vld [vmem:[#allocation3 + $0x9a] sm:$0xff] }
 0x5a3   : > { %10206 = vmatprep.mubr.msk.f32.mxu1 %vm5080_vm3, %v6415_v54  ;;  %5591 = vrot.lane.b32.xlu0 %v13865_v39, %s10811_s30  ;;  %v5409_v19 = vpop.permute.xlu1 %5408 }
 0x5a4   : > { %5486 = vst.msk [vmem:[#allocation7 + $0x70] sm:$0xff] %vm5478_vm4, %v5409_v19  ;;  %v6423_v19 = vld [vmem:[#allocation7 + $0x78] sm:$0xff] }
 0x5a5   : > { %v5576_v0 = vpop.permute.xlu0 %5575  ;;  %5655 = vst.msk [vmem:[#allocation7 + $0x70] sm:$0xff] %vm5647_vm5, %v5578_v28  ;;  %5758 = vrot.lane.b32.xlu1 %v5184_v36, %s10806_s25 }
 0x5a6   : > { %5654 = vst.msk [vmem:[#allocation7 + $0x60] sm:$0xff] %vm5647_vm5, %v5576_v0 }
 0x5a7   : > { %5760 = vrot.lane.b32.xlu0 %v5185_v14, %s10806_s25  ;;  %v5743_v22 = vpop.permute.xlu1 %5742 }
 0x5a8   : > { %5822 = vst.msk [vmem:[#allocation7 + $0x50] sm:$0xff] %vm5816_vm6, %v5743_v22 }
 0x5a9   : > { %v5745_v47 = vpop.permute.xlu0 %5744  ;;  %5927 = vrot.lane.b32.xlu1 %v13844_v49, %s10812_s10 }
 0x5aa   : > { %5823 = vst.msk [vmem:[#allocation7 + $0x60] sm:$0xff] %vm5816_vm6, %v5745_v47 }
 0x5ab   : > { %5929 = vrot.lane.b32.xlu0 %v13846_v29, %s10812_s10  ;;  %v5912_v52 = vpop.permute.xlu1 %5911 }
 0x5ac   : > { %5991 = vst.msk [vmem:[#allocation7 + $0x50] sm:$0xff] %vm5985_vm7, %v5912_v52 }
 0x5ad   : > { %v5914_v27 = vpop.permute.xlu0 %5913  ;;  %6160 = vst.msk [vmem:[#allocation7 + $0x50] sm:$0xff] %vm6154_vm0, %v6081_v20  ;;  %6261 = vrot.lane.b32.xlu1 %v5184_v36, %s10813_s20  ;;  %v5189_v20 = vld [vmem:[#allocation3 + $0xa1] sm:$0xff]  ;;  %v6421_v36 = vld [vmem:[#allocation7 + $0x68] sm:$0xff] }
 0x5ae   : > { %5992 = vst.msk [vmem:[#allocation7 + $0x60] sm:$0xff] %vm5985_vm7, %v5914_v27 }
 0x5af   : > { %6094 = vrot.lane.b32.xlu0 %v13865_v39, %s10809_s17  ;;  %v6246_v24 = vpop.permute.xlu1 %6245 }
 0x5b0   : > { %6327 = vst.msk [vmem:[#allocation7 + $0x30] sm:$0xff] %vm6323_vm8, %v6246_v24 }
 0x5b1   : > { %v6079_v49 = vpop.permute.xlu0 %6078  ;;  %5597 = vrot.lane.b32.xlu1 %v13873_v5, %s10811_s30 }
 0x5b2   : > { %6159 = vst.msk [vmem:[#allocation7 + $0x40] sm:$0xff] %vm6154_vm0, %v6079_v49 }
 0x5b3   : > { %6263 = vrot.lane.b32.xlu0 %v5185_v14, %s10813_s20  ;;  %v5582_v29 = vpop.permute.xlu1 %5581 }
 0x5b5   : > { %v6248_v44 = vpop.permute.xlu0 %6247  ;;  %6100 = vrot.lane.b32.xlu1 %v13873_v5, %s10809_s17 }
 0x5b6   : > { %6328 = vst.msk [vmem:[#allocation7 + $0x40] sm:$0xff] %vm6323_vm8, %v6248_v44 }
 0x5b7   : > { %5261 = vrot.lane.b32.xlu0 %v5187_v56, %s10810_s29  ;;  %v6085_v39 = vpop.permute.xlu1 %6084  ;;  %v6414_v18 = vld [vmem:[#allocation7 + $0x30] sm:$0xff] }
 0x5b8   : > { %6653 = vmatmul.mubr.f32.gmra.mrb[134].mxu1 %v6414_v18 }
 0x5b9   : > { %v5246_v40 = vpop.permute.xlu0 %5245  ;;  %5259 = vrot.lane.b32.xlu1 %v5186_v23, %s10810_s29  ;;  %10207 = vmatprep.mubr.msk.f32.mxu1 %vm5080_vm3, %v6417_v30  ;;  %v6425_v30 = vld [vmem:[#allocation7 + $0x88] sm:$0xff] }
 0x5ba   : > { %5320 = vst.msk [vmem:[#allocation7 + $0xa0] sm:$0xff] %vm5309_vm2, %v5246_v40 }
 0x5bb   : > { %5430 = vrot.lane.b32.xlu0 %v13877_v10, %s10808_s16  ;;  %v5244_v58 = vpop.permute.xlu1 %5243 }
 0x5bc   : > { %5319 = vst.msk [vmem:[#allocation7 + $0x90] sm:$0xff] %vm5309_vm2, %v5244_v58  ;;  %v5360_v58 = vld [vmem:[#allocation3 + $0xb2] sm:$0xff] }
 0x5bd   : > { %v5415_v5 = vpop.permute.xlu0 %5414  ;;  %v6416_v35 = vld [vmem:[#allocation7 + $0x40] sm:$0xff]  ;;  %5428 = vrot.lane.b32.xlu1 %v13875_v26, %s10808_s16 }
 0x5be   : > { %5489 = vst.msk [vmem:[#allocation7 + $0xa0] sm:$0xff] %vm5478_vm4, %v5415_v5  ;;  %6658 = vmatmul.mubr.f32.gmra.mrb[136].mxu1 %v6416_v35  ;;  %v5359_v35 = vld [vmem:[#allocation3 + $0xaa] sm:$0xff] }
 0x5bf   : > { %5595 = vrot.lane.b32.xlu0 %v13909_v38, %s10811_s30  ;;  %10208 = vmatprep.mubr.msk.f32.mxu1 %vm5080_vm3, %v6419_v57  ;;  %v5413_v31 = vpop.permute.xlu1 %5412 }
 0x5c0   : > { %5488 = vst.msk [vmem:[#allocation7 + $0x90] sm:$0xff] %vm5478_vm4, %v5413_v31  ;;  %v6427_v31 = vld [vmem:[#allocation7 + $0x98] sm:$0xff] }
 0x5c1   : > { %v5580_v63 = vpop.permute.xlu0 %5579  ;;  %5657 = vst.msk [vmem:[#allocation7 + $0x90] sm:$0xff] %vm5647_vm5, %v5582_v29  ;;  %5762 = vrot.lane.b32.xlu1 %v5186_v23, %s10806_s25 }
 0x5c2   : > { %5656 = vst.msk [vmem:[#allocation7 + $0x80] sm:$0xff] %vm5647_vm5, %v5580_v63 }
 0x5c3   : > { %5764 = vrot.lane.b32.xlu0 %v5187_v56, %s10806_s25  ;;  %v5747_v21 = vpop.permute.xlu1 %5746 }
 0x5c4   : > { %5824 = vst.msk [vmem:[#allocation7 + $0x70] sm:$0xff] %vm5816_vm6, %v5747_v21 }
 0x5c5   : > { %v5749_v17 = vpop.permute.xlu0 %5748  ;;  %5931 = vrot.lane.b32.xlu1 %v13875_v26, %s10812_s10 }
 0x5c6   : > { %5825 = vst.msk [vmem:[#allocation7 + $0x80] sm:$0xff] %vm5816_vm6, %v5749_v17 }
 0x5c7   : > { %5933 = vrot.lane.b32.xlu0 %v13877_v10, %s10812_s10  ;;  %v5916_v43 = vpop.permute.xlu1 %5915 }
 0x5c8   : > { %5993 = vst.msk [vmem:[#allocation7 + $0x70] sm:$0xff] %vm5985_vm7, %v5916_v43 }
 0x5c9   : > { %v5918_v28 = vpop.permute.xlu0 %5917  ;;  %6162 = vst.msk [vmem:[#allocation7 + $0x70] sm:$0xff] %vm6154_vm0, %v6085_v39  ;;  %6265 = vrot.lane.b32.xlu1 %v5186_v23, %s10813_s20  ;;  %v5191_v39 = vld [vmem:[#allocation3 + $0xb1] sm:$0xff]  ;;  %v5190_v23 = vld [vmem:[#allocation3 + $0xa9] sm:$0xff] }
 0x5ca   : > { %5994 = vst.msk [vmem:[#allocation7 + $0x80] sm:$0xff] %vm5985_vm7, %v5918_v28 }
 0x5cb   : > { %6098 = vrot.lane.b32.xlu0 %v13909_v38, %s10809_s17  ;;  %v6250_v33 = vpop.permute.xlu1 %6249 }
 0x5cc   : > { %6329 = vst.msk [vmem:[#allocation7 + $0x50] sm:$0xff] %vm6323_vm8, %v6250_v33 }
 0x5cd   : > { %v6083_v26 = vpop.permute.xlu0 %6082  ;;  %5601 = vrot.lane.b32.xlu1 %v13917_v2, %s10811_s30 }
 0x5ce   : > { %6161 = vst.msk [vmem:[#allocation7 + $0x60] sm:$0xff] %vm6154_vm0, %v6083_v26 }
 0x5cf   : > { %6267 = vrot.lane.b32.xlu0 %v5187_v56, %s10813_s20  ;;  %v5586_v10 = vpop.permute.xlu1 %5585 }
 0x5d1   : > { %v6252_v14 = vpop.permute.xlu0 %6251  ;;  %6104 = vrot.lane.b32.xlu1 %v13917_v2, %s10809_s17 }
 0x5d2   : > { %6330 = vst.msk [vmem:[#allocation7 + $0x60] sm:$0xff] %vm6323_vm8, %v6252_v14 }
 0x5d3   : > { %5265 = vrot.lane.b32.xlu0 %v5189_v20, %s10810_s29  ;;  %v6089_v38 = vpop.permute.xlu1 %6088  ;;  %v6418_v25 = vld [vmem:[#allocation7 + $0x50] sm:$0xff] }
 0x5d4   : > { %6663 = vmatmul.mubr.f32.gmra.mrb[138].mxu1 %v6418_v25 }
 0x5d5   : > { %v5250_v55 = vpop.permute.xlu0 %5249  ;;  %5263 = vrot.lane.b32.xlu1 %v5188_v53, %s10810_s29  ;;  %10209 = vmatprep.mubr.msk.f32.mxu1 %vm5080_vm3, %v6421_v36  ;;  %v6429_v36 = vld [vmem:[#allocation7 + $0xa8] sm:$0xff] }
 0x5d6   : > { %5322 = vst.msk [vmem:[#allocation7 + $0xc0] sm:$0xff] %vm5309_vm2, %v5250_v55 }
 0x5d7   : > { %5434 = vrot.lane.b32.xlu0 %v5358_v60, %s10808_s16  ;;  %v5248_v7 = vpop.permute.xlu1 %5247 }
 0x5d8   : > { %5321 = vst.msk [vmem:[#allocation7 + $0xb0] sm:$0xff] %vm5309_vm2, %v5248_v7 }
 0x5d9   : > { %v5419_v2 = vpop.permute.xlu0 %5418  ;;  %v6420_v54 = vld [vmem:[#allocation7 + $0x60] sm:$0xff]  ;;  %5432 = vrot.lane.b32.xlu1 %v5357_v45, %s10808_s16 }
 0x5da   : > { %5491 = vst.msk [vmem:[#allocation7 + $0xc0] sm:$0xff] %vm5478_vm4, %v5419_v2  ;;  %6668 = vmatmul.mubr.f32.gmra.mrb[140].mxu1 %v6420_v54  ;;  %v5361_v2 = vld [vmem:[#allocation3 + $0xba] sm:$0xff]  ;;  %v6431_v54 = vld [vmem:[#allocation7 + $0xb8] sm:$0xff] }
 0x5db   : > { %5599 = vrot.lane.b32.xlu0 %v13934_v9, %s10811_s30  ;;  %10210 = vmatprep.mubr.msk.f32.mxu1 %vm5080_vm3, %v6423_v19  ;;  %v5417_v0 = vpop.permute.xlu1 %5416 }
 0x5dc   : > { %5490 = vst.msk [vmem:[#allocation7 + $0xb0] sm:$0xff] %vm5478_vm4, %v5417_v0 }
 0x5dd   : > { %v5584_v22 = vpop.permute.xlu0 %5583  ;;  %5659 = vst.msk [vmem:[#allocation7 + $0xb0] sm:$0xff] %vm5647_vm5, %v5586_v10  ;;  %5766 = vrot.lane.b32.xlu1 %v5188_v53, %s10806_s25 }
 0x5de   : > { %5658 = vst.msk [vmem:[#allocation7 + $0xa0] sm:$0xff] %vm5647_vm5, %v5584_v22 }
 0x5df   : > { %5768 = vrot.lane.b32.xlu0 %v5189_v20, %s10806_s25  ;;  %v5751_v47 = vpop.permute.xlu1 %5750 }
 0x5e0   : > { %5826 = vst.msk [vmem:[#allocation7 + $0x90] sm:$0xff] %vm5816_vm6, %v5751_v47 }
 0x5e1   : > { %v5753_v52 = vpop.permute.xlu0 %5752  ;;  %5935 = vrot.lane.b32.xlu1 %v5357_v45, %s10812_s10 }
 0x5e2   : > { %5827 = vst.msk [vmem:[#allocation7 + $0xa0] sm:$0xff] %vm5816_vm6, %v5753_v52 }
 0x5e3   : > { %5937 = vrot.lane.b32.xlu0 %v5358_v60, %s10812_s10  ;;  %v5920_v27 = vpop.permute.xlu1 %5919  ;;  %v5362_v60 = vld [vmem:[#allocation3 + $0xc2] sm:$0xff] }
 0x5e4   : > { %5995 = vst.msk [vmem:[#allocation7 + $0x90] sm:$0xff] %vm5985_vm7, %v5920_v27 }
 0x5e5   : > { %v5922_v24 = vpop.permute.xlu0 %5921  ;;  %6164 = vst.msk [vmem:[#allocation7 + $0x90] sm:$0xff] %vm6154_vm0, %v6089_v38  ;;  %6269 = vrot.lane.b32.xlu1 %v5188_v53, %s10813_s20  ;;  %v5193_v38 = vld [vmem:[#allocation3 + $0xc1] sm:$0xff]  ;;  %v5192_v53 = vld [vmem:[#allocation3 + $0xb9] sm:$0xff] }
 0x5e6   : > { %5996 = vst.msk [vmem:[#allocation7 + $0xa0] sm:$0xff] %vm5985_vm7, %v5922_v24 }
 0x5e7   : > { %6102 = vrot.lane.b32.xlu0 %v13934_v9, %s10809_s17  ;;  %v6254_v49 = vpop.permute.xlu1 %6253 }
 0x5e8   : > { %6331 = vst.msk [vmem:[#allocation7 + $0x70] sm:$0xff] %vm6323_vm8, %v6254_v49 }
 0x5e9   : > { %v6087_v29 = vpop.permute.xlu0 %6086  ;;  %5605 = vrot.lane.b32.xlu1 %v13936_v32, %s10811_s30 }
 0x5ea   : > { %6163 = vst.msk [vmem:[#allocation7 + $0x80] sm:$0xff] %vm6154_vm0, %v6087_v29  ;;  %v5196_v29 = vld [vmem:[#allocation3 + $0xd9] sm:$0xff] }
 0x5eb   : > { %6271 = vrot.lane.b32.xlu0 %v5189_v20, %s10813_s20  ;;  %v5590_v44 = vpop.permute.xlu1 %5589 }
 0x5ed   : > { %v6256_v56 = vpop.permute.xlu0 %6255  ;;  %6108 = vrot.lane.b32.xlu1 %v13936_v32, %s10809_s17 }
 0x5ee   : > { %6332 = vst.msk [vmem:[#allocation7 + $0x80] sm:$0xff] %vm6323_vm8, %v6256_v56 }
 0x5ef   : > { %5269 = vrot.lane.b32.xlu0 %v5191_v39, %s10810_s29  ;;  %v6093_v9 = vpop.permute.xlu1 %6092  ;;  %v6422_v18 = vld [vmem:[#allocation7 + $0x70] sm:$0xff] }
 0x5f0   : > { %6673 = vmatmul.mubr.f32.gmra.mrb[142].mxu1 %v6422_v18 }
 0x5f1   : > { %v5254_v40 = vpop.permute.xlu0 %5253  ;;  %5267 = vrot.lane.b32.xlu1 %v5190_v23, %s10810_s29  ;;  %10211 = vmatprep.mubr.msk.f32.mxu1 %vm5080_vm3, %v6425_v30  ;;  %v5364_v30 = vld [vmem:[#allocation3 + $0xd2] sm:$0xff] }
 0x5f2   : > { %5324 = vst.msk [vmem:[#allocation7 + $0xe0] sm:$0xff] %vm5309_vm2, %v5254_v40 }
 0x5f3   : > { %5438 = vrot.lane.b32.xlu0 %v5360_v58, %s10808_s16  ;;  %v5252_v5 = vpop.permute.xlu1 %5251 }
 0x5f4   : > { %5323 = vst.msk [vmem:[#allocation7 + $0xd0] sm:$0xff] %vm5309_vm2, %v5252_v5 }
 0x5f5   : > { %v5423_v32 = vpop.permute.xlu0 %5422  ;;  %v6424_v57 = vld [vmem:[#allocation7 + $0x80] sm:$0xff]  ;;  %5436 = vrot.lane.b32.xlu1 %v5359_v35, %s10808_s16 }
 0x5f6   : > { %5493 = vst.msk [vmem:[#allocation7 + $0xe0] sm:$0xff] %vm5478_vm4, %v5423_v32  ;;  %6678 = vmatmul.mubr.f32.gmra.mrb[144].mxu1 %v6424_v57 }
 0x5f7   : > { %5603 = vrot.lane.b32.xlu0 %v13950_v15, %s10811_s30  ;;  %10212 = vmatprep.mubr.msk.f32.mxu1 %vm5080_vm3, %v6427_v31  ;;  %v5421_v63 = vpop.permute.xlu1 %5420 }
 0x5f8   : > { %5492 = vst.msk [vmem:[#allocation7 + $0xd0] sm:$0xff] %vm5478_vm4, %v5421_v63 }
 0x5f9   : > { %v5588_v21 = vpop.permute.xlu0 %5587  ;;  %5661 = vst.msk [vmem:[#allocation7 + $0xd0] sm:$0xff] %vm5647_vm5, %v5590_v44  ;;  %5770 = vrot.lane.b32.xlu1 %v5190_v23, %s10806_s25 }
 0x5fa   : > { %5660 = vst.msk [vmem:[#allocation7 + $0xc0] sm:$0xff] %vm5647_vm5, %v5588_v21 }
 0x5fb   : > { %5772 = vrot.lane.b32.xlu0 %v5191_v39, %s10806_s25  ;;  %v5755_v17 = vpop.permute.xlu1 %5754 }
 0x5fc   : > { %5828 = vst.msk [vmem:[#allocation7 + $0xb0] sm:$0xff] %vm5816_vm6, %v5755_v17 }
 0x5fd   : > { %v5757_v43 = vpop.permute.xlu0 %5756  ;;  %5939 = vrot.lane.b32.xlu1 %v5359_v35, %s10812_s10  ;;  %v6435_v35 = vld [vmem:[#allocation7 + $0xd8] sm:$0xff] }
 0x5fe   : > { %5829 = vst.msk [vmem:[#allocation7 + $0xc0] sm:$0xff] %vm5816_vm6, %v5757_v43 }
 0x5ff   : > { %5941 = vrot.lane.b32.xlu0 %v5360_v58, %s10812_s10  ;;  %v5924_v28 = vpop.permute.xlu1 %5923 }
 0x600   : > { %5997 = vst.msk [vmem:[#allocation7 + $0xb0] sm:$0xff] %vm5985_vm7, %v5924_v28 }
 0x601   : > { %v5926_v33 = vpop.permute.xlu0 %5925  ;;  %6166 = vst.msk [vmem:[#allocation7 + $0xb0] sm:$0xff] %vm6154_vm0, %v6093_v9  ;;  %6273 = vrot.lane.b32.xlu1 %v5190_v23, %s10813_s20  ;;  %v5195_v9 = vld [vmem:[#allocation3 + $0xd1] sm:$0xff] }
 0x602   : > { %5998 = vst.msk [vmem:[#allocation7 + $0xc0] sm:$0xff] %vm5985_vm7, %v5926_v33  ;;  %v6433_v23 = vld [vmem:[#allocation7 + $0xc8] sm:$0xff] }
 0x603   : > { %6106 = vrot.lane.b32.xlu0 %v13950_v15, %s10809_s17  ;;  %v6258_v26 = vpop.permute.xlu1 %6257 }
 0x604   : > { %6333 = vst.msk [vmem:[#allocation7 + $0x90] sm:$0xff] %vm6323_vm8, %v6258_v26 }
 0x605   : > { %v6091_v10 = vpop.permute.xlu0 %6090  ;;  %5609 = vrot.lane.b32.xlu1 %v13952_v34, %s10811_s30 }
 0x606   : > { %6165 = vst.msk [vmem:[#allocation7 + $0xa0] sm:$0xff] %vm6154_vm0, %v6091_v10 }
 0x607   : > { %6275 = vrot.lane.b32.xlu0 %v5191_v39, %s10813_s20  ;;  %v5594_v14 = vpop.permute.xlu1 %5593  ;;  %v5365_v39 = vld [vmem:[#allocation3 + $0xda] sm:$0xff] }
 0x609   : > { %v6260_v20 = vpop.permute.xlu0 %6259  ;;  %6112 = vrot.lane.b32.xlu1 %v13952_v34, %s10809_s17 }
 0x60a   : > { %6334 = vst.msk [vmem:[#allocation7 + $0xa0] sm:$0xff] %vm6323_vm8, %v6260_v20 }
 0x60b   : > { %5273 = vrot.lane.b32.xlu0 %v5193_v38, %s10810_s29  ;;  %v6097_v15 = vpop.permute.xlu1 %6096  ;;  %v6426_v25 = vld [vmem:[#allocation7 + $0x90] sm:$0xff] }
 0x60c   : > { %6683 = vmatmul.mubr.f32.gmra.mrb[146].mxu1 %v6426_v25 }
 0x60d   : > { %v5258_v55 = vpop.permute.xlu0 %5257  ;;  %5271 = vrot.lane.b32.xlu1 %v5192_v53, %s10810_s29  ;;  %10213 = vmatprep.mubr.msk.f32.mxu1 %vm5080_vm3, %v6429_v36  ;;  %v6439_v36 = vld [vmem:[#allocation7 + $0xf8] sm:$0xff] }
 0x60e   : > { %5326 = vst.msk [vmem:[#allocation7 + $0x100] sm:$0xff] %vm5309_vm2, %v5258_v55 }
 0x60f   : > { %5442 = vrot.lane.b32.xlu0 %v5362_v60, %s10808_s16  ;;  %v5256_v7 = vpop.permute.xlu1 %5255 }
 0x610   : > { %5325 = vst.msk [vmem:[#allocation7 + $0xf0] sm:$0xff] %vm5309_vm2, %v5256_v7 }
 0x611   : > { %v5427_v34 = vpop.permute.xlu0 %5426  ;;  %v6428_v45 = vld [vmem:[#allocation7 + $0xa0] sm:$0xff]  ;;  %5440 = vrot.lane.b32.xlu1 %v5361_v2, %s10808_s16 }
 0x612   : > { %5495 = vst.msk [vmem:[#allocation7 + $0x100] sm:$0xff] %vm5478_vm4, %v5427_v34  ;;  %6688 = vmatmul.mubr.f32.gmra.mrb[148].mxu1 %v6428_v45  ;;  %v6376_v34 = vld [vmem:[#allocation3 + $0xe2] sm:$0xff] }
 0x613   : > { %5607 = vrot.lane.b32.xlu0 %v13963_v41, %s10811_s30  ;;  %10214 = vmatprep.mubr.msk.f32.mxu1 %vm5080_vm3, %v6431_v54  ;;  %v5425_v19 = vpop.permute.xlu1 %5424  ;;  %6404 = vst.msk [vmem:[#allocation7 + $0x188] sm:$0xff] %vm5080_vm3, %v6376_v34  ;;  %v6377_v54 = vld [vmem:[#allocation3 + $0xea] sm:$0xff]  ;;  %v6445_v34 = vld [vmem:[#allocation7 + $0x128] sm:$0xff] }
 0x614   : > { %5494 = vst.msk [vmem:[#allocation7 + $0xf0] sm:$0xff] %vm5478_vm4, %v5425_v19 }
 0x615   : > { %v5592_v0 = vpop.permute.xlu0 %5591  ;;  %5663 = vst.msk [vmem:[#allocation7 + $0xf0] sm:$0xff] %vm5647_vm5, %v5594_v14  ;;  %5774 = vrot.lane.b32.xlu1 %v5192_v53, %s10806_s25  ;;  %v5363_v14 = vld [vmem:[#allocation3 + $0xca] sm:$0xff] }
 0x616   : > { %5662 = vst.msk [vmem:[#allocation7 + $0xe0] sm:$0xff] %vm5647_vm5, %v5592_v0 }
 0x617   : > { %5776 = vrot.lane.b32.xlu0 %v5193_v38, %s10806_s25  ;;  %v5759_v22 = vpop.permute.xlu1 %5758  ;;  %6405 = vst.msk [vmem:[#allocation7 + $0x198] sm:$0xff] %vm5080_vm3, %v6377_v54 }
 0x618   : > { %5830 = vst.msk [vmem:[#allocation7 + $0xd0] sm:$0xff] %vm5816_vm6, %v5759_v22  ;;  %v6378_v22 = vld [vmem:[#allocation3 + $0xf2] sm:$0xff] }
 0x619   : > { %v5761_v47 = vpop.permute.xlu0 %5760  ;;  %5943 = vrot.lane.b32.xlu1 %v5361_v2, %s10812_s10  ;;  %6406 = vst.msk [vmem:[#allocation7 + $0x1a8] sm:$0xff] %vm5080_vm3, %v6378_v22 }
 0x61a   : > { %5831 = vst.msk [vmem:[#allocation7 + $0xe0] sm:$0xff] %vm5816_vm6, %v5761_v47  ;;  %v14362_v47 = vld [vmem:[%s16183_s6] ss:$0 sm:$0xff] }
 0x61b   : > { %5945 = vrot.lane.b32.xlu0 %v5362_v60, %s10812_s10  ;;  %v5928_v52 = vpop.permute.xlu1 %5927 }
 0x61c   : > { %5999 = vst.msk [vmem:[#allocation7 + $0xd0] sm:$0xff] %vm5985_vm7, %v5928_v52 }
 0x61d   : > { %v5930_v27 = vpop.permute.xlu0 %5929  ;;  %6168 = vst.msk [vmem:[#allocation7 + $0xd0] sm:$0xff] %vm6154_vm0, %v6097_v15  ;;  %6277 = vrot.lane.b32.xlu1 %v5192_v53, %s10813_s20  ;;  %v6437_v15 = vld [vmem:[#allocation7 + $0xe8] sm:$0xff] }
 0x61e   : > { %6000 = vst.msk [vmem:[#allocation7 + $0xe0] sm:$0xff] %vm5985_vm7, %v5930_v27 }
 0x61f   : > { %6110 = vrot.lane.b32.xlu0 %v13963_v41, %s10809_s17  ;;  %v6262_v24 = vpop.permute.xlu1 %6261 }
 0x620   : > { %6335 = vst.msk [vmem:[#allocation7 + $0xb0] sm:$0xff] %vm6323_vm8, %v6262_v24 }
 0x621   : > { %v6095_v49 = vpop.permute.xlu0 %6094  ;;  %5279 = vrot.lane.b32.xlu1 %v5196_v29, %s10810_s29 }
 0x622   : > { %6167 = vst.msk [vmem:[#allocation7 + $0xc0] sm:$0xff] %vm6154_vm0, %v6095_v49 }
 0x623   : > { %6279 = vrot.lane.b32.xlu0 %v5193_v38, %s10813_s20  ;;  %v5598_v44 = vpop.permute.xlu1 %5597 }
 0x625   : > { %v6264_v56 = vpop.permute.xlu0 %6263  ;;  %5448 = vrot.lane.b32.xlu1 %v5365_v39, %s10808_s16 }
 0x626   : > { %6336 = vst.msk [vmem:[#allocation7 + $0xc0] sm:$0xff] %vm6323_vm8, %v6264_v56 }
 0x627   : > { %5277 = vrot.lane.b32.xlu0 %v5195_v9, %s10810_s29  ;;  %v6101_v41 = vpop.permute.xlu1 %6100  ;;  %v6430_v18 = vld [vmem:[#allocation7 + $0xb0] sm:$0xff] }
 0x628   : > { %6693 = vmatmul.mubr.f32.gmra.mrb[150].mxu1 %v6430_v18 }
 0x629   : > { %v5262_v40 = vpop.permute.xlu0 %5261  ;;  %5613 = vrot.lane.b32.xlu1 %v13974_v62, %s10811_s30  ;;  %10215 = vmatprep.mubr.msk.f32.mxu1 %vm5080_vm3, %v6433_v23  ;;  %v6441_v23 = vld [vmem:[#allocation7 + $0x108] sm:$0xff] }
 0x62a   : > { %5328 = vst.msk [vmem:[#allocation7 + $0x120] sm:$0xff] %vm5309_vm2, %v5262_v40 }
 0x62b   : > { %5446 = vrot.lane.b32.xlu0 %v5364_v30, %s10808_s16  ;;  %v5260_v58 = vpop.permute.xlu1 %5259 }
 0x62c   : > { %5327 = vst.msk [vmem:[#allocation7 + $0x110] sm:$0xff] %vm5309_vm2, %v5260_v58 }
 0x62d   : > { %v5431_v5 = vpop.permute.xlu0 %5430  ;;  %v6432_v32 = vld [vmem:[#allocation7 + $0xc0] sm:$0xff]  ;;  %5782 = vrot.lane.b32.xlu1 %v5196_v29, %s10806_s25 }
 0x62e   : > { %5497 = vst.msk [vmem:[#allocation7 + $0x120] sm:$0xff] %vm5478_vm4, %v5431_v5  ;;  %6698 = vmatmul.mubr.f32.gmra.mrb[152].mxu1 %v6432_v32 }
 0x62f   : > { %5611 = vrot.lane.b32.xlu0 %v13976_v51, %s10811_s30  ;;  %10216 = vmatprep.mubr.msk.f32.mxu1 %vm5080_vm3, %v6435_v35  ;;  %v5429_v57 = vpop.permute.xlu1 %5428  ;;  %v6443_v35 = vld [vmem:[#allocation7 + $0x118] sm:$0xff] }
 0x630   : > { %5496 = vst.msk [vmem:[#allocation7 + $0x110] sm:$0xff] %vm5478_vm4, %v5429_v57 }
 0x631   : > { %v5596_v31 = vpop.permute.xlu0 %5595  ;;  %5665 = vst.msk [vmem:[#allocation7 + $0x110] sm:$0xff] %vm5647_vm5, %v5598_v44  ;;  %5951 = vrot.lane.b32.xlu1 %v5365_v39, %s10812_s10  ;;  %v6379_v44 = vld [vmem:[#allocation3 + $0xfa] sm:$0xff] }
 0x632   : > { %5664 = vst.msk [vmem:[#allocation7 + $0x100] sm:$0xff] %vm5647_vm5, %v5596_v31 }
 0x633   : > { %5780 = vrot.lane.b32.xlu0 %v5195_v9, %s10806_s25  ;;  %v5763_v63 = vpop.permute.xlu1 %5762  ;;  %6407 = vst.msk [vmem:[#allocation7 + $0x1b8] sm:$0xff] %vm5080_vm3, %v6379_v44 }
 0x634   : > { %5832 = vst.msk [vmem:[#allocation7 + $0xf0] sm:$0xff] %vm5816_vm6, %v5763_v63 }
 0x635   : > { %v5765_v21 = vpop.permute.xlu0 %5764  ;;  %6116 = vrot.lane.b32.xlu1 %v13974_v62, %s10809_s17  ;;  %v5194_v62 = vld [vmem:[#allocation3 + $0xc9] sm:$0xff] }
 0x636   : > { %5833 = vst.msk [vmem:[#allocation7 + $0x100] sm:$0xff] %vm5816_vm6, %v5765_v21 }
 0x637   : > { %5949 = vrot.lane.b32.xlu0 %v5364_v30, %s10812_s10  ;;  %v5932_v17 = vpop.permute.xlu1 %5931 }
 0x638   : > { %6001 = vst.msk [vmem:[#allocation7 + $0xf0] sm:$0xff] %vm5985_vm7, %v5932_v17 }
 0x639   : > { %v5934_v43 = vpop.permute.xlu0 %5933  ;;  %6170 = vst.msk [vmem:[#allocation7 + $0xf0] sm:$0xff] %vm6154_vm0, %v6101_v41  ;;  %6285 = vrot.lane.b32.xlu1 %v5196_v29, %s10813_s20 }
 0x63a   : > { %6002 = vst.msk [vmem:[#allocation7 + $0x100] sm:$0xff] %vm5985_vm7, %v5934_v43 }
 0x63b   : > { %6114 = vrot.lane.b32.xlu0 %v13976_v51, %s10809_s17  ;;  %v6266_v28 = vpop.permute.xlu1 %6265 }
 0x63c   : > { %6337 = vst.msk [vmem:[#allocation7 + $0xd0] sm:$0xff] %vm6323_vm8, %v6266_v28 }
 0x63d   : > { %v6099_v33 = vpop.permute.xlu0 %6098  ;;  %5275 = vrot.lane.b32.xlu1 %v5194_v62, %s10810_s29 }
 0x63e   : > { %6169 = vst.msk [vmem:[#allocation7 + $0xe0] sm:$0xff] %vm6154_vm0, %v6099_v33 }
 0x63f   : > { %6283 = vrot.lane.b32.xlu0 %v5195_v9, %s10813_s20  ;;  %v5602_v26 = vpop.permute.xlu1 %5601 }
 0x641   : > { %v6268_v10 = vpop.permute.xlu0 %6267  ;;  %5444 = vrot.lane.b32.xlu1 %v5363_v14, %s10808_s16 }
 0x642   : > { %6338 = vst.msk [vmem:[#allocation7 + $0xe0] sm:$0xff] %vm6323_vm8, %v6268_v10 }
 0x643   : > { %v6105_v20 = vpop.permute.xlu1 %6104  ;;  %v6434_v51 = vld [vmem:[#allocation7 + $0xd0] sm:$0xff] }
 0x644   : > { %6703 = vmatmul.mubr.f32.gmra.mrb[154].mxu1 %v6434_v51 }
 0x645   : > { %v5266_v38 = vpop.permute.xlu0 %5265  ;;  %5778 = vrot.lane.b32.xlu1 %v5194_v62, %s10806_s25  ;;  %10217 = vmatprep.mubr.msk.f32.mxu1 %vm5080_vm3, %v6437_v15 }
 0x646   : > { %5330 = vst.msk [vmem:[#allocation7 + $0x140] sm:$0xff] %vm5309_vm2, %v5266_v38 }
 0x647   : > { %v5264_v25 = vpop.permute.xlu1 %5263 }
 0x648   : > { %5329 = vst.msk [vmem:[#allocation7 + $0x130] sm:$0xff] %vm5309_vm2, %v5264_v25 }
 0x649   : > { %v5435_v55 = vpop.permute.xlu0 %5434  ;;  %v6436_v53 = vld [vmem:[#allocation7 + $0xe0] sm:$0xff]  ;;  %5947 = vrot.lane.b32.xlu1 %v5363_v14, %s10812_s10 }
 0x64a   : > { %5499 = vst.msk [vmem:[#allocation7 + $0x140] sm:$0xff] %vm5478_vm4, %v5435_v55  ;;  %6708 = vmatmul.mubr.f32.gmra.mrb[156].mxu1 %v6436_v53 }
 0x64b   : > { %10218 = vmatprep.mubr.msk.f32.mxu1 %vm5080_vm3, %v6439_v36  ;;  %v5433_v60 = vpop.permute.xlu1 %5432 }
 0x64c   : > { %5498 = vst.msk [vmem:[#allocation7 + $0x130] sm:$0xff] %vm5478_vm4, %v5433_v60 }
 0x64d   : > { %v5600_v7 = vpop.permute.xlu0 %5599  ;;  %5667 = vst.msk [vmem:[#allocation7 + $0x130] sm:$0xff] %vm5647_vm5, %v5602_v26  ;;  %6281 = vrot.lane.b32.xlu1 %v5194_v62, %s10813_s20 }
 0x64e   : > { %5666 = vst.msk [vmem:[#allocation7 + $0x120] sm:$0xff] %vm5647_vm5, %v5600_v7 }
 0x64f   : > { %v5767_v2 = vpop.permute.xlu1 %5766 }
 0x650   : > { %5834 = vst.msk [vmem:[#allocation7 + $0x110] sm:$0xff] %vm5816_vm6, %v5767_v2 }
 0x651   : > { %v5769_v45 = vpop.permute.xlu0 %5768 }
 0x652   : > { %5835 = vst.msk [vmem:[#allocation7 + $0x120] sm:$0xff] %vm5816_vm6, %v5769_v45 }
 0x653   : > { %v5936_v19 = vpop.permute.xlu1 %5935 }
 0x654   : > { %6003 = vst.msk [vmem:[#allocation7 + $0x110] sm:$0xff] %vm5985_vm7, %v5936_v19 }
 0x655   : > { %v5938_v0 = vpop.permute.xlu0 %5937  ;;  %6172 = vst.msk [vmem:[#allocation7 + $0x110] sm:$0xff] %vm6154_vm0, %v6105_v20 }
 0x656   : > { %6004 = vst.msk [vmem:[#allocation7 + $0x120] sm:$0xff] %vm5985_vm7, %v5938_v0 }
 0x657   : > { %v6270_v52 = vpop.permute.xlu1 %6269 }
 0x658   : > { %6339 = vst.msk [vmem:[#allocation7 + $0xf0] sm:$0xff] %vm6323_vm8, %v6270_v52  ;;  %v6447_v52 = vld [vmem:[#allocation7 + $0x138] sm:$0xff] }
 0x659   : > { %v6639_v27 = vpop.f32.mrb[128].mxu1  ;;  %v6103_v24 = vpop.permute.xlu0 %6102 }
 0x65a   : > { %v6640_v49 = vadd.f32 %v14362_v47, %v6639_v27  ;;  %6171 = vst.msk [vmem:[#allocation7 + $0x100] sm:$0xff] %vm6154_vm0, %v6103_v24  ;;  %v6641_v29 = vpop.f32.mrb[129].mxu1 }
 0x65b   : > { %v5606_v39 = vpop.permute.xlu1 %5605 }
 0x65c   : > { %v6778_v56 = vmax.f32 %v6640_v49, 0.0 }
 0x65d   : > { %v6272_v9 = vpop.permute.xlu0 %6271 }
 0x65e   : > { %6807 = vst.msk [vmem:[#allocation4] sm:$0xff] %vm6806_vm9, %v6778_v56 }
 0x65f   : > { %6340 = vst.msk [vmem:[#allocation7 + $0x100] sm:$0xff] %vm6323_vm8, %v6272_v9  ;;  %v6109_v41 = vpop.permute.xlu1 %6108  ;;  %v6438_v18 = vld [vmem:[#allocation7 + $0xf0] sm:$0xff] }
 0x660   : > { %6713 = vmatmul.mubr.f32.gmra.mrb[158].mxu1 %v6438_v18 }
 0x661   : > { %v5270_v40 = vpop.permute.xlu0 %5269  ;;  %10219 = vmatprep.mubr.msk.f32.mxu1 %vm5080_vm3, %v6441_v23 }
 0x662   : > { %5332 = vst.msk [vmem:[#allocation7 + $0x160] sm:$0xff] %vm5309_vm2, %v5270_v40 }
 0x663   : > { %v5268_v30 = vpop.permute.xlu1 %5267 }
 0x664   : > { %5331 = vst.msk [vmem:[#allocation7 + $0x150] sm:$0xff] %vm5309_vm2, %v5268_v30 }
 0x665   : > { %v5439_v58 = vpop.permute.xlu0 %5438  ;;  %v6835_v32 = vld [vmem:[#allocation4] sm:$0xff] }
 0x666   : > { %v6440_v5 = vld [vmem:[#allocation7 + $0x100] sm:$0xff]  ;;  %5501 = vst.msk [vmem:[#allocation7 + $0x160] sm:$0xff] %vm5478_vm4, %v5439_v58 }
 0x667   : > { %6718 = vmatmul.mubr.f32.gmra.mrb[160].mxu1 %v6440_v5  ;;  %6855 = vst.msk [vmem:[#allocation8] sm:$0xff] %vm6806_vm9, %v6835_v32  ;;  %v5437_v57 = vpop.permute.xlu1 %5436 }
 0x668   : > { %10220 = vmatprep.mubr.msk.f32.mxu1 %vm5080_vm3, %v6443_v35  ;;  %5500 = vst.msk [vmem:[#allocation7 + $0x150] sm:$0xff] %vm5478_vm4, %v5437_v57 }
 0x669   : > { %v5604_v31 = vpop.permute.xlu0 %5603  ;;  %5669 = vst.msk [vmem:[#allocation7 + $0x150] sm:$0xff] %vm5647_vm5, %v5606_v39 }
 0x66a   : > { %5668 = vst.msk [vmem:[#allocation7 + $0x140] sm:$0xff] %vm5647_vm5, %v5604_v31 }
 0x66b   : > { %v5771_v63 = vpop.permute.xlu1 %5770 }
 0x66c   : > { %5836 = vst.msk [vmem:[#allocation7 + $0x130] sm:$0xff] %vm5816_vm6, %v5771_v63 }
 0x66d   : > { %v5773_v21 = vpop.permute.xlu0 %5772 }
 0x66e   : > { %5837 = vst.msk [vmem:[#allocation7 + $0x140] sm:$0xff] %vm5816_vm6, %v5773_v21 }
 0x66f   : > { %v6644_v17 = vpop.f32.mrb[130].mxu1  ;;  %v5940_v43 = vpop.permute.xlu1 %5939 }
 0x670   : > { %v6645_v28 = vadd.f32 %v14362_v47, %v6644_v17  ;;  %6005 = vst.msk [vmem:[#allocation7 + $0x130] sm:$0xff] %vm5985_vm7, %v5940_v43  ;;  %v6646_v33 = vpop.f32.mrb[131].mxu1 }
 0x671   : > { %v5942_v62 = vpop.permute.xlu0 %5941  ;;  %6174 = vst.msk [vmem:[#allocation7 + $0x130] sm:$0xff] %vm6154_vm0, %v6109_v41 }
 0x672   : > { %6006 = vst.msk [vmem:[#allocation7 + $0x140] sm:$0xff] %vm5985_vm7, %v5942_v62  ;;  %v6779_v26 = vmax.f32 %v6645_v28, 0.0 }
 0x673   : > { %v6274_v10 = vpop.permute.xlu1 %6273 }
 0x674   : > { %6808 = vst.msk [vmem:[#allocation4 + $0x8] sm:$0xff] %vm6806_vm9, %v6779_v26 }
 0x675   : > { %6341 = vst.msk [vmem:[#allocation7 + $0x110] sm:$0xff] %vm6323_vm8, %v6274_v10  ;;  %v6649_v14 = vpop.f32.mrb[132].mxu1  ;;  %v6107_v20 = vpop.permute.xlu0 %6106 }
 0x676   : > { %v6650_v51 = vadd.f32 %v14362_v47, %v6649_v14  ;;  %6173 = vst.msk [vmem:[#allocation7 + $0x120] sm:$0xff] %vm6154_vm0, %v6107_v20  ;;  %v6651_v38 = vpop.f32.mrb[133].mxu1  ;;  %v6449_v20 = vld [vmem:[#allocation7 + $0x148] sm:$0xff] }
 0x677   : > { %v5610_v25 = vpop.permute.xlu1 %5609 }
 0x678   : > { %v6780_v15 = vmax.f32 %v6650_v51, 0.0 }
 0x679   : > { %v6276_v55 = vpop.permute.xlu0 %6275 }
 0x67a   : > { %6809 = vst.msk [vmem:[#allocation4 + $0x10] sm:$0xff] %vm6806_vm9, %v6780_v15 }
 0x67b   : > { %6342 = vst.msk [vmem:[#allocation7 + $0x120] sm:$0xff] %vm6323_vm8, %v6276_v55  ;;  %v6113_v53 = vpop.permute.xlu1 %6112  ;;  %v6875_v36 = vld [vmem:[#allocation4 + $0x1] sm:$0xff] }
 0x67c   : > { %v6442_v60 = vld [vmem:[#allocation7 + $0x110] sm:$0xff]  ;;  %6915 = vrot.lane.b32.xlu0 %v6875_v36, %s10814_s8  ;;  %v6836_v2 = vld [vmem:[#allocation4 + $0x8] sm:$0xff] }
 0x67d   : > { %v5274_v7 = vpop.permute.xlu0 %5273  ;;  %6723 = vmatmul.mubr.f32.gmra.mrb[162].mxu1 %v6442_v60  ;;  %6856 = vst.msk [vmem:[#allocation8 + $0x10] sm:$0xff] %vm6806_vm9, %v6836_v2  ;;  %v6996_v54 = vld [vmem:[#allocation4 + $0x2] sm:$0xff] }
 0x67e   : > { %5334 = vst.msk [vmem:[#allocation7 + $0x180] sm:$0xff] %vm5309_vm2, %v5274_v7  ;;  %10221 = vmatprep.mubr.msk.f32.mxu1 %vm5080_vm3, %v6445_v34  ;;  %v7117_v49 = vld [vmem:[#allocation4 + $0x3] sm:$0xff] }
 0x67f   : > { %v5272_v45 = vpop.permute.xlu1 %5271  ;;  %v7238_v39 = vld [vmem:[#allocation4 + $0x4] sm:$0xff] }
 0x680   : > { %5333 = vst.msk [vmem:[#allocation7 + $0x170] sm:$0xff] %vm5309_vm2, %v5272_v45  ;;  %7036 = vrot.lane.b32.xlu0 %v6996_v54, %s10810_s29 }
 0x681   : > { %v5443_v19 = vpop.permute.xlu0 %5442  ;;  %v6876_v0 = vld [vmem:[#allocation4 + $0x9] sm:$0xff] }
 0x682   : > { %v6444_v22 = vld [vmem:[#allocation7 + $0x120] sm:$0xff]  ;;  %5503 = vst.msk [vmem:[#allocation7 + $0x180] sm:$0xff] %vm5478_vm4, %v5443_v19  ;;  %6917 = vrot.lane.b32.xlu1 %v6876_v0, %s10814_s8  ;;  %v7359_v27 = vld [vmem:[#allocation4 + $0x10] sm:$0xff] }
 0x683   : > { %6728 = vmatmul.mubr.f32.gmra.mrb[164].mxu1 %v6444_v22  ;;  %6857 = vst.msk [vmem:[#allocation8 + $0x20] sm:$0xff] %vm6806_vm9, %v7359_v27  ;;  %v5441_v24 = vpop.permute.xlu1 %5440  ;;  %v6997_v44 = vld [vmem:[#allocation4 + $0xa] sm:$0xff] }
 0x684   : > { %10222 = vmatprep.mubr.msk.f32.mxu1 %vm5080_vm3, %v6447_v52  ;;  %5502 = vst.msk [vmem:[#allocation7 + $0x170] sm:$0xff] %vm5478_vm4, %v5441_v24  ;;  %7157 = vrot.lane.b32.xlu0 %v7117_v49, %s10815_s14  ;;  %v7118_v41 = vld [vmem:[#allocation4 + $0xb] sm:$0xff] }
 0x685   : > { %v5608_v29 = vpop.permute.xlu0 %5607  ;;  %5671 = vst.msk [vmem:[#allocation7 + $0x170] sm:$0xff] %vm5647_vm5, %v5610_v25  ;;  %v7239_v5 = vld [vmem:[#allocation4 + $0xc] sm:$0xff] }
 0x686   : > { %5670 = vst.msk [vmem:[#allocation7 + $0x160] sm:$0xff] %vm5647_vm5, %v5608_v29  ;;  %7038 = vrot.lane.b32.xlu1 %v6997_v44, %s10810_s29 }
 0x687   : > { %v5775_v56 = vpop.permute.xlu1 %5774 }
 0x688   : > { %5838 = vst.msk [vmem:[#allocation7 + $0x150] sm:$0xff] %vm5816_vm6, %v5775_v56  ;;  %7278 = vrot.lane.b32.xlu0 %v7238_v39, %s10808_s16 }
 0x689   : > { %v5777_v9 = vpop.permute.xlu0 %5776 }
 0x68a   : > { %5839 = vst.msk [vmem:[#allocation7 + $0x160] sm:$0xff] %vm5816_vm6, %v5777_v9  ;;  %7159 = vrot.lane.b32.xlu1 %v7118_v41, %s10815_s14 }
 0x68b   : > { %v6654_v18 = vpop.f32.mrb[134].mxu1  ;;  %v5944_v40 = vpop.permute.xlu1 %5943 }
 0x68c   : > { %v6655_v23 = vadd.f32 %v14362_v47, %v6654_v18  ;;  %6007 = vst.msk [vmem:[#allocation7 + $0x150] sm:$0xff] %vm5985_vm7, %v5944_v40  ;;  %7399 = vrot.lane.b32.xlu0 %v7359_v27, %s10816_s15  ;;  %v6656_v58 = vpop.f32.mrb[135].mxu1 }
 0x68d   : > { %v5946_v30 = vpop.permute.xlu0 %5945  ;;  %6176 = vst.msk [vmem:[#allocation7 + $0x150] sm:$0xff] %vm6154_vm0, %v6113_v53 }
 0x68e   : > { %6008 = vst.msk [vmem:[#allocation7 + $0x160] sm:$0xff] %vm5985_vm7, %v5946_v30  ;;  %7280 = vrot.lane.b32.xlu1 %v7239_v5, %s10808_s16  ;;  %v6781_v32 = vmax.f32 %v6655_v23, 0.0 }
 0x68f   : > { %v6278_v35 = vpop.permute.xlu1 %6277 }
 0x690   : > { %6810 = vst.msk [vmem:[#allocation4 + $0x18] sm:$0xff] %vm6806_vm9, %v6781_v32 }
 0x691   : > { %6343 = vst.msk [vmem:[#allocation7 + $0x130] sm:$0xff] %vm6323_vm8, %v6278_v35  ;;  %v6111_v57 = vpop.permute.xlu0 %6110  ;;  %v6659_v31 = vpop.f32.mrb[136].mxu1  ;;  %v6453_v35 = vld [vmem:[#allocation7 + $0x168] sm:$0xff] }
 0x692   : > { %6175 = vst.msk [vmem:[#allocation7 + $0x140] sm:$0xff] %vm6154_vm0, %v6111_v57  ;;  %v6660_v63 = vadd.f32 %v14362_v47, %v6659_v31  ;;  %v6661_v21 = vpop.f32.mrb[137].mxu1 }
 0x693   : > { %v5280_v43 = vpop.permute.xlu1 %5279 }
 0x694   : > { %v6782_v17 = vmax.f32 %v6660_v63, 0.0  ;;  %5337 = vst.msk [vmem:[#allocation7 + $0x1b0] sm:$0xff] %vm5309_vm2, %v5280_v43 }
 0x695   : > { %v6280_v28 = vpop.permute.xlu0 %6279 }
 0x696   : > { %6811 = vst.msk [vmem:[#allocation4 + $0x20] sm:$0xff] %vm6806_vm9, %v6782_v17 }
 0x697   : > { %6344 = vst.msk [vmem:[#allocation7 + $0x140] sm:$0xff] %vm6323_vm8, %v6280_v28  ;;  %v5449_v33 = vpop.permute.xlu1 %5448  ;;  %v6877_v62 = vld [vmem:[#allocation4 + $0x11] sm:$0xff]  ;;  %v6455_v28 = vld [vmem:[#allocation7 + $0x178] sm:$0xff] }
 0x698   : > { %v7360_v26 = vld [vmem:[#allocation4 + $0x18] sm:$0xff]  ;;  %5506 = vst.msk [vmem:[#allocation7 + $0x1b0] sm:$0xff] %vm5478_vm4, %v5449_v33  ;;  %6919 = vrot.lane.b32.xlu0 %v6877_v62, %s10814_s8  ;;  %v6457_v33 = vld [vmem:[#allocation7 + $0x188] sm:$0xff] }
 0x699   : > { %v6446_v10 = vld [vmem:[#allocation7 + $0x130] sm:$0xff]  ;;  %v5278_v14 = vpop.permute.xlu0 %5277  ;;  %7401 = vrot.lane.b32.xlu1 %v7360_v26, %s10816_s15  ;;  %6858 = vst.msk [vmem:[#allocation8 + $0x30] sm:$0xff] %vm6806_vm9, %v7360_v26 }
 0x69a   : > { %5675 = vst.msk [vmem:[#allocation7 + $0x1b0] sm:$0xff] %vm5647_vm5, %v14003_v16  ;;  %6733 = vmatmul.mubr.f32.gmra.mrb[166].mxu1 %v6446_v10  ;;  %v6998_v38 = vld [vmem:[#allocation4 + $0x12] sm:$0xff] }
 0x69b   : > { %5336 = vst.msk [vmem:[#allocation7 + $0x1a0] sm:$0xff] %vm5309_vm2, %v5278_v14  ;;  %10223 = vmatprep.mubr.msk.f32.mxu1 %vm5080_vm3, %v6449_v20  ;;  %v14436_v51 = vpop.permute.xlu1 %5613  ;;  %v6459_v14 = vld [vmem:[#allocation7 + $0x198] sm:$0xff] }
 0x69c   : > { %5844 = vst.msk [vmem:[#allocation7 + $0x1b0] sm:$0xff] %vm5816_vm6, %v14010_v12  ;;  %7040 = vrot.lane.b32.xlu0 %v6998_v38, %s10810_s29  ;;  %v6451_v12 = vld [vmem:[#allocation7 + $0x158] sm:$0xff] }
 0x69d   : > { %6013 = vst.msk [vmem:[#allocation7 + $0x1b0] sm:$0xff] %vm5985_vm7, %v14017_v61  ;;  %v5447_v15 = vpop.permute.xlu0 %5446  ;;  %v6878_v16 = vld [vmem:[#allocation4 + $0x19] sm:$0xff] }
 0x69e   : > { %6182 = vst.msk [vmem:[#allocation7 + $0x1b0] sm:$0xff] %vm6154_vm0, %v14034_v1  ;;  %v6448_v25 = vld [vmem:[#allocation7 + $0x140] sm:$0xff]  ;;  %6921 = vrot.lane.b32.xlu1 %v6878_v16, %s10814_s8  ;;  %v14445_v61 = vld [vmem:[#allocation4 + $0x20] sm:$0xff] }
 0x69f   : > { %6351 = vst.msk [vmem:[#allocation7 + $0x1b0] sm:$0xff] %vm6323_vm8, %v14052_v46  ;;  %6738 = vmatmul.mubr.f32.gmra.mrb[168].mxu1 %v6448_v25  ;;  %v5783_v1 = vpop.permute.xlu1 %5782  ;;  %v7119_v46 = vld [vmem:[#allocation4 + $0x13] sm:$0xff]  ;;  %v7241_v45 = vld [vmem:[#allocation4 + $0x1c] sm:$0xff] }
 0x6a0   : > { %5505 = vst.msk [vmem:[#allocation7 + $0x1a0] sm:$0xff] %vm5478_vm4, %v5447_v15  ;;  %10224 = vmatprep.mubr.msk.f32.mxu1 %vm5080_vm3, %v6451_v12  ;;  %7161 = vrot.lane.b32.xlu0 %v7119_v46, %s10815_s14  ;;  %v6999_v53 = vld [vmem:[#allocation4 + $0x1a] sm:$0xff]  ;;  %v6461_v15 = vld [vmem:[#allocation7 + $0x1a8] sm:$0xff] }
 0x6a1   : > { %5674 = vst.msk [vmem:[#allocation7 + $0x1a0] sm:$0xff] %vm5647_vm5, %v13440_v4  ;;  %v5612_v55 = vpop.permute.xlu0 %5611  ;;  %v6463_v12 = vld [vmem:[#allocation7 + $0x1b8] sm:$0xff] }
 0x6a2   : > { %6859 = vst.msk [vmem:[#allocation8 + $0x40] sm:$0xff] %vm6806_vm9, %v14445_v61  ;;  %7042 = vrot.lane.b32.xlu1 %v6999_v53, %s10810_s29 }
 0x6a3   : > { %5843 = vst.msk [vmem:[#allocation7 + $0x1a0] sm:$0xff] %vm5816_vm6, %v13448_v48  ;;  %v5952_v4 = vpop.permute.xlu1 %5951  ;;  %v7240_v48 = vld [vmem:[#allocation4 + $0x14] sm:$0xff] }
 0x6a4   : > { %6012 = vst.msk [vmem:[#allocation7 + $0x1a0] sm:$0xff] %vm5985_vm7, %v14020_v11  ;;  %7282 = vrot.lane.b32.xlu0 %v7240_v48, %s10808_s16  ;;  %v7120_v11 = vld [vmem:[#allocation4 + $0x1b] sm:$0xff] }
 0x6a5   : > { %6181 = vst.msk [vmem:[#allocation7 + $0x1a0] sm:$0xff] %vm6154_vm0, %v14037_v6  ;;  %v5781_v36 = vpop.permute.xlu0 %5780 }
 0x6a6   : > { %5672 = vst.msk [vmem:[#allocation7 + $0x180] sm:$0xff] %vm5647_vm5, %v5612_v55  ;;  %7163 = vrot.lane.b32.xlu1 %v7120_v11, %s10815_s14 }
 0x6a7   : > { %6350 = vst.msk [vmem:[#allocation7 + $0x1a0] sm:$0xff] %vm6323_vm8, %v14055_v8  ;;  %v6664_v60 = vpop.f32.mrb[138].mxu1  ;;  %v6117_v7 = vpop.permute.xlu1 %6116 }
 0x6a8   : > { %5841 = vst.msk [vmem:[#allocation7 + $0x180] sm:$0xff] %vm5816_vm6, %v5781_v36  ;;  %v6665_v6 = vadd.f32 %v14362_v47, %v6664_v60  ;;  %7520 = vrot.lane.b32.xlu0 %v6877_v62, %s10811_s30  ;;  %v6666_v2 = vpop.f32.mrb[139].mxu1 }
 0x6a9   : > { %v5950_v34 = vpop.permute.xlu0 %5949 }
 0x6aa   : > { %6010 = vst.msk [vmem:[#allocation7 + $0x180] sm:$0xff] %vm5985_vm7, %v5950_v34  ;;  %7284 = vrot.lane.b32.xlu1 %v7241_v45, %s10808_s16  ;;  %v6783_v8 = vmax.f32 %v6665_v6, 0.0 }
 0x6ab   : > { %6179 = vst.msk [vmem:[#allocation7 + $0x180] sm:$0xff] %vm6154_vm0, %v14027_v3  ;;  %v6286_v54 = vpop.permute.xlu1 %6285 }
 0x6ac   : > { %6348 = vst.msk [vmem:[#allocation7 + $0x180] sm:$0xff] %vm6323_vm8, %v14045_v50  ;;  %7641 = vrot.lane.b32.xlu0 %v6998_v38, %s10817_s18 }
 0x6ad   : > { %6812 = vst.msk [vmem:[#allocation4 + $0x28] sm:$0xff] %vm6806_vm9, %v6783_v8  ;;  %v6115_v19 = vpop.permute.xlu0 %6114  ;;  %v6669_v0 = vpop.f32.mrb[140].mxu1 }
 0x6ae   : > { %6177 = vst.msk [vmem:[#allocation7 + $0x160] sm:$0xff] %vm6154_vm0, %v6115_v19  ;;  %v6670_v22 = vadd.f32 %v14362_v47, %v6669_v0  ;;  %v6671_v52 = vpop.f32.mrb[141].mxu1  ;;  %7522 = vrot.lane.b32.xlu1 %v6878_v16, %s10811_s30 }
 0x6af   : > { %v5276_v3 = vpop.permute.xlu1 %5275 }
 0x6b0   : > { %v6784_v27 = vmax.f32 %v6670_v22, 0.0  ;;  %5335 = vst.msk [vmem:[#allocation7 + $0x190] sm:$0xff] %vm5309_vm2, %v5276_v3  ;;  %7762 = vrot.lane.b32.xlu0 %v7119_v46, %s10806_s25  ;;  %v6462_v46 = vld [vmem:[#allocation7 + $0x1b0] sm:$0xff]  ;;  %vm7096_vm2 = vcmask 195712  }
 0x6b1   : > { %v6284_v50 = vpop.permute.xlu0 %6283 }
 0x6b2   : > { %6813 = vst.msk [vmem:[#allocation4 + $0x30] sm:$0xff] %vm6806_vm9, %v6784_v27  ;;  %7643 = vrot.lane.b32.xlu1 %v6999_v53, %s10817_s18 }
 0x6b3   : > { %6346 = vst.msk [vmem:[#allocation7 + $0x160] sm:$0xff] %vm6323_vm8, %v6284_v50  ;;  %v5445_v24 = vpop.permute.xlu1 %5444 }
 0x6b4   : > { %v7362_v49 = vld [vmem:[#allocation4 + $0x28] sm:$0xff]  ;;  %5504 = vst.msk [vmem:[#allocation7 + $0x190] sm:$0xff] %vm5478_vm4, %v5445_v24  ;;  %7883 = vrot.lane.b32.xlu0 %v7240_v48, %s10818_s19  ;;  %vm7217_vm4 = vcmask 261312  }
 0x6b5   : > { %6860 = vst.msk [vmem:[#allocation8 + $0x50] sm:$0xff] %vm6806_vm9, %v7362_v49  ;;  %v7000_v9 = vld [vmem:[#allocation4 + $0x22] sm:$0xff] }
 0x6b6   : > { %5673 = vst.msk [vmem:[#allocation7 + $0x190] sm:$0xff] %vm5647_vm5, %v14436_v51  ;;  %7764 = vrot.lane.b32.xlu1 %v7120_v11, %s10806_s25  ;;  %v7121_v30 = vld [vmem:[#allocation4 + $0x23] sm:$0xff]  ;;  %vm7338_vm5 = vcmask 326912  }
 0x6b7   : > { %5842 = vst.msk [vmem:[#allocation7 + $0x190] sm:$0xff] %vm5816_vm6, %v5783_v1  ;;  %v5779_v29 = vpop.permute.xlu1 %5778  ;;  %v7242_v21 = vld [vmem:[#allocation4 + $0x24] sm:$0xff] }
 0x6b8   : > { %6011 = vst.msk [vmem:[#allocation7 + $0x190] sm:$0xff] %vm5985_vm7, %v5952_v4  ;;  %7403 = vrot.lane.b32.xlu0 %v14445_v61, %s10816_s15  ;;  %v6456_v51 = vld [vmem:[#allocation7 + $0x180] sm:$0xff] }
 0x6b9   : > { %6180 = vst.msk [vmem:[#allocation7 + $0x190] sm:$0xff] %vm6154_vm0, %v14025_v42  ;;  %v14500_v44 = vld [vmem:[#allocation4 + $0x30] sm:$0xff] }
 0x6ba   : > { %5840 = vst.msk [vmem:[#allocation7 + $0x170] sm:$0xff] %vm5816_vm6, %v5779_v29  ;;  %7885 = vrot.lane.b32.xlu1 %v7241_v45, %s10818_s19  ;;  %v6880_v40 = vld [vmem:[#allocation4 + $0x29] sm:$0xff]  ;;  %vm7459_vm6 = vcmask 392512  }
 0x6bb   : > { %6349 = vst.msk [vmem:[#allocation7 + $0x190] sm:$0xff] %vm6323_vm8, %v14043_v37  ;;  %v5948_v56 = vpop.permute.xlu1 %5947  ;;  %v6879_v37 = vld [vmem:[#allocation4 + $0x21] sm:$0xff]  ;;  %v7001_v32 = vld [vmem:[#allocation4 + $0x2a] sm:$0xff] }
 0x6bc   : > { %6861 = vst.msk [vmem:[#allocation8 + $0x60] sm:$0xff] %vm6806_vm9, %v14500_v44  ;;  %8004 = vrot.lane.b32.xlu0 %v14445_v61, %s10812_s10  ;;  %v6452_v17 = vld [vmem:[#allocation7 + $0x160] sm:$0xff] }
 0x6bd   : > { %6009 = vst.msk [vmem:[#allocation7 + $0x170] sm:$0xff] %vm5985_vm7, %v5948_v56  ;;  %v7122_v43 = vld [vmem:[#allocation4 + $0x2b] sm:$0xff]  ;;  %vm7580_vm7 = vcmask 458112  }
 0x6be   : > { %6178 = vst.msk [vmem:[#allocation7 + $0x170] sm:$0xff] %vm6154_vm0, %v6117_v7  ;;  %7405 = vrot.lane.b32.xlu1 %v7362_v49, %s10816_s15  ;;  %v7243_v10 = vld [vmem:[#allocation4 + $0x2c] sm:$0xff]  ;;  %vm8548_vm0 = vcmask 982912  }
 0x6bf   : > { %6347 = vst.msk [vmem:[#allocation7 + $0x170] sm:$0xff] %vm6323_vm8, %v6286_v54  ;;  %v6282_v42 = vpop.permute.xlu1 %6281  ;;  %v6460_v61 = vld [vmem:[#allocation7 + $0x1a0] sm:$0xff] }
 0x6c0   : > { %6345 = vst.msk [vmem:[#allocation7 + $0x150] sm:$0xff] %vm6323_vm8, %v6282_v42  ;;  %6923 = vrot.lane.b32.xlu0 %v6879_v37, %s10814_s8  ;;  %vm8669_vm8 = vcmask 1048512  }
 0x6c2   : > { %8006 = vrot.lane.b32.xlu1 %v7362_v49, %s10812_s10  ;;  %v6458_v16 = vld [vmem:[#allocation7 + $0x190] sm:$0xff] }
 0x6c3   : > { %v6674_v39 = vpop.f32.mrb[142].mxu1 }
 0x6c4   : > { %v6675_v41 = vadd.f32 %v14362_v47, %v6674_v39  ;;  %7044 = vrot.lane.b32.xlu0 %v7000_v9, %s10810_s29  ;;  %v6676_v18 = vpop.f32.mrb[143].mxu1 }
 0x6c6   : > { %6925 = vrot.lane.b32.xlu1 %v6880_v40, %s10814_s8  ;;  %v6785_v23 = vmax.f32 %v6675_v41, 0.0  ;;  %v6454_v62 = vld [vmem:[#allocation7 + $0x170] sm:$0xff] }
 0x6c7   : > { %v6450_v58 = vld [vmem:[#allocation7 + $0x150] sm:$0xff] }
 0x6c8   : > { %6814 = vst.msk [vmem:[#allocation4 + $0x38] sm:$0xff] %vm6806_vm9, %v6785_v23  ;;  %7165 = vrot.lane.b32.xlu0 %v7121_v30, %s10815_s14  ;;  %6743 = vmatmul.mubr.f32.gmra.mrb[170].mxu1 %v6450_v58 }
 0x6c9   : > { %v6679_v5 = vpop.f32.mrb[144].mxu1  ;;  %10225 = vmatprep.mubr.msk.f32.mxu1 %vm5080_vm3, %v6453_v35 }
 0x6ca   : > { %v6680_v57 = vadd.f32 %v14362_v47, %v6679_v5  ;;  %7046 = vrot.lane.b32.xlu1 %v7001_v32, %s10810_s29  ;;  %v6681_v31 = vpop.f32.mrb[145].mxu1 }
 0x6cc   : > { %v6786_v63 = vmax.f32 %v6680_v57, 0.0  ;;  %7286 = vrot.lane.b32.xlu0 %v7242_v21, %s10808_s16  ;;  %6748 = vmatmul.mubr.f32.gmra.mrb[172].mxu1 %v6452_v17 }
 0x6cd   : > { %10226 = vmatprep.mubr.msk.f32.mxu1 %vm5080_vm3, %v6455_v28 }
 0x6ce   : > { %6815 = vst.msk [vmem:[#allocation4 + $0x40] sm:$0xff] %vm6806_vm9, %v6786_v63  ;;  %7167 = vrot.lane.b32.xlu1 %v7122_v43, %s10815_s14 }
 0x6cf   : > { %v7364_v26 = vld [vmem:[#allocation4 + $0x38] sm:$0xff] }
 0x6d0   : > { %7524 = vrot.lane.b32.xlu0 %v6879_v37, %s10811_s30  ;;  %6753 = vmatmul.mubr.f32.gmra.mrb[174].mxu1 %v6454_v62  ;;  %6862 = vst.msk [vmem:[#allocation8 + $0x70] sm:$0xff] %vm6806_vm9, %v7364_v26  ;;  %v8690_v20 = vld [vmem:[#allocation4 + $0x31] sm:$0xff] }
 0x6d1   : > { %10227 = vmatprep.mubr.msk.f32.mxu1 %vm5080_vm3, %v6457_v33  ;;  %8710 = vst.msk [vmem:[#allocation8 + $0x8] sm:$0xff] %vm6806_vm9, %v8690_v20  ;;  %v6881_v7 = vld [vmem:[#allocation4 + $0x31] sm:$0xff] }
 0x6d2   : > { %7288 = vrot.lane.b32.xlu1 %v7243_v10, %s10808_s16  ;;  %v7002_v6 = vld [vmem:[#allocation4 + $0x32] sm:$0xff] }
 0x6d3   : > { %v7123_v54 = vld [vmem:[#allocation4 + $0x33] sm:$0xff] }
 0x6d4   : > { %7645 = vrot.lane.b32.xlu0 %v7000_v9, %s10817_s18  ;;  %6758 = vmatmul.mubr.f32.gmra.mrb[176].mxu1 %v6456_v51  ;;  %v7244_v27 = vld [vmem:[#allocation4 + $0x34] sm:$0xff] }
 0x6d5   : > { %10228 = vmatprep.mubr.msk.f32.mxu1 %vm5080_vm3, %v6459_v14  ;;  %v14533_v38 = vld [vmem:[#allocation4 + $0x40] sm:$0xff] }
 0x6d6   : > { %7526 = vrot.lane.b32.xlu1 %v6880_v40, %s10811_s30  ;;  %6863 = vst.msk [vmem:[#allocation8 + $0x80] sm:$0xff] %vm6806_vm9, %v14533_v38  ;;  %v8691_v25 = vld [vmem:[#allocation4 + $0x39] sm:$0xff] }
 0x6d7   : > { %8711 = vst.msk [vmem:[#allocation8 + $0x18] sm:$0xff] %vm6806_vm9, %v8691_v25  ;;  %v6882_v2 = vld [vmem:[#allocation4 + $0x39] sm:$0xff] }
 0x6d8   : > { %7766 = vrot.lane.b32.xlu0 %v7121_v30, %s10806_s25  ;;  %6763 = vmatmul.mubr.f32.gmra.mrb[178].mxu1 %v6458_v16  ;;  %v7003_v19 = vld [vmem:[#allocation4 + $0x3a] sm:$0xff] }
 0x6d9   : > { %10229 = vmatprep.mubr.msk.f32.mxu1 %vm5080_vm3, %v6461_v15  ;;  %v7124_v50 = vld [vmem:[#allocation4 + $0x3b] sm:$0xff] }
 0x6da   : > { %7647 = vrot.lane.b32.xlu1 %v7001_v32, %s10817_s18  ;;  %v7245_v29 = vld [vmem:[#allocation4 + $0x3c] sm:$0xff] }
 0x6dc   : > { %7887 = vrot.lane.b32.xlu0 %v7242_v21, %s10818_s19  ;;  %6768 = vmatmul.mubr.f32.gmra.mrb[180].mxu1 %v6460_v61 }
 0x6dd   : > { %10230 = vmatprep.mubr.msk.f32.mxu1 %vm5080_vm3, %v6463_v12  ;;  %vm6975_vm3 = vcmask 130112  }
 0x6de   : > { %7768 = vrot.lane.b32.xlu1 %v7122_v43, %s10806_s25 }
 0x6df   : > { %v6684_v1 = vpop.f32.mrb[146].mxu1 }
 0x6e0   : > { %v6685_v55 = vadd.f32 %v14362_v47, %v6684_v1  ;;  %7407 = vrot.lane.b32.xlu0 %v14500_v44, %s10816_s15  ;;  %v6686_v53 = vpop.f32.mrb[147].mxu1  ;;  %6773 = vmatmul.mubr.f32.gmra.mrb[182].mxu1 %v6462_v46 }
 0x6e2   : > { %7889 = vrot.lane.b32.xlu1 %v7243_v10, %s10818_s19  ;;  %v6787_v4 = vmax.f32 %v6685_v55, 0.0 }
 0x6e4   : > { %6816 = vst.msk [vmem:[#allocation4 + $0x48] sm:$0xff] %vm6806_vm9, %v6787_v4  ;;  %8008 = vrot.lane.b32.xlu0 %v14500_v44, %s10812_s10 }
 0x6e5   : > { %v6689_v48 = vpop.f32.mrb[148].mxu1 }
 0x6e6   : > { %v6690_v36 = vadd.f32 %v14362_v47, %v6689_v48  ;;  %7409 = vrot.lane.b32.xlu1 %v7364_v26, %s10816_s15  ;;  %v6691_v11 = vpop.f32.mrb[149].mxu1 }
 0x6e8   : > { %v6788_v60 = vmax.f32 %v6690_v36, 0.0  ;;  %6927 = vrot.lane.b32.xlu0 %v6881_v7, %s10814_s8 }
 0x6ea   : > { %6817 = vst.msk [vmem:[#allocation4 + $0x50] sm:$0xff] %vm6806_vm9, %v6788_v60  ;;  %8010 = vrot.lane.b32.xlu1 %v7364_v26, %s10812_s10 }
 0x6eb   : > { %v14556_v34 = vld [vmem:[#allocation4 + $0x48] sm:$0xff] }
 0x6ec   : > { %7048 = vrot.lane.b32.xlu0 %v7002_v6, %s10810_s29  ;;  %6864 = vst.msk [vmem:[#allocation8 + $0x90] sm:$0xff] %vm6806_vm9, %v14556_v34  ;;  %v8692_v8 = vld [vmem:[#allocation4 + $0x41] sm:$0xff] }
 0x6ed   : > { %8712 = vst.msk [vmem:[#allocation8 + $0x28] sm:$0xff] %vm6806_vm9, %v8692_v8  ;;  %v6883_v17 = vld [vmem:[#allocation4 + $0x41] sm:$0xff] }
 0x6ee   : > { %6929 = vrot.lane.b32.xlu1 %v6882_v2, %s10814_s8  ;;  %v6916_v45 = vpop.permute.xlu0 %6915  ;;  %v7004_v62 = vld [vmem:[#allocation4 + $0x42] sm:$0xff] }
 0x6ef   : > { %6976 = vst.msk [vmem:[#allocation8] sm:$0xff] %vm6975_vm3, %v6916_v45  ;;  %v7125_v51 = vld [vmem:[#allocation4 + $0x43] sm:$0xff] }
 0x6f0   : > { %7169 = vrot.lane.b32.xlu0 %v7123_v54, %s10815_s14  ;;  %v7246_v1 = vld [vmem:[#allocation4 + $0x44] sm:$0xff] }
 0x6f1   : > { %v14566_v0 = vld [vmem:[#allocation4 + $0x50] sm:$0xff] }
 0x6f2   : > { %7050 = vrot.lane.b32.xlu1 %v7003_v19, %s10810_s29  ;;  %v7037_v22 = vpop.permute.xlu0 %7036  ;;  %6865 = vst.msk [vmem:[#allocation8 + $0xa0] sm:$0xff] %vm6806_vm9, %v14566_v0  ;;  %v8693_v3 = vld [vmem:[#allocation4 + $0x49] sm:$0xff] }
 0x6f3   : > { %7097 = vst.msk [vmem:[#allocation8] sm:$0xff] %vm7096_vm2, %v7037_v22  ;;  %v6884_v26 = vld [vmem:[#allocation4 + $0x49] sm:$0xff] }
 0x6f4   : > { %v6918_v52 = vpop.permute.xlu1 %6917  ;;  %7290 = vrot.lane.b32.xlu0 %v7244_v27, %s10808_s16  ;;  %8713 = vst.msk [vmem:[#allocation8 + $0x38] sm:$0xff] %vm6806_vm9, %v8693_v3  ;;  %v7005_v16 = vld [vmem:[#allocation4 + $0x4a] sm:$0xff] }
 0x6f5   : > { %6977 = vst.msk [vmem:[#allocation8 + $0x10] sm:$0xff] %vm6975_vm3, %v6918_v52  ;;  %v7126_v55 = vld [vmem:[#allocation4 + $0x4b] sm:$0xff] }
 0x6f6   : > { %7171 = vrot.lane.b32.xlu1 %v7124_v50, %s10815_s14  ;;  %v7158_v24 = vpop.permute.xlu0 %7157  ;;  %v7247_v60 = vld [vmem:[#allocation4 + $0x4c] sm:$0xff] }
 0x6f7   : > { %7218 = vst.msk [vmem:[#allocation8] sm:$0xff] %vm7217_vm4, %v7158_v24 }
 0x6f8   : > { %v7039_v49 = vpop.permute.xlu1 %7038  ;;  %7528 = vrot.lane.b32.xlu0 %v6881_v7, %s10811_s30 }
 0x6f9   : > { %7098 = vst.msk [vmem:[#allocation8 + $0x10] sm:$0xff] %vm7096_vm2, %v7039_v49 }
 0x6fa   : > { %7292 = vrot.lane.b32.xlu1 %v7245_v29, %s10808_s16  ;;  %v7279_v44 = vpop.permute.xlu0 %7278 }
 0x6fb   : > { %7339 = vst.msk [vmem:[#allocation8] sm:$0xff] %vm7338_vm5, %v7279_v44  ;;  %v6694_v42 = vpop.f32.mrb[150].mxu1 }
 0x6fc   : > { %v7160_v56 = vpop.permute.xlu1 %7159  ;;  %v6695_v37 = vadd.f32 %v14362_v47, %v6694_v42  ;;  %7649 = vrot.lane.b32.xlu0 %v7002_v6, %s10817_s18  ;;  %v6696_v39 = vpop.f32.mrb[151].mxu1 }
 0x6fd   : > { %7219 = vst.msk [vmem:[#allocation8 + $0x10] sm:$0xff] %vm7217_vm4, %v7160_v56 }
 0x6fe   : > { %7530 = vrot.lane.b32.xlu1 %v6882_v2, %s10811_s30  ;;  %v6789_v9 = vmax.f32 %v6695_v37, 0.0  ;;  %v7400_v41 = vpop.permute.xlu0 %7399 }
 0x6ff   : > { %7460 = vst.msk [vmem:[#allocation8] sm:$0xff] %vm7459_vm6, %v7400_v41 }
 0x700   : > { %v7281_v18 = vpop.permute.xlu1 %7280  ;;  %6818 = vst.msk [vmem:[#allocation4 + $0x58] sm:$0xff] %vm6806_vm9, %v6789_v9  ;;  %7770 = vrot.lane.b32.xlu0 %v7123_v54, %s10806_s25 }
 0x701   : > { %7340 = vst.msk [vmem:[#allocation8 + $0x10] sm:$0xff] %vm7338_vm5, %v7281_v18  ;;  %v6699_v40 = vpop.f32.mrb[152].mxu1 }
 0x702   : > { %v6700_v23 = vadd.f32 %v14362_v47, %v6699_v40  ;;  %v6701_v30 = vpop.f32.mrb[153].mxu1  ;;  %7651 = vrot.lane.b32.xlu1 %v7003_v19, %s10817_s18 }
 0x704   : > { %v6790_v58 = vmax.f32 %v6700_v23, 0.0  ;;  %7891 = vrot.lane.b32.xlu0 %v7244_v27, %s10818_s19 }
 0x706   : > { %6819 = vst.msk [vmem:[#allocation4 + $0x60] sm:$0xff] %vm6806_vm9, %v6790_v58  ;;  %7772 = vrot.lane.b32.xlu1 %v7124_v50, %s10806_s25 }
 0x707   : > { %v14593_v5 = vld [vmem:[#allocation4 + $0x58] sm:$0xff] }
 0x708   : > { %7411 = vrot.lane.b32.xlu0 %v14533_v38, %s10816_s15  ;;  %6866 = vst.msk [vmem:[#allocation8 + $0xb0] sm:$0xff] %vm6806_vm9, %v14593_v5  ;;  %v8694_v57 = vld [vmem:[#allocation4 + $0x51] sm:$0xff] }
 0x709   : > { %8714 = vst.msk [vmem:[#allocation8 + $0x48] sm:$0xff] %vm6806_vm9, %v8694_v57  ;;  %v6885_v39 = vld [vmem:[#allocation4 + $0x51] sm:$0xff] }
 0x70a   : > { %7893 = vrot.lane.b32.xlu1 %v7245_v29, %s10818_s19  ;;  %v6920_v32 = vpop.permute.xlu0 %6919  ;;  %v7006_v30 = vld [vmem:[#allocation4 + $0x52] sm:$0xff] }
 0x70b   : > { %v7402_v35 = vpop.permute.xlu1 %7401  ;;  %6978 = vst.msk [vmem:[#allocation8 + $0x20] sm:$0xff] %vm6975_vm3, %v6920_v32 }
 0x70c   : > { %7461 = vst.msk [vmem:[#allocation8 + $0x10] sm:$0xff] %vm7459_vm6, %v7402_v35  ;;  %8012 = vrot.lane.b32.xlu0 %v14533_v38, %s10812_s10 }
 0x70d   : > { %v14607_v31 = vld [vmem:[#allocation4 + $0x60] sm:$0xff] }
 0x70e   : > { %7413 = vrot.lane.b32.xlu1 %v14556_v34, %s10816_s15  ;;  %v7041_v63 = vpop.permute.xlu0 %7040  ;;  %6867 = vst.msk [vmem:[#allocation8 + $0xc0] sm:$0xff] %vm6806_vm9, %v14607_v31  ;;  %v8695_v43 = vld [vmem:[#allocation4 + $0x59] sm:$0xff] }
 0x70f   : > { %7099 = vst.msk [vmem:[#allocation8 + $0x20] sm:$0xff] %vm7096_vm2, %v7041_v63  ;;  %v6886_v58 = vld [vmem:[#allocation4 + $0x59] sm:$0xff] }
 0x710   : > { %v6922_v21 = vpop.permute.xlu1 %6921  ;;  %6931 = vrot.lane.b32.xlu0 %v6883_v17, %s10814_s8  ;;  %8715 = vst.msk [vmem:[#allocation8 + $0x58] sm:$0xff] %vm6806_vm9, %v8695_v43  ;;  %v7007_v57 = vld [vmem:[#allocation4 + $0x5a] sm:$0xff] }
 0x711   : > { %6979 = vst.msk [vmem:[#allocation8 + $0x30] sm:$0xff] %vm6975_vm3, %v6922_v21  ;;  %v7248_v43 = vld [vmem:[#allocation4 + $0x54] sm:$0xff] }
 0x712   : > { %8014 = vrot.lane.b32.xlu1 %v14556_v34, %s10812_s10  ;;  %v7162_v28 = vpop.permute.xlu0 %7161 }
 0x713   : > { %7220 = vst.msk [vmem:[#allocation8 + $0x20] sm:$0xff] %vm7217_vm4, %v7162_v28  ;;  %v7128_v28 = vld [vmem:[#allocation4 + $0x5b] sm:$0xff] }
 0x714   : > { %v7043_v33 = vpop.permute.xlu1 %7042  ;;  %7052 = vrot.lane.b32.xlu0 %v7004_v62, %s10810_s29 }
 0x715   : > { %7100 = vst.msk [vmem:[#allocation8 + $0x30] sm:$0xff] %vm7096_vm2, %v7043_v33 }
 0x716   : > { %6933 = vrot.lane.b32.xlu1 %v6884_v26, %s10814_s8  ;;  %v7283_v10 = vpop.permute.xlu0 %7282 }
 0x717   : > { %7341 = vst.msk [vmem:[#allocation8 + $0x20] sm:$0xff] %vm7338_vm5, %v7283_v10  ;;  %v6704_v20 = vpop.f32.mrb[154].mxu1 }
 0x718   : > { %v7164_v14 = vpop.permute.xlu1 %7163  ;;  %v6705_v38 = vadd.f32 %v14362_v47, %v6704_v20  ;;  %v6706_v15 = vpop.f32.mrb[155].mxu1  ;;  %7173 = vrot.lane.b32.xlu0 %v7125_v51, %s10815_s14 }
 0x719   : > { %7221 = vst.msk [vmem:[#allocation8 + $0x30] sm:$0xff] %vm7217_vm4, %v7164_v14  ;;  %v7249_v14 = vld [vmem:[#allocation4 + $0x5c] sm:$0xff] }
 0x71a   : > { %7054 = vrot.lane.b32.xlu1 %v7005_v16, %s10810_s29  ;;  %v6791_v25 = vmax.f32 %v6705_v38, 0.0  ;;  %v7521_v12 = vpop.permute.xlu0 %7520 }
 0x71b   : > { %7581 = vst.msk [vmem:[#allocation8] sm:$0xff] %vm7580_vm7, %v7521_v12 }
 0x71c   : > { %v7285_v61 = vpop.permute.xlu1 %7284  ;;  %6820 = vst.msk [vmem:[#allocation4 + $0x68] sm:$0xff] %vm6806_vm9, %v6791_v25  ;;  %7294 = vrot.lane.b32.xlu0 %v7246_v1, %s10808_s16  ;;  %v14726_v25 = vld [vmem:[%s16183_s6] ss:$0 sm:$0xff] }
 0x71d   : > { %7342 = vst.msk [vmem:[#allocation8 + $0x30] sm:$0xff] %vm7338_vm5, %v7285_v61  ;;  %v6709_v46 = vpop.f32.mrb[156].mxu1 }
 0x71e   : > { %v6710_v53 = vadd.f32 %v14362_v47, %v6709_v46  ;;  %v6711_v4 = vpop.f32.mrb[157].mxu1  ;;  %7175 = vrot.lane.b32.xlu1 %v7126_v55, %s10815_s14  ;;  %v7642_v48 = vpop.permute.xlu0 %7641 }
 0x71f   : > { %7702 = vst.msk [vmem:[#allocation8] sm:$0xff] %vm7701_vm10, %v7642_v48 }
 0x720   : > { %v6792_v36 = vmax.f32 %v6710_v53, 0.0  ;;  %v7523_v11 = vpop.permute.xlu1 %7522  ;;  %7532 = vrot.lane.b32.xlu0 %v6883_v17, %s10811_s30 }
 0x721   : > { %7582 = vst.msk [vmem:[#allocation8 + $0x10] sm:$0xff] %vm7580_vm7, %v7523_v11 }
 0x722   : > { %6821 = vst.msk [vmem:[#allocation4 + $0x70] sm:$0xff] %vm6806_vm9, %v6792_v36  ;;  %7296 = vrot.lane.b32.xlu1 %v7247_v60, %s10808_s16  ;;  %v7763_v7 = vpop.permute.xlu0 %7762 }
 0x723   : > { %7823 = vst.msk [vmem:[#allocation8] sm:$0xff] %vm7822_vm11, %v7763_v7  ;;  %v14638_v34 = vld [vmem:[#allocation4 + $0x68] sm:$0xff] }
 0x724   : > { %v7644_v6 = vpop.permute.xlu1 %7643  ;;  %7653 = vrot.lane.b32.xlu0 %v7004_v62, %s10817_s18  ;;  %6868 = vst.msk [vmem:[#allocation8 + $0xd0] sm:$0xff] %vm6806_vm9, %v14638_v34  ;;  %v14645_v2 = vld [vmem:[#allocation4 + $0x61] sm:$0xff] }
 0x725   : > { %7703 = vst.msk [vmem:[#allocation8 + $0x10] sm:$0xff] %vm7701_vm10, %v7644_v6 }
 0x726   : > { %7534 = vrot.lane.b32.xlu1 %v6884_v26, %s10811_s30  ;;  %v7884_v45 = vpop.permute.xlu0 %7883  ;;  %8716 = vst.msk [vmem:[#allocation8 + $0x68] sm:$0xff] %vm6806_vm9, %v14645_v2 }
 0x727   : > { %7944 = vst.msk [vmem:[#allocation8] sm:$0xff] %vm7943_vm12, %v7884_v45 }
 0x728   : > { %v7765_v8 = vpop.permute.xlu1 %7764  ;;  %7774 = vrot.lane.b32.xlu0 %v7125_v51, %s10806_s25 }
 0x729   : > { %7824 = vst.msk [vmem:[#allocation8 + $0x10] sm:$0xff] %vm7822_vm11, %v7765_v8  ;;  %v14653_v54 = vld [vmem:[#allocation4 + $0x70] sm:$0xff] }
 0x72a   : > { %7655 = vrot.lane.b32.xlu1 %v7005_v16, %s10817_s18  ;;  %v7404_v19 = vpop.permute.xlu0 %7403  ;;  %6869 = vst.msk [vmem:[#allocation8 + $0xe0] sm:$0xff] %vm6806_vm9, %v14653_v54  ;;  %v14657_v22 = vld [vmem:[#allocation4 + $0x69] sm:$0xff] }
 0x72b   : > { %7462 = vst.msk [vmem:[#allocation8 + $0x20] sm:$0xff] %vm7459_vm6, %v7404_v19 }
 0x72c   : > { %v7886_v52 = vpop.permute.xlu1 %7885  ;;  %8717 = vst.msk [vmem:[#allocation8 + $0x78] sm:$0xff] %vm6806_vm9, %v14657_v22  ;;  %7895 = vrot.lane.b32.xlu0 %v7246_v1, %s10818_s19 }
 0x72d   : > { %7945 = vst.msk [vmem:[#allocation8 + $0x10] sm:$0xff] %vm7943_vm12, %v7886_v52 }
 0x72e   : > { %7776 = vrot.lane.b32.xlu1 %v7126_v55, %s10806_s25  ;;  %v8005_v27 = vpop.permute.xlu0 %8004 }
 0x72f   : > { %8065 = vst.msk [vmem:[#allocation8] sm:$0xff] %vm8064_vm13, %v8005_v27  ;;  %v14758_v27 = vld [vmem:[#allocation4 + $0x61] sm:$0xff] }
 0x730   : > { %v7406_v3 = vpop.permute.xlu1 %7405  ;;  %7415 = vrot.lane.b32.xlu0 %v14566_v0, %s10816_s15 }
 0x731   : > { %7463 = vst.msk [vmem:[#allocation8 + $0x30] sm:$0xff] %vm7459_vm6, %v7406_v3 }
 0x732   : > { %7897 = vrot.lane.b32.xlu1 %v7247_v60, %s10818_s19  ;;  %v6924_v50 = vpop.permute.xlu0 %6923 }
 0x733   : > { %6980 = vst.msk [vmem:[#allocation8 + $0x40] sm:$0xff] %vm6975_vm3, %v6924_v50  ;;  %v6714_v49 = vpop.f32.mrb[158].mxu1 }
 0x734   : > { %v8007_v24 = vpop.permute.xlu1 %8006  ;;  %v6715_v29 = vadd.f32 %v14362_v47, %v6714_v49  ;;  %v6716_v44 = vpop.f32.mrb[159].mxu1  ;;  %8016 = vrot.lane.b32.xlu0 %v14566_v0, %s10812_s10  ;;  %v7008_v49 = vld [vmem:[#allocation4 + $0x62] sm:$0xff] }
 0x735   : > { %8066 = vst.msk [vmem:[#allocation8 + $0x10] sm:$0xff] %vm8064_vm13, %v8007_v24 }
 0x736   : > { %7417 = vrot.lane.b32.xlu1 %v14593_v5, %s10816_s15  ;;  %v6793_v56 = vmax.f32 %v6715_v29, 0.0  ;;  %v7045_v42 = vpop.permute.xlu0 %7044 }
 0x737   : > { %7101 = vst.msk [vmem:[#allocation8 + $0x40] sm:$0xff] %vm7096_vm2, %v7045_v42  ;;  %v7009_v42 = vld [vmem:[#allocation4 + $0x6a] sm:$0xff] }
 0x738   : > { %v6926_v37 = vpop.permute.xlu1 %6925  ;;  %6822 = vst.msk [vmem:[#allocation4 + $0x78] sm:$0xff] %vm6806_vm9, %v6793_v56  ;;  %6935 = vrot.lane.b32.xlu0 %v6885_v39, %s10814_s8  ;;  %v7129_v56 = vld [vmem:[#allocation4 + $0x63] sm:$0xff] }
 0x739   : > { %6981 = vst.msk [vmem:[#allocation8 + $0x50] sm:$0xff] %vm6975_vm3, %v6926_v37 }
 0x73a   : > { %v6719_v9 = vpop.f32.mrb[160].mxu1  ;;  %8018 = vrot.lane.b32.xlu1 %v14593_v5, %s10812_s10  ;;  %v7166_v0 = vpop.permute.xlu0 %7165  ;;  %v7127_v5 = vld [vmem:[#allocation4 + $0x53] sm:$0xff] }
 0x73b   : > { %v6720_v41 = vadd.f32 %v14362_v47, %v6719_v9  ;;  %v6721_v18 = vpop.f32.mrb[161].mxu1  ;;  %7222 = vst.msk [vmem:[#allocation8 + $0x40] sm:$0xff] %vm7217_vm4, %v7166_v0  ;;  %v7250_v9 = vld [vmem:[#allocation4 + $0x64] sm:$0xff] }
 0x73c   : > { %v7047_v23 = vpop.permute.xlu1 %7046  ;;  %7056 = vrot.lane.b32.xlu0 %v7006_v30, %s10810_s29  ;;  %v7130_v18 = vld [vmem:[#allocation4 + $0x6b] sm:$0xff] }
 0x73d   : > { %v6794_v40 = vmax.f32 %v6720_v41, 0.0  ;;  %7102 = vst.msk [vmem:[#allocation8 + $0x50] sm:$0xff] %vm7096_vm2, %v7047_v23 }
 0x73e   : > { %6937 = vrot.lane.b32.xlu1 %v6886_v58, %s10814_s8  ;;  %v7287_v47 = vpop.permute.xlu0 %7286 }
 0x73f   : > { %6823 = vst.msk [vmem:[#allocation4 + $0x80] sm:$0xff] %vm6806_vm9, %v6794_v40  ;;  %v14690_v35 = vld [vmem:[#allocation4 + $0x78] sm:$0xff] }
 0x740   : > { %7343 = vst.msk [vmem:[#allocation8 + $0x40] sm:$0xff] %vm7338_vm5, %v7287_v47  ;;  %v7168_v32 = vpop.permute.xlu1 %7167  ;;  %7177 = vrot.lane.b32.xlu0 %v7127_v5, %s10815_s14  ;;  %v14697_v63 = vld [vmem:[#allocation4 + $0x71] sm:$0xff] }
 0x741   : > { %7223 = vst.msk [vmem:[#allocation8 + $0x50] sm:$0xff] %vm7217_vm4, %v7168_v32  ;;  %v7251_v32 = vld [vmem:[#allocation4 + $0x6c] sm:$0xff] }
 0x742   : > { %6870 = vst.msk [vmem:[#allocation8 + $0xf0] sm:$0xff] %vm6806_vm9, %v14690_v35  ;;  %7058 = vrot.lane.b32.xlu1 %v7007_v57, %s10810_s29  ;;  %v7525_v21 = vpop.permute.xlu0 %7524  ;;  %8718 = vst.msk [vmem:[#allocation8 + $0x88] sm:$0xff] %vm6806_vm9, %v14697_v63 }
 0x743   : > { %7583 = vst.msk [vmem:[#allocation8 + $0x20] sm:$0xff] %vm7580_vm7, %v7525_v21 }
 0x744   : > { %v7289_v17 = vpop.permute.xlu1 %7288  ;;  %7298 = vrot.lane.b32.xlu0 %v7248_v43, %s10808_s16 }
 0x745   : > { %7344 = vst.msk [vmem:[#allocation8 + $0x50] sm:$0xff] %vm7338_vm5, %v7289_v17 }
 0x746   : > { %7179 = vrot.lane.b32.xlu1 %v7128_v28, %s10815_s14  ;;  %v14705_v33 = vld [vmem:[#allocation4 + $0x80] sm:$0xff]  ;;  %v7646_v62 = vpop.permute.xlu0 %7645 }
 0x747   : > { %6871 = vst.msk [vmem:[#allocation8 + $0x100] sm:$0xff] %vm6806_vm9, %v14705_v33  ;;  %v14709_v26 = vld [vmem:[#allocation4 + $0x79] sm:$0xff] }
 0x748   : > { %7704 = vst.msk [vmem:[#allocation8 + $0x20] sm:$0xff] %vm7701_vm10, %v7646_v62  ;;  %v7527_v10 = vpop.permute.xlu1 %7526  ;;  %7536 = vrot.lane.b32.xlu0 %v6885_v39, %s10811_s30 }
 0x749   : > { %8719 = vst.msk [vmem:[#allocation8 + $0x98] sm:$0xff] %vm6806_vm9, %v14709_v26 }
 0x74a   : > { %7584 = vst.msk [vmem:[#allocation8 + $0x30] sm:$0xff] %vm7580_vm7, %v7527_v10  ;;  %7300 = vrot.lane.b32.xlu1 %v7249_v14, %s10808_s16  ;;  %v7767_v20 = vpop.permute.xlu0 %7766 }
 0x74b   : > { %7825 = vst.msk [vmem:[#allocation8 + $0x20] sm:$0xff] %vm7822_vm11, %v7767_v20 }
 0x74c   : > { %v7648_v51 = vpop.permute.xlu1 %7647  ;;  %7657 = vrot.lane.b32.xlu0 %v7006_v30, %s10817_s18 }
 0x74d   : > { %7705 = vst.msk [vmem:[#allocation8 + $0x30] sm:$0xff] %vm7701_vm10, %v7648_v51 }
 0x74e   : > { %7538 = vrot.lane.b32.xlu1 %v6886_v58, %s10811_s30  ;;  %v7888_v38 = vpop.permute.xlu0 %7887 }
 0x74f   : > { %7946 = vst.msk [vmem:[#allocation8 + $0x20] sm:$0xff] %vm7943_vm12, %v7888_v38 }
 0x750   : > { %v7769_v15 = vpop.permute.xlu1 %7768  ;;  %v6724_v16 = vpop.f32.mrb[162].mxu1  ;;  %7778 = vrot.lane.b32.xlu0 %v7127_v5, %s10806_s25 }
 0x751   : > { %7826 = vst.msk [vmem:[#allocation8 + $0x30] sm:$0xff] %vm7822_vm11, %v7769_v15  ;;  %v6725_v12 = vadd.f32 %v14726_v25, %v6724_v16  ;;  %v6726_v61 = vpop.f32.mrb[163].mxu1 }
 0x752   : > { %7659 = vrot.lane.b32.xlu1 %v7007_v57, %s10817_s18  ;;  %v7408_v46 = vpop.permute.xlu0 %7407 }
 0x753   : > { %v6795_v1 = vmax.f32 %v6725_v12, 0.0  ;;  %7464 = vst.msk [vmem:[#allocation8 + $0x40] sm:$0xff] %vm7459_vm6, %v7408_v46 }
 0x754   : > { %v7890_v55 = vpop.permute.xlu1 %7889  ;;  %7899 = vrot.lane.b32.xlu0 %v7248_v43, %s10818_s19 }
 0x755   : > { %6824 = vst.msk [vmem:[#allocation4 + $0x88] sm:$0xff] %vm6806_vm9, %v6795_v1 }
 0x756   : > { %7947 = vst.msk [vmem:[#allocation8 + $0x30] sm:$0xff] %vm7943_vm12, %v7890_v55  ;;  %v6729_v53 = vpop.f32.mrb[164].mxu1  ;;  %7780 = vrot.lane.b32.xlu1 %v7128_v28, %s10806_s25  ;;  %v8009_v36 = vpop.permute.xlu0 %8008  ;;  %v14834_v55 = vld [vmem:[#allocation4 + $0x71] sm:$0xff] }
 0x757   : > { %v6730_v4 = vadd.f32 %v14726_v25, %v6729_v53  ;;  %v6731_v48 = vpop.f32.mrb[165].mxu1  ;;  %8067 = vst.msk [vmem:[#allocation8 + $0x20] sm:$0xff] %vm8064_vm13, %v8009_v36 }
 0x758   : > { %v7410_v60 = vpop.permute.xlu1 %7409  ;;  %7419 = vrot.lane.b32.xlu0 %v14607_v31, %s10816_s15  ;;  %v14847_v48 = vld [vmem:[#allocation4 + $0x79] sm:$0xff] }
 0x759   : > { %v6796_v11 = vmax.f32 %v6730_v4, 0.0  ;;  %7465 = vst.msk [vmem:[#allocation8 + $0x50] sm:$0xff] %vm7459_vm6, %v7410_v60  ;;  %v14842_v4 = vld [vmem:[#allocation4 + $0x72] sm:$0xff]  ;;  %v14854_v60 = vld [vmem:[#allocation4 + $0x7a] sm:$0xff] }
 0x75a   : > { %7901 = vrot.lane.b32.xlu1 %v7249_v14, %s10818_s19  ;;  %v6928_v7 = vpop.permute.xlu0 %6927 }
 0x75b   : > { %6825 = vst.msk [vmem:[#allocation4 + $0x90] sm:$0xff] %vm6806_vm9, %v6796_v11  ;;  %v7131_v11 = vld [vmem:[#allocation4 + $0x73] sm:$0xff] }
 0x75c   : > { %6982 = vst.msk [vmem:[#allocation8 + $0x60] sm:$0xff] %vm6975_vm3, %v6928_v7  ;;  %v8011_v6 = vpop.permute.xlu1 %8010  ;;  %v14744_v45 = vld [vmem:[#allocation4 + $0x88] sm:$0xff]  ;;  %8020 = vrot.lane.b32.xlu0 %v14607_v31, %s10812_s10 }
 0x75d   : > { %8068 = vst.msk [vmem:[#allocation8 + $0x30] sm:$0xff] %vm8064_vm13, %v8011_v6  ;;  %v14751_v8 = vld [vmem:[#allocation4 + $0x81] sm:$0xff] }
 0x75e   : > { %6872 = vst.msk [vmem:[#allocation8 + $0x110] sm:$0xff] %vm6806_vm9, %v14744_v45  ;;  %7421 = vrot.lane.b32.xlu1 %v14638_v34, %s10816_s15  ;;  %8720 = vst.msk [vmem:[#allocation8 + $0xa8] sm:$0xff] %vm6806_vm9, %v14751_v8  ;;  %v7049_v19 = vpop.permute.xlu0 %7048 }
 0x75f   : > { %7103 = vst.msk [vmem:[#allocation8 + $0x60] sm:$0xff] %vm7096_vm2, %v7049_v19  ;;  %v7252_v19 = vld [vmem:[#allocation4 + $0x74] sm:$0xff] }
 0x760   : > { %v6930_v52 = vpop.permute.xlu1 %6929  ;;  %6939 = vrot.lane.b32.xlu0 %v14758_v27, %s10814_s8 }
 0x761   : > { %6983 = vst.msk [vmem:[#allocation8 + $0x70] sm:$0xff] %vm6975_vm3, %v6930_v52  ;;  %v7132_v52 = vld [vmem:[#allocation4 + $0x7b] sm:$0xff] }
 0x762   : > { %8022 = vrot.lane.b32.xlu1 %v14638_v34, %s10812_s10  ;;  %v14765_v31 = vld [vmem:[#allocation4 + $0x90] sm:$0xff]  ;;  %v7170_v50 = vpop.permute.xlu0 %7169 }
 0x763   : > { %v14767_v3 = vld [vmem:[#allocation4 + $0x89] sm:$0xff]  ;;  %6873 = vst.msk [vmem:[#allocation8 + $0x120] sm:$0xff] %vm6806_vm9, %v14765_v31 }
 0x764   : > { %8721 = vst.msk [vmem:[#allocation8 + $0xb8] sm:$0xff] %vm6806_vm9, %v14767_v3  ;;  %v7051_v24 = vpop.permute.xlu1 %7050  ;;  %7060 = vrot.lane.b32.xlu0 %v7008_v49, %s10810_s29  ;;  %v14776_v34 = vld [vmem:[#allocation4 + $0x69] sm:$0xff] }
 0x765   : > { %7224 = vst.msk [vmem:[#allocation8 + $0x60] sm:$0xff] %vm7217_vm4, %v7170_v50 }
 0x766   : > { %7104 = vst.msk [vmem:[#allocation8 + $0x70] sm:$0xff] %vm7096_vm2, %v7051_v24  ;;  %6941 = vrot.lane.b32.xlu1 %v14776_v34, %s10814_s8  ;;  %v7291_v29 = vpop.permute.xlu0 %7290 }
 0x767   : > { %7345 = vst.msk [vmem:[#allocation8 + $0x60] sm:$0xff] %vm7338_vm5, %v7291_v29 }
 0x768   : > { %v7172_v44 = vpop.permute.xlu1 %7171  ;;  %7181 = vrot.lane.b32.xlu0 %v7129_v56, %s10815_s14 }
 0x769   : > { %7225 = vst.msk [vmem:[#allocation8 + $0x70] sm:$0xff] %vm7217_vm4, %v7172_v44 }
 0x76a   : > { %7062 = vrot.lane.b32.xlu1 %v7009_v42, %s10810_s29  ;;  %v7529_v37 = vpop.permute.xlu0 %7528 }
 0x76b   : > { %7585 = vst.msk [vmem:[#allocation8 + $0x40] sm:$0xff] %vm7580_vm7, %v7529_v37 }
 0x76c   : > { %v7293_v39 = vpop.permute.xlu1 %7292  ;;  %7302 = vrot.lane.b32.xlu0 %v7250_v9, %s10808_s16 }
 0x76d   : > { %v6734_v41 = vpop.f32.mrb[166].mxu1  ;;  %7346 = vst.msk [vmem:[#allocation8 + $0x70] sm:$0xff] %vm7338_vm5, %v7293_v39 }
 0x76e   : > { %v6735_v0 = vadd.f32 %v14726_v25, %v6734_v41  ;;  %v6736_v40 = vpop.f32.mrb[167].mxu1  ;;  %7183 = vrot.lane.b32.xlu1 %v7130_v18, %s10815_s14  ;;  %v7650_v23 = vpop.permute.xlu0 %7649 }
 0x76f   : > { %7706 = vst.msk [vmem:[#allocation8 + $0x40] sm:$0xff] %vm7701_vm10, %v7650_v23 }
 0x770   : > { %v6797_v30 = vmax.f32 %v6735_v0, 0.0  ;;  %v7531_v58 = vpop.permute.xlu1 %7530  ;;  %7540 = vrot.lane.b32.xlu0 %v14758_v27, %s10811_s30 }
 0x771   : > { %7586 = vst.msk [vmem:[#allocation8 + $0x50] sm:$0xff] %vm7580_vm7, %v7531_v58 }
 0x772   : > { %v6739_v47 = vpop.f32.mrb[168].mxu1  ;;  %6826 = vst.msk [vmem:[#allocation4 + $0x98] sm:$0xff] %vm6806_vm9, %v6797_v30  ;;  %7304 = vrot.lane.b32.xlu1 %v7251_v32, %s10808_s16  ;;  %v7771_v21 = vpop.permute.xlu0 %7770 }
 0x773   : > { %v6740_v5 = vadd.f32 %v14726_v25, %v6739_v47  ;;  %v6741_v57 = vpop.f32.mrb[169].mxu1  ;;  %7827 = vst.msk [vmem:[#allocation8 + $0x40] sm:$0xff] %vm7822_vm11, %v7771_v21 }
 0x774   : > { %v7652_v43 = vpop.permute.xlu1 %7651  ;;  %7661 = vrot.lane.b32.xlu0 %v7008_v49, %s10817_s18  ;;  %v7253_v49 = vld [vmem:[#allocation4 + $0x7c] sm:$0xff] }
 0x775   : > { %v6798_v17 = vmax.f32 %v6740_v5, 0.0  ;;  %7707 = vst.msk [vmem:[#allocation8 + $0x50] sm:$0xff] %vm7701_vm10, %v7652_v43 }
 0x776   : > { %7542 = vrot.lane.b32.xlu1 %v14776_v34, %s10811_s30  ;;  %v7892_v28 = vpop.permute.xlu0 %7891 }
 0x777   : > { %6827 = vst.msk [vmem:[#allocation4 + $0xa0] sm:$0xff] %vm6806_vm9, %v6798_v17 }
 0x778   : > { %7948 = vst.msk [vmem:[#allocation8 + $0x40] sm:$0xff] %vm7943_vm12, %v7892_v28  ;;  %v7773_v62 = vpop.permute.xlu1 %7772  ;;  %7782 = vrot.lane.b32.xlu0 %v7129_v56, %s10806_s25 }
 0x779   : > { %7828 = vst.msk [vmem:[#allocation8 + $0x50] sm:$0xff] %vm7822_vm11, %v7773_v62  ;;  %v14805_v10 = vld [vmem:[#allocation4 + $0x98] sm:$0xff] }
 0x77a   : > { %7663 = vrot.lane.b32.xlu1 %v7009_v42, %s10817_s18  ;;  %6874 = vst.msk [vmem:[#allocation8 + $0x130] sm:$0xff] %vm6806_vm9, %v14805_v10  ;;  %v14810_v14 = vld [vmem:[#allocation4 + $0x91] sm:$0xff]  ;;  %v7412_v20 = vpop.permute.xlu0 %7411 }
 0x77b   : > { %8722 = vst.msk [vmem:[#allocation8 + $0xc8] sm:$0xff] %vm6806_vm9, %v14810_v14 }
 0x77c   : > { %7466 = vst.msk [vmem:[#allocation8 + $0x60] sm:$0xff] %vm7459_vm6, %v7412_v20  ;;  %v7894_v51 = vpop.permute.xlu1 %7893  ;;  %7903 = vrot.lane.b32.xlu0 %v7250_v9, %s10818_s19 }
 0x77d   : > { %7949 = vst.msk [vmem:[#allocation8 + $0x50] sm:$0xff] %vm7943_vm12, %v7894_v51 }
 0x77e   : > { %7784 = vrot.lane.b32.xlu1 %v7130_v18, %s10806_s25  ;;  %v14818_v38 = vld [vmem:[#allocation4 + $0x99] sm:$0xff]  ;;  %v8013_v15 = vpop.permute.xlu0 %8012 }
 0x77f   : > { %8723 = vst.msk [vmem:[#allocation8 + $0xd8] sm:$0xff] %vm6806_vm9, %v14818_v38 }
 0x780   : > { %8069 = vst.msk [vmem:[#allocation8 + $0x40] sm:$0xff] %vm8064_vm13, %v8013_v15  ;;  %v7414_v16 = vpop.permute.xlu1 %7413  ;;  %7423 = vrot.lane.b32.xlu0 %v14653_v54, %s10816_s15 }
 0x781   : > { %7467 = vst.msk [vmem:[#allocation8 + $0x70] sm:$0xff] %vm7459_vm6, %v7414_v16 }
 0x782   : > { %7905 = vrot.lane.b32.xlu1 %v7251_v32, %s10818_s19  ;;  %v6932_v12 = vpop.permute.xlu0 %6931 }
 0x783   : > { %6984 = vst.msk [vmem:[#allocation8 + $0x80] sm:$0xff] %vm6975_vm3, %v6932_v12 }
 0x784   : > { %v8015_v61 = vpop.permute.xlu1 %8014  ;;  %8024 = vrot.lane.b32.xlu0 %v14653_v54, %s10812_s10 }
 0x785   : > { %8070 = vst.msk [vmem:[#allocation8 + $0x50] sm:$0xff] %vm8064_vm13, %v8015_v61 }
 0x786   : > { %7425 = vrot.lane.b32.xlu1 %v14690_v35, %s10816_s15  ;;  %v7053_v1 = vpop.permute.xlu0 %7052 }
 0x787   : > { %7105 = vst.msk [vmem:[#allocation8 + $0x80] sm:$0xff] %vm7096_vm2, %v7053_v1 }
 0x788   : > { %v6934_v46 = vpop.permute.xlu1 %6933  ;;  %6943 = vrot.lane.b32.xlu0 %v14834_v55, %s10814_s8 }
 0x789   : > { %6985 = vst.msk [vmem:[#allocation8 + $0x90] sm:$0xff] %vm6975_vm3, %v6934_v46 }
 0x78a   : > { %8026 = vrot.lane.b32.xlu1 %v14690_v35, %s10812_s10  ;;  %v7174_v53 = vpop.permute.xlu0 %7173 }
 0x78b   : > { %7226 = vst.msk [vmem:[#allocation8 + $0x80] sm:$0xff] %vm7217_vm4, %v7174_v53 }
 0x78c   : > { %v7055_v54 = vpop.permute.xlu1 %7054  ;;  %7064 = vrot.lane.b32.xlu0 %v14842_v4, %s10810_s29 }
 0x78d   : > { %7106 = vst.msk [vmem:[#allocation8 + $0x90] sm:$0xff] %vm7096_vm2, %v7055_v54 }
 0x78e   : > { %6945 = vrot.lane.b32.xlu1 %v14847_v48, %s10814_s8  ;;  %v7295_v36 = vpop.permute.xlu0 %7294 }
 0x78f   : > { %7347 = vst.msk [vmem:[#allocation8 + $0x80] sm:$0xff] %vm7338_vm5, %v7295_v36 }
 0x790   : > { %v7176_v35 = vpop.permute.xlu1 %7175  ;;  %7185 = vrot.lane.b32.xlu0 %v7131_v11, %s10815_s14 }
 0x791   : > { %7227 = vst.msk [vmem:[#allocation8 + $0x90] sm:$0xff] %vm7217_vm4, %v7176_v35 }
 0x792   : > { %7066 = vrot.lane.b32.xlu1 %v14854_v60, %s10810_s29  ;;  %v7533_v7 = vpop.permute.xlu0 %7532 }
 0x793   : > { %7587 = vst.msk [vmem:[#allocation8 + $0x60] sm:$0xff] %vm7580_vm7, %v7533_v7 }
 0x794   : > { %v7297_v6 = vpop.permute.xlu1 %7296  ;;  %7306 = vrot.lane.b32.xlu0 %v7252_v19, %s10808_s16 }
 0x795   : > { %7348 = vst.msk [vmem:[#allocation8 + $0x90] sm:$0xff] %vm7338_vm5, %v7297_v6 }
 0x796   : > { %7187 = vrot.lane.b32.xlu1 %v7132_v52, %s10815_s14  ;;  %v7654_v50 = vpop.permute.xlu0 %7653 }
 0x797   : > { %7708 = vst.msk [vmem:[#allocation8 + $0x60] sm:$0xff] %vm7701_vm10, %v7654_v50 }
 0x798   : > { %v7535_v24 = vpop.permute.xlu1 %7534  ;;  %7544 = vrot.lane.b32.xlu0 %v14834_v55, %s10811_s30 }
 0x799   : > { %7588 = vst.msk [vmem:[#allocation8 + $0x70] sm:$0xff] %vm7580_vm7, %v7535_v24 }
 0x79a   : > { %7308 = vrot.lane.b32.xlu1 %v7253_v49, %s10808_s16  ;;  %v7775_v29 = vpop.permute.xlu0 %7774 }
 0x79b   : > { %7829 = vst.msk [vmem:[#allocation8 + $0x60] sm:$0xff] %vm7822_vm11, %v7775_v29  ;;  %v6744_v44 = vpop.f32.mrb[170].mxu1 }
 0x79c   : > { %v7656_v56 = vpop.permute.xlu1 %7655  ;;  %v6745_v42 = vadd.f32 %v14726_v25, %v6744_v44  ;;  %v6746_v37 = vpop.f32.mrb[171].mxu1  ;;  %7665 = vrot.lane.b32.xlu0 %v14842_v4, %s10817_s18 }
 0x79d   : > { %7709 = vst.msk [vmem:[#allocation8 + $0x70] sm:$0xff] %vm7701_vm10, %v7656_v56 }
 0x79e   : > { %7546 = vrot.lane.b32.xlu1 %v14847_v48, %s10811_s30  ;;  %v6799_v39 = vmax.f32 %v6745_v42, 0.0  ;;  %v7896_v9 = vpop.permute.xlu0 %7895 }
 0x79f   : > { %7950 = vst.msk [vmem:[#allocation8 + $0x60] sm:$0xff] %vm7943_vm12, %v7896_v9  ;;  %v6749_v41 = vpop.f32.mrb[172].mxu1  ;;  %v14947_v9 = vld [vmem:[#allocation4 + $0x8a] sm:$0xff] }
 0x7a0   : > { %v7777_v18 = vpop.permute.xlu1 %7776  ;;  %6828 = vst.msk [vmem:[#allocation4 + $0xa8] sm:$0xff] %vm6806_vm9, %v6799_v39  ;;  %v6750_v0 = vadd.f32 %v14726_v25, %v6749_v41  ;;  %v6751_v40 = vpop.f32.mrb[173].mxu1  ;;  %7786 = vrot.lane.b32.xlu0 %v7131_v11, %s10806_s25  ;;  %v14911_v11 = vld [vmem:[#allocation4 + $0x81] sm:$0xff] }
 0x7a1   : > { %7830 = vst.msk [vmem:[#allocation8 + $0x70] sm:$0xff] %vm7822_vm11, %v7777_v18  ;;  %v14941_v39 = vld [vmem:[#allocation4 + $0x83] sm:$0xff] }
 0x7a2   : > { %7667 = vrot.lane.b32.xlu1 %v14854_v60, %s10817_s18  ;;  %v6800_v23 = vmax.f32 %v6750_v0, 0.0  ;;  %v7416_v30 = vpop.permute.xlu0 %7415  ;;  %v14956_v40 = vld [vmem:[#allocation4 + $0x84] sm:$0xff] }
 0x7a3   : > { %7468 = vst.msk [vmem:[#allocation8 + $0x80] sm:$0xff] %vm7459_vm6, %v7416_v30  ;;  %v6754_v58 = vpop.f32.mrb[174].mxu1 }
 0x7a4   : > { %v7898_v47 = vpop.permute.xlu1 %7897  ;;  %6829 = vst.msk [vmem:[#allocation4 + $0xb0] sm:$0xff] %vm6806_vm9, %v6800_v23  ;;  %v6755_v32 = vadd.f32 %v14726_v25, %v6754_v58  ;;  %v6756_v5 = vpop.f32.mrb[175].mxu1  ;;  %7907 = vrot.lane.b32.xlu0 %v7252_v19, %s10818_s19  ;;  %v14961_v23 = vld [vmem:[#allocation4 + $0x8b] sm:$0xff] }
 0x7a5   : > { %7951 = vst.msk [vmem:[#allocation8 + $0x70] sm:$0xff] %vm7943_vm12, %v7898_v47 }
 0x7a6   : > { %7788 = vrot.lane.b32.xlu1 %v7132_v52, %s10806_s25  ;;  %v6801_v57 = vmax.f32 %v6755_v32, 0.0  ;;  %v8017_v21 = vpop.permute.xlu0 %8016  ;;  %v14973_v32 = vld [vmem:[#allocation4 + $0x8c] sm:$0xff] }
 0x7a7   : > { %8071 = vst.msk [vmem:[#allocation8 + $0x60] sm:$0xff] %vm8064_vm13, %v8017_v21  ;;  %v6759_v17 = vpop.f32.mrb[176].mxu1  ;;  %v14893_v20 = vld [vmem:[#allocation4 + $0xa1] sm:$0xff] }
 0x7a8   : > { %v7418_v43 = vpop.permute.xlu1 %7417  ;;  %6830 = vst.msk [vmem:[#allocation4 + $0xb8] sm:$0xff] %vm6806_vm9, %v6801_v57  ;;  %v6760_v28 = vadd.f32 %v14726_v25, %v6759_v17  ;;  %v6761_v62 = vpop.f32.mrb[177].mxu1  ;;  %7427 = vrot.lane.b32.xlu0 %v14705_v33, %s10816_s15  ;;  %8724 = vst.msk [vmem:[#allocation8 + $0xe8] sm:$0xff] %vm6806_vm9, %v14893_v20 }
 0x7a9   : > { %7469 = vst.msk [vmem:[#allocation8 + $0x90] sm:$0xff] %vm7459_vm6, %v7418_v43 }
 0x7aa   : > { %7909 = vrot.lane.b32.xlu1 %v7253_v49, %s10818_s19  ;;  %v6802_v51 = vmax.f32 %v6760_v28, 0.0  ;;  %v6936_v15 = vpop.permute.xlu0 %6935  ;;  %v14925_v49 = vld [vmem:[#allocation4 + $0x82] sm:$0xff] }
 0x7ab   : > { %6986 = vst.msk [vmem:[#allocation8 + $0xa0] sm:$0xff] %vm6975_vm3, %v6936_v15  ;;  %v6764_v16 = vpop.f32.mrb[178].mxu1  ;;  %v14904_v46 = vld [vmem:[#allocation4 + $0xa9] sm:$0xff] }
 0x7ac   : > { %v8019_v12 = vpop.permute.xlu1 %8018  ;;  %6831 = vst.msk [vmem:[#allocation4 + $0xc0] sm:$0xff] %vm6806_vm9, %v6802_v51  ;;  %v6765_v61 = vadd.f32 %v14726_v25, %v6764_v16  ;;  %v6766_v1 = vpop.f32.mrb[179].mxu1  ;;  %8028 = vrot.lane.b32.xlu0 %v14705_v33, %s10812_s10  ;;  %8725 = vst.msk [vmem:[#allocation8 + $0xf8] sm:$0xff] %vm6806_vm9, %v14904_v46 }
 0x7ad   : > { %8072 = vst.msk [vmem:[#allocation8 + $0x70] sm:$0xff] %vm8064_vm13, %v8019_v12  ;;  %v15008_v1 = vld [vmem:[#allocation4 + $0x91] sm:$0xff] }
 0x7ae   : > { %7429 = vrot.lane.b32.xlu1 %v14744_v45, %s10816_s15  ;;  %v6803_v53 = vmax.f32 %v6765_v61, 0.0  ;;  %v7057_v54 = vpop.permute.xlu0 %7056 }
 0x7af   : > { %7107 = vst.msk [vmem:[#allocation8 + $0xa0] sm:$0xff] %vm7096_vm2, %v7057_v54  ;;  %v6769_v36 = vpop.f32.mrb[180].mxu1  ;;  %v14918_v6 = vld [vmem:[#allocation4 + $0xb1] sm:$0xff] }
 0x7b0   : > { %v6938_v35 = vpop.permute.xlu1 %6937  ;;  %6832 = vst.msk [vmem:[#allocation4 + $0xc8] sm:$0xff] %vm6806_vm9, %v6803_v53  ;;  %v6770_v33 = vadd.f32 %v14726_v25, %v6769_v36  ;;  %v6771_v7 = vpop.f32.mrb[181].mxu1  ;;  %6947 = vrot.lane.b32.xlu0 %v14911_v11, %s10814_s8  ;;  %8726 = vst.msk [vmem:[#allocation8 + $0x108] sm:$0xff] %vm6806_vm9, %v14918_v6  ;;  %v15016_v54 = vld [vmem:[#allocation4 + $0x92] sm:$0xff] }
 0x7b1   : > { %6987 = vst.msk [vmem:[#allocation8 + $0xb0] sm:$0xff] %vm6975_vm3, %v6938_v35  ;;  %v15021_v36 = vld [vmem:[#allocation4 + $0x99] sm:$0xff] }
 0x7b2   : > { %8030 = vrot.lane.b32.xlu1 %v14744_v45, %s10812_s10  ;;  %v6804_v19 = vmax.f32 %v6770_v33, 0.0  ;;  %v7178_v52 = vpop.permute.xlu0 %7177  ;;  %v14932_v45 = vld [vmem:[#allocation4 + $0x89] sm:$0xff]  ;;  %v15026_v33 = vld [vmem:[#allocation4 + $0x93] sm:$0xff] }
 0x7b3   : > { %7228 = vst.msk [vmem:[#allocation8 + $0xa0] sm:$0xff] %vm7217_vm4, %v7178_v52  ;;  %v6774_v50 = vpop.f32.mrb[182].mxu1  ;;  %v14934_v56 = vld [vmem:[#allocation4 + $0xb9] sm:$0xff] }
 0x7b4   : > { %v7059_v24 = vpop.permute.xlu1 %7058  ;;  %6833 = vst.msk [vmem:[#allocation4 + $0xd0] sm:$0xff] %vm6806_vm9, %v6804_v19  ;;  %v6775_v29 = vadd.f32 %v14726_v25, %v6774_v50  ;;  %v6776_v44 = vpop.f32.mrb[183].mxu1  ;;  %7068 = vrot.lane.b32.xlu0 %v14925_v49, %s10810_s29  ;;  %8727 = vst.msk [vmem:[#allocation8 + $0x118] sm:$0xff] %vm6806_vm9, %v14934_v56  ;;  %v15031_v7 = vld [vmem:[#allocation4 + $0x9a] sm:$0xff] }
 0x7b5   : > { %7108 = vst.msk [vmem:[#allocation8 + $0xb0] sm:$0xff] %vm7096_vm2, %v7059_v24  ;;  %v15036_v50 = vld [vmem:[#allocation4 + $0x94] sm:$0xff] }
 0x7b6   : > { %6949 = vrot.lane.b32.xlu1 %v14932_v45, %s10814_s8  ;;  %v6805_v42 = vmax.f32 %v6775_v29, 0.0  ;;  %v7299_v37 = vpop.permute.xlu0 %7298  ;;  %v15041_v24 = vld [vmem:[#allocation4 + $0x9b] sm:$0xff] }
 0x7b7   : > { %7349 = vst.msk [vmem:[#allocation8 + $0xa0] sm:$0xff] %vm7338_vm5, %v7299_v37  ;;  %v14949_v41 = vld [vmem:[#allocation4 + $0xc1] sm:$0xff] }
 0x7b8   : > { %v7180_v25 = vpop.permute.xlu1 %7179  ;;  %6834 = vst.msk [vmem:[#allocation4 + $0xd8] sm:$0xff] %vm6806_vm9, %v6805_v42  ;;  %7189 = vrot.lane.b32.xlu0 %v14941_v39, %s10815_s14  ;;  %8728 = vst.msk [vmem:[#allocation8 + $0x128] sm:$0xff] %vm6806_vm9, %v14949_v41  ;;  %v15049_v42 = vld [vmem:[#allocation4 + $0x9c] sm:$0xff] }
 0x7b9   : > { %7229 = vst.msk [vmem:[#allocation8 + $0xb0] sm:$0xff] %vm7217_vm4, %v7180_v25 }
 0x7ba   : > { %7070 = vrot.lane.b32.xlu1 %v14947_v9, %s10810_s29  ;;  %v7537_v18 = vpop.permute.xlu0 %7536 }
 0x7bb   : > { %7589 = vst.msk [vmem:[#allocation8 + $0x80] sm:$0xff] %vm7580_vm7, %v7537_v18  ;;  %v14963_v30 = vld [vmem:[#allocation4 + $0xc9] sm:$0xff] }
 0x7bc   : > { %v7301_v0 = vpop.permute.xlu1 %7300  ;;  %7310 = vrot.lane.b32.xlu0 %v14956_v40, %s10808_s16  ;;  %8729 = vst.msk [vmem:[#allocation8 + $0x138] sm:$0xff] %vm6806_vm9, %v14963_v30  ;;  %vm9762_vm9 = vcmask 588800  }
 0x7bd   : > { %7350 = vst.msk [vmem:[#allocation8 + $0xb0] sm:$0xff] %vm7338_vm5, %v7301_v0 }
 0x7be   : > { %7191 = vrot.lane.b32.xlu1 %v14961_v23, %s10815_s14  ;;  %v7658_v58 = vpop.permute.xlu0 %7657 }
 0x7bf   : > { %7710 = vst.msk [vmem:[#allocation8 + $0x80] sm:$0xff] %vm7701_vm10, %v7658_v58 }
 0x7c0   : > { %v7539_v47 = vpop.permute.xlu1 %7538  ;;  %7548 = vrot.lane.b32.xlu0 %v14911_v11, %s10811_s30 }
 0x7c1   : > { %7590 = vst.msk [vmem:[#allocation8 + $0x90] sm:$0xff] %vm7580_vm7, %v7539_v47 }
 0x7c2   : > { %7312 = vrot.lane.b32.xlu1 %v14973_v32, %s10808_s16  ;;  %v7779_v5 = vpop.permute.xlu0 %7778 }
 0x7c3   : > { %7831 = vst.msk [vmem:[#allocation8 + $0x80] sm:$0xff] %vm7822_vm11, %v7779_v5 }
 0x7c4   : > { %v7660_v57 = vpop.permute.xlu1 %7659  ;;  %7669 = vrot.lane.b32.xlu0 %v14925_v49, %s10817_s18 }
 0x7c5   : > { %7711 = vst.msk [vmem:[#allocation8 + $0x90] sm:$0xff] %vm7701_vm10, %v7660_v57 }
 0x7c6   : > { %7550 = vrot.lane.b32.xlu1 %v14932_v45, %s10811_s30  ;;  %v7900_v21 = vpop.permute.xlu0 %7899 }
 0x7c7   : > { %7952 = vst.msk [vmem:[#allocation8 + $0x80] sm:$0xff] %vm7943_vm12, %v7900_v21  ;;  %v7377_v21 = vld [vmem:[#allocation4 + $0xa0] sm:$0xff] }
 0x7c8   : > { %v7781_v17 = vpop.permute.xlu1 %7780  ;;  %7790 = vrot.lane.b32.xlu0 %v14941_v39, %s10806_s25 }
 0x7c9   : > { %7832 = vst.msk [vmem:[#allocation8 + $0x90] sm:$0xff] %vm7822_vm11, %v7781_v17 }
 0x7ca   : > { %7671 = vrot.lane.b32.xlu1 %v14947_v9, %s10817_s18  ;;  %v7420_v43 = vpop.permute.xlu0 %7419 }
 0x7cb   : > { %7470 = vst.msk [vmem:[#allocation8 + $0xa0] sm:$0xff] %vm7459_vm6, %v7420_v43 }
 0x7cc   : > { %v7902_v28 = vpop.permute.xlu1 %7901  ;;  %7911 = vrot.lane.b32.xlu0 %v14956_v40, %s10818_s19 }
 0x7cd   : > { %7953 = vst.msk [vmem:[#allocation8 + $0x90] sm:$0xff] %vm7943_vm12, %v7902_v28  ;;  %v7378_v28 = vld [vmem:[#allocation4 + $0xa8] sm:$0xff] }
 0x7ce   : > { %7792 = vrot.lane.b32.xlu1 %v14961_v23, %s10806_s25  ;;  %v8021_v62 = vpop.permute.xlu0 %8020 }
 0x7cf   : > { %8073 = vst.msk [vmem:[#allocation8 + $0x80] sm:$0xff] %vm8064_vm13, %v8021_v62 }
 0x7d0   : > { %v7422_v51 = vpop.permute.xlu1 %7421  ;;  %7431 = vrot.lane.b32.xlu0 %v14765_v31, %s10816_s15 }
 0x7d1   : > { %7471 = vst.msk [vmem:[#allocation8 + $0xb0] sm:$0xff] %vm7459_vm6, %v7422_v51 }
 0x7d2   : > { %7913 = vrot.lane.b32.xlu1 %v14973_v32, %s10818_s19  ;;  %v6940_v15 = vpop.permute.xlu0 %6939 }
 0x7d3   : > { %6988 = vst.msk [vmem:[#allocation8 + $0xc0] sm:$0xff] %vm6975_vm3, %v6940_v15  ;;  %v15081_v15 = vld [vmem:[#allocation4 + $0xa1] sm:$0xff] }
 0x7d4   : > { %v8023_v16 = vpop.permute.xlu1 %8022  ;;  %8032 = vrot.lane.b32.xlu0 %v14765_v31, %s10812_s10 }
 0x7d5   : > { %8074 = vst.msk [vmem:[#allocation8 + $0x90] sm:$0xff] %vm8064_vm13, %v8023_v16 }
 0x7d6   : > { %7433 = vrot.lane.b32.xlu1 %v14805_v10, %s10816_s15  ;;  %v7061_v12 = vpop.permute.xlu0 %7060 }
 0x7d7   : > { %7109 = vst.msk [vmem:[#allocation8 + $0xc0] sm:$0xff] %vm7096_vm2, %v7061_v12 }
 0x7d8   : > { %v6942_v61 = vpop.permute.xlu1 %6941  ;;  %6951 = vrot.lane.b32.xlu0 %v15008_v1, %s10814_s8 }
 0x7d9   : > { %6989 = vst.msk [vmem:[#allocation8 + $0xd0] sm:$0xff] %vm6975_vm3, %v6942_v61  ;;  %v15088_v61 = vld [vmem:[#allocation4 + $0xa2] sm:$0xff] }
 0x7da   : > { %8034 = vrot.lane.b32.xlu1 %v14805_v10, %s10812_s10  ;;  %v7182_v53 = vpop.permute.xlu0 %7181 }
 0x7db   : > { %7230 = vst.msk [vmem:[#allocation8 + $0xc0] sm:$0xff] %vm7217_vm4, %v7182_v53  ;;  %v15093_v53 = vld [vmem:[#allocation4 + $0xa9] sm:$0xff] }
 0x7dc   : > { %v7063_v31 = vpop.permute.xlu1 %7062  ;;  %7072 = vrot.lane.b32.xlu0 %v15016_v54, %s10810_s29 }
 0x7dd   : > { %7110 = vst.msk [vmem:[#allocation8 + $0xd0] sm:$0xff] %vm7096_vm2, %v7063_v31 }
 0x7de   : > { %6953 = vrot.lane.b32.xlu1 %v15021_v36, %s10814_s8  ;;  %v7303_v35 = vpop.permute.xlu0 %7302 }
 0x7df   : > { %7351 = vst.msk [vmem:[#allocation8 + $0xc0] sm:$0xff] %vm7338_vm5, %v7303_v35 }
 0x7e0   : > { %v7184_v10 = vpop.permute.xlu1 %7183  ;;  %7193 = vrot.lane.b32.xlu0 %v15026_v33, %s10815_s14 }
 0x7e1   : > { %7231 = vst.msk [vmem:[#allocation8 + $0xd0] sm:$0xff] %vm7217_vm4, %v7184_v10  ;;  %v15098_v10 = vld [vmem:[#allocation4 + $0xa3] sm:$0xff] }
 0x7e2   : > { %7074 = vrot.lane.b32.xlu1 %v15031_v7, %s10810_s29  ;;  %v7541_v19 = vpop.permute.xlu0 %7540 }
 0x7e3   : > { %7591 = vst.msk [vmem:[#allocation8 + $0xa0] sm:$0xff] %vm7580_vm7, %v7541_v19  ;;  %v15103_v19 = vld [vmem:[#allocation4 + $0xaa] sm:$0xff] }
 0x7e4   : > { %v7305_v52 = vpop.permute.xlu1 %7304  ;;  %7314 = vrot.lane.b32.xlu0 %v15036_v50, %s10808_s16 }
 0x7e5   : > { %7352 = vst.msk [vmem:[#allocation8 + $0xd0] sm:$0xff] %vm7338_vm5, %v7305_v52 }
 0x7e6   : > { %7195 = vrot.lane.b32.xlu1 %v15041_v24, %s10815_s14  ;;  %v7662_v29 = vpop.permute.xlu0 %7661 }
 0x7e7   : > { %7712 = vst.msk [vmem:[#allocation8 + $0xa0] sm:$0xff] %vm7701_vm10, %v7662_v29 }
 0x7e8   : > { %v7543_v44 = vpop.permute.xlu1 %7542  ;;  %7552 = vrot.lane.b32.xlu0 %v15008_v1, %s10811_s30 }
 0x7e9   : > { %7592 = vst.msk [vmem:[#allocation8 + $0xb0] sm:$0xff] %vm7580_vm7, %v7543_v44  ;;  %v15108_v44 = vld [vmem:[#allocation4 + $0xa4] sm:$0xff] }
 0x7ea   : > { %7316 = vrot.lane.b32.xlu1 %v15049_v42, %s10808_s16  ;;  %v7783_v37 = vpop.permute.xlu0 %7782 }
 0x7eb   : > { %7833 = vst.msk [vmem:[#allocation8 + $0xa0] sm:$0xff] %vm7822_vm11, %v7783_v37  ;;  %v15113_v37 = vld [vmem:[#allocation4 + $0xab] sm:$0xff] }
 0x7ec   : > { %v7664_v25 = vpop.permute.xlu1 %7663  ;;  %7673 = vrot.lane.b32.xlu0 %v15016_v54, %s10817_s18 }
 0x7ed   : > { %7713 = vst.msk [vmem:[#allocation8 + $0xb0] sm:$0xff] %vm7701_vm10, %v7664_v25 }
 0x7ee   : > { %7554 = vrot.lane.b32.xlu1 %v15021_v36, %s10811_s30  ;;  %v7904_v18 = vpop.permute.xlu0 %7903 }
 0x7ef   : > { %7954 = vst.msk [vmem:[#allocation8 + $0xa0] sm:$0xff] %vm7943_vm12, %v7904_v18 }
 0x7f0   : > { %v7785_v0 = vpop.permute.xlu1 %7784  ;;  %7794 = vrot.lane.b32.xlu0 %v15026_v33, %s10806_s25 }
 0x7f1   : > { %7834 = vst.msk [vmem:[#allocation8 + $0xb0] sm:$0xff] %vm7822_vm11, %v7785_v0  ;;  %v7982_v0 = vld [vmem:[#allocation4 + $0xb0] sm:$0xff] }
 0x7f2   : > { %7675 = vrot.lane.b32.xlu1 %v15031_v7, %s10817_s18  ;;  %v7424_v58 = vpop.permute.xlu0 %7423 }
 0x7f3   : > { %7472 = vst.msk [vmem:[#allocation8 + $0xc0] sm:$0xff] %vm7459_vm6, %v7424_v58  ;;  %v15120_v58 = vld [vmem:[#allocation4 + $0xac] sm:$0xff] }
 0x7f4   : > { %v7906_v47 = vpop.permute.xlu1 %7905  ;;  %7915 = vrot.lane.b32.xlu0 %v15036_v50, %s10818_s19 }
 0x7f5   : > { %7955 = vst.msk [vmem:[#allocation8 + $0xb0] sm:$0xff] %vm7943_vm12, %v7906_v47 }
 0x7f6   : > { %7796 = vrot.lane.b32.xlu1 %v15041_v24, %s10806_s25  ;;  %v8025_v5 = vpop.permute.xlu0 %8024 }
 0x7f7   : > { %8075 = vst.msk [vmem:[#allocation8 + $0xa0] sm:$0xff] %vm8064_vm13, %v8025_v5 }
 0x7f8   : > { %v7426_v57 = vpop.permute.xlu1 %7425  ;;  %7435 = vrot.lane.b32.xlu0 %v7377_v21, %s10816_s15 }
 0x7f9   : > { %7473 = vst.msk [vmem:[#allocation8 + $0xd0] sm:$0xff] %vm7459_vm6, %v7426_v57  ;;  %v8085_v57 = vld [vmem:[#allocation4 + $0x21] sm:$0xff] }
 0x7fa   : > { %7917 = vrot.lane.b32.xlu1 %v15049_v42, %s10818_s19  ;;  %v6944_v17 = vpop.permute.xlu0 %6943 }
 0x7fb   : > { %6990 = vst.msk [vmem:[#allocation8 + $0xe0] sm:$0xff] %vm6975_vm3, %v6944_v17 }
 0x7fc   : > { %v8027_v43 = vpop.permute.xlu1 %8026  ;;  %8036 = vrot.lane.b32.xlu0 %v7377_v21, %s10812_s10  ;;  %v8086_v21 = vld [vmem:[#allocation4 + $0x29] sm:$0xff] }
 0x7fd   : > { %8076 = vst.msk [vmem:[#allocation8 + $0xb0] sm:$0xff] %vm8064_vm13, %v8027_v43 }
 0x7fe   : > { %7437 = vrot.lane.b32.xlu1 %v7378_v28, %s10816_s15  ;;  %v7065_v62 = vpop.permute.xlu0 %7064 }
 0x7ff   : > { %7111 = vst.msk [vmem:[#allocation8 + $0xe0] sm:$0xff] %vm7096_vm2, %v7065_v62  ;;  %v7983_v62 = vld [vmem:[#allocation4 + $0xb8] sm:$0xff] }
 0x800   : > { %v6946_v51 = vpop.permute.xlu1 %6945  ;;  %7556 = vrot.lane.b32.xlu0 %v15081_v15, %s10811_s30 }
 0x801   : > { %6991 = vst.msk [vmem:[#allocation8 + $0xf0] sm:$0xff] %vm6975_vm3, %v6946_v51 }
 0x802   : > { %8038 = vrot.lane.b32.xlu1 %v7378_v28, %s10812_s10  ;;  %v7186_v16 = vpop.permute.xlu0 %7185  ;;  %v8087_v28 = vld [vmem:[#allocation4 + $0x31] sm:$0xff] }
 0x803   : > { %7232 = vst.msk [vmem:[#allocation8 + $0xe0] sm:$0xff] %vm7217_vm4, %v7186_v16 }
 0x804   : > { %v7067_v12 = vpop.permute.xlu1 %7066  ;;  %7677 = vrot.lane.b32.xlu0 %v15088_v61, %s10817_s18 }
 0x805   : > { %7112 = vst.msk [vmem:[#allocation8 + $0xf0] sm:$0xff] %vm7096_vm2, %v7067_v12  ;;  %v15133_v12 = vld [vmem:[#allocation4 + $0x41] sm:$0xff] }
 0x806   : > { %7558 = vrot.lane.b32.xlu1 %v15093_v53, %s10811_s30  ;;  %v7307_v31 = vpop.permute.xlu0 %7306 }
 0x807   : > { %7353 = vst.msk [vmem:[#allocation8 + $0xe0] sm:$0xff] %vm7338_vm5, %v7307_v31  ;;  %v8088_v31 = vld [vmem:[#allocation4 + $0x39] sm:$0xff] }
 0x808   : > { %v7188_v35 = vpop.permute.xlu1 %7187  ;;  %7798 = vrot.lane.b32.xlu0 %v15098_v10, %s10806_s25 }
 0x809   : > { %7233 = vst.msk [vmem:[#allocation8 + $0xf0] sm:$0xff] %vm7217_vm4, %v7188_v35 }
 0x80a   : > { %7679 = vrot.lane.b32.xlu1 %v15103_v19, %s10817_s18  ;;  %v7545_v52 = vpop.permute.xlu0 %7544 }
 0x80b   : > { %7593 = vst.msk [vmem:[#allocation8 + $0xc0] sm:$0xff] %vm7580_vm7, %v7545_v52 }
 0x80c   : > { %v7309_v29 = vpop.permute.xlu1 %7308  ;;  %7919 = vrot.lane.b32.xlu0 %v15108_v44, %s10818_s19 }
 0x80d   : > { %7354 = vst.msk [vmem:[#allocation8 + $0xf0] sm:$0xff] %vm7338_vm5, %v7309_v29  ;;  %v15140_v29 = vld [vmem:[#allocation4 + $0x51] sm:$0xff] }
 0x80e   : > { %7800 = vrot.lane.b32.xlu1 %v15113_v37, %s10806_s25  ;;  %v7666_v25 = vpop.permute.xlu0 %7665 }
 0x80f   : > { %7714 = vst.msk [vmem:[#allocation8 + $0xc0] sm:$0xff] %vm7701_vm10, %v7666_v25  ;;  %v15145_v25 = vld [vmem:[#allocation4 + $0x49] sm:$0xff] }
 0x810   : > { %v7547_v18 = vpop.permute.xlu1 %7546  ;;  %8040 = vrot.lane.b32.xlu0 %v7982_v0, %s10812_s10 }
 0x811   : > { %7594 = vst.msk [vmem:[#allocation8 + $0xd0] sm:$0xff] %vm7580_vm7, %v7547_v18 }
 0x812   : > { %7921 = vrot.lane.b32.xlu1 %v15120_v58, %s10818_s19  ;;  %v7787_v47 = vpop.permute.xlu0 %7786 }
 0x813   : > { %7835 = vst.msk [vmem:[#allocation8 + $0xc0] sm:$0xff] %vm7822_vm11, %v7787_v47  ;;  %v15153_v47 = vld [vmem:[#allocation4 + $0x59] sm:$0xff] }
 0x814   : > { %v7668_v5 = vpop.permute.xlu1 %7667  ;;  %8125 = vrot.lane.b32.xlu0 %v8085_v57, %s10819_s23 }
 0x815   : > { %7715 = vst.msk [vmem:[#allocation8 + $0xd0] sm:$0xff] %vm7701_vm10, %v7668_v5 }
 0x816   : > { %8127 = vrot.lane.b32.xlu1 %v8086_v21, %s10819_s23  ;;  %v7908_v17 = vpop.permute.xlu0 %7907 }
 0x817   : > { %7956 = vst.msk [vmem:[#allocation8 + $0xc0] sm:$0xff] %vm7943_vm12, %v7908_v17 }
 0x818   : > { %v7789_v43 = vpop.permute.xlu1 %7788  ;;  %8129 = vrot.lane.b32.xlu0 %v8087_v28, %s10819_s23 }
 0x819   : > { %7836 = vst.msk [vmem:[#allocation8 + $0xd0] sm:$0xff] %vm7822_vm11, %v7789_v43 }
 0x81a   : > { %8042 = vrot.lane.b32.xlu1 %v7983_v62, %s10812_s10  ;;  %v7428_v51 = vpop.permute.xlu0 %7427  ;;  %s10820_s10 = smov 104  }
 0x81b   : > { %7474 = vst.msk [vmem:[#allocation8 + $0xe0] sm:$0xff] %vm7459_vm6, %v7428_v51 }
 0x81c   : > { %v7910_v16 = vpop.permute.xlu1 %7909  ;;  %8133 = vrot.lane.b32.xlu0 %v15133_v12, %s10819_s23 }
 0x81d   : > { %7957 = vst.msk [vmem:[#allocation8 + $0xd0] sm:$0xff] %vm7943_vm12, %v7910_v16  ;;  %v15191_v16 = vld [vmem:[#allocation4 + $0x32] sm:$0xff] }
 0x81e   : > { %8131 = vrot.lane.b32.xlu1 %v8088_v31, %s10819_s23  ;;  %v8029_v35 = vpop.permute.xlu0 %8028 }
 0x81f   : > { %8077 = vst.msk [vmem:[#allocation8 + $0xc0] sm:$0xff] %vm8064_vm13, %v8029_v35 }
 0x820   : > { %v7430_v52 = vpop.permute.xlu1 %7429  ;;  %8137 = vrot.lane.b32.xlu0 %v15140_v29, %s10819_s23 }
 0x821   : > { %7475 = vst.msk [vmem:[#allocation8 + $0xf0] sm:$0xff] %vm7459_vm6, %v7430_v52  ;;  %v15198_v52 = vld [vmem:[#allocation4 + $0x42] sm:$0xff] }
 0x822   : > { %8135 = vrot.lane.b32.xlu1 %v15145_v25, %s10819_s23  ;;  %v6948_v18 = vpop.permute.xlu0 %6947 }
 0x823   : > { %6992 = vst.msk [vmem:[#allocation8 + $0x100] sm:$0xff] %vm6975_vm3, %v6948_v18  ;;  %v15203_v18 = vld [vmem:[#allocation4 + $0x3a] sm:$0xff] }
 0x824   : > { %v8031_v0 = vpop.permute.xlu1 %8030  ;;  %8141 = vrot.lane.b32.xlu0 %v14758_v27, %s10819_s23 }
 0x825   : > { %8078 = vst.msk [vmem:[#allocation8 + $0xd0] sm:$0xff] %vm8064_vm13, %v8031_v0 }
 0x826   : > { %8139 = vrot.lane.b32.xlu1 %v15153_v47, %s10819_s23  ;;  %v7069_v5 = vpop.permute.xlu0 %7068 }
 0x827   : > { %7113 = vst.msk [vmem:[#allocation8 + $0x100] sm:$0xff] %vm7096_vm2, %v7069_v5 }
 0x828   : > { %v6950_v57 = vpop.permute.xlu1 %6949  ;;  %8145 = vrot.lane.b32.xlu0 %v14834_v55, %s10819_s23 }
 0x829   : > { %6993 = vst.msk [vmem:[#allocation8 + $0x110] sm:$0xff] %vm6975_vm3, %v6950_v57  ;;  %v15208_v57 = vld [vmem:[#allocation4 + $0x52] sm:$0xff] }
 0x82a   : > { %8143 = vrot.lane.b32.xlu1 %v14776_v34, %s10819_s23  ;;  %v7190_v21 = vpop.permute.xlu0 %7189 }
 0x82b   : > { %7234 = vst.msk [vmem:[#allocation8 + $0x100] sm:$0xff] %vm7217_vm4, %v7190_v21  ;;  %v15213_v21 = vld [vmem:[#allocation4 + $0x4a] sm:$0xff] }
 0x82c   : > { %v7071_v27 = vpop.permute.xlu1 %7070  ;;  %8149 = vrot.lane.b32.xlu0 %v14911_v11, %s10819_s23 }
 0x82d   : > { %7114 = vst.msk [vmem:[#allocation8 + $0x110] sm:$0xff] %vm7096_vm2, %v7071_v27 }
 0x82e   : > { %8147 = vrot.lane.b32.xlu1 %v14847_v48, %s10819_s23  ;;  %v7311_v17 = vpop.permute.xlu0 %7310 }
 0x82f   : > { %7355 = vst.msk [vmem:[#allocation8 + $0x100] sm:$0xff] %vm7338_vm5, %v7311_v17 }
 0x830   : > { %v7192_v43 = vpop.permute.xlu1 %7191  ;;  %8153 = vrot.lane.b32.xlu0 %v15008_v1, %s10819_s23  ;;  %v8103_v1 = vld [vmem:[#allocation4 + $0xb1] sm:$0xff] }
 0x831   : > { %7235 = vst.msk [vmem:[#allocation8 + $0x110] sm:$0xff] %vm7217_vm4, %v7192_v43  ;;  %v15218_v43 = vld [vmem:[#allocation4 + $0x62] sm:$0xff] }
 0x832   : > { %8151 = vrot.lane.b32.xlu1 %v14932_v45, %s10819_s23  ;;  %v7549_v34 = vpop.permute.xlu0 %7548 }
 0x833   : > { %7595 = vst.msk [vmem:[#allocation8 + $0xe0] sm:$0xff] %vm7580_vm7, %v7549_v34  ;;  %v15223_v34 = vld [vmem:[#allocation4 + $0x5a] sm:$0xff] }
 0x834   : > { %v7313_v55 = vpop.permute.xlu1 %7312  ;;  %8157 = vrot.lane.b32.xlu0 %v15081_v15, %s10819_s23  ;;  %v8206_v15 = vld [vmem:[#allocation4 + $0x22] sm:$0xff] }
 0x835   : > { %7356 = vst.msk [vmem:[#allocation8 + $0x110] sm:$0xff] %vm7338_vm5, %v7313_v55 }
 0x836   : > { %8155 = vrot.lane.b32.xlu1 %v15021_v36, %s10819_s23  ;;  %v7670_v48 = vpop.permute.xlu0 %7669  ;;  %v8104_v36 = vld [vmem:[#allocation4 + $0xb9] sm:$0xff] }
 0x837   : > { %7716 = vst.msk [vmem:[#allocation8 + $0xe0] sm:$0xff] %vm7701_vm10, %v7670_v48 }
 0x838   : > { %v7551_v11 = vpop.permute.xlu1 %7550  ;;  %8161 = vrot.lane.b32.xlu0 %v8103_v1, %s10819_s23 }
 0x839   : > { %7596 = vst.msk [vmem:[#allocation8 + $0xf0] sm:$0xff] %vm7580_vm7, %v7551_v11  ;;  %v15231_v11 = vld [vmem:[#allocation4 + $0x6a] sm:$0xff] }
 0x83a   : > { %8159 = vrot.lane.b32.xlu1 %v15093_v53, %s10819_s23  ;;  %v7791_v45 = vpop.permute.xlu0 %7790  ;;  %v8207_v53 = vld [vmem:[#allocation4 + $0x2a] sm:$0xff] }
 0x83b   : > { %7837 = vst.msk [vmem:[#allocation8 + $0xe0] sm:$0xff] %vm7822_vm11, %v7791_v45 }
 0x83c   : > { %v7672_v28 = vpop.permute.xlu1 %7671  ;;  %8246 = vrot.lane.b32.xlu0 %v8206_v15, %s10809_s17 }
 0x83d   : > { %7717 = vst.msk [vmem:[#allocation8 + $0xf0] sm:$0xff] %vm7701_vm10, %v7672_v28 }
 0x83e   : > { %8163 = vrot.lane.b32.xlu1 %v8104_v36, %s10819_s23  ;;  %v7912_v62 = vpop.permute.xlu0 %7911 }
 0x83f   : > { %7958 = vst.msk [vmem:[#allocation8 + $0xe0] sm:$0xff] %vm7943_vm12, %v7912_v62 }
 0x840   : > { %v7793_v51 = vpop.permute.xlu1 %7792  ;;  %8250 = vrot.lane.b32.xlu0 %v15191_v16, %s10809_s17 }
 0x841   : > { %7838 = vst.msk [vmem:[#allocation8 + $0xf0] sm:$0xff] %vm7822_vm11, %v7793_v51 }
 0x842   : > { %8248 = vrot.lane.b32.xlu1 %v8207_v53, %s10809_s17  ;;  %v7432_v31 = vpop.permute.xlu0 %7431 }
 0x843   : > { %7476 = vst.msk [vmem:[#allocation8 + $0x100] sm:$0xff] %vm7459_vm6, %v7432_v31  ;;  %v15263_v31 = vld [vmem:[#allocation4 + $0x33] sm:$0xff] }
 0x844   : > { %v7914_v35 = vpop.permute.xlu1 %7913  ;;  %8254 = vrot.lane.b32.xlu0 %v15198_v52, %s10809_s17 }
 0x845   : > { %7959 = vst.msk [vmem:[#allocation8 + $0xf0] sm:$0xff] %vm7943_vm12, %v7914_v35 }
 0x846   : > { %8252 = vrot.lane.b32.xlu1 %v15203_v18, %s10809_s17  ;;  %v8033_v0 = vpop.permute.xlu0 %8032 }
 0x847   : > { %8079 = vst.msk [vmem:[#allocation8 + $0xe0] sm:$0xff] %vm8064_vm13, %v8033_v0 }
 0x848   : > { %v7434_v5 = vpop.permute.xlu1 %7433  ;;  %8258 = vrot.lane.b32.xlu0 %v15208_v57, %s10809_s17 }
 0x849   : > { %7477 = vst.msk [vmem:[#allocation8 + $0x110] sm:$0xff] %vm7459_vm6, %v7434_v5  ;;  %v15270_v5 = vld [vmem:[#allocation4 + $0x43] sm:$0xff] }
 0x84a   : > { %8256 = vrot.lane.b32.xlu1 %v15213_v21, %s10809_s17  ;;  %v6952_v27 = vpop.permute.xlu0 %6951 }
 0x84b   : > { %6994 = vst.msk [vmem:[#allocation8 + $0x120] sm:$0xff] %vm6975_vm3, %v6952_v27  ;;  %v15275_v27 = vld [vmem:[#allocation4 + $0x3b] sm:$0xff] }
 0x84c   : > { %v8035_v17 = vpop.permute.xlu1 %8034  ;;  %8262 = vrot.lane.b32.xlu0 %v15218_v43, %s10809_s17 }
 0x84d   : > { %8080 = vst.msk [vmem:[#allocation8 + $0xf0] sm:$0xff] %vm8064_vm13, %v8035_v17 }
 0x84e   : > { %8260 = vrot.lane.b32.xlu1 %v15223_v34, %s10809_s17  ;;  %v7073_v55 = vpop.permute.xlu0 %7072 }
 0x84f   : > { %7115 = vst.msk [vmem:[#allocation8 + $0x120] sm:$0xff] %vm7096_vm2, %v7073_v55 }
 0x850   : > { %v6954_v48 = vpop.permute.xlu1 %6953  ;;  %8266 = vrot.lane.b32.xlu0 %v14842_v4, %s10809_s17 }
 0x851   : > { %6995 = vst.msk [vmem:[#allocation8 + $0x130] sm:$0xff] %vm6975_vm3, %v6954_v48  ;;  %v15280_v48 = vld [vmem:[#allocation4 + $0x53] sm:$0xff] }
 0x852   : > { %8264 = vrot.lane.b32.xlu1 %v15231_v11, %s10809_s17  ;;  %v7194_v1 = vpop.permute.xlu0 %7193 }
 0x853   : > { %7236 = vst.msk [vmem:[#allocation8 + $0x120] sm:$0xff] %vm7217_vm4, %v7194_v1  ;;  %v15285_v1 = vld [vmem:[#allocation4 + $0x4b] sm:$0xff] }
 0x854   : > { %v7075_v45 = vpop.permute.xlu1 %7074  ;;  %8270 = vrot.lane.b32.xlu0 %v14925_v49, %s10809_s17 }
 0x855   : > { %7116 = vst.msk [vmem:[#allocation8 + $0x130] sm:$0xff] %vm7096_vm2, %v7075_v45 }
 0x856   : > { %8268 = vrot.lane.b32.xlu1 %v14854_v60, %s10809_s17  ;;  %v7315_v28 = vpop.permute.xlu0 %7314 }
 0x857   : > { %7357 = vst.msk [vmem:[#allocation8 + $0x120] sm:$0xff] %vm7338_vm5, %v7315_v28 }
 0x858   : > { %v7196_v4 = vpop.permute.xlu1 %7195  ;;  %8274 = vrot.lane.b32.xlu0 %v15016_v54, %s10809_s17  ;;  %v8224_v54 = vld [vmem:[#allocation4 + $0xb2] sm:$0xff] }
 0x859   : > { %7237 = vst.msk [vmem:[#allocation8 + $0x130] sm:$0xff] %vm7217_vm4, %v7196_v4  ;;  %v15290_v4 = vld [vmem:[#allocation4 + $0x63] sm:$0xff] }
 0x85a   : > { %8272 = vrot.lane.b32.xlu1 %v14947_v9, %s10809_s17  ;;  %v7553_v15 = vpop.permute.xlu0 %7552 }
 0x85b   : > { %7597 = vst.msk [vmem:[#allocation8 + $0x100] sm:$0xff] %vm7580_vm7, %v7553_v15  ;;  %v15295_v15 = vld [vmem:[#allocation4 + $0x5b] sm:$0xff] }
 0x85c   : > { %v7317_v36 = vpop.permute.xlu1 %7316  ;;  %8278 = vrot.lane.b32.xlu0 %v15088_v61, %s10809_s17  ;;  %v8327_v61 = vld [vmem:[#allocation4 + $0x23] sm:$0xff] }
 0x85d   : > { %7358 = vst.msk [vmem:[#allocation8 + $0x130] sm:$0xff] %vm7338_vm5, %v7317_v36 }
 0x85e   : > { %8276 = vrot.lane.b32.xlu1 %v15031_v7, %s10809_s17  ;;  %v7674_v60 = vpop.permute.xlu0 %7673  ;;  %v8225_v7 = vld [vmem:[#allocation4 + $0xba] sm:$0xff] }
 0x85f   : > { %7718 = vst.msk [vmem:[#allocation8 + $0x100] sm:$0xff] %vm7701_vm10, %v7674_v60 }
 0x860   : > { %v7555_v49 = vpop.permute.xlu1 %7554  ;;  %8282 = vrot.lane.b32.xlu0 %v8224_v54, %s10809_s17  ;;  %v15305_v54 = vld [vmem:[#allocation4 + $0x6b] sm:$0xff] }
 0x861   : > { %7598 = vst.msk [vmem:[#allocation8 + $0x110] sm:$0xff] %vm7580_vm7, %v7555_v49  ;;  %v15300_v49 = vld [vmem:[#allocation4 + $0x73] sm:$0xff] }
 0x862   : > { %8280 = vrot.lane.b32.xlu1 %v15103_v19, %s10809_s17  ;;  %v7795_v9 = vpop.permute.xlu0 %7794  ;;  %v8328_v19 = vld [vmem:[#allocation4 + $0x2b] sm:$0xff] }
 0x863   : > { %7839 = vst.msk [vmem:[#allocation8 + $0x100] sm:$0xff] %vm7822_vm11, %v7795_v9 }
 0x864   : > { %v7676_v62 = vpop.permute.xlu1 %7675  ;;  %8367 = vrot.lane.b32.xlu0 %v8327_v61, %s10820_s10  ;;  %v15313_v61 = vld [vmem:[#allocation4 + $0x7b] sm:$0xff] }
 0x865   : > { %7719 = vst.msk [vmem:[#allocation8 + $0x110] sm:$0xff] %vm7701_vm10, %v7676_v62 }
 0x866   : > { %8284 = vrot.lane.b32.xlu1 %v8225_v7, %s10809_s17  ;;  %v7916_v51 = vpop.permute.xlu0 %7915 }
 0x867   : > { %7960 = vst.msk [vmem:[#allocation8 + $0x100] sm:$0xff] %vm7943_vm12, %v7916_v51 }
 0x868   : > { %v7797_v53 = vpop.permute.xlu1 %7796  ;;  %8371 = vrot.lane.b32.xlu0 %v15263_v31, %s10820_s10 }
 0x869   : > { %7840 = vst.msk [vmem:[#allocation8 + $0x110] sm:$0xff] %vm7822_vm11, %v7797_v53 }
 0x86a   : > { %8369 = vrot.lane.b32.xlu1 %v8328_v19, %s10820_s10  ;;  %v7436_v35 = vpop.permute.xlu0 %7435 }
 0x86b   : > { %7478 = vst.msk [vmem:[#allocation8 + $0x120] sm:$0xff] %vm7459_vm6, %v7436_v35  ;;  %v8345_v35 = vld [vmem:[#allocation4 + $0xb3] sm:$0xff] }
 0x86c   : > { %v7918_v0 = vpop.permute.xlu1 %7917  ;;  %8375 = vrot.lane.b32.xlu0 %v15270_v5, %s10820_s10 }
 0x86d   : > { %7961 = vst.msk [vmem:[#allocation8 + $0x110] sm:$0xff] %vm7943_vm12, %v7918_v0  ;;  %v8448_v0 = vld [vmem:[#allocation4 + $0x24] sm:$0xff] }
 0x86e   : > { %8373 = vrot.lane.b32.xlu1 %v15275_v27, %s10820_s10  ;;  %v8037_v17 = vpop.permute.xlu0 %8036 }
 0x86f   : > { %8081 = vst.msk [vmem:[#allocation8 + $0x100] sm:$0xff] %vm8064_vm13, %v8037_v17 }
 0x870   : > { %v7438_v55 = vpop.permute.xlu1 %7437  ;;  %8379 = vrot.lane.b32.xlu0 %v15280_v48, %s10820_s10 }
 0x871   : > { %7479 = vst.msk [vmem:[#allocation8 + $0x130] sm:$0xff] %vm7459_vm6, %v7438_v55 }
 0x872   : > { %8377 = vrot.lane.b32.xlu1 %v15285_v1, %s10820_s10  ;;  %v7557_v45 = vpop.permute.xlu0 %7556 }
 0x873   : > { %7599 = vst.msk [vmem:[#allocation8 + $0x120] sm:$0xff] %vm7580_vm7, %v7557_v45  ;;  %v15339_v45 = vld [vmem:[#allocation4 + $0x34] sm:$0xff] }
 0x874   : > { %v8039_v28 = vpop.permute.xlu1 %8038  ;;  %8383 = vrot.lane.b32.xlu0 %v15290_v4, %s10820_s10 }
 0x875   : > { %8082 = vst.msk [vmem:[#allocation8 + $0x110] sm:$0xff] %vm8064_vm13, %v8039_v28 }
 0x876   : > { %8381 = vrot.lane.b32.xlu1 %v15295_v15, %s10820_s10  ;;  %v7678_v36 = vpop.permute.xlu0 %7677 }
 0x877   : > { %7720 = vst.msk [vmem:[#allocation8 + $0x120] sm:$0xff] %vm7701_vm10, %v7678_v36 }
 0x878   : > { %v7559_v60 = vpop.permute.xlu1 %7558  ;;  %8387 = vrot.lane.b32.xlu0 %v15300_v49, %s10820_s10 }
 0x879   : > { %7600 = vst.msk [vmem:[#allocation8 + $0x130] sm:$0xff] %vm7580_vm7, %v7559_v60  ;;  %v15346_v60 = vld [vmem:[#allocation4 + $0x44] sm:$0xff] }
 0x87a   : > { %8385 = vrot.lane.b32.xlu1 %v15305_v54, %s10820_s10  ;;  %v7799_v9 = vpop.permute.xlu0 %7798 }
 0x87b   : > { %7841 = vst.msk [vmem:[#allocation8 + $0x120] sm:$0xff] %vm7822_vm11, %v7799_v9  ;;  %v15351_v9 = vld [vmem:[#allocation4 + $0x3c] sm:$0xff] }
 0x87c   : > { %v7680_v62 = vpop.permute.xlu1 %7679  ;;  %8391 = vrot.lane.b32.xlu0 %v14941_v39, %s10820_s10 }
 0x87d   : > { %7721 = vst.msk [vmem:[#allocation8 + $0x130] sm:$0xff] %vm7701_vm10, %v7680_v62 }
 0x87e   : > { %8389 = vrot.lane.b32.xlu1 %v15313_v61, %s10820_s10  ;;  %v7920_v7 = vpop.permute.xlu0 %7919 }
 0x87f   : > { %7962 = vst.msk [vmem:[#allocation8 + $0x120] sm:$0xff] %vm7943_vm12, %v7920_v7 }
 0x880   : > { %v7801_v51 = vpop.permute.xlu1 %7800  ;;  %8395 = vrot.lane.b32.xlu0 %v15026_v33, %s10820_s10 }
 0x881   : > { %7842 = vst.msk [vmem:[#allocation8 + $0x130] sm:$0xff] %vm7822_vm11, %v7801_v51  ;;  %v15356_v51 = vld [vmem:[#allocation4 + $0x54] sm:$0xff] }
 0x882   : > { %8393 = vrot.lane.b32.xlu1 %v14961_v23, %s10820_s10  ;;  %v8041_v53 = vpop.permute.xlu0 %8040 }
 0x883   : > { %8083 = vst.msk [vmem:[#allocation8 + $0x120] sm:$0xff] %vm8064_vm13, %v8041_v53  ;;  %v15361_v53 = vld [vmem:[#allocation4 + $0x4c] sm:$0xff] }
 0x884   : > { %v7922_v39 = vpop.permute.xlu1 %7921  ;;  %8399 = vrot.lane.b32.xlu0 %v15098_v10, %s10820_s10 }
 0x885   : > { %7963 = vst.msk [vmem:[#allocation8 + $0x130] sm:$0xff] %vm7943_vm12, %v7922_v39  ;;  %vm9988_vm12 = vcmask 7168  }
 0x886   : > { %8397 = vrot.lane.b32.xlu1 %v15041_v24, %s10820_s10  ;;  %v8126_v19 = vpop.permute.xlu0 %8125  ;;  %v8346_v24 = vld [vmem:[#allocation4 + $0xbb] sm:$0xff] }
 0x887   : > { %8186 = vst.msk [vmem:[#allocation8] sm:$0xff] %vm8185_vm14, %v8126_v19 }
 0x888   : > { %v8128_v33 = vpop.permute.xlu1 %8127  ;;  %8403 = vrot.lane.b32.xlu0 %v8345_v35, %s10820_s10  ;;  %v15371_v35 = vld [vmem:[#allocation4 + $0x5c] sm:$0xff] }
 0x889   : > { %8187 = vst.msk [vmem:[#allocation8 + $0x10] sm:$0xff] %vm8185_vm14, %v8128_v33  ;;  %v15366_v33 = vld [vmem:[#allocation4 + $0x64] sm:$0xff] }
 0x88a   : > { %8401 = vrot.lane.b32.xlu1 %v15113_v37, %s10820_s10  ;;  %v8130_v23 = vpop.permute.xlu0 %8129  ;;  %v8449_v37 = vld [vmem:[#allocation4 + $0x2c] sm:$0xff] }
 0x88b   : > { %8188 = vst.msk [vmem:[#allocation8 + $0x20] sm:$0xff] %vm8185_vm14, %v8130_v23  ;;  %v9730_v23 = vld [vmem:[%s16184_s7] sm:$0xff] }
 0x88c   : > { %v8043_v10 = vpop.permute.xlu1 %8042  ;;  %8488 = vrot.lane.b32.xlu0 %v8448_v0, %s10813_s20 }
 0x88d   : > { %8084 = vst.msk [vmem:[#allocation8 + $0x130] sm:$0xff] %vm8064_vm13, %v8043_v10  ;;  %v9731_v10 = vld [vmem:[%s16184_s7 + $0x8] sm:$0xff] }
 0x88e   : > { %8405 = vrot.lane.b32.xlu1 %v8346_v24, %s10820_s10  ;;  %v8134_v17 = vpop.permute.xlu0 %8133  ;;  %v10646_v0 = vpack.c.bf16 %v9731_v10, %v9730_v23  ;;  %v9734_v23 = vld [vmem:[%s16184_s7 + $0x20] sm:$0xff]  ;;  %v9735_v10 = vld [vmem:[%s16184_s7 + $0x28] sm:$0xff] }
 0x88f   : > { %8190 = vst.msk [vmem:[#allocation8 + $0x40] sm:$0xff] %vm8185_vm14, %v8134_v17 }
 0x890   : > { %v8132_v55 = vpop.permute.xlu1 %8131  ;;  %8492 = vrot.lane.b32.xlu0 %v15339_v45, %s10813_s20  ;;  %10647 = vmatpush1.bf16.msra.mxu0 %v10646_v0 }
 0x891   : > { %8189 = vst.msk [vmem:[#allocation8 + $0x30] sm:$0xff] %vm8185_vm14, %v8132_v55  ;;  %v15382_v55 = vld [vmem:[#allocation4 + $0x74] sm:$0xff]  ;;  %10694 = vmatpush1.bf16.msra.mxu1 %v10646_v0  ;;  %10648 = vmatprep.subr.bf16.mxu0 %v16207_v13  ;;  %v10652_v0 = vpack.c.bf16 %v9735_v10, %v9734_v23 }
 0x892   : > { %8490 = vrot.lane.b32.xlu1 %v8449_v37, %s10813_s20  ;;  %v8138_v28 = vpop.permute.xlu0 %8137  ;;  %v15387_v37 = vld [vmem:[#allocation4 + $0x6c] sm:$0xff]  ;;  %10682 = vmatprep.subr.bf16.mxu1 %v16207_v13  ;;  %v8466_v10 = vld [vmem:[#allocation4 + $0xb4] sm:$0xff] }
 0x893   : > { %8192 = vst.msk [vmem:[#allocation8 + $0x60] sm:$0xff] %vm8185_vm14, %v8138_v28  ;;  %v9732_v28 = vld [vmem:[%s16184_s7 + $0x10] sm:$0xff] }
 0x894   : > { %v8136_v36 = vpop.permute.xlu1 %8135  ;;  %8496 = vrot.lane.b32.xlu0 %v15346_v60, %s10813_s20 }
 0x895   : > { %8191 = vst.msk [vmem:[#allocation8 + $0x50] sm:$0xff] %vm8185_vm14, %v8136_v36  ;;  %v9733_v36 = vld [vmem:[%s16184_s7 + $0x18] sm:$0xff] }
 0x896   : > { %8494 = vrot.lane.b32.xlu1 %v15351_v9, %s10813_s20  ;;  %v8142_v62 = vpop.permute.xlu0 %8141 }
 0x897   : > { %8194 = vst.msk [vmem:[#allocation8 + $0x80] sm:$0xff] %vm8185_vm14, %v8142_v62  ;;  %v10649_v62 = vpack.c.bf16 %v9733_v36, %v9732_v28  ;;  %v9737_v28 = vld [vmem:[%s16184_s7 + $0x38] sm:$0xff] }
 0x898   : > { %v8140_v7 = vpop.permute.xlu1 %8139  ;;  %8500 = vrot.lane.b32.xlu0 %v15356_v51, %s10813_s20 }
 0x899   : > { %8193 = vst.msk [vmem:[#allocation8 + $0x70] sm:$0xff] %vm8185_vm14, %v8140_v7  ;;  %10650 = vmatpush1.bf16.msra.mxu0 %v10649_v62  ;;  %10695 = vmatpush1.bf16.msra.mxu1 %v10649_v62 }
 0x89a   : > { %8498 = vrot.lane.b32.xlu1 %v15361_v53, %s10813_s20  ;;  %v8146_v39 = vpop.permute.xlu0 %8145  ;;  %10651 = vmatprep.subr.bf16.mxu0 %v16207_v13 }
 0x89b   : > { %8196 = vst.msk [vmem:[#allocation8 + $0xa0] sm:$0xff] %vm8185_vm14, %v8146_v39  ;;  %10683 = vmatprep.subr.bf16.mxu1 %v16207_v13 }
 0x89c   : > { %v8144_v19 = vpop.permute.xlu1 %8143  ;;  %8504 = vrot.lane.b32.xlu0 %v15366_v33, %s10813_s20 }
 0x89d   : > { %8195 = vst.msk [vmem:[#allocation8 + $0x90] sm:$0xff] %vm8185_vm14, %v8144_v19  ;;  %v15403_v19 = vld [vmem:[#allocation4 + $0x7c] sm:$0xff]  ;;  %10653 = vmatpush1.bf16.msra.mxu0 %v10652_v0  ;;  %10696 = vmatpush1.bf16.msra.mxu1 %v10652_v0  ;;  %v9741_v0 = vld [vmem:[%s16184_s7 + $0x58] sm:$0xff] }
 0x89e   : > { %8502 = vrot.lane.b32.xlu1 %v15371_v35, %s10813_s20  ;;  %v8150_v24 = vpop.permute.xlu0 %8149  ;;  %10654 = vmatprep.subr.bf16.mxu0 %v16207_v13 }
 0x89f   : > { %8198 = vst.msk [vmem:[#allocation8 + $0xc0] sm:$0xff] %vm8185_vm14, %v8150_v24  ;;  %10684 = vmatprep.subr.bf16.mxu1 %v16207_v13 }
 0x8a0   : > { %v8148_v17 = vpop.permute.xlu1 %8147  ;;  %8508 = vrot.lane.b32.xlu0 %v15382_v55, %s10813_s20 }
 0x8a1   : > { %8197 = vst.msk [vmem:[#allocation8 + $0xb0] sm:$0xff] %vm8185_vm14, %v8148_v17  ;;  %v9736_v17 = vld [vmem:[%s16184_s7 + $0x30] sm:$0xff] }
 0x8a2   : > { %8506 = vrot.lane.b32.xlu1 %v15387_v37, %s10813_s20  ;;  %v8154_v7 = vpop.permute.xlu0 %8153  ;;  %v10655_v36 = vpack.c.bf16 %v9737_v28, %v9736_v17  ;;  %v8569_v28 = vld [vmem:[#allocation4 + $0x30] sm:$0xff] }
 0x8a3   : > { %8200 = vst.msk [vmem:[#allocation8 + $0xe0] sm:$0xff] %vm8185_vm14, %v8154_v7  ;;  %v9739_v7 = vld [vmem:[%s16184_s7 + $0x48] sm:$0xff] }
 0x8a4   : > { %v8152_v39 = vpop.permute.xlu1 %8151  ;;  %8512 = vrot.lane.b32.xlu0 %v14956_v40, %s10813_s20  ;;  %10656 = vmatpush1.bf16.msra.mxu0 %v10655_v36 }
 0x8a5   : > { %8199 = vst.msk [vmem:[#allocation8 + $0xd0] sm:$0xff] %vm8185_vm14, %v8152_v39  ;;  %10697 = vmatpush1.bf16.msra.mxu1 %v10655_v36  ;;  %10657 = vmatprep.subr.bf16.mxu0 %v16207_v13  ;;  %v8467_v36 = vld [vmem:[#allocation4 + $0xbc] sm:$0xff] }
 0x8a6   : > { %8510 = vrot.lane.b32.xlu1 %v15403_v19, %s10813_s20  ;;  %v8158_v24 = vpop.permute.xlu0 %8157  ;;  %10685 = vmatprep.subr.bf16.mxu1 %v16207_v13 }
 0x8a7   : > { %8202 = vst.msk [vmem:[#allocation8 + $0x100] sm:$0xff] %vm8185_vm14, %v8158_v24 }
 0x8a8   : > { %v8156_v40 = vpop.permute.xlu1 %8155  ;;  %8516 = vrot.lane.b32.xlu0 %v15036_v50, %s10813_s20 }
 0x8a9   : > { %8201 = vst.msk [vmem:[#allocation8 + $0xf0] sm:$0xff] %vm8185_vm14, %v8156_v40 }
 0x8aa   : > { %8514 = vrot.lane.b32.xlu1 %v14973_v32, %s10813_s20  ;;  %v8162_v62 = vpop.permute.xlu0 %8161  ;;  %v9738_v32 = vld [vmem:[%s16184_s7 + $0x40] sm:$0xff] }
 0x8ab   : > { %8204 = vst.msk [vmem:[#allocation8 + $0x120] sm:$0xff] %vm8185_vm14, %v8162_v62  ;;  %v10658_v39 = vpack.c.bf16 %v9739_v7, %v9738_v32  ;;  %v9743_v62 = vld [vmem:[%s16184_s7 + $0x68] sm:$0xff] }
 0x8ac   : > { %v8160_v50 = vpop.permute.xlu1 %8159  ;;  %8520 = vrot.lane.b32.xlu0 %v15108_v44, %s10813_s20 }
 0x8ad   : > { %8203 = vst.msk [vmem:[#allocation8 + $0x110] sm:$0xff] %vm8185_vm14, %v8160_v50  ;;  %10659 = vmatpush1.bf16.msra.mxu0 %v10658_v39  ;;  %10698 = vmatpush1.bf16.msra.mxu1 %v10658_v39  ;;  %v8570_v39 = vld [vmem:[#allocation4 + $0x38] sm:$0xff] }
 0x8ae   : > { %8518 = vrot.lane.b32.xlu1 %v15049_v42, %s10813_s20  ;;  %v8247_v23 = vpop.permute.xlu0 %8246  ;;  %10660 = vmatprep.subr.bf16.mxu0 %v16207_v13  ;;  %v9740_v42 = vld [vmem:[%s16184_s7 + $0x50] sm:$0xff] }
 0x8af   : > { %8307 = vst.msk [vmem:[#allocation8] sm:$0xff] %vm8306_vm15, %v8247_v23  ;;  %v10661_v24 = vpack.c.bf16 %v9741_v0, %v9740_v42  ;;  %10686 = vmatprep.subr.bf16.mxu1 %v16207_v13  ;;  %v9744_v23 = vld [vmem:[%s16184_s7 + $0x70] sm:$0xff]  ;;  %v9746_v0 = vld [vmem:[%s16184_s7 + $0x80] sm:$0xff] }
 0x8b0   : > { %v8164_v44 = vpop.permute.xlu1 %8163  ;;  %8524 = vrot.lane.b32.xlu0 %v8466_v10, %s10813_s20 }
 0x8b1   : > { %8205 = vst.msk [vmem:[#allocation8 + $0x130] sm:$0xff] %vm8185_vm14, %v8164_v44  ;;  %10662 = vmatpush1.bf16.msra.mxu0 %v10661_v24  ;;  %10699 = vmatpush1.bf16.msra.mxu1 %v10661_v24  ;;  %v9745_v44 = vld [vmem:[%s16184_s7 + $0x78] sm:$0xff]  ;;  %v9747_v24 = vld [vmem:[%s16184_s7 + $0x88] sm:$0xff] }
 0x8b2   : > { %8522 = vrot.lane.b32.xlu1 %v15120_v58, %s10813_s20  ;;  %v8251_v40 = vpop.permute.xlu0 %8250  ;;  %10663 = vmatprep.subr.bf16.mxu0 %v16207_v13  ;;  %v9742_v58 = vld [vmem:[%s16184_s7 + $0x60] sm:$0xff]  ;;  %v10667_v10 = vpack.c.bf16 %v9745_v44, %v9744_v23  ;;  %v9753_v23 = vld [vmem:[%s16184_s7 + $0xb8] sm:$0xff] }
 0x8b3   : > { %8309 = vst.msk [vmem:[#allocation8 + $0x20] sm:$0xff] %vm8306_vm15, %v8251_v40  ;;  %v10664_v50 = vpack.c.bf16 %v9743_v62, %v9742_v58  ;;  %10687 = vmatprep.subr.bf16.mxu1 %v16207_v13  ;;  %v10670_v40 = vpack.c.bf16 %v9747_v24, %v9746_v0 }
 0x8b4   : > { %v8249_v17 = vpop.permute.xlu1 %8248  ;;  %8609 = vrot.lane.b32.xlu0 %v8569_v28, %s10821_s26  ;;  %v15499_v28 = vld [vmem:[#allocation4 + $0x40] sm:$0xff] }
 0x8b5   : > { %8308 = vst.msk [vmem:[#allocation8 + $0x10] sm:$0xff] %vm8306_vm15, %v8249_v17  ;;  %10665 = vmatpush1.bf16.msra.mxu0 %v10664_v50  ;;  %10700 = vmatpush1.bf16.msra.mxu1 %v10664_v50  ;;  %v9750_v50 = vld [vmem:[%s16184_s7 + $0xa0] sm:$0xff] }
 0x8b6   : > { %8526 = vrot.lane.b32.xlu1 %v8467_v36, %s10813_s20  ;;  %v8255_v32 = vpop.permute.xlu0 %8254  ;;  %10666 = vmatprep.subr.bf16.mxu0 %v16207_v13  ;;  %v9749_v36 = vld [vmem:[%s16184_s7 + $0x98] sm:$0xff] }
 0x8b7   : > { %8311 = vst.msk [vmem:[#allocation8 + $0x40] sm:$0xff] %vm8306_vm15, %v8255_v32  ;;  %10688 = vmatprep.subr.bf16.mxu1 %v16207_v13  ;;  %v9751_v32 = vld [vmem:[%s16184_s7 + $0xa8] sm:$0xff] }
 0x8b8   : > { %v8253_v7 = vpop.permute.xlu1 %8252  ;;  %8770 = vrot.lane.b32.xlu0 %v15191_v16, %s10814_s8 }
 0x8b9   : > { %8310 = vst.msk [vmem:[#allocation8 + $0x30] sm:$0xff] %vm8306_vm15, %v8253_v7  ;;  %10668 = vmatpush1.bf16.msra.mxu0 %v10667_v10  ;;  %10701 = vmatpush1.bf16.msra.mxu1 %v10667_v10  ;;  %v10676_v7 = vpack.c.bf16 %v9751_v32, %v9750_v50 }
 0x8ba   : > { %8611 = vrot.lane.b32.xlu1 %v8570_v39, %s10821_s26  ;;  %v8259_v42 = vpop.permute.xlu0 %8258  ;;  %10669 = vmatprep.subr.bf16.mxu0 %v16207_v13 }
 0x8bb   : > { %8313 = vst.msk [vmem:[#allocation8 + $0x60] sm:$0xff] %vm8306_vm15, %v8259_v42  ;;  %10689 = vmatprep.subr.bf16.mxu1 %v16207_v13  ;;  %v15540_v42 = vld [vmem:[#allocation4 + $0x48] sm:$0xff] }
 0x8bc   : > { %v8257_v16 = vpop.permute.xlu1 %8256  ;;  %9010 = vrot.lane.b32.xlu0 %v15339_v45, %s10815_s14 }
 0x8bd   : > { %8312 = vst.msk [vmem:[#allocation8 + $0x50] sm:$0xff] %vm8306_vm15, %v8257_v16  ;;  %10671 = vmatpush1.bf16.msra.mxu0 %v10670_v40  ;;  %10702 = vmatpush1.bf16.msra.mxu1 %v10670_v40  ;;  %v9754_v16 = vld [vmem:[%s16184_s7 + $0xc0] sm:$0xff] }
 0x8be   : > { %8890 = vrot.lane.b32.xlu1 %v15263_v31, %s10810_s29  ;;  %v8263_v17 = vpop.permute.xlu0 %8262  ;;  %10672 = vmatprep.subr.bf16.mxu0 %v16207_v13  ;;  %v9748_v31 = vld [vmem:[%s16184_s7 + $0x90] sm:$0xff] }
 0x8bf   : > { %8315 = vst.msk [vmem:[#allocation8 + $0x80] sm:$0xff] %vm8306_vm15, %v8263_v17  ;;  %v10673_v58 = vpack.c.bf16 %v9749_v36, %v9748_v31  ;;  %10690 = vmatprep.subr.bf16.mxu1 %v16207_v13 }
 0x8c0   : > { %v8261_v45 = vpop.permute.xlu1 %8260  ;;  %8772 = vrot.lane.b32.xlu0 %v15203_v18, %s10814_s8 }
 0x8c1   : > { %8314 = vst.msk [vmem:[#allocation8 + $0x70] sm:$0xff] %vm8306_vm15, %v8261_v45  ;;  %10674 = vmatpush1.bf16.msra.mxu0 %v10673_v58  ;;  %10703 = vmatpush1.bf16.msra.mxu1 %v10673_v58  ;;  %v15571_v45 = vld [vmem:[#allocation4 + $0x50] sm:$0xff] }
 0x8c2   : > { %9130 = vrot.lane.b32.xlu1 %v15499_v28, %s10808_s16  ;;  %v8267_v62 = vpop.permute.xlu0 %8266  ;;  %10675 = vmatprep.subr.bf16.mxu0 %v16207_v13 }
 0x8c3   : > { %8317 = vst.msk [vmem:[#allocation8 + $0xa0] sm:$0xff] %vm8306_vm15, %v8267_v62  ;;  %10691 = vmatprep.subr.bf16.mxu1 %v16207_v13 }
 0x8c4   : > { %v8265_v18 = vpop.permute.xlu1 %8264  ;;  %8892 = vrot.lane.b32.xlu0 %v15275_v27, %s10810_s29 }
 0x8c5   : > { %8316 = vst.msk [vmem:[#allocation8 + $0x90] sm:$0xff] %vm8306_vm15, %v8265_v18  ;;  %10677 = vmatpush1.bf16.msra.mxu0 %v10676_v7  ;;  %10704 = vmatpush1.bf16.msra.mxu1 %v10676_v7 }
 0x8c6   : > { %9250 = vrot.lane.b32.xlu1 %v15133_v12, %s10816_s15  ;;  %v8271_v39 = vpop.permute.xlu0 %8270  ;;  %10678 = vmatprep.subr.bf16.mxu0 %v16207_v13  ;;  %v9752_v12 = vld [vmem:[%s16184_s7 + $0xb0] sm:$0xff] }
 0x8c7   : > { %8319 = vst.msk [vmem:[#allocation8 + $0xc0] sm:$0xff] %vm8306_vm15, %v8271_v39  ;;  %v10679_v44 = vpack.c.bf16 %v9753_v23, %v9752_v12  ;;  %10692 = vmatprep.subr.bf16.mxu1 %v16207_v13 }
 0x8c8   : > { %v8269_v27 = vpop.permute.xlu1 %8268  ;;  %9012 = vrot.lane.b32.xlu0 %v15351_v9, %s10815_s14 }
 0x8c9   : > { %8318 = vst.msk [vmem:[#allocation8 + $0xb0] sm:$0xff] %vm8306_vm15, %v8269_v27  ;;  %10680 = vmatpush1.bf16.msra.mxu0 %v10679_v44  ;;  %10705 = vmatpush1.bf16.msra.mxu1 %v10679_v44 }
 0x8ca   : > { %9370 = vrot.lane.b32.xlu1 %v15198_v52, %s10811_s30  ;;  %v8275_v10 = vpop.permute.xlu0 %8274  ;;  %9871 = vmatprep.subr.mxu0 %v16225_v59 }
 0x8cb   : > { %8321 = vst.msk [vmem:[#allocation8 + $0xe0] sm:$0xff] %vm8306_vm15, %v8275_v10  ;;  %10693 = vmatprep.subr.mxu1 %v16225_v59 }
 0x8cc   : > { %v8273_v9 = vpop.permute.xlu1 %8272  ;;  %9132 = vrot.lane.b32.xlu0 %v15540_v42, %s10808_s16 }
 0x8cd   : > { %8320 = vst.msk [vmem:[#allocation8 + $0xd0] sm:$0xff] %vm8306_vm15, %v8273_v9  ;;  %9872 = vmatpush1.msra.mxu0 %v9754_v16  ;;  %10706 = vmatpush1.msra.mxu1 %v9754_v16 }
 0x8ce   : > { %9490 = vrot.lane.b32.xlu1 %v15270_v5, %s10817_s18  ;;  %v8279_v13 = vpop.permute.xlu0 %8278 }
 0x8cf   : > { %8323 = vst.msk [vmem:[#allocation8 + $0x100] sm:$0xff] %vm8306_vm15, %v8279_v13 }
 0x8d0   : > { %v8277_v0 = vpop.permute.xlu1 %8276  ;;  %8774 = vrot.lane.b32.xlu0 %v15198_v52, %s10814_s8 }
 0x8d1   : > { %8322 = vst.msk [vmem:[#allocation8 + $0xf0] sm:$0xff] %vm8306_vm15, %v8277_v0 }
 0x8d2   : > { %9610 = vrot.lane.b32.xlu1 %v15346_v60, %s10806_s25  ;;  %v8283_v24 = vpop.permute.xlu0 %8282 }
 0x8d3   : > { %8325 = vst.msk [vmem:[#allocation8 + $0x120] sm:$0xff] %vm8306_vm15, %v8283_v24 }
 0x8d4   : > { %v8281_v40 = vpop.permute.xlu1 %8280  ;;  %8894 = vrot.lane.b32.xlu0 %v15270_v5, %s10810_s29 }
 0x8d5   : > { %8324 = vst.msk [vmem:[#allocation8 + $0x110] sm:$0xff] %vm8306_vm15, %v8281_v40 }
 0x8d6   : > { %9252 = vrot.lane.b32.xlu1 %v15145_v25, %s10816_s15  ;;  %v8368_v59 = vpop.permute.xlu0 %8367 }
 0x8d7   : > { %8428 = vst.msk [vmem:[#allocation8] sm:$0xff] %vm8427_vm1, %v8368_v59 }
 0x8d8   : > { %v8285_v52 = vpop.permute.xlu1 %8284  ;;  %9014 = vrot.lane.b32.xlu0 %v15346_v60, %s10815_s14 }
 0x8d9   : > { %8326 = vst.msk [vmem:[#allocation8 + $0x130] sm:$0xff] %vm8306_vm15, %v8285_v52 }
 0x8da   : > { %9372 = vrot.lane.b32.xlu1 %v15213_v21, %s10811_s30  ;;  %v8372_v17 = vpop.permute.xlu0 %8371 }
 0x8db   : > { %8430 = vst.msk [vmem:[#allocation8 + $0x20] sm:$0xff] %vm8427_vm1, %v8372_v17 }
 0x8dc   : > { %v8370_v5 = vpop.permute.xlu1 %8369  ;;  %9134 = vrot.lane.b32.xlu0 %v15571_v45, %s10808_s16 }
 0x8dd   : > { %8429 = vst.msk [vmem:[#allocation8 + $0x10] sm:$0xff] %vm8427_vm1, %v8370_v5 }
 0x8de   : > { %9492 = vrot.lane.b32.xlu1 %v15285_v1, %s10817_s18  ;;  %v8376_v25 = vpop.permute.xlu0 %8375 }
 0x8df   : > { %8432 = vst.msk [vmem:[#allocation8 + $0x40] sm:$0xff] %vm8427_vm1, %v8376_v25 }
 0x8e0   : > { %v8374_v60 = vpop.permute.xlu1 %8373  ;;  %8776 = vrot.lane.b32.xlu0 %v15213_v21, %s10814_s8 }
 0x8e1   : > { %8431 = vst.msk [vmem:[#allocation8 + $0x30] sm:$0xff] %vm8427_vm1, %v8374_v60 }
 0x8e2   : > { %9612 = vrot.lane.b32.xlu1 %v15361_v53, %s10806_s25  ;;  %v8380_v31 = vpop.permute.xlu0 %8379 }
 0x8e3   : > { %8434 = vst.msk [vmem:[#allocation8 + $0x60] sm:$0xff] %vm8427_vm1, %v8380_v31 }
 0x8e4   : > { %v8378_v36 = vpop.permute.xlu1 %8377  ;;  %8896 = vrot.lane.b32.xlu0 %v15285_v1, %s10810_s29  ;;  %v15597_v1 = vld [vmem:[#allocation4 + $0x58] sm:$0xff] }
 0x8e5   : > { %8433 = vst.msk [vmem:[#allocation8 + $0x50] sm:$0xff] %vm8427_vm1, %v8378_v36 }
 0x8e6   : > { %9254 = vrot.lane.b32.xlu1 %v15140_v29, %s10816_s15  ;;  %v8384_v58 = vpop.permute.xlu0 %8383 }
 0x8e7   : > { %8436 = vst.msk [vmem:[#allocation8 + $0x80] sm:$0xff] %vm8427_vm1, %v8384_v58 }
 0x8e8   : > { %v8382_v62 = vpop.permute.xlu1 %8381  ;;  %9016 = vrot.lane.b32.xlu0 %v15361_v53, %s10815_s14 }
 0x8e9   : > { %8435 = vst.msk [vmem:[#allocation8 + $0x70] sm:$0xff] %vm8427_vm1, %v8382_v62 }
 0x8ea   : > { %9374 = vrot.lane.b32.xlu1 %v15208_v57, %s10811_s30  ;;  %v8388_v21 = vpop.permute.xlu0 %8387 }
 0x8eb   : > { %8438 = vst.msk [vmem:[#allocation8 + $0xa0] sm:$0xff] %vm8427_vm1, %v8388_v21 }
 0x8ec   : > { %v8386_v18 = vpop.permute.xlu1 %8385  ;;  %9136 = vrot.lane.b32.xlu0 %v15597_v1, %s10808_s16 }
 0x8ed   : > { %8437 = vst.msk [vmem:[#allocation8 + $0x90] sm:$0xff] %vm8427_vm1, %v8386_v18  ;;  %v9337_v18 = vld [vmem:[#allocation4 + $0x7a] sm:$0xff] }
 0x8ee   : > { %9494 = vrot.lane.b32.xlu1 %v15280_v48, %s10817_s18  ;;  %v8392_v29 = vpop.permute.xlu0 %8391 }
 0x8ef   : > { %8440 = vst.msk [vmem:[#allocation8 + $0xc0] sm:$0xff] %vm8427_vm1, %v8392_v29 }
 0x8f0   : > { %v8390_v53 = vpop.permute.xlu1 %8389  ;;  %8613 = vrot.lane.b32.xlu0 %v15499_v28, %s10821_s26 }
 0x8f1   : > { %8439 = vst.msk [vmem:[#allocation8 + $0xb0] sm:$0xff] %vm8427_vm1, %v8390_v53 }
 0x8f2   : > { %9614 = vrot.lane.b32.xlu1 %v15356_v51, %s10806_s25  ;;  %v8396_v50 = vpop.permute.xlu0 %8395 }
 0x8f3   : > { %8442 = vst.msk [vmem:[#allocation8 + $0xe0] sm:$0xff] %vm8427_vm1, %v8396_v50 }
 0x8f4   : > { %v8394_v32 = vpop.permute.xlu1 %8393  ;;  %9256 = vrot.lane.b32.xlu0 %v15153_v47, %s10816_s15 }
 0x8f5   : > { %8441 = vst.msk [vmem:[#allocation8 + $0xd0] sm:$0xff] %vm8427_vm1, %v8394_v32 }
 0x8f6   : > { %8778 = vrot.lane.b32.xlu1 %v15208_v57, %s10814_s8  ;;  %v8400_v7 = vpop.permute.xlu0 %8399 }
 0x8f7   : > { %8444 = vst.msk [vmem:[#allocation8 + $0x100] sm:$0xff] %vm8427_vm1, %v8400_v7 }
 0x8f8   : > { %v8398_v39 = vpop.permute.xlu1 %8397  ;;  %9376 = vrot.lane.b32.xlu0 %v15223_v34, %s10811_s30 }
 0x8f9   : > { %8443 = vst.msk [vmem:[#allocation8 + $0xf0] sm:$0xff] %vm8427_vm1, %v8398_v39 }
 0x8fa   : > { %8898 = vrot.lane.b32.xlu1 %v15280_v48, %s10810_s29  ;;  %v8404_v28 = vpop.permute.xlu0 %8403  ;;  %v15632_v48 = vld [vmem:[#allocation4 + $0x60] sm:$0xff] }
 0x8fb   : > { %8446 = vst.msk [vmem:[#allocation8 + $0x120] sm:$0xff] %vm8427_vm1, %v8404_v28 }
 0x8fc   : > { %v8402_v27 = vpop.permute.xlu1 %8401  ;;  %9496 = vrot.lane.b32.xlu0 %v15295_v15, %s10817_s18 }
 0x8fd   : > { %8445 = vst.msk [vmem:[#allocation8 + $0x110] sm:$0xff] %vm8427_vm1, %v8402_v27 }
 0x8fe   : > { %9018 = vrot.lane.b32.xlu1 %v15356_v51, %s10815_s14  ;;  %v8489_v47 = vpop.permute.xlu0 %8488 }
 0x8ff   : > { %8549 = vst.msk [vmem:[#allocation8] sm:$0xff] %vm8548_vm0, %v8489_v47 }
 0x900   : > { %v8406_v57 = vpop.permute.xlu1 %8405  ;;  %9616 = vrot.lane.b32.xlu0 %v15371_v35, %s10806_s25 }
 0x901   : > { %8447 = vst.msk [vmem:[#allocation8 + $0x130] sm:$0xff] %vm8427_vm1, %v8406_v57  ;;  %v9338_v57 = vld [vmem:[#allocation4 + $0x82] sm:$0xff] }
 0x902   : > { %9138 = vrot.lane.b32.xlu1 %v15632_v48, %s10808_s16  ;;  %v8493_v12 = vpop.permute.xlu0 %8492 }
 0x903   : > { %8551 = vst.msk [vmem:[#allocation8 + $0x20] sm:$0xff] %vm8548_vm0, %v8493_v12 }
 0x904   : > { %v8491_v23 = vpop.permute.xlu1 %8490  ;;  %8780 = vrot.lane.b32.xlu0 %v15223_v34, %s10814_s8 }
 0x905   : > { %8550 = vst.msk [vmem:[#allocation8 + $0x10] sm:$0xff] %vm8548_vm0, %v8491_v23 }
 0x906   : > { %8615 = vrot.lane.b32.xlu1 %v15540_v42, %s10821_s26  ;;  %v8497_v51 = vpop.permute.xlu0 %8496 }
 0x907   : > { %8553 = vst.msk [vmem:[#allocation8 + $0x40] sm:$0xff] %vm8548_vm0, %v8497_v51 }
 0x908   : > { %v8495_v44 = vpop.permute.xlu1 %8494  ;;  %8900 = vrot.lane.b32.xlu0 %v15295_v15, %s10810_s29  ;;  %v15655_v15 = vld [vmem:[#allocation4 + $0x68] sm:$0xff] }
 0x909   : > { %8552 = vst.msk [vmem:[#allocation8 + $0x30] sm:$0xff] %vm8548_vm0, %v8495_v44  ;;  %v9578_v44 = vld [vmem:[#allocation4 + $0x84] sm:$0xff] }
 0x90a   : > { %9258 = vrot.lane.b32.xlu1 %v14645_v2, %s10816_s15  ;;  %v8501_v10 = vpop.permute.xlu0 %8500 }
 0x90b   : > { %8555 = vst.msk [vmem:[#allocation8 + $0x60] sm:$0xff] %vm8548_vm0, %v8501_v10 }
 0x90c   : > { %v8499_v9 = vpop.permute.xlu1 %8498  ;;  %9020 = vrot.lane.b32.xlu0 %v15371_v35, %s10815_s14 }
 0x90d   : > { %8554 = vst.msk [vmem:[#allocation8 + $0x50] sm:$0xff] %vm8548_vm0, %v8499_v9 }
 0x90e   : > { %9378 = vrot.lane.b32.xlu1 %v15218_v43, %s10811_s30  ;;  %v8505_v34 = vpop.permute.xlu0 %8504 }
 0x90f   : > { %8557 = vst.msk [vmem:[#allocation8 + $0x80] sm:$0xff] %vm8548_vm0, %v8505_v34 }
 0x910   : > { %v8503_v42 = vpop.permute.xlu1 %8502  ;;  %9140 = vrot.lane.b32.xlu0 %v15655_v15, %s10808_s16 }
 0x911   : > { %8556 = vst.msk [vmem:[#allocation8 + $0x70] sm:$0xff] %vm8548_vm0, %v8503_v42 }
 0x912   : > { %9498 = vrot.lane.b32.xlu1 %v15290_v4, %s10817_s18  ;;  %v8509_v2 = vpop.permute.xlu0 %8508 }
 0x913   : > { %8559 = vst.msk [vmem:[#allocation8 + $0xa0] sm:$0xff] %vm8548_vm0, %v8509_v2  ;;  %v9339_v2 = vld [vmem:[#allocation4 + $0x8a] sm:$0xff] }
 0x914   : > { %v8507_v35 = vpop.permute.xlu1 %8506  ;;  %8617 = vrot.lane.b32.xlu0 %v15571_v45, %s10821_s26 }
 0x915   : > { %8558 = vst.msk [vmem:[#allocation8 + $0x90] sm:$0xff] %vm8548_vm0, %v8507_v35 }
 0x916   : > { %9618 = vrot.lane.b32.xlu1 %v15366_v33, %s10806_s25  ;;  %v8513_v16 = vpop.permute.xlu0 %8512 }
 0x917   : > { %8561 = vst.msk [vmem:[#allocation8 + $0xc0] sm:$0xff] %vm8548_vm0, %v8513_v16 }
 0x918   : > { %v8511_v13 = vpop.permute.xlu1 %8510  ;;  %9260 = vrot.lane.b32.xlu0 %v14657_v22, %s10816_s15 }
 0x919   : > { %8560 = vst.msk [vmem:[#allocation8 + $0xb0] sm:$0xff] %vm8548_vm0, %v8511_v13  ;;  %v9459_v13 = vld [vmem:[#allocation4 + $0x8b] sm:$0xff] }
 0x91a   : > { %8782 = vrot.lane.b32.xlu1 %v15218_v43, %s10814_s8  ;;  %v8517_v0 = vpop.permute.xlu0 %8516 }
 0x91b   : > { %8563 = vst.msk [vmem:[#allocation8 + $0xe0] sm:$0xff] %vm8548_vm0, %v8517_v0 }
 0x91c   : > { %v8515_v24 = vpop.permute.xlu1 %8514  ;;  %9380 = vrot.lane.b32.xlu0 %v15231_v11, %s10811_s30 }
 0x91d   : > { %8562 = vst.msk [vmem:[#allocation8 + $0xd0] sm:$0xff] %vm8548_vm0, %v8515_v24  ;;  %v9579_v24 = vld [vmem:[#allocation4 + $0x8c] sm:$0xff] }
 0x91e   : > { %8902 = vrot.lane.b32.xlu1 %v15290_v4, %s10810_s29  ;;  %v8521_v40 = vpop.permute.xlu0 %8520  ;;  %v15690_v4 = vld [vmem:[#allocation4 + $0x70] sm:$0xff] }
 0x91f   : > { %8565 = vst.msk [vmem:[#allocation8 + $0x100] sm:$0xff] %vm8548_vm0, %v8521_v40 }
 0x920   : > { %v8519_v59 = vpop.permute.xlu1 %8518  ;;  %9500 = vrot.lane.b32.xlu0 %v15305_v54, %s10817_s18 }
 0x921   : > { %8564 = vst.msk [vmem:[#allocation8 + $0xf0] sm:$0xff] %vm8548_vm0, %v8519_v59  ;;  %v15796_v59 = vld [vmem:[#allocation4 + $0x90] sm:$0xff] }
 0x922   : > { %9022 = vrot.lane.b32.xlu1 %v15366_v33, %s10815_s14  ;;  %v8525_v22 = vpop.permute.xlu0 %8524 }
 0x923   : > { %8567 = vst.msk [vmem:[#allocation8 + $0x120] sm:$0xff] %vm8548_vm0, %v8525_v22 }
 0x924   : > { %v8523_v43 = vpop.permute.xlu1 %8522  ;;  %9620 = vrot.lane.b32.xlu0 %v15387_v37, %s10806_s25 }
 0x925   : > { %8566 = vst.msk [vmem:[#allocation8 + $0x110] sm:$0xff] %vm8548_vm0, %v8523_v43 }
 0x926   : > { %9142 = vrot.lane.b32.xlu1 %v15690_v4, %s10808_s16  ;;  %v8610_v52 = vpop.permute.xlu0 %8609 }
 0x927   : > { %8670 = vst.msk [vmem:[#allocation8] sm:$0xff] %vm8669_vm8, %v8610_v52 }
 0x928   : > { %v8527_v17 = vpop.permute.xlu1 %8526  ;;  %8784 = vrot.lane.b32.xlu0 %v15231_v11, %s10814_s8  ;;  %v9336_v11 = vld [vmem:[#allocation4 + $0x72] sm:$0xff] }
 0x929   : > { %8568 = vst.msk [vmem:[#allocation8 + $0x130] sm:$0xff] %vm8548_vm0, %v8527_v17 }
 0x92a   : > { %8619 = vrot.lane.b32.xlu1 %v15597_v1, %s10821_s26  ;;  %v8771_v33 = vpop.permute.xlu0 %8770 }
 0x92b   : > { %8830 = vst.msk [vmem:[#allocation8 + $0x8] sm:$0xff] %vm6975_vm3, %v8771_v33 }
 0x92c   : > { %v8612_v5 = vpop.permute.xlu1 %8611  ;;  %8904 = vrot.lane.b32.xlu0 %v15305_v54, %s10810_s29  ;;  %v15712_v54 = vld [vmem:[#allocation4 + $0x78] sm:$0xff] }
 0x92d   : > { %8671 = vst.msk [vmem:[#allocation8 + $0x10] sm:$0xff] %vm8669_vm8, %v8612_v5 }
 0x92e   : > { %9262 = vrot.lane.b32.xlu1 %v14697_v63, %s10816_s15  ;;  %v9011_v45 = vpop.permute.xlu0 %9010  ;;  %v9690_v7 = vld [vmem:[#allocation8] sm:$0xff] }
 0x930   : > { %v8891_v25 = vpop.permute.xlu1 %8890  ;;  %9024 = vrot.lane.b32.xlu0 %v15387_v37, %s10815_s14 }
 0x931   : > { %8950 = vst.msk [vmem:[#allocation8 + $0x8] sm:$0xff] %vm7096_vm2, %v8891_v25 }
 0x932   : > { %9070 = vst.msk [vmem:[#allocation8 + $0x8] sm:$0xff] %vm7217_vm4, %v9011_v45  ;;  %9382 = vrot.lane.b32.xlu1 %v9336_v11, %s10811_s30  ;;  %v8773_v60 = vpop.permute.xlu0 %8772  ;;  %v9340_v45 = vld [vmem:[#allocation4 + $0x92] sm:$0xff] }
 0x933   : > { %8831 = vst.msk [vmem:[#allocation8 + $0x18] sm:$0xff] %vm6975_vm3, %v8773_v60 }
 0x934   : > { %v9131_v31 = vpop.permute.xlu1 %9130  ;;  %9144 = vrot.lane.b32.xlu0 %v15712_v54, %s10808_s16  ;;  %v9692_v10 = vld [vmem:[#allocation8 + $0x10] sm:$0xff] }
 0x935   : > { %9190 = vst.msk [vmem:[#allocation8 + $0x8] sm:$0xff] %vm7338_vm5, %v9131_v31  ;;  %v15816_v31 = vld [vmem:[#allocation4 + $0x98] sm:$0xff] }
 0x936   : > { %9502 = vrot.lane.b32.xlu1 %v15300_v49, %s10817_s18  ;;  %v8893_v63 = vpop.permute.xlu0 %8892 }
 0x937   : > { %8951 = vst.msk [vmem:[#allocation8 + $0x18] sm:$0xff] %vm7096_vm2, %v8893_v63 }
 0x938   : > { %v9251_v37 = vpop.permute.xlu1 %9250  ;;  %8621 = vrot.lane.b32.xlu0 %v15632_v48, %s10821_s26 }
 0x939   : > { %9310 = vst.msk [vmem:[#allocation8 + $0x8] sm:$0xff] %vm7459_vm6, %v9251_v37 }
 0x93a   : > { %9622 = vrot.lane.b32.xlu1 %v15382_v55, %s10806_s25  ;;  %v9013_v36 = vpop.permute.xlu0 %9012 }
 0x93b   : > { %9071 = vst.msk [vmem:[#allocation8 + $0x18] sm:$0xff] %vm7217_vm4, %v9013_v36  ;;  %v9580_v36 = vld [vmem:[#allocation4 + $0x94] sm:$0xff] }
 0x93c   : > { %v9371_v58 = vpop.permute.xlu1 %9370  ;;  %9264 = vrot.lane.b32.xlu0 %v14709_v26, %s10816_s15 }
 0x93d   : > { %9430 = vst.msk [vmem:[#allocation8 + $0x8] sm:$0xff] %vm7580_vm7, %v9371_v58 }
 0x93e   : > { %8786 = vrot.lane.b32.xlu1 %v9336_v11, %s10814_s8  ;;  %v9133_v62 = vpop.permute.xlu0 %9132 }
 0x93f   : > { %9191 = vst.msk [vmem:[#allocation8 + $0x18] sm:$0xff] %vm7338_vm5, %v9133_v62 }
 0x940   : > { %v9491_v21 = vpop.permute.xlu1 %9490  ;;  %9384 = vrot.lane.b32.xlu0 %v9337_v18, %s10811_s30 }
 0x941   : > { %9550 = vst.msk [vmem:[#allocation8 + $0x8] sm:$0xff] %vm7701_vm10, %v9491_v21 }
 0x942   : > { %8906 = vrot.lane.b32.xlu1 %v15300_v49, %s10810_s29  ;;  %v8775_v1 = vpop.permute.xlu0 %8774  ;;  %v15745_v49 = vld [vmem:[#allocation4 + $0x80] sm:$0xff] }
 0x943   : > { %8832 = vst.msk [vmem:[#allocation8 + $0x28] sm:$0xff] %vm6975_vm3, %v8775_v1  ;;  %v9341_v1 = vld [vmem:[#allocation4 + $0x9a] sm:$0xff] }
 0x944   : > { %v9611_v29 = vpop.permute.xlu1 %9610  ;;  %9504 = vrot.lane.b32.xlu0 %v15313_v61, %s10817_s18 }
 0x945   : > { %9670 = vst.msk [vmem:[#allocation8 + $0x8] sm:$0xff] %vm7822_vm11, %v9611_v29 }
 0x946   : > { %9026 = vrot.lane.b32.xlu1 %v15382_v55, %s10815_s14  ;;  %v8895_v26 = vpop.permute.xlu0 %8894 }
 0x947   : > { %8952 = vst.msk [vmem:[#allocation8 + $0x28] sm:$0xff] %vm7096_vm2, %v8895_v26 }
 0x948   : > { %v9253_v53 = vpop.permute.xlu1 %9252  ;;  %9624 = vrot.lane.b32.xlu0 %v15403_v19, %s10806_s25 }
 0x949   : > { %9311 = vst.msk [vmem:[#allocation8 + $0x18] sm:$0xff] %vm7459_vm6, %v9253_v53  ;;  %v9461_v53 = vld [vmem:[#allocation4 + $0x9b] sm:$0xff] }
 0x94a   : > { %9146 = vrot.lane.b32.xlu1 %v15745_v49, %s10808_s16  ;;  %v9015_v50 = vpop.permute.xlu0 %9014 }
 0x94b   : > { %9072 = vst.msk [vmem:[#allocation8 + $0x28] sm:$0xff] %vm7217_vm4, %v9015_v50  ;;  %v9581_v50 = vld [vmem:[#allocation4 + $0x9c] sm:$0xff] }
 0x94c   : > { %v9373_v32 = vpop.permute.xlu1 %9372  ;;  %v9691_v55 = vld [vmem:[#allocation8 + $0x8] sm:$0xff]  ;;  %8788 = vrot.lane.b32.xlu0 %v9337_v18, %s10814_s8 }
 0x94d   : > { %9431 = vst.msk [vmem:[#allocation8 + $0x18] sm:$0xff] %vm7580_vm7, %v9373_v32  ;;  %10232 = vmatprep.mubr.msk.f32.mxu0 %vm9762_vm9, %v9691_v55  ;;  %v15844_v55 = vld [vmem:[#allocation4 + $0xa0] sm:$0xff] }
 0x94e   : > { %8623 = vrot.lane.b32.xlu1 %v15655_v15, %s10821_s26  ;;  %9888 = vmatmul.mubr.f32.vlgmr.msra.gmra.mrb[88].mxu0 %v9690_v7  ;;  %v9135_v39 = vpop.permute.xlu0 %9134 }
 0x94f   : > { %9192 = vst.msk [vmem:[#allocation8 + $0x28] sm:$0xff] %vm7338_vm5, %v9135_v39 }
 0x950   : > { %v9493_v28 = vpop.permute.xlu1 %9492  ;;  %8908 = vrot.lane.b32.xlu0 %v15313_v61, %s10810_s29  ;;  %v15767_v61 = vld [vmem:[#allocation4 + $0x88] sm:$0xff] }
 0x951   : > { %9551 = vst.msk [vmem:[#allocation8 + $0x18] sm:$0xff] %vm7701_vm10, %v9493_v28 }
 0x952   : > { %9266 = vrot.lane.b32.xlu1 %v14751_v8, %s10816_s15  ;;  %v8777_v27 = vpop.permute.xlu0 %8776  ;;  %v9458_v8 = vld [vmem:[#allocation4 + $0x83] sm:$0xff] }
 0x953   : > { %8833 = vst.msk [vmem:[#allocation8 + $0x38] sm:$0xff] %vm6975_vm3, %v8777_v27 }
 0x954   : > { %v9613_v47 = vpop.permute.xlu1 %9612  ;;  %9028 = vrot.lane.b32.xlu0 %v15403_v19, %s10815_s14 }
 0x955   : > { %9671 = vst.msk [vmem:[#allocation8 + $0x18] sm:$0xff] %vm7822_vm11, %v9613_v47 }
 0x956   : > { %9386 = vrot.lane.b32.xlu1 %v9338_v57, %s10811_s30  ;;  %v8897_v48 = vpop.permute.xlu0 %8896 }
 0x957   : > { %8953 = vst.msk [vmem:[#allocation8 + $0x38] sm:$0xff] %vm7096_vm2, %v8897_v48 }
 0x958   : > { %v9255_v12 = vpop.permute.xlu1 %9254  ;;  %9148 = vrot.lane.b32.xlu0 %v15767_v61, %s10808_s16 }
 0x959   : > { %9312 = vst.msk [vmem:[#allocation8 + $0x28] sm:$0xff] %vm7459_vm6, %v9255_v12  ;;  %v9342_v12 = vld [vmem:[#allocation4 + $0xa2] sm:$0xff] }
 0x95a   : > { %9506 = vrot.lane.b32.xlu1 %v9458_v8, %s10817_s18  ;;  %v9017_v23 = vpop.permute.xlu0 %9016 }
 0x95b   : > { %9073 = vst.msk [vmem:[#allocation8 + $0x38] sm:$0xff] %vm7217_vm4, %v9017_v23 }
 0x95c   : > { %v9375_v19 = vpop.permute.xlu1 %9374  ;;  %v9693_v51 = vld [vmem:[#allocation8 + $0x18] sm:$0xff]  ;;  %8625 = vrot.lane.b32.xlu0 %v15690_v4, %s10821_s26 }
 0x95d   : > { %9432 = vst.msk [vmem:[#allocation8 + $0x28] sm:$0xff] %vm7580_vm7, %v9375_v19  ;;  %10233 = vmatprep.mubr.msk.f32.mxu0 %vm9762_vm9, %v9693_v51  ;;  %v15864_v19 = vld [vmem:[#allocation4 + $0xa8] sm:$0xff] }
 0x95e   : > { %9626 = vrot.lane.b32.xlu1 %v9578_v44, %s10806_s25  ;;  %9893 = vmatmul.mubr.f32.gmra.mrb[90].mxu0 %v9692_v10  ;;  %v9137_v9 = vpop.permute.xlu0 %9136 }
 0x95f   : > { %9193 = vst.msk [vmem:[#allocation8 + $0x38] sm:$0xff] %vm7338_vm5, %v9137_v9  ;;  %v9582_v9 = vld [vmem:[#allocation4 + $0xa4] sm:$0xff] }
 0x960   : > { %v9495_v34 = vpop.permute.xlu1 %9494  ;;  %9268 = vrot.lane.b32.xlu0 %v14767_v3, %s10816_s15 }
 0x961   : > { %9552 = vst.msk [vmem:[#allocation8 + $0x28] sm:$0xff] %vm7701_vm10, %v9495_v34 }
 0x962   : > { %8790 = vrot.lane.b32.xlu1 %v9338_v57, %s10814_s8  ;;  %v8614_v42 = vpop.permute.xlu0 %8613 }
 0x963   : > { %8672 = vst.msk [vmem:[#allocation8 + $0x20] sm:$0xff] %vm8669_vm8, %v8614_v42 }
 0x964   : > { %v9615_v15 = vpop.permute.xlu1 %9614  ;;  %9388 = vrot.lane.b32.xlu0 %v9339_v2, %s10811_s30 }
 0x965   : > { %9672 = vst.msk [vmem:[#allocation8 + $0x28] sm:$0xff] %vm7822_vm11, %v9615_v15 }
 0x966   : > { %8910 = vrot.lane.b32.xlu1 %v9458_v8, %s10810_s29  ;;  %v9257_v35 = vpop.permute.xlu0 %9256 }
 0x967   : > { %9313 = vst.msk [vmem:[#allocation8 + $0x38] sm:$0xff] %vm7459_vm6, %v9257_v35  ;;  %v9343_v35 = vld [vmem:[#allocation4 + $0xaa] sm:$0xff] }
 0x968   : > { %v8779_v16 = vpop.permute.xlu1 %8778  ;;  %9508 = vrot.lane.b32.xlu0 %v9459_v13, %s10817_s18 }
 0x969   : > { %8834 = vst.msk [vmem:[#allocation8 + $0x48] sm:$0xff] %vm6975_vm3, %v8779_v16 }
 0x96a   : > { %9030 = vrot.lane.b32.xlu1 %v9578_v44, %s10815_s14  ;;  %v9377_v3 = vpop.permute.xlu0 %9376  ;;  %v9694_v22 = vld [vmem:[#allocation8 + $0x20] sm:$0xff] }
 0x96b   : > { %9433 = vst.msk [vmem:[#allocation8 + $0x38] sm:$0xff] %vm7580_vm7, %v9377_v3  ;;  %v9463_v3 = vld [vmem:[#allocation4 + $0xab] sm:$0xff] }
 0x96c   : > { %v8899_v0 = vpop.permute.xlu1 %8898  ;;  %v9695_v40 = vld [vmem:[#allocation8 + $0x28] sm:$0xff]  ;;  %9628 = vrot.lane.b32.xlu0 %v9579_v24, %s10806_s25 }
 0x96d   : > { %8954 = vst.msk [vmem:[#allocation8 + $0x48] sm:$0xff] %vm7096_vm2, %v8899_v0  ;;  %10234 = vmatprep.mubr.msk.f32.mxu0 %vm9762_vm9, %v9695_v40 }
 0x96e   : > { %9150 = vrot.lane.b32.xlu1 %v15796_v59, %s10808_s16  ;;  %9898 = vmatmul.mubr.f32.gmra.mrb[92].mxu0 %v9694_v22  ;;  %v9497_v43 = vpop.permute.xlu0 %9496 }
 0x96f   : > { %9553 = vst.msk [vmem:[#allocation8 + $0x38] sm:$0xff] %vm7701_vm10, %v9497_v43 }
 0x970   : > { %v9019_v4 = vpop.permute.xlu1 %9018  ;;  %8792 = vrot.lane.b32.xlu0 %v9339_v2, %s10814_s8 }
 0x971   : > { %9074 = vst.msk [vmem:[#allocation8 + $0x48] sm:$0xff] %vm7217_vm4, %v9019_v4 }
 0x972   : > { %8627 = vrot.lane.b32.xlu1 %v15712_v54, %s10821_s26  ;;  %v9617_v52 = vpop.permute.xlu0 %9616 }
 0x973   : > { %9673 = vst.msk [vmem:[#allocation8 + $0x38] sm:$0xff] %vm7822_vm11, %v9617_v52 }
 0x974   : > { %v9139_v17 = vpop.permute.xlu1 %9138  ;;  %8912 = vrot.lane.b32.xlu0 %v9459_v13, %s10810_s29 }
 0x975   : > { %9194 = vst.msk [vmem:[#allocation8 + $0x48] sm:$0xff] %vm7338_vm5, %v9139_v17 }
 0x976   : > { %9270 = vrot.lane.b32.xlu1 %v14810_v14, %s10816_s15  ;;  %v8781_v33 = vpop.permute.xlu0 %8780  ;;  %v9460_v14 = vld [vmem:[#allocation4 + $0x93] sm:$0xff] }
 0x977   : > { %8835 = vst.msk [vmem:[#allocation8 + $0x58] sm:$0xff] %vm6975_vm3, %v8781_v33 }
 0x978   : > { %v8616_v5 = vpop.permute.xlu1 %8615  ;;  %9032 = vrot.lane.b32.xlu0 %v9579_v24, %s10815_s14  ;;  %v9583_v24 = vld [vmem:[#allocation4 + $0xac] sm:$0xff] }
 0x979   : > { %8673 = vst.msk [vmem:[#allocation8 + $0x30] sm:$0xff] %vm8669_vm8, %v8616_v5 }
 0x97a   : > { %9390 = vrot.lane.b32.xlu1 %v9340_v45, %s10811_s30  ;;  %v8901_v25 = vpop.permute.xlu0 %8900  ;;  %v9697_v11 = vld [vmem:[#allocation8 + $0x38] sm:$0xff] }
 0x97b   : > { %8955 = vst.msk [vmem:[#allocation8 + $0x58] sm:$0xff] %vm7096_vm2, %v8901_v25  ;;  %10235 = vmatprep.mubr.msk.f32.mxu0 %vm9762_vm9, %v9697_v11 }
 0x97c   : > { %v9259_v60 = vpop.permute.xlu1 %9258  ;;  %9152 = vrot.lane.b32.xlu0 %v15816_v31, %s10808_s16 }
 0x97d   : > { %9314 = vst.msk [vmem:[#allocation8 + $0x48] sm:$0xff] %vm7459_vm6, %v9259_v60 }
 0x97e   : > { %9510 = vrot.lane.b32.xlu1 %v9460_v14, %s10817_s18  ;;  %v9021_v54 = vpop.permute.xlu0 %9020 }
 0x97f   : > { %9075 = vst.msk [vmem:[#allocation8 + $0x58] sm:$0xff] %vm7217_vm4, %v9021_v54 }
 0x980   : > { %v9379_v63 = vpop.permute.xlu1 %9378  ;;  %v9696_v37 = vld [vmem:[#allocation8 + $0x30] sm:$0xff]  ;;  %8629 = vrot.lane.b32.xlu0 %v15745_v49, %s10821_s26 }
 0x981   : > { %9434 = vst.msk [vmem:[#allocation8 + $0x48] sm:$0xff] %vm7580_vm7, %v9379_v63  ;;  %9903 = vmatmul.mubr.f32.gmra.mrb[94].mxu0 %v9696_v37  ;;  %v9584_v37 = vld [vmem:[#allocation4 + $0xb4] sm:$0xff] }
 0x982   : > { %9630 = vrot.lane.b32.xlu1 %v9580_v36, %s10806_s25  ;;  %v9141_v58 = vpop.permute.xlu0 %9140 }
 0x983   : > { %9195 = vst.msk [vmem:[#allocation8 + $0x58] sm:$0xff] %vm7338_vm5, %v9141_v58 }
 0x984   : > { %v9499_v62 = vpop.permute.xlu1 %9498  ;;  %9272 = vrot.lane.b32.xlu0 %v14818_v38, %s10816_s15 }
 0x985   : > { %9554 = vst.msk [vmem:[#allocation8 + $0x48] sm:$0xff] %vm7701_vm10, %v9499_v62  ;;  %v15924_v62 = vld [vmem:[#allocation4 + $0xc2] sm:$0xff] }
 0x986   : > { %8794 = vrot.lane.b32.xlu1 %v9340_v45, %s10814_s8  ;;  %v8618_v21 = vpop.permute.xlu0 %8617  ;;  %v9344_v45 = vld [vmem:[#allocation4 + $0xb2] sm:$0xff] }
 0x987   : > { %8674 = vst.msk [vmem:[#allocation8 + $0x40] sm:$0xff] %vm8669_vm8, %v8618_v21 }
 0x988   : > { %v9619_v18 = vpop.permute.xlu1 %9618  ;;  %9392 = vrot.lane.b32.xlu0 %v9341_v1, %s10811_s30 }
 0x989   : > { %9674 = vst.msk [vmem:[#allocation8 + $0x48] sm:$0xff] %vm7822_vm11, %v9619_v18 }
 0x98a   : > { %8914 = vrot.lane.b32.xlu1 %v9460_v14, %s10810_s29  ;;  %v9261_v29 = vpop.permute.xlu0 %9260 }
 0x98b   : > { %9315 = vst.msk [vmem:[#allocation8 + $0x58] sm:$0xff] %vm7459_vm6, %v9261_v29 }
 0x98c   : > { %v8783_v26 = vpop.permute.xlu1 %8782  ;;  %9512 = vrot.lane.b32.xlu0 %v9461_v53, %s10817_s18 }
 0x98d   : > { %8836 = vst.msk [vmem:[#allocation8 + $0x68] sm:$0xff] %vm6975_vm3, %v8783_v26  ;;  %v9345_v26 = vld [vmem:[#allocation4 + $0xba] sm:$0xff] }
 0x98e   : > { %9034 = vrot.lane.b32.xlu1 %v9580_v36, %s10815_s14  ;;  %v9381_v38 = vpop.permute.xlu0 %9380  ;;  %v9698_v7 = vld [vmem:[#allocation8 + $0x40] sm:$0xff] }
 0x98f   : > { %9435 = vst.msk [vmem:[#allocation8 + $0x58] sm:$0xff] %vm7580_vm7, %v9381_v38 }
 0x990   : > { %v8903_v49 = vpop.permute.xlu1 %8902  ;;  %v9699_v32 = vld [vmem:[#allocation8 + $0x48] sm:$0xff]  ;;  %9632 = vrot.lane.b32.xlu0 %v9581_v50, %s10806_s25 }
 0x991   : > { %8956 = vst.msk [vmem:[#allocation8 + $0x68] sm:$0xff] %vm7096_vm2, %v8903_v49  ;;  %10236 = vmatprep.mubr.msk.f32.mxu0 %vm9762_vm9, %v9699_v32 }
 0x992   : > { %9154 = vrot.lane.b32.xlu1 %v15844_v55, %s10808_s16  ;;  %9908 = vmatmul.mubr.f32.gmra.mrb[96].mxu0 %v9698_v7  ;;  %v9501_v39 = vpop.permute.xlu0 %9500 }
 0x993   : > { %9555 = vst.msk [vmem:[#allocation8 + $0x58] sm:$0xff] %vm7701_vm10, %v9501_v39  ;;  %v15951_v39 = vld [vmem:[#allocation4 + $0xc0] sm:$0xff] }
 0x994   : > { %v9023_v28 = vpop.permute.xlu1 %9022  ;;  %8796 = vrot.lane.b32.xlu0 %v9341_v1, %s10814_s8 }
 0x995   : > { %9076 = vst.msk [vmem:[#allocation8 + $0x68] sm:$0xff] %vm7217_vm4, %v9023_v28  ;;  %v9465_v28 = vld [vmem:[#allocation4 + $0xbb] sm:$0xff] }
 0x996   : > { %8631 = vrot.lane.b32.xlu1 %v15767_v61, %s10821_s26  ;;  %v9621_v27 = vpop.permute.xlu0 %9620 }
 0x997   : > { %9675 = vst.msk [vmem:[#allocation8 + $0x58] sm:$0xff] %vm7822_vm11, %v9621_v27 }
 0x998   : > { %v9143_v47 = vpop.permute.xlu1 %9142  ;;  %8916 = vrot.lane.b32.xlu0 %v9461_v53, %s10810_s29  ;;  %v15938_v53 = vld [vmem:[#allocation4 + $0xc3] sm:$0xff] }
 0x999   : > { %9196 = vst.msk [vmem:[#allocation8 + $0x68] sm:$0xff] %vm7338_vm5, %v9143_v47 }
 0x99a   : > { %9274 = vrot.lane.b32.xlu1 %v14893_v20, %s10816_s15  ;;  %v8785_v57 = vpop.permute.xlu0 %8784  ;;  %v9462_v20 = vld [vmem:[#allocation4 + $0xa3] sm:$0xff] }
 0x99b   : > { %8837 = vst.msk [vmem:[#allocation8 + $0x78] sm:$0xff] %vm6975_vm3, %v8785_v57  ;;  %v9585_v57 = vld [vmem:[#allocation4 + $0xbc] sm:$0xff] }
 0x99c   : > { %v8620_v48 = vpop.permute.xlu1 %8619  ;;  %9036 = vrot.lane.b32.xlu0 %v9581_v50, %s10815_s14  ;;  %v15943_v50 = vld [vmem:[#allocation4 + $0xc4] sm:$0xff] }
 0x99d   : > { %8675 = vst.msk [vmem:[#allocation8 + $0x50] sm:$0xff] %vm8669_vm8, %v8620_v48  ;;  %v9108_v48 = vld [vmem:[#allocation4 + $0xd0] sm:$0xff] }
 0x99e   : > { %9394 = vrot.lane.b32.xlu1 %v9342_v12, %s10811_s30  ;;  %v8905_v61 = vpop.permute.xlu0 %8904  ;;  %v9701_v8 = vld [vmem:[#allocation8 + $0x58] sm:$0xff] }
 0x99f   : > { %8957 = vst.msk [vmem:[#allocation8 + $0x78] sm:$0xff] %vm7096_vm2, %v8905_v61  ;;  %10237 = vmatprep.mubr.msk.f32.mxu0 %vm9762_vm9, %v9701_v8 }
 0x9a0   : > { %v9263_v23 = vpop.permute.xlu1 %9262  ;;  %9156 = vrot.lane.b32.xlu0 %v15864_v19, %s10808_s16 }
 0x9a1   : > { %9316 = vst.msk [vmem:[#allocation8 + $0x68] sm:$0xff] %vm7459_vm6, %v9263_v23 }
 0x9a2   : > { %9514 = vrot.lane.b32.xlu1 %v9462_v20, %s10817_s18  ;;  %v9025_v51 = vpop.permute.xlu0 %9024 }
 0x9a3   : > { %9077 = vst.msk [vmem:[#allocation8 + $0x78] sm:$0xff] %vm7217_vm4, %v9025_v51  ;;  %v15971_v51 = vld [vmem:[#allocation4 + $0xca] sm:$0xff] }
 0x9a4   : > { %v9383_v44 = vpop.permute.xlu1 %9382  ;;  %v9700_v10 = vld [vmem:[#allocation8 + $0x50] sm:$0xff]  ;;  %8633 = vrot.lane.b32.xlu0 %v15796_v59, %s10821_s26  ;;  %v15892_v59 = vld [vmem:[#allocation4 + $0xb0] sm:$0xff] }
 0x9a5   : > { %9436 = vst.msk [vmem:[#allocation8 + $0x68] sm:$0xff] %vm7580_vm7, %v9383_v44  ;;  %9913 = vmatmul.mubr.f32.gmra.mrb[98].mxu0 %v9700_v10 }
 0x9a6   : > { %9634 = vrot.lane.b32.xlu1 %v9582_v9, %s10806_s25  ;;  %v9145_v34 = vpop.permute.xlu0 %9144 }
 0x9a7   : > { %9197 = vst.msk [vmem:[#allocation8 + $0x78] sm:$0xff] %vm7338_vm5, %v9145_v34 }
 0x9a8   : > { %v9503_v42 = vpop.permute.xlu1 %9502  ;;  %9276 = vrot.lane.b32.xlu0 %v14904_v46, %s10816_s15 }
 0x9a9   : > { %9556 = vst.msk [vmem:[#allocation8 + $0x68] sm:$0xff] %vm7701_vm10, %v9503_v42  ;;  %v8869_v42 = vld [vmem:[#allocation4 + $0xcb] sm:$0xff] }
 0x9aa   : > { %8798 = vrot.lane.b32.xlu1 %v9342_v12, %s10814_s8  ;;  %v8622_v15 = vpop.permute.xlu0 %8621 }
 0x9ab   : > { %8676 = vst.msk [vmem:[#allocation8 + $0x60] sm:$0xff] %vm8669_vm8, %v8622_v15 }
 0x9ac   : > { %v9623_v2 = vpop.permute.xlu1 %9622  ;;  %9396 = vrot.lane.b32.xlu0 %v9343_v35, %s10811_s30 }
 0x9ad   : > { %9676 = vst.msk [vmem:[#allocation8 + $0x68] sm:$0xff] %vm7822_vm11, %v9623_v2 }
 0x9ae   : > { %8918 = vrot.lane.b32.xlu1 %v9462_v20, %s10810_s29  ;;  %v9265_v16 = vpop.permute.xlu0 %9264 }
 0x9af   : > { %9317 = vst.msk [vmem:[#allocation8 + $0x78] sm:$0xff] %vm7459_vm6, %v9265_v16 }
 0x9b0   : > { %v8787_v13 = vpop.permute.xlu1 %8786  ;;  %9516 = vrot.lane.b32.xlu0 %v9463_v3, %s10817_s18 }
 0x9b1   : > { %8838 = vst.msk [vmem:[#allocation8 + $0x88] sm:$0xff] %vm6975_vm3, %v8787_v13 }
 0x9b2   : > { %9038 = vrot.lane.b32.xlu1 %v9582_v9, %s10815_s14  ;;  %v9385_v46 = vpop.permute.xlu0 %9384  ;;  %v9702_v22 = vld [vmem:[#allocation8 + $0x60] sm:$0xff]  ;;  %v9228_v9 = vld [vmem:[#allocation4 + $0xd1] sm:$0xff] }
 0x9b3   : > { %9437 = vst.msk [vmem:[#allocation8 + $0x78] sm:$0xff] %vm7580_vm7, %v9385_v46 }
 0x9b4   : > { %v8907_v0 = vpop.permute.xlu1 %8906  ;;  %v9703_v40 = vld [vmem:[#allocation8 + $0x68] sm:$0xff]  ;;  %9636 = vrot.lane.b32.xlu0 %v9583_v24, %s10806_s25 }
 0x9b5   : > { %8958 = vst.msk [vmem:[#allocation8 + $0x88] sm:$0xff] %vm7096_vm2, %v8907_v0  ;;  %10238 = vmatprep.mubr.msk.f32.mxu0 %vm9762_vm9, %v9703_v40 }
 0x9b6   : > { %9158 = vrot.lane.b32.xlu1 %v15892_v59, %s10808_s16  ;;  %9918 = vmatmul.mubr.f32.gmra.mrb[100].mxu0 %v9702_v22  ;;  %v9505_v43 = vpop.permute.xlu0 %9504  ;;  %v9468_v22 = vld [vmem:[#allocation4 + $0xd3] sm:$0xff] }
 0x9b7   : > { %9557 = vst.msk [vmem:[#allocation8 + $0x78] sm:$0xff] %vm7701_vm10, %v9505_v43 }
 0x9b8   : > { %v9027_v4 = vpop.permute.xlu1 %9026  ;;  %8800 = vrot.lane.b32.xlu0 %v9343_v35, %s10814_s8  ;;  %v9348_v35 = vld [vmem:[#allocation4 + $0xd2] sm:$0xff] }
 0x9b9   : > { %9078 = vst.msk [vmem:[#allocation8 + $0x88] sm:$0xff] %vm7217_vm4, %v9027_v4 }
 0x9ba   : > { %8635 = vrot.lane.b32.xlu1 %v15816_v31, %s10821_s26  ;;  %v9625_v52 = vpop.permute.xlu0 %9624  ;;  %v15912_v31 = vld [vmem:[#allocation4 + $0xb8] sm:$0xff] }
 0x9bb   : > { %9677 = vst.msk [vmem:[#allocation8 + $0x78] sm:$0xff] %vm7822_vm11, %v9625_v52 }
 0x9bc   : > { %v9147_v17 = vpop.permute.xlu1 %9146  ;;  %8920 = vrot.lane.b32.xlu0 %v9463_v3, %s10810_s29  ;;  %v8989_v3 = vld [vmem:[#allocation4 + $0xcc] sm:$0xff] }
 0x9bd   : > { %9198 = vst.msk [vmem:[#allocation8 + $0x88] sm:$0xff] %vm7338_vm5, %v9147_v17  ;;  %v9109_v17 = vld [vmem:[#allocation4 + $0xd8] sm:$0xff] }
 0x9be   : > { %9278 = vrot.lane.b32.xlu1 %v14918_v6, %s10816_s15  ;;  %v8789_v33 = vpop.permute.xlu0 %8788  ;;  %v9464_v6 = vld [vmem:[#allocation4 + $0xb3] sm:$0xff] }
 0x9bf   : > { %8839 = vst.msk [vmem:[#allocation8 + $0x98] sm:$0xff] %vm6975_vm3, %v8789_v33 }
 0x9c0   : > { %v8624_v5 = vpop.permute.xlu1 %8623  ;;  %9040 = vrot.lane.b32.xlu0 %v9583_v24, %s10815_s14  ;;  %v15994_v24 = vld [vmem:[#allocation4 + $0xc8] sm:$0xff] }
 0x9c1   : > { %8677 = vst.msk [vmem:[#allocation8 + $0x70] sm:$0xff] %vm8669_vm8, %v8624_v5 }
 0x9c2   : > { %9398 = vrot.lane.b32.xlu1 %v9344_v45, %s10811_s30  ;;  %v8909_v25 = vpop.permute.xlu0 %8908  ;;  %v9705_v11 = vld [vmem:[#allocation8 + $0x78] sm:$0xff] }
 0x9c3   : > { %8959 = vst.msk [vmem:[#allocation8 + $0x98] sm:$0xff] %vm7096_vm2, %v8909_v25  ;;  %10239 = vmatprep.mubr.msk.f32.mxu0 %vm9762_vm9, %v9705_v11 }
 0x9c4   : > { %v9267_v60 = vpop.permute.xlu1 %9266  ;;  %9160 = vrot.lane.b32.xlu0 %v15912_v31, %s10808_s16 }
 0x9c5   : > { %9318 = vst.msk [vmem:[#allocation8 + $0x88] sm:$0xff] %vm7459_vm6, %v9267_v60 }
 0x9c6   : > { %9518 = vrot.lane.b32.xlu1 %v9464_v6, %s10817_s18  ;;  %v9029_v14 = vpop.permute.xlu0 %9028 }
 0x9c7   : > { %9079 = vst.msk [vmem:[#allocation8 + $0x98] sm:$0xff] %vm7217_vm4, %v9029_v14  ;;  %v9229_v14 = vld [vmem:[#allocation4 + $0xd9] sm:$0xff] }
 0x9c8   : > { %v9387_v54 = vpop.permute.xlu1 %9386  ;;  %v9704_v63 = vld [vmem:[#allocation8 + $0x70] sm:$0xff]  ;;  %8637 = vrot.lane.b32.xlu0 %v15844_v55, %s10821_s26 }
 0x9c9   : > { %9438 = vst.msk [vmem:[#allocation8 + $0x88] sm:$0xff] %vm7580_vm7, %v9387_v54  ;;  %9923 = vmatmul.mubr.f32.gmra.mrb[102].mxu0 %v9704_v63 }
 0x9ca   : > { %9638 = vrot.lane.b32.xlu1 %v9584_v37, %s10806_s25  ;;  %v9149_v36 = vpop.permute.xlu0 %9148 }
 0x9cb   : > { %9199 = vst.msk [vmem:[#allocation8 + $0x98] sm:$0xff] %vm7338_vm5, %v9149_v36 }
 0x9cc   : > { %v9507_v58 = vpop.permute.xlu1 %9506  ;;  %8806 = vrot.lane.b32.xlu0 %v15924_v62, %s10814_s8 }
 0x9cd   : > { %9558 = vst.msk [vmem:[#allocation8 + $0x88] sm:$0xff] %vm7701_vm10, %v9507_v58 }
 0x9ce   : > { %8802 = vrot.lane.b32.xlu1 %v9344_v45, %s10814_s8  ;;  %v8626_v21 = vpop.permute.xlu0 %8625  ;;  %v9588_v45 = vld [vmem:[#allocation4 + $0xd4] sm:$0xff] }
 0x9cf   : > { %8678 = vst.msk [vmem:[#allocation8 + $0x80] sm:$0xff] %vm8669_vm8, %v8626_v21 }
 0x9d0   : > { %v9627_v18 = vpop.permute.xlu1 %9626  ;;  %8922 = vrot.lane.b32.xlu0 %v9464_v6, %s10810_s29 }
 0x9d1   : > { %9678 = vst.msk [vmem:[#allocation8 + $0x88] sm:$0xff] %vm7822_vm11, %v9627_v18 }
 0x9d2   : > { %9280 = vrot.lane.b32.xlu1 %v14934_v56, %s10816_s15  ;;  %v9269_v1 = vpop.permute.xlu0 %9268 }
 0x9d3   : > { %9319 = vst.msk [vmem:[#allocation8 + $0x98] sm:$0xff] %vm7459_vm6, %v9269_v1  ;;  %v9589_v1 = vld [vmem:[#allocation4 + $0xdc] sm:$0xff] }
 0x9d4   : > { %v8791_v29 = vpop.permute.xlu1 %8790  ;;  %9400 = vrot.lane.b32.xlu0 %v9345_v26, %s10811_s30 }
 0x9d5   : > { %8840 = vst.msk [vmem:[#allocation8 + $0xa8] sm:$0xff] %vm6975_vm3, %v8791_v29 }
 0x9d6   : > { %8926 = vrot.lane.b32.xlu1 %v15938_v53, %s10810_s29  ;;  %v9389_v38 = vpop.permute.xlu0 %9388  ;;  %v9706_v32 = vld [vmem:[#allocation8 + $0x80] sm:$0xff] }
 0x9d7   : > { %9439 = vst.msk [vmem:[#allocation8 + $0x98] sm:$0xff] %vm7580_vm7, %v9389_v38  ;;  %v16042_v38 = vld [vmem:[#allocation9] ss:$0 sm:$0xff] }
 0x9d8   : > { %v8911_v49 = vpop.permute.xlu1 %8910  ;;  %v9707_v56 = vld [vmem:[#allocation8 + $0x88] sm:$0xff]  ;;  %9046 = vrot.lane.b32.xlu0 %v15943_v50, %s10815_s14 }
 0x9d9   : > { %8960 = vst.msk [vmem:[#allocation8 + $0xa8] sm:$0xff] %vm7096_vm2, %v8911_v49  ;;  %10240 = vmatprep.mubr.msk.f32.mxu0 %vm9762_vm9, %v9707_v56 }
 0x9da   : > { %9042 = vrot.lane.b32.xlu1 %v9584_v37, %s10815_s14  ;;  %9928 = vmatmul.mubr.f32.gmra.mrb[104].mxu0 %v9706_v32  ;;  %v9509_v55 = vpop.permute.xlu0 %9508  ;;  %v9349_v37 = vld [vmem:[#allocation4 + $0xda] sm:$0xff] }
 0x9db   : > { %9559 = vst.msk [vmem:[#allocation8 + $0x98] sm:$0xff] %vm7701_vm10, %v9509_v55 }
 0x9dc   : > { %v9031_v7 = vpop.permute.xlu1 %9030  ;;  %9162 = vrot.lane.b32.xlu0 %v15951_v39, %s10808_s16 }
 0x9dd   : > { %9080 = vst.msk [vmem:[#allocation8 + $0xa8] sm:$0xff] %vm7217_vm4, %v9031_v7 }
 0x9de   : > { %9520 = vrot.lane.b32.xlu1 %v9465_v28, %s10817_s18  ;;  %v9629_v27 = vpop.permute.xlu0 %9628 }
 0x9df   : > { %9679 = vst.msk [vmem:[#allocation8 + $0x98] sm:$0xff] %vm7822_vm11, %v9629_v27 }
 0x9e0   : > { %v9151_v47 = vpop.permute.xlu1 %9150  ;;  %9640 = vrot.lane.b32.xlu0 %v9585_v57, %s10806_s25 }
 0x9e1   : > { %9200 = vst.msk [vmem:[#allocation8 + $0xa8] sm:$0xff] %vm7338_vm5, %v9151_v47 }
 0x9e2   : > { %9166 = vrot.lane.b32.xlu1 %v9108_v48, %s10808_s16  ;;  %v8793_v12 = vpop.permute.xlu0 %8792 }
 0x9e3   : > { %8841 = vst.msk [vmem:[#allocation8 + $0xb8] sm:$0xff] %vm6975_vm3, %v8793_v12 }
 0x9e4   : > { %v8628_v61 = vpop.permute.xlu1 %8627  ;;  %8804 = vrot.lane.b32.xlu0 %v9345_v26, %s10814_s8 }
 0x9e5   : > { %8679 = vst.msk [vmem:[#allocation8 + $0x90] sm:$0xff] %vm8669_vm8, %v8628_v61 }
 0x9e6   : > { %8639 = vrot.lane.b32.xlu1 %v15864_v19, %s10821_s26  ;;  %v8913_v8 = vpop.permute.xlu0 %8912  ;;  %v9709_v23 = vld [vmem:[#allocation8 + $0x98] sm:$0xff] }
 0x9e7   : > { %8961 = vst.msk [vmem:[#allocation8 + $0xb8] sm:$0xff] %vm7096_vm2, %v8913_v8  ;;  %10241 = vmatprep.mubr.msk.f32.mxu0 %vm9762_vm9, %v9709_v23 }
 0x9e8   : > { %v9271_v20 = vpop.permute.xlu1 %9270  ;;  %9282 = vrot.lane.b32.xlu0 %v14949_v41, %s10816_s15 }
 0x9e9   : > { %9320 = vst.msk [vmem:[#allocation8 + $0xa8] sm:$0xff] %vm7459_vm6, %v9271_v20 }
 0x9ea   : > { %8808 = vrot.lane.b32.xlu1 %v15971_v51, %s10814_s8  ;;  %v9033_v44 = vpop.permute.xlu0 %9032 }
 0x9eb   : > { %9081 = vst.msk [vmem:[#allocation8 + $0xb8] sm:$0xff] %vm7217_vm4, %v9033_v44 }
 0x9ec   : > { %v9391_v19 = vpop.permute.xlu1 %9390  ;;  %v9708_v10 = vld [vmem:[#allocation8 + $0x90] sm:$0xff]  ;;  %8924 = vrot.lane.b32.xlu0 %v9465_v28, %s10810_s29 }
 0x9ed   : > { %9440 = vst.msk [vmem:[#allocation8 + $0xa8] sm:$0xff] %vm7580_vm7, %v9391_v19  ;;  %9933 = vmatmul.mubr.f32.gmra.mrb[106].mxu0 %v9708_v10 }
 0x9ee   : > { %9286 = vrot.lane.b32.xlu1 %v9228_v9, %s10816_s15  ;;  %v9153_v34 = vpop.permute.xlu0 %9152 }
 0x9ef   : > { %9201 = vst.msk [vmem:[#allocation8 + $0xb8] sm:$0xff] %vm7338_vm5, %v9153_v34 }
 0x9f0   : > { %v9511_v41 = vpop.permute.xlu1 %9510  ;;  %9402 = vrot.lane.b32.xlu0 %v15924_v62, %s10811_s30  ;;  %v9469_v62 = vld [vmem:[#allocation4 + $0xdb] sm:$0xff] }
 0x9f1   : > { %9560 = vst.msk [vmem:[#allocation8 + $0xa8] sm:$0xff] %vm7701_vm10, %v9511_v41 }
 0x9f2   : > { %8928 = vrot.lane.b32.xlu1 %v8869_v42, %s10810_s29  ;;  %v8630_v15 = vpop.permute.xlu0 %8629 }
 0x9f3   : > { %8680 = vst.msk [vmem:[#allocation8 + $0xa0] sm:$0xff] %vm8669_vm8, %v8630_v15 }
 0x9f4   : > { %v9631_v2 = vpop.permute.xlu1 %9630  ;;  %9044 = vrot.lane.b32.xlu0 %v9585_v57, %s10815_s14 }
 0x9f5   : > { %9680 = vst.msk [vmem:[#allocation8 + $0xa8] sm:$0xff] %vm7822_vm11, %v9631_v2 }
 0x9f6   : > { %9406 = vrot.lane.b32.xlu1 %v9348_v35, %s10811_s30  ;;  %v9273_v16 = vpop.permute.xlu0 %9272 }
 0x9f7   : > { %9321 = vst.msk [vmem:[#allocation8 + $0xb8] sm:$0xff] %vm7459_vm6, %v9273_v16 }
 0x9f8   : > { %v8795_v13 = vpop.permute.xlu1 %8794  ;;  %9522 = vrot.lane.b32.xlu0 %v15938_v53, %s10817_s18 }
 0x9f9   : > { %8842 = vst.msk [vmem:[#allocation8 + $0xc8] sm:$0xff] %vm6975_vm3, %v8795_v13 }
 0x9fa   : > { %9048 = vrot.lane.b32.xlu1 %v8989_v3, %s10815_s14  ;;  %v9393_v46 = vpop.permute.xlu0 %9392  ;;  %v9710_v43 = vld [vmem:[#allocation8 + $0xa0] sm:$0xff] }
 0x9fb   : > { %9441 = vst.msk [vmem:[#allocation8 + $0xb8] sm:$0xff] %vm7580_vm7, %v9393_v46 }
 0x9fc   : > { %v8915_v0 = vpop.permute.xlu1 %8914  ;;  %v9711_v40 = vld [vmem:[#allocation8 + $0xa8] sm:$0xff]  ;;  %9164 = vrot.lane.b32.xlu0 %v15994_v24, %s10808_s16 }
 0x9fd   : > { %8962 = vst.msk [vmem:[#allocation8 + $0xc8] sm:$0xff] %vm7096_vm2, %v8915_v0  ;;  %10242 = vmatprep.mubr.msk.f32.mxu0 %vm9762_vm9, %v9711_v40 }
 0x9fe   : > { %9526 = vrot.lane.b32.xlu1 %v9468_v22, %s10817_s18  ;;  %9938 = vmatmul.mubr.f32.gmra.mrb[108].mxu0 %v9710_v43  ;;  %v9513_v4 = vpop.permute.xlu0 %9512 }
 0x9ff   : > { %9561 = vst.msk [vmem:[#allocation8 + $0xb8] sm:$0xff] %vm7701_vm10, %v9513_v4 }
 0xa00   : > { %v9035_v52 = vpop.permute.xlu1 %9034  ;;  %9642 = vrot.lane.b32.xlu0 %v15943_v50, %s10806_s25 }
 0xa01   : > { %9082 = vst.msk [vmem:[#allocation8 + $0xc8] sm:$0xff] %vm7217_vm4, %v9035_v52 }
 0xa02   : > { %9168 = vrot.lane.b32.xlu1 %v9109_v17, %s10808_s16  ;;  %v9633_v33 = vpop.permute.xlu0 %9632  ;;  %s332_s16 = smul.u32 20, %s10065_s12 }
 0xa03   : > { %9681 = vst.msk [vmem:[#allocation8 + $0xb8] sm:$0xff] %vm7822_vm11, %v9633_v33 }
 0xa04   : > { %v9155_v5 = vpop.permute.xlu1 %9154  ;;  %8641 = vrot.lane.b32.xlu0 %v15892_v59, %s10821_s26  ;;  %p333_p4 = scmp.lt.s32.totalorder %s332_s16, 39 }
 0xa05   : > { %9202 = vst.msk [vmem:[#allocation8 + $0xc8] sm:$0xff] %vm7338_vm5, %v9155_v5 }
 0xa06   : > { %9646 = vrot.lane.b32.xlu1 %v9588_v45, %s10806_s25  ;;  %v8797_v25 = vpop.permute.xlu0 %8796  ;;  %s16277_s16 = smov (!%p333_p4, %s332_s16), 39 }
 0xa07   : > { %8843 = vst.msk [vmem:[#allocation8 + $0xd8] sm:$0xff] %vm6975_vm3, %v8797_v25  ;;  %s10071_s12 = sshll.u32 %s16277_s16, 3 }
 0xa08   : > { %v8632_v11 = vpop.permute.xlu1 %8631  ;;  %9284 = vrot.lane.b32.xlu0 %v14963_v30, %s10816_s15 }
 0xa09   : > { %8681 = vst.msk [vmem:[#allocation8 + $0xb0] sm:$0xff] %vm8669_vm8, %v8632_v11 }
 0xa0a   : > { %8645 = vrot.lane.b32.xlu1 %v15951_v39, %s10821_s26  ;;  %v8917_v60 = vpop.permute.xlu0 %8916  ;;  %v9713_v6 = vld [vmem:[#allocation8 + $0xb8] sm:$0xff] }
 0xa0b   : > { %8963 = vst.msk [vmem:[#allocation8 + $0xd8] sm:$0xff] %vm7096_vm2, %v8917_v60  ;;  %10243 = vmatprep.mubr.msk.f32.mxu0 %vm9762_vm9, %v9713_v6 }
 0xa0c   : > { %v9275_v59 = vpop.permute.xlu1 %9274  ;;  %9404 = vrot.lane.b32.xlu0 %v15971_v51, %s10811_s30 }
 0xa0d   : > { %9322 = vst.msk [vmem:[#allocation8 + $0xc8] sm:$0xff] %vm7459_vm6, %v9275_v59 }
 0xa0e   : > { %9288 = vrot.lane.b32.xlu1 %v9229_v14, %s10816_s15  ;;  %v9037_v30 = vpop.permute.xlu0 %9036 }
 0xa0f   : > { %9083 = vst.msk [vmem:[#allocation8 + $0xd8] sm:$0xff] %vm7217_vm4, %v9037_v30 }
 0xa10   : > { %v9395_v54 = vpop.permute.xlu1 %9394  ;;  %v9712_v63 = vld [vmem:[#allocation8 + $0xb0] sm:$0xff]  ;;  %9524 = vrot.lane.b32.xlu0 %v8869_v42, %s10817_s18 }
 0xa11   : > { %9442 = vst.msk [vmem:[#allocation8 + $0xc8] sm:$0xff] %vm7580_vm7, %v9395_v54  ;;  %9943 = vmatmul.mubr.f32.gmra.mrb[110].mxu0 %v9712_v63 }
 0xa12   : > { %9408 = vrot.lane.b32.xlu1 %v9349_v37, %s10811_s30  ;;  %v9157_v36 = vpop.permute.xlu0 %9156  ;;  %s16049_s30 = scalar_lea.vmem %s16186_s9, %s10071_s12 }
 0xa13   : > { %9203 = vst.msk [vmem:[#allocation8 + $0xd8] sm:$0xff] %vm7338_vm5, %v9157_v36 }
 0xa14   : > { %v9515_v58 = vpop.permute.xlu1 %9514  ;;  %9644 = vrot.lane.b32.xlu0 %v8989_v3, %s10806_s25 }
 0xa15   : > { %9562 = vst.msk [vmem:[#allocation8 + $0xc8] sm:$0xff] %vm7701_vm10, %v9515_v58 }
 0xa16   : > { %9528 = vrot.lane.b32.xlu1 %v9469_v62, %s10817_s18  ;;  %v8634_v21 = vpop.permute.xlu0 %8633 }
 0xa17   : > { %8682 = vst.msk [vmem:[#allocation8 + $0xc0] sm:$0xff] %vm8669_vm8, %v8634_v21 }
 0xa18   : > { %v9635_v18 = vpop.permute.xlu1 %9634  ;;  %8643 = vrot.lane.b32.xlu0 %v15912_v31, %s10821_s26 }
 0xa19   : > { %9682 = vst.msk [vmem:[#allocation8 + $0xc8] sm:$0xff] %vm7822_vm11, %v9635_v18 }
 0xa1a   : > { %9648 = vrot.lane.b32.xlu1 %v9589_v1, %s10806_s25  ;;  %v9277_v29 = vpop.permute.xlu0 %9276 }
 0xa1b   : > { %9323 = vst.msk [vmem:[#allocation8 + $0xd8] sm:$0xff] %vm7459_vm6, %v9277_v29 }
 0xa1c   : > { %v8799_v26 = vpop.permute.xlu1 %8798 }
 0xa1d   : > { %8844 = vst.msk [vmem:[#allocation8 + $0xe8] sm:$0xff] %vm6975_vm3, %v8799_v26 }
 0xa1e   : > { %8647 = vrot.lane.b32.xlu1 %v15994_v24, %s10821_s26  ;;  %v9397_v53 = vpop.permute.xlu0 %9396  ;;  %v9714_v56 = vld [vmem:[#allocation8 + $0xc0] sm:$0xff] }
 0xa1f   : > { %9443 = vst.msk [vmem:[#allocation8 + $0xd8] sm:$0xff] %vm7580_vm7, %v9397_v53 }
 0xa20   : > { %v8919_v31 = vpop.permute.xlu1 %8918  ;;  %v9715_v49 = vld [vmem:[#allocation8 + $0xc8] sm:$0xff] }
 0xa21   : > { %8964 = vst.msk [vmem:[#allocation8 + $0xe8] sm:$0xff] %vm7096_vm2, %v8919_v31  ;;  %v9889_v50 = vpop.f32.mrb[88].mxu0  ;;  %10244 = vmatprep.mubr.msk.f32.mxu0 %vm9762_vm9, %v9715_v49 }
 0xa22   : > { %v9890_v32 = vadd.f32 %v16042_v38, %v9889_v50  ;;  %v9891_v55 = vpop.f32.mrb[89].mxu0  ;;  %9948 = vmatmul.mubr.f32.gmra.mrb[112].mxu0 %v9714_v56  ;;  %v9517_v7 = vpop.permute.xlu0 %9516 }
 0xa23   : > { %9563 = vst.msk [vmem:[#allocation8 + $0xd8] sm:$0xff] %vm7701_vm10, %v9517_v7 }
 0xa24   : > { %9989 = vst.msk [vmem:[%s16049_s30] sm:$0xff] %vm9988_vm12, %v9890_v32  ;;  %v9039_v39 = vpop.permute.xlu1 %9038 }
 0xa25   : > { %9084 = vst.msk [vmem:[#allocation8 + $0xe8] sm:$0xff] %vm7217_vm4, %v9039_v39 }
 0xa26   : > { %v9637_v28 = vpop.permute.xlu0 %9636 }
 0xa27   : > { %9683 = vst.msk [vmem:[#allocation8 + $0xd8] sm:$0xff] %vm7822_vm11, %v9637_v28 }
 0xa28   : > { %v9159_v27 = vpop.permute.xlu1 %9158 }
 0xa29   : > { %9204 = vst.msk [vmem:[#allocation8 + $0xe8] sm:$0xff] %vm7338_vm5, %v9159_v27 }
 0xa2a   : > { %v8801_v47 = vpop.permute.xlu0 %8800 }
 0xa2b   : > { %8845 = vst.msk [vmem:[#allocation8 + $0xf8] sm:$0xff] %vm6975_vm3, %v8801_v47 }
 0xa2c   : > { %v8636_v57 = vpop.permute.xlu1 %8635 }
 0xa2d   : > { %8683 = vst.msk [vmem:[#allocation8 + $0xd0] sm:$0xff] %vm8669_vm8, %v8636_v57 }
 0xa2e   : > { %v8921_v48 = vpop.permute.xlu0 %8920  ;;  %v9717_v12 = vld [vmem:[#allocation8 + $0xd8] sm:$0xff] }
 0xa2f   : > { %8965 = vst.msk [vmem:[#allocation8 + $0xf8] sm:$0xff] %vm7096_vm2, %v8921_v48  ;;  %10245 = vmatprep.mubr.msk.f32.mxu0 %vm9762_vm9, %v9717_v12 }
 0xa30   : > { %v9279_v61 = vpop.permute.xlu1 %9278 }
 0xa31   : > { %9324 = vst.msk [vmem:[#allocation8 + $0xe8] sm:$0xff] %vm7459_vm6, %v9279_v61  ;;  %v9894_v8 = vpop.f32.mrb[90].mxu0 }
 0xa32   : > { %v9895_v23 = vadd.f32 %v16042_v38, %v9894_v8  ;;  %v9896_v20 = vpop.f32.mrb[91].mxu0  ;;  %v9041_v51 = vpop.permute.xlu0 %9040 }
 0xa33   : > { %9085 = vst.msk [vmem:[#allocation8 + $0xf8] sm:$0xff] %vm7217_vm4, %v9041_v51 }
 0xa34   : > { %9990 = vst.msk [vmem:[%s16049_s30 + $0x8] sm:$0xff] %vm9988_vm12, %v9895_v23  ;;  %v9399_v44 = vpop.permute.xlu1 %9398  ;;  %v9716_v19 = vld [vmem:[#allocation8 + $0xd0] sm:$0xff] }
 0xa35   : > { %9444 = vst.msk [vmem:[#allocation8 + $0xe8] sm:$0xff] %vm7580_vm7, %v9399_v44  ;;  %9953 = vmatmul.mubr.f32.gmra.mrb[114].mxu0 %v9716_v19 }
 0xa36   : > { %v9161_v10 = vpop.permute.xlu0 %9160 }
 0xa37   : > { %9205 = vst.msk [vmem:[#allocation8 + $0xf8] sm:$0xff] %vm7338_vm5, %v9161_v10 }
 0xa38   : > { %v9519_v9 = vpop.permute.xlu1 %9518 }
 0xa39   : > { %9564 = vst.msk [vmem:[#allocation8 + $0xe8] sm:$0xff] %vm7701_vm10, %v9519_v9 }
 0xa3a   : > { %v8638_v34 = vpop.permute.xlu0 %8637 }
 0xa3b   : > { %8684 = vst.msk [vmem:[#allocation8 + $0xe0] sm:$0xff] %vm8669_vm8, %v8638_v34 }
 0xa3c   : > { %v9639_v41 = vpop.permute.xlu1 %9638 }
 0xa3d   : > { %9684 = vst.msk [vmem:[#allocation8 + $0xe8] sm:$0xff] %vm7822_vm11, %v9639_v41 }
 0xa3e   : > { %v8807_v42 = vpop.permute.xlu0 %8806 }
 0xa3f   : > { %8848 = vst.msk [vmem:[#allocation8 + $0x128] sm:$0xff] %vm6975_vm3, %v8807_v42 }
 0xa40   : > { %v8803_v15 = vpop.permute.xlu1 %8802 }
 0xa41   : > { %8846 = vst.msk [vmem:[#allocation8 + $0x108] sm:$0xff] %vm6975_vm3, %v8803_v15  ;;  %v9899_v2 = vpop.f32.mrb[92].mxu0 }
 0xa42   : > { %v9900_v35 = vadd.f32 %v16042_v38, %v9899_v2  ;;  %v9901_v16 = vpop.f32.mrb[93].mxu0  ;;  %v8923_v13 = vpop.permute.xlu0 %8922  ;;  %v9718_v0 = vld [vmem:[#allocation8 + $0xe0] sm:$0xff] }
 0xa43   : > { %8966 = vst.msk [vmem:[#allocation8 + $0x108] sm:$0xff] %vm7096_vm2, %v8923_v13 }
 0xa44   : > { %9991 = vst.msk [vmem:[%s16049_s30 + $0x10] sm:$0xff] %vm9988_vm12, %v9900_v35  ;;  %v9281_v3 = vpop.permute.xlu1 %9280  ;;  %v9719_v46 = vld [vmem:[#allocation8 + $0xe8] sm:$0xff] }
 0xa45   : > { %9325 = vst.msk [vmem:[#allocation8 + $0xf8] sm:$0xff] %vm7459_vm6, %v9281_v3  ;;  %10246 = vmatprep.mubr.msk.f32.mxu0 %vm9762_vm9, %v9719_v46 }
 0xa46   : > { %9958 = vmatmul.mubr.f32.gmra.mrb[116].mxu0 %v9718_v0  ;;  %v9401_v24 = vpop.permute.xlu0 %9400 }
 0xa47   : > { %9445 = vst.msk [vmem:[#allocation8 + $0xf8] sm:$0xff] %vm7580_vm7, %v9401_v24 }
 0xa48   : > { %v8927_v40 = vpop.permute.xlu1 %8926 }
 0xa49   : > { %8968 = vst.msk [vmem:[#allocation8 + $0x128] sm:$0xff] %vm7096_vm2, %v8927_v40 }
 0xa4a   : > { %v9047_v22 = vpop.permute.xlu0 %9046 }
 0xa4b   : > { %9088 = vst.msk [vmem:[#allocation8 + $0x128] sm:$0xff] %vm7217_vm4, %v9047_v22 }
 0xa4c   : > { %v9043_v43 = vpop.permute.xlu1 %9042 }
 0xa4d   : > { %9086 = vst.msk [vmem:[#allocation8 + $0x108] sm:$0xff] %vm7217_vm4, %v9043_v43 }
 0xa4e   : > { %v9163_v4 = vpop.permute.xlu0 %9162 }
 0xa4f   : > { %9206 = vst.msk [vmem:[#allocation8 + $0x108] sm:$0xff] %vm7338_vm5, %v9163_v4 }
 0xa50   : > { %v9521_v52 = vpop.permute.xlu1 %9520 }
 0xa51   : > { %9565 = vst.msk [vmem:[#allocation8 + $0xf8] sm:$0xff] %vm7701_vm10, %v9521_v52 }
 0xa52   : > { %v9641_v17 = vpop.permute.xlu0 %9640 }
 0xa53   : > { %9685 = vst.msk [vmem:[#allocation8 + $0xf8] sm:$0xff] %vm7822_vm11, %v9641_v17 }
 0xa54   : > { %v9904_v33 = vpop.f32.mrb[94].mxu0  ;;  %v9167_v5 = vpop.permute.xlu1 %9166 }
 0xa55   : > { %v9905_v45 = vadd.f32 %v16042_v38, %v9904_v33  ;;  %9208 = vst.msk [vmem:[#allocation8 + $0x128] sm:$0xff] %vm7338_vm5, %v9167_v5  ;;  %v9906_v25 = vpop.f32.mrb[95].mxu0 }
 0xa56   : > { %v8805_v11 = vpop.permute.xlu0 %8804 }
 0xa57   : > { %9992 = vst.msk [vmem:[%s16049_s30 + $0x18] sm:$0xff] %vm9988_vm12, %v9905_v45 }
 0xa58   : > { %8847 = vst.msk [vmem:[#allocation8 + $0x118] sm:$0xff] %vm6975_vm3, %v8805_v11  ;;  %v8640_v60 = vpop.permute.xlu1 %8639 }
 0xa59   : > { %8685 = vst.msk [vmem:[#allocation8 + $0xf0] sm:$0xff] %vm8669_vm8, %v8640_v60 }
 0xa5a   : > { %v9283_v6 = vpop.permute.xlu0 %9282  ;;  %v9721_v59 = vld [vmem:[#allocation8 + $0xf8] sm:$0xff] }
 0xa5b   : > { %9326 = vst.msk [vmem:[#allocation8 + $0x108] sm:$0xff] %vm7459_vm6, %v9283_v6  ;;  %10247 = vmatprep.mubr.msk.f32.mxu0 %vm9762_vm9, %v9721_v59 }
 0xa5c   : > { %v8809_v14 = vpop.permute.xlu1 %8808 }
 0xa5d   : > { %8849 = vst.msk [vmem:[#allocation8 + $0x138] sm:$0xff] %vm6975_vm3, %v8809_v14 }
 0xa5e   : > { %v8925_v30 = vpop.permute.xlu0 %8924 }
 0xa5f   : > { %8967 = vst.msk [vmem:[#allocation8 + $0x118] sm:$0xff] %vm7096_vm2, %v8925_v30 }
 0xa60   : > { %v9287_v54 = vpop.permute.xlu1 %9286  ;;  %v9720_v63 = vld [vmem:[#allocation8 + $0xf0] sm:$0xff] }
 0xa61   : > { %9328 = vst.msk [vmem:[#allocation8 + $0x128] sm:$0xff] %vm7459_vm6, %v9287_v54  ;;  %9963 = vmatmul.mubr.f32.gmra.mrb[118].mxu0 %v9720_v63 }
 0xa62   : > { %v9403_v37 = vpop.permute.xlu0 %9402 }
 0xa63   : > { %9446 = vst.msk [vmem:[#allocation8 + $0x108] sm:$0xff] %vm7580_vm7, %v9403_v37 }
 0xa64   : > { %v8929_v36 = vpop.permute.xlu1 %8928 }
 0xa65   : > { %8969 = vst.msk [vmem:[#allocation8 + $0x138] sm:$0xff] %vm7096_vm2, %v8929_v36  ;;  %v9909_v58 = vpop.f32.mrb[96].mxu0 }
 0xa66   : > { %v9910_v62 = vadd.f32 %v16042_v38, %v9909_v58  ;;  %v9911_v21 = vpop.f32.mrb[97].mxu0  ;;  %v9045_v18 = vpop.permute.xlu0 %9044 }
 0xa67   : > { %9087 = vst.msk [vmem:[#allocation8 + $0x118] sm:$0xff] %vm7217_vm4, %v9045_v18 }
 0xa68   : > { %9993 = vst.msk [vmem:[%s16049_s30 + $0x20] sm:$0xff] %vm9988_vm12, %v9910_v62  ;;  %v9407_v1 = vpop.permute.xlu1 %9406 }
 0xa69   : > { %9448 = vst.msk [vmem:[#allocation8 + $0x128] sm:$0xff] %vm7580_vm7, %v9407_v1 }
 0xa6a   : > { %v9523_v29 = vpop.permute.xlu0 %9522 }
 0xa6b   : > { %9566 = vst.msk [vmem:[#allocation8 + $0x108] sm:$0xff] %vm7701_vm10, %v9523_v29 }
 0xa6c   : > { %v9049_v26 = vpop.permute.xlu1 %9048 }
 0xa6d   : > { %9089 = vst.msk [vmem:[#allocation8 + $0x138] sm:$0xff] %vm7217_vm4, %v9049_v26 }
 0xa6e   : > { %v9165_v53 = vpop.permute.xlu0 %9164 }
 0xa6f   : > { %9207 = vst.msk [vmem:[#allocation8 + $0x118] sm:$0xff] %vm7338_vm5, %v9165_v53 }
 0xa70   : > { %v9527_v31 = vpop.permute.xlu1 %9526 }
 0xa71   : > { %9568 = vst.msk [vmem:[#allocation8 + $0x128] sm:$0xff] %vm7701_vm10, %v9527_v31 }
 0xa72   : > { %v9643_v49 = vpop.permute.xlu0 %9642 }
 0xa73   : > { %9686 = vst.msk [vmem:[#allocation8 + $0x108] sm:$0xff] %vm7822_vm11, %v9643_v49 }
 0xa74   : > { %v9169_v50 = vpop.permute.xlu1 %9168 }
 0xa75   : > { %9209 = vst.msk [vmem:[#allocation8 + $0x138] sm:$0xff] %vm7338_vm5, %v9169_v50 }
 0xa76   : > { %v8642_v56 = vpop.permute.xlu0 %8641 }
 0xa77   : > { %8686 = vst.msk [vmem:[#allocation8 + $0x100] sm:$0xff] %vm8669_vm8, %v8642_v56 }
 0xa78   : > { %v9914_v32 = vpop.f32.mrb[98].mxu0  ;;  %v9647_v55 = vpop.permute.xlu1 %9646 }
 0xa79   : > { %v9915_v7 = vadd.f32 %v16042_v38, %v9914_v32  ;;  %9688 = vst.msk [vmem:[#allocation8 + $0x128] sm:$0xff] %vm7822_vm11, %v9647_v55  ;;  %v9916_v39 = vpop.f32.mrb[99].mxu0 }
 0xa7a   : > { %v9285_v28 = vpop.permute.xlu0 %9284  ;;  %v9723_v27 = vld [vmem:[#allocation8 + $0x108] sm:$0xff] }
 0xa7b   : > { %9994 = vst.msk [vmem:[%s16049_s30 + $0x28] sm:$0xff] %vm9988_vm12, %v9915_v7  ;;  %10248 = vmatprep.mubr.msk.f32.mxu0 %vm9762_vm9, %v9723_v27 }
 0xa7c   : > { %9327 = vst.msk [vmem:[#allocation8 + $0x118] sm:$0xff] %vm7459_vm6, %v9285_v28  ;;  %v8646_v47 = vpop.permute.xlu1 %8645 }
 0xa7d   : > { %8688 = vst.msk [vmem:[#allocation8 + $0x120] sm:$0xff] %vm8669_vm8, %v8646_v47 }
 0xa7e   : > { %v9405_v57 = vpop.permute.xlu0 %9404  ;;  %v9722_v48 = vld [vmem:[#allocation8 + $0x100] sm:$0xff] }
 0xa7f   : > { %9447 = vst.msk [vmem:[#allocation8 + $0x118] sm:$0xff] %vm7580_vm7, %v9405_v57  ;;  %9968 = vmatmul.mubr.f32.gmra.mrb[120].mxu0 %v9722_v48 }
 0xa80   : > { %v9289_v12 = vpop.permute.xlu1 %9288  ;;  %v9727_v61 = vld [vmem:[#allocation8 + $0x128] sm:$0xff] }
 0xa81   : > { %9329 = vst.msk [vmem:[#allocation8 + $0x138] sm:$0xff] %vm7459_vm6, %v9289_v12  ;;  %10250 = vmatprep.mubr.msk.f32.mxu1 %vm9762_vm9, %v9727_v61 }
 0xa82   : > { %v9525_v8 = vpop.permute.xlu0 %9524 }
 0xa83   : > { %9567 = vst.msk [vmem:[#allocation8 + $0x118] sm:$0xff] %vm7701_vm10, %v9525_v8 }
 0xa84   : > { %v9409_v23 = vpop.permute.xlu1 %9408  ;;  %v9726_v20 = vld [vmem:[#allocation8 + $0x120] sm:$0xff] }
 0xa85   : > { %9449 = vst.msk [vmem:[#allocation8 + $0x138] sm:$0xff] %vm7580_vm7, %v9409_v23  ;;  %9978 = vmatmul.mubr.f32.vlgmr.msra.gmra.mrb[184].mxu1 %v9726_v20 }
 0xa86   : > { %v9645_v51 = vpop.permute.xlu0 %9644 }
 0xa87   : > { %9687 = vst.msk [vmem:[#allocation8 + $0x118] sm:$0xff] %vm7822_vm11, %v9645_v51 }
 0xa88   : > { %v9529_v44 = vpop.permute.xlu1 %9528 }
 0xa89   : > { %9569 = vst.msk [vmem:[#allocation8 + $0x138] sm:$0xff] %vm7701_vm10, %v9529_v44  ;;  %v9919_v19 = vpop.f32.mrb[100].mxu0 }
 0xa8a   : > { %v9920_v10 = vadd.f32 %v16042_v38, %v9919_v19  ;;  %v9921_v9 = vpop.f32.mrb[101].mxu0  ;;  %v8644_v34 = vpop.permute.xlu0 %8643 }
 0xa8b   : > { %8687 = vst.msk [vmem:[#allocation8 + $0x110] sm:$0xff] %vm8669_vm8, %v8644_v34 }
 0xa8c   : > { %9995 = vst.msk [vmem:[%s16049_s30 + $0x30] sm:$0xff] %vm9988_vm12, %v9920_v10  ;;  %v9649_v41 = vpop.permute.xlu1 %9648 }
 0xa8d   : > { %9689 = vst.msk [vmem:[#allocation8 + $0x138] sm:$0xff] %vm7822_vm11, %v9649_v41 }
 0xa8e   : > { %v9725_v42 = vld [vmem:[#allocation8 + $0x118] sm:$0xff] }
 0xa8f   : > { %10249 = vmatprep.mubr.msk.f32.mxu0 %vm9762_vm9, %v9725_v42 }
 0xa90   : > { %v8648_v15 = vpop.permute.xlu1 %8647 }
 0xa91   : > { %8689 = vst.msk [vmem:[#allocation8 + $0x130] sm:$0xff] %vm8669_vm8, %v8648_v15 }
 0xa92   : > { %v9724_v2 = vld [vmem:[#allocation8 + $0x110] sm:$0xff] }
 0xa93   : > { %9973 = vmatmul.mubr.f32.gmra.mrb[122].mxu0 %v9724_v2 }
 0xa94   : > { %v9729_v35 = vld [vmem:[#allocation8 + $0x138] sm:$0xff] }
 0xa95   : > { %10251 = vmatprep.mubr.msk.f32.mxu1 %vm9762_vm9, %v9729_v35 }
 0xa98   : > { %v9728_v16 = vld [vmem:[#allocation8 + $0x130] sm:$0xff] }
 0xa99   : > { %9983 = vmatmul.mubr.f32.gmra.mrb[186].mxu1 %v9728_v16 }
 0xa9c   : > { %v9924_v13 = vpop.f32.mrb[102].mxu0 }
 0xa9d   : > { %v9925_v3 = vadd.f32 %v16042_v38, %v9924_v13  ;;  %v9926_v46 = vpop.f32.mrb[103].mxu0 }
 0xa9f   : > { %9996 = vst.msk [vmem:[%s16049_s30 + $0x38] sm:$0xff] %vm9988_vm12, %v9925_v3 }
 0xaad   : > { %v9929_v0 = vpop.f32.mrb[104].mxu0 }
 0xaae   : > { %v9930_v24 = vadd.f32 %v16042_v38, %v9929_v0  ;;  %v9931_v40 = vpop.f32.mrb[105].mxu0 }
 0xab0   : > { %9997 = vst.msk [vmem:[%s16049_s30 + $0x40] sm:$0xff] %vm9988_vm12, %v9930_v24 }
 0xac0   : > { %v9934_v22 = vpop.f32.mrb[106].mxu0 }
 0xac1   : > { %v9935_v43 = vadd.f32 %v16042_v38, %v9934_v22  ;;  %v9936_v4 = vpop.f32.mrb[107].mxu0 }
 0xac3   : > { %9998 = vst.msk [vmem:[%s16049_s30 + $0x48] sm:$0xff] %vm9988_vm12, %v9935_v43 }
 0xad1   : > { %v9939_v52 = vpop.f32.mrb[108].mxu0 }
 0xad2   : > { %v9940_v17 = vadd.f32 %v16042_v38, %v9939_v52  ;;  %v9941_v33 = vpop.f32.mrb[109].mxu0 }
 0xad4   : > { %9999 = vst.msk [vmem:[%s16049_s30 + $0x50] sm:$0xff] %vm9988_vm12, %v9940_v17 }
 0xae4   : > { %v9944_v5 = vpop.f32.mrb[110].mxu0 }
 0xae5   : > { %v9945_v45 = vadd.f32 %v16042_v38, %v9944_v5  ;;  %v9946_v25 = vpop.f32.mrb[111].mxu0 }
 0xae7   : > { %10000 = vst.msk [vmem:[%s16049_s30 + $0x58] sm:$0xff] %vm9988_vm12, %v9945_v45 }
 0xaf5   : > { %v9949_v11 = vpop.f32.mrb[112].mxu0 }
 0xaf6   : > { %v9950_v60 = vadd.f32 %v16042_v38, %v9949_v11  ;;  %v9951_v6 = vpop.f32.mrb[113].mxu0 }
 0xaf8   : > { %10001 = vst.msk [vmem:[%s16049_s30 + $0x60] sm:$0xff] %vm9988_vm12, %v9950_v60 }
 0xb08   : > { %v9954_v59 = vpop.f32.mrb[114].mxu0 }
 0xb09   : > { %v9955_v14 = vadd.f32 %v16042_v38, %v9954_v59  ;;  %v9956_v30 = vpop.f32.mrb[115].mxu0 }
 0xb0b   : > { %10002 = vst.msk [vmem:[%s16049_s30 + $0x68] sm:$0xff] %vm9988_vm12, %v9955_v14 }
 0xb19   : > { %v9959_v54 = vpop.f32.mrb[116].mxu0 }
 0xb1a   : > { %v9960_v63 = vadd.f32 %v16042_v38, %v9959_v54  ;;  %v9961_v37 = vpop.f32.mrb[117].mxu0 }
 0xb1c   : > { %10003 = vst.msk [vmem:[%s16049_s30 + $0x70] sm:$0xff] %vm9988_vm12, %v9960_v63 }
 0xb34   : > { %v9964_v36 = vpop.f32.mrb[118].mxu0 }
 0xb35   : > { %v9965_v58 = vadd.f32 %v16042_v38, %v9964_v36  ;;  %v9966_v62 = vpop.f32.mrb[119].mxu0 }
 0xb37   : > { %10004 = vst.msk [vmem:[%s16049_s30 + $0x78] sm:$0xff] %vm9988_vm12, %v9965_v58 }
 0xb52   : > { %v9969_v21 = vpop.f32.mrb[120].mxu0 }
 0xb53   : > { %v9970_v18 = vadd.f32 %v16042_v38, %v9969_v21  ;;  %v9971_v1 = vpop.f32.mrb[121].mxu0 }
 0xb55   : > { %10005 = vst.msk [vmem:[%s16049_s30 + $0x80] sm:$0xff] %vm9988_vm12, %v9970_v18 }
 0xb58   : > { %v9979_v29 = vpop.f32.mrb[184].mxu1 }
 0xb59   : > { %v9980_v26 = vadd.f32 %v16042_v38, %v9979_v29  ;;  %v9981_v53 = vpop.f32.mrb[185].mxu1 }
 0xb5b   : > { %10007 = vst.msk [vmem:[%s16049_s30 + $0x90] sm:$0xff] %vm9988_vm12, %v9980_v26 }
 0xb66   : > { %v9974_v31 = vpop.f32.mrb[122].mxu0 }
 0xb67   : > { %v9975_v49 = vadd.f32 %v16042_v38, %v9974_v31  ;;  %v9976_v50 = vpop.f32.mrb[123].mxu0 }
 0xb69   : > { %10006 = vst.msk [vmem:[%s16049_s30 + $0x88] sm:$0xff] %vm9988_vm12, %v9975_v49 }
 0xb6c   : > { %v9984_v56 = vpop.f32.mrb[186].mxu1 }
 0xb6d   : > { %v9985_v32 = vadd.f32 %v16042_v38, %v9984_v56  ;;  %v9986_v55 = vpop.f32.mrb[187].mxu1 }
 0xb6f   : > { %10008 = vst.msk [vmem:[%s16049_s30 + $0x98] sm:$0xff] %vm9988_vm12, %v9985_v32 }
 0xb70 PF: > { %s21_s11 = sadd.s32 1, %s10803_s11  }
 0xb71   : > { %p18_p5 = scmp.ge.s32.totalorder %s21_s11, 4  }
 0xb73   :  { %20 = sbr.rel (!%p18_p5) target bundleno = 3 (0x3), region = 86 }

</bundles_post_ra>
